<compile_context>
chip_gen: v6e
topology: v6e:2x2x1
jax: 0.10.0
libtpu: 0.0.40
codegen_flags: <defaults>
</compile_context>

<pallas_src>
import functools

import numpy as np
import jax
import jax.numpy as jnp
from jax.experimental import pallas as pl
from jax.experimental.pallas import tpu as pltpu


# ----------------------------------------------------------------------------
# Filter definitions
# ----------------------------------------------------------------------------
def get_filter_taps(filter_type: str):
    ft = filter_type.lower()
    if ft == "sobel":
        return (-1.0, 0.0, 1.0), (1.0, 2.0, 1.0)
    if ft == "scharr":
        return (-1.0, 0.0, 1.0), (3.0, 10.0, 3.0)
    if ft == "central":
        return (-0.5, 0.0, 0.5), (0.0, 1.0, 0.0)
    if ft == "laplacian":
        return (1.0, -2.0, 1.0), (0.0, 0.0, 0.0)
    raise ValueError(filter_type)


def get_kernels_3d(filter_type: str) -> np.ndarray:
    """Dense (N,3,3,3) kernels — used only by the pure-JAX reference."""
    ft = filter_type.lower()
    if ft == "laplacian":
        k = np.zeros((1, 3, 3, 3), np.float32)
        k[0, 1, 1, 1] = -6.0
        k[0, 0, 1, 1] = k[0, 2, 1, 1] = 1.0
        k[0, 1, 0, 1] = k[0, 1, 2, 1] = 1.0
        k[0, 1, 1, 0] = k[0, 1, 1, 2] = 1.0
        return k
    d, s = get_filter_taps(ft)
    d = np.asarray(d, np.float32)
    s = np.asarray(s, np.float32)
    kd = np.einsum("i,j,k->ijk", d, s, s)
    kh = np.einsum("i,j,k->ijk", s, d, s)
    kw = np.einsum("i,j,k->ijk", s, s, d)
    return np.stack([kd, kh, kw], axis=0).astype(np.float32)


def _banded_right(taps, n: int) -> np.ndarray:
    """(n,n) matrix M with M[i,j] = taps[i-j+1]; X @ M == 3-tap cross-correlation
    of X along its last axis with zero padding."""
    m = np.zeros((n, n), np.float32)
    for t, v in enumerate(taps):
        if float(v) != 0.0:
            m += np.float32(v) * np.eye(n, k=1 - t, dtype=np.float32)
    return m


def _banded_left(taps, n: int) -> np.ndarray:
    """(n,n) matrix A with A[i,j] = taps[j-i+1]; A @ X == 3-tap cross-correlation
    of X along its first axis with zero padding."""
    return np.ascontiguousarray(_banded_right(taps, n).T)


# ----------------------------------------------------------------------------
# Pallas kernel.  One grid step processes G (B*C) volumes.
# args = (diff_ref, [target_ref,] mat_refs..., out_ref, pad_scratch_ref)
# ----------------------------------------------------------------------------
def _grad_loss_kernel(*args, G, D, H, W, d_taps, s_taps, is_laplacian,
                      need_target, use_abs):
    n_mats = 2 if is_laplacian else 4
    n_in = 1 + (1 if need_target else 0) + n_mats
    in_refs = args[:n_in]
    out_ref = args[n_in]
    pad_ref = args[n_in + 1]

    x_ref = in_refs[0]
    pos = 1
    t_ref = None
    if need_target:
        t_ref = in_refs[pos]
        pos += 1
    mat_refs = in_refs[pos:]

    f32 = jnp.float32
    Dp = D + 2
    Bp = G * Dp     # matmul batch over the D-padded volume
    Bc = G * D      # matmul batch over the un-padded (centre) volume

    # Hoist the (small) banded-matrix broadcasts once per grid step.
    if is_laplacian:
        bw_l = jnp.broadcast_to(mat_refs[0][...], (Bc, W, W))
        ah_l = jnp.broadcast_to(mat_refs[1][...], (Bc, H, H))
    else:
        bw_s = jnp.broadcast_to(mat_refs[0][...], (Bp, W, W))
        bw_d = jnp.broadcast_to(mat_refs[1][...], (Bp, W, W))
        ah_s = jnp.broadcast_to(mat_refs[2][...], (Bp, H, H))
        ah_d = jnp.broadcast_to(mat_refs[3][...], (Bp, H, H))

    def dconv(taps, y):
        """3-tap cross-correlation along the (already padded) D axis (VPU)."""
        out = None
        for k in range(3):
            wgt = float(taps[k])
            if wgt == 0.0:
                continue
            sl = y[:, k:k + D]
            term = sl if wgt == 1.0 else wgt * sl
            out = term if out is None else out + term
        return out

    def grads_of(src_ref):
        """List of (G, D, H, W) float32 gradient volumes of one input block."""
        # Build the D-padded f32 copy in VMEM (no HBM pad pass).
        pad_ref[:, 0:1] = jnp.zeros((G, 1, H, W), f32)
        pad_ref[:, Dp - 1:Dp] = jnp.zeros((G, 1, H, W), f32)
        pad_ref[:, 1:Dp - 1] = src_ref[...].astype(f32)
        xp = pad_ref[...]                                   # (G, Dp, H, W)

        if is_laplacian:
            xc3 = src_ref[...].astype(f32).reshape(Bc, H, W)
            t_w = jnp.einsum("bhw,bwv->bhv", xc3, bw_l,
                             preferred_element_type=f32).reshape(G, D, H, W)
            t_h = jnp.einsum("bij,bjw->biw", ah_l, xc3,
                             preferred_element_type=f32).reshape(G, D, H, W)
            t_d = dconv(d_taps, xp)
            return [t_d + t_h + t_w]

        x3 = xp.reshape(Bp, H, W)
        # W-axis 3-tap passes as MXU matmuls.
        u_s = jnp.einsum("bhw,bwv->bhv", x3, bw_s, preferred_element_type=f32)
        u_d = jnp.einsum("bhw,bwv->bhv", x3, bw_d, preferred_element_type=f32)
        # H-axis 3-tap passes as MXU matmuls (left-multiplication).
        p = jnp.einsum("bij,bjw->biw", ah_s, u_s,
                       preferred_element_type=f32).reshape(G, Dp, H, W)
        q = jnp.einsum("bij,bjw->biw", ah_d, u_s,
                       preferred_element_type=f32).reshape(G, Dp, H, W)
        r = jnp.einsum("bij,bjw->biw", ah_s, u_d,
                       preferred_element_type=f32).reshape(G, Dp, H, W)
        # D-axis passes (cheap, VPU):  kd = d(D) s(H) s(W), kh = s d s, kw = s s d
        return [dconv(d_taps, p), dconv(s_taps, q), dconv(s_taps, r)]

    def stat(vol):
        return jnp.sum(jnp.abs(vol)) if use_abs else jnp.sum(vol * vol)

    diff_grads = grads_of(x_ref)
    tgt_grads = grads_of(t_ref) if need_target else None

    base = pl.program_id(0) * G
    for g in range(G):
        acc = f32(0.0)
        for arr in diff_grads:
            acc = acc + stat(arr[g])
        out_ref[0, base + g] = acc
        if need_target:
            tacc = f32(0.0)
            for arr in tgt_grads:
                tacc = tacc + stat(arr[g])
            out_ref[1, base + g] = tacc


# ----------------------------------------------------------------------------
# Wrapper (== SpatialGradientLoss3D.forward with the default reduce dims)
# ----------------------------------------------------------------------------
def _pick_group_size(bc, per_vol_bytes, target_bytes=2 << 20, max_group=8):
    g = int(max(1, min(bc, max_group, target_bytes // max(per_vol_bytes, 1))))
    while bc % g != 0:
        g -= 1
    return g


def spatial_gradient_loss_3d(pred, target, *, filter_type="sobel", loss_type="l1"):
    assert pred.shape == target.shape, "Shape mismatch"
    loss_type = loss_type.lower()
    assert loss_type in ("l1", "mse", "rel_l1", "rel_mse")
    filter_type = filter_type.lower()
    is_laplacian = filter_type == "laplacian"
    need_target = loss_type in ("rel_l1", "rel_mse")
    use_abs = loss_type in ("l1", "rel_l1")
    n_filters = 1 if is_laplacian else 3

    B, C, D, H, W = pred.shape
    BC = B * C
    d_taps, s_taps = get_filter_taps(filter_type)

    # Linearity: grad(pred) - grad(target) == grad(pred - target), so only the
    # diff volume is convolved; grad(target) only for the relative losses.
    # Inputs stay in their original dtype (cast to f32 inside the kernel).
    diff = (pred - target).reshape(BC, D, H, W)
    inputs = [diff]
    if need_target:
        inputs.append(target.reshape(BC, D, H, W))

    # Banded matrices implementing the separable H / W 3-tap passes (MXU).
    if is_laplacian:
        mats = [_banded_right(d_taps, W), _banded_left(d_taps, H)]
    else:
        mats = [_banded_right(s_taps, W), _banded_right(d_taps, W),
                _banded_left(s_taps, H), _banded_left(d_taps, H)]
    mats = [jnp.asarray(m) for m in mats]

    itemsize = np.dtype(pred.dtype).itemsize
    G = _pick_group_size(BC, D * H * W * itemsize)
    n_steps = BC // G
    n_stats = 2 if need_target else 1

    vol_spec = pl.BlockSpec((G, D, H, W), lambda i: (i, 0, 0, 0))
    mat_specs = [pl.BlockSpec(m.shape, lambda i: (0, 0)) for m in mats]
    in_specs = [vol_spec] * len(inputs) + mat_specs

    kernel = functools.partial(
        _grad_loss_kernel, G=G, D=D, H=H, W=W,
        d_taps=d_taps, s_taps=s_taps, is_laplacian=is_laplacian,
        need_target=need_target, use_abs=use_abs)

    sums = pl.pallas_call(
        kernel,
        out_shape=jax.ShapeDtypeStruct((n_stats, BC), jnp.float32),
        grid=(n_steps,),
        in_specs=in_specs,
        out_specs=pl.BlockSpec(memory_space=pltpu.MemorySpace.SMEM),
        scratch_shapes=[pltpu.VMEM((G, D + 2, H, W), jnp.float32)],
        compiler_params=pltpu.CompilerParams(
            dimension_semantics=("arbitrary",)),
    )(*inputs, *mats)

    per_vol = jnp.float32(n_filters * D * H * W)
    d_sums = sums[0]
    if loss_type in ("l1", "mse"):
        return jnp.sum(d_sums) / (BC * per_vol)
    t_sums = sums[1]
    rel = (d_sums / per_vol) / (t_sums / per_vol + 1e-8)
    return jnp.mean(rel)


# ----------------------------------------------------------------------------
# Pure-JAX reference (dense 3D conv) — mirrors the torch forward exactly.
# ----------------------------------------------------------------------------
def _reference_loss(pred, target, kernels, loss_type="l1"):
    B, C, D, H, W = pred.shape
    x = pred.reshape(B * C, 1, D, H, W).astype(jnp.float32)
    y = target.reshape(B * C, 1, D, H, W).astype(jnp.float32)
    k = jnp.asarray(kernels)[:, None]  # (N, 1, 3, 3, 3)
    dn = jax.lax.conv_dimension_numbers(x.shape, k.shape,
                                        ("NCDHW", "OIDHW", "NCDHW"))
    conv = lambda a: jax.lax.conv_general_dilated(
        a, k, (1, 1, 1), [(1, 1), (1, 1), (1, 1)], dimension_numbers=dn)
    gp, gt = conv(x), conv(y)
    if loss_type == "l1":
        return jnp.mean(jnp.abs(gp - gt))
    elif loss_type == "mse":
        return jnp.mean((gp - gt) ** 2)
    elif loss_type == "rel_l1":
        num = jnp.mean(jnp.abs(gp - gt), axis=(1, 2, 3, 4))
        den = jnp.mean(jnp.abs(gt), axis=(1, 2, 3, 4)) + 1e-8
        return jnp.mean(num / den)
    else:
        num = jnp.mean((gp - gt) ** 2, axis=(1, 2, 3, 4))
        den = jnp.mean(gt ** 2, axis=(1, 2, 3, 4)) + 1e-8
        return jnp.mean(num / den)


if __name__ == "__main__":
    key = jax.random.PRNGKey(0)
    k1, k2 = jax.random.split(key)
    B, C, D, H, W = 2, 4, 8, 16, 16
    pred = jax.random.normal(k1, (B, C, D, H, W), dtype=jnp.float32)
    target = jax.random.normal(k2, (B, C, D, H, W), dtype=jnp.float32)

    dense_k = get_kernels_3d("sobel")
    for lt in ("l1", "mse", "rel_l1"):
        loss = spatial_gradient_loss_3d(pred, target,
                                        filter_type="sobel", loss_type=lt)
        loss = jax.block_until_ready(loss)
        ref = jax.block_until_ready(_reference_loss(pred, target, dense_k, lt))
        assert np.allclose(np.asarray(loss), np.asarray(ref),
                           rtol=1e-4, atol=1e-5), (lt, float(loss), float(ref))
    print("KERNEL_OK")
</pallas_src>

<mosaic_0001>
module attributes {stable_mosaic.version = 11 : i64} {
  func.func @_grad_loss_kernel(%arg0: i32, %arg1: memref<8x8x16x16xf32, #tpu.memory_space<vmem>>, %arg2: memref<16x16xf32, #tpu.memory_space<vmem>>, %arg3: memref<16x16xf32, #tpu.memory_space<vmem>>, %arg4: memref<16x16xf32, #tpu.memory_space<vmem>>, %arg5: memref<16x16xf32, #tpu.memory_space<vmem>>, %arg6: memref<1x8xf32, #tpu.memory_space<smem>>, %arg7: memref<8x10x16x16xf32, #tpu.memory_space<vmem>>) attributes {dimension_semantics = [#tpu.dimension_semantics<arbitrary>], iteration_bounds = array<i64: 1>, scalar_prefetch = 0 : i64, scratch_operands = 1 : i64, tpu.core_type = #tpu.core_type<tc>, window_params = [{transform_indices = @transform_0, window_bounds = array<i64: 8, 8, 16, 16>}, {pipeline_mode = #tpu.pipeline_mode<synchronous>, transform_indices = @transform_1, window_bounds = array<i64: 16, 16>}, {pipeline_mode = #tpu.pipeline_mode<synchronous>, transform_indices = @transform_2, window_bounds = array<i64: 16, 16>}, {pipeline_mode = #tpu.pipeline_mode<synchronous>, transform_indices = @transform_3, window_bounds = array<i64: 16, 16>}, {pipeline_mode = #tpu.pipeline_mode<synchronous>, transform_indices = @transform_4, window_bounds = array<i64: 16, 16>}, {transform_indices = @transform_5, window_bounds = array<i64: 1, 8>}]} {
    %c0 = arith.constant 0 : index
    %c0_0 = arith.constant 0 : index
    %0 = vector.load %arg2[%c0, %c0_0] : memref<16x16xf32, #tpu.memory_space<vmem>>, vector<16x16xf32>
    %1 = vector.shape_cast %0 : vector<16x16xf32> to vector<1x16x16xf32>
    %2 = vector.broadcast %1 : vector<1x16x16xf32> to vector<80x16x16xf32>
    %c0_1 = arith.constant 0 : index
    %c0_2 = arith.constant 0 : index
    %3 = vector.load %arg3[%c0_1, %c0_2] : memref<16x16xf32, #tpu.memory_space<vmem>>, vector<16x16xf32>
    %4 = vector.shape_cast %3 : vector<16x16xf32> to vector<1x16x16xf32>
    %5 = vector.broadcast %4 : vector<1x16x16xf32> to vector<80x16x16xf32>
    %c0_3 = arith.constant 0 : index
    %c0_4 = arith.constant 0 : index
    %6 = vector.load %arg4[%c0_3, %c0_4] : memref<16x16xf32, #tpu.memory_space<vmem>>, vector<16x16xf32>
    %7 = vector.shape_cast %6 : vector<16x16xf32> to vector<1x16x16xf32>
    %8 = vector.broadcast %7 : vector<1x16x16xf32> to vector<80x16x16xf32>
    %c0_5 = arith.constant 0 : index
    %c0_6 = arith.constant 0 : index
    %9 = vector.load %arg5[%c0_5, %c0_6] : memref<16x16xf32, #tpu.memory_space<vmem>>, vector<16x16xf32>
    %10 = vector.shape_cast %9 : vector<16x16xf32> to vector<1x16x16xf32>
    %11 = vector.broadcast %10 : vector<1x16x16xf32> to vector<80x16x16xf32>
    %cst = arith.constant 0.000000e+00 : f32
    %12 = vector.broadcast %cst : f32 to vector<8x1x16x16xf32>
    %c0_7 = arith.constant 0 : index
    %c0_8 = arith.constant 0 : index
    %c0_9 = arith.constant 0 : index
    %c0_10 = arith.constant 0 : index
    %13 = vector.load %arg7[%c0_7, %c0_8, %c0_9, %c0_10] : memref<8x10x16x16xf32, #tpu.memory_space<vmem>>, vector<8x1x16x16xf32>
    tpu.vector_store %arg7[%c0_7, %c0_8, %c0_9, %c0_10], %12 {strides = array<i32>} : memref<8x10x16x16xf32, #tpu.memory_space<vmem>>, vector<8x1x16x16xf32>,
    %cst_11 = arith.constant 0.000000e+00 : f32
    %14 = vector.broadcast %cst_11 : f32 to vector<8x1x16x16xf32>
    %c0_12 = arith.constant 0 : index
    %c9 = arith.constant 9 : index
    %c0_13 = arith.constant 0 : index
    %c0_14 = arith.constant 0 : index
    %15 = vector.load %arg7[%c0_12, %c9, %c0_13, %c0_14] : memref<8x10x16x16xf32, #tpu.memory_space<vmem>>, vector<8x1x16x16xf32>
    tpu.vector_store %arg7[%c0_12, %c9, %c0_13, %c0_14], %14 {strides = array<i32>} : memref<8x10x16x16xf32, #tpu.memory_space<vmem>>, vector<8x1x16x16xf32>,
    %c0_15 = arith.constant 0 : index
    %c0_16 = arith.constant 0 : index
    %c0_17 = arith.constant 0 : index
    %c0_18 = arith.constant 0 : index
    %16 = vector.load %arg1[%c0_15, %c0_16, %c0_17, %c0_18] : memref<8x8x16x16xf32, #tpu.memory_space<vmem>>, vector<8x8x16x16xf32>
    %c0_19 = arith.constant 0 : index
    %c1 = arith.constant 1 : index
    %c0_20 = arith.constant 0 : index
    %c0_21 = arith.constant 0 : index
    %17 = vector.load %arg7[%c0_19, %c1, %c0_20, %c0_21] : memref<8x10x16x16xf32, #tpu.memory_space<vmem>>, vector<8x8x16x16xf32>
    tpu.vector_store %arg7[%c0_19, %c1, %c0_20, %c0_21], %16 {strides = array<i32>} : memref<8x10x16x16xf32, #tpu.memory_space<vmem>>, vector<8x8x16x16xf32>,
    %c0_22 = arith.constant 0 : index
    %c0_23 = arith.constant 0 : index
    %c0_24 = arith.constant 0 : index
    %c0_25 = arith.constant 0 : index
    %18 = vector.load %arg7[%c0_22, %c0_23, %c0_24, %c0_25] : memref<8x10x16x16xf32, #tpu.memory_space<vmem>>, vector<8x10x16x16xf32>
    %19 = vector.shape_cast %18 : vector<8x10x16x16xf32> to vector<80x16x16xf32>
    "tpu.trace_start"() <{level = 10 : i32, message = "bhw,bwv->bhv"}> : () -> ()
    %cst_26 = arith.constant dense<0.000000e+00> : vector<80x16x16xf32>
    %20 = tpu.matmul %19, %2, %cst_26 {dimension_numbers = #tpu.dot_dimension_numbers<[2], [1], [1], [2], [0, 0, 0, 1, 1, 2], [0], [0]>} : vector<80x16x16xf32>, vector<80x16x16xf32>, vector<80x16x16xf32> -> vector<80x16x16xf32>
    %cst_27 = arith.constant dense<0.000000e+00> : vector<80x16x16xf32>
    %21 = tpu.matmul %19, %5, %cst_27 {dimension_numbers = #tpu.dot_dimension_numbers<[2], [1], [1], [2], [0, 0, 0, 1, 1, 2], [0], [0]>} : vector<80x16x16xf32>, vector<80x16x16xf32>, vector<80x16x16xf32> -> vector<80x16x16xf32>
    "tpu.trace_stop"() : () -> ()
    "tpu.trace_start"() <{level = 10 : i32, message = "bij,bjw->biw"}> : () -> ()
    %cst_28 = arith.constant dense<0.000000e+00> : vector<80x16x16xf32>
    %22 = tpu.matmul %8, %20, %cst_28 {dimension_numbers = #tpu.dot_dimension_numbers<[2], [1], [1], [2], [0, 0, 0, 1, 1, 2], [0], [0]>} : vector<80x16x16xf32>, vector<80x16x16xf32>, vector<80x16x16xf32> -> vector<80x16x16xf32>
    "tpu.trace_stop"() : () -> ()
    %23 = vector.shape_cast %22 : vector<80x16x16xf32> to vector<8x10x16x16xf32>
    "tpu.trace_start"() <{level = 10 : i32, message = "bij,bjw->biw"}> : () -> ()
    %cst_29 = arith.constant dense<0.000000e+00> : vector<80x16x16xf32>
    %24 = tpu.matmul %11, %20, %cst_29 {dimension_numbers = #tpu.dot_dimension_numbers<[2], [1], [1], [2], [0, 0, 0, 1, 1, 2], [0], [0]>} : vector<80x16x16xf32>, vector<80x16x16xf32>, vector<80x16x16xf32> -> vector<80x16x16xf32>
    "tpu.trace_stop"() : () -> ()
    %25 = vector.shape_cast %24 : vector<80x16x16xf32> to vector<8x10x16x16xf32>
    "tpu.trace_start"() <{level = 10 : i32, message = "bij,bjw->biw"}> : () -> ()
    %cst_30 = arith.constant dense<0.000000e+00> : vector<80x16x16xf32>
    %26 = tpu.matmul %8, %21, %cst_30 {dimension_numbers = #tpu.dot_dimension_numbers<[2], [1], [1], [2], [0, 0, 0, 1, 1, 2], [0], [0]>} : vector<80x16x16xf32>, vector<80x16x16xf32>, vector<80x16x16xf32> -> vector<80x16x16xf32>
    "tpu.trace_stop"() : () -> ()
    %27 = vector.shape_cast %26 : vector<80x16x16xf32> to vector<8x10x16x16xf32>
    %28 = vector.extract_strided_slice %23 {offsets = [0, 0, 0, 0], sizes = [8, 8, 16, 16], strides = [1, 1, 1, 1]} : vector<8x10x16x16xf32> to vector<8x8x16x16xf32>
    %cst_31 = arith.constant -1.000000e+00 : f32
    %29 = vector.broadcast %cst_31 : f32 to vector<8x8x16x16xf32>
    %30 = arith.mulf %29, %28 : vector<8x8x16x16xf32>
    %31 = vector.extract_strided_slice %23 {offsets = [0, 2, 0, 0], sizes = [8, 8, 16, 16], strides = [1, 1, 1, 1]} : vector<8x10x16x16xf32> to vector<8x8x16x16xf32>
    %32 = arith.addf %30, %31 : vector<8x8x16x16xf32>
    %33 = vector.extract_strided_slice %25 {offsets = [0, 0, 0, 0], sizes = [8, 8, 16, 16], strides = [1, 1, 1, 1]} : vector<8x10x16x16xf32> to vector<8x8x16x16xf32>
    %34 = vector.extract_strided_slice %25 {offsets = [0, 1, 0, 0], sizes = [8, 8, 16, 16], strides = [1, 1, 1, 1]} : vector<8x10x16x16xf32> to vector<8x8x16x16xf32>
    %cst_32 = arith.constant 2.000000e+00 : f32
    %35 = vector.broadcast %cst_32 : f32 to vector<8x8x16x16xf32>
    %36 = arith.mulf %35, %34 : vector<8x8x16x16xf32>
    %37 = arith.addf %33, %36 : vector<8x8x16x16xf32>
    %38 = vector.extract_strided_slice %25 {offsets = [0, 2, 0, 0], sizes = [8, 8, 16, 16], strides = [1, 1, 1, 1]} : vector<8x10x16x16xf32> to vector<8x8x16x16xf32>
    %39 = arith.addf %37, %38 : vector<8x8x16x16xf32>
    %40 = vector.extract_strided_slice %27 {offsets = [0, 0, 0, 0], sizes = [8, 8, 16, 16], strides = [1, 1, 1, 1]} : vector<8x10x16x16xf32> to vector<8x8x16x16xf32>
    %41 = vector.extract_strided_slice %27 {offsets = [0, 1, 0, 0], sizes = [8, 8, 16, 16], strides = [1, 1, 1, 1]} : vector<8x10x16x16xf32> to vector<8x8x16x16xf32>
    %cst_33 = arith.constant 2.000000e+00 : f32
    %42 = vector.broadcast %cst_33 : f32 to vector<8x8x16x16xf32>
    %43 = arith.mulf %42, %41 : vector<8x8x16x16xf32>
    %44 = arith.addf %40, %43 : vector<8x8x16x16xf32>
    %45 = vector.extract_strided_slice %27 {offsets = [0, 2, 0, 0], sizes = [8, 8, 16, 16], strides = [1, 1, 1, 1]} : vector<8x10x16x16xf32> to vector<8x8x16x16xf32>
    %46 = arith.addf %44, %45 : vector<8x8x16x16xf32>
    %c8_i32 = arith.constant 8 : i32
    %47 = arith.muli %arg0, %c8_i32 : i32
    %48 = vector.extract_strided_slice %32 {offsets = [0, 0, 0, 0], sizes = [1, 8, 16, 16], strides = [1, 1, 1, 1]} : vector<8x8x16x16xf32> to vector<1x8x16x16xf32>
    %49 = vector.shape_cast %48 : vector<1x8x16x16xf32> to vector<8x16x16xf32>
    %50 = math.absf %49 : vector<8x16x16xf32>
    %51 = vector.shape_cast %50 : vector<8x16x16xf32> to vector<1x8x16x16xf32>
    %cst_34 = arith.constant dense<0.000000e+00> : vector<1xf32>
    %52 = vector.multi_reduction <add>, %51, %cst_34 [1, 2, 3] : vector<1x8x16x16xf32> to vector<1xf32>
    %53 = vector.shape_cast %52 : vector<1xf32> to vector<1x1x1x1xf32>
    %54 = vector.extract %53[0, 0, 0, 0] : f32 from vector<1x1x1x1xf32>
    %cst_35 = arith.constant 0.000000e+00 : f32
    %55 = arith.addf %cst_35, %54 : f32
    %56 = vector.extract_strided_slice %39 {offsets = [0, 0, 0, 0], sizes = [1, 8, 16, 16], strides = [1, 1, 1, 1]} : vector<8x8x16x16xf32> to vector<1x8x16x16xf32>
    %57 = vector.shape_cast %56 : vector<1x8x16x16xf32> to vector<8x16x16xf32>
    %58 = math.absf %57 : vector<8x16x16xf32>
    %59 = vector.shape_cast %58 : vector<8x16x16xf32> to vector<1x8x16x16xf32>
    %cst_36 = arith.constant dense<0.000000e+00> : vector<1xf32>
    %60 = vector.multi_reduction <add>, %59, %cst_36 [1, 2, 3] : vector<1x8x16x16xf32> to vector<1xf32>
    %61 = vector.shape_cast %60 : vector<1xf32> to vector<1x1x1x1xf32>
    %62 = vector.extract %61[0, 0, 0, 0] : f32 from vector<1x1x1x1xf32>
    %63 = arith.addf %55, %62 : f32
    %64 = vector.extract_strided_slice %46 {offsets = [0, 0, 0, 0], sizes = [1, 8, 16, 16], strides = [1, 1, 1, 1]} : vector<8x8x16x16xf32> to vector<1x8x16x16xf32>
    %65 = vector.shape_cast %64 : vector<1x8x16x16xf32> to vector<8x16x16xf32>
    %66 = math.absf %65 : vector<8x16x16xf32>
    %67 = vector.shape_cast %66 : vector<8x16x16xf32> to vector<1x8x16x16xf32>
    %cst_37 = arith.constant dense<0.000000e+00> : vector<1xf32>
    %68 = vector.multi_reduction <add>, %67, %cst_37 [1, 2, 3] : vector<1x8x16x16xf32> to vector<1xf32>
    %69 = vector.shape_cast %68 : vector<1xf32> to vector<1x1x1x1xf32>
    %70 = vector.extract %69[0, 0, 0, 0] : f32 from vector<1x1x1x1xf32>
    %71 = arith.addf %63, %70 : f32
    %c0_i32 = arith.constant 0 : i32
    %72 = arith.addi %47, %c0_i32 : i32
    %c0_38 = arith.constant 0 : index
    %73 = arith.index_cast %72 : i32 to index
    %74 = memref.load %arg6[%c0_38, %73] : memref<1x8xf32, #tpu.memory_space<smem>>
    memref.store %71, %arg6[%c0_38, %73] : memref<1x8xf32, #tpu.memory_space<smem>>
    %75 = vector.extract_strided_slice %32 {offsets = [1, 0, 0, 0], sizes = [1, 8, 16, 16], strides = [1, 1, 1, 1]} : vector<8x8x16x16xf32> to vector<1x8x16x16xf32>
    %76 = vector.shape_cast %75 : vector<1x8x16x16xf32> to vector<8x16x16xf32>
    %77 = math.absf %76 : vector<8x16x16xf32>
    %78 = vector.shape_cast %77 : vector<8x16x16xf32> to vector<1x8x16x16xf32>
    %cst_39 = arith.constant dense<0.000000e+00> : vector<1xf32>
    %79 = vector.multi_reduction <add>, %78, %cst_39 [1, 2, 3] : vector<1x8x16x16xf32> to vector<1xf32>
    %80 = vector.shape_cast %79 : vector<1xf32> to vector<1x1x1x1xf32>
    %81 = vector.extract %80[0, 0, 0, 0] : f32 from vector<1x1x1x1xf32>
    %cst_40 = arith.constant 0.000000e+00 : f32
    %82 = arith.addf %cst_40, %81 : f32
    %83 = vector.extract_strided_slice %39 {offsets = [1, 0, 0, 0], sizes = [1, 8, 16, 16], strides = [1, 1, 1, 1]} : vector<8x8x16x16xf32> to vector<1x8x16x16xf32>
    %84 = vector.shape_cast %83 : vector<1x8x16x16xf32> to vector<8x16x16xf32>
    %85 = math.absf %84 : vector<8x16x16xf32>
    %86 = vector.shape_cast %85 : vector<8x16x16xf32> to vector<1x8x16x16xf32>
    %cst_41 = arith.constant dense<0.000000e+00> : vector<1xf32>
    %87 = vector.multi_reduction <add>, %86, %cst_41 [1, 2, 3] : vector<1x8x16x16xf32> to vector<1xf32>
    %88 = vector.shape_cast %87 : vector<1xf32> to vector<1x1x1x1xf32>
    %89 = vector.extract %88[0, 0, 0, 0] : f32 from vector<1x1x1x1xf32>
    %90 = arith.addf %82, %89 : f32
    %91 = vector.extract_strided_slice %46 {offsets = [1, 0, 0, 0], sizes = [1, 8, 16, 16], strides = [1, 1, 1, 1]} : vector<8x8x16x16xf32> to vector<1x8x16x16xf32>
    %92 = vector.shape_cast %91 : vector<1x8x16x16xf32> to vector<8x16x16xf32>
    %93 = math.absf %92 : vector<8x16x16xf32>
    %94 = vector.shape_cast %93 : vector<8x16x16xf32> to vector<1x8x16x16xf32>
    %cst_42 = arith.constant dense<0.000000e+00> : vector<1xf32>
    %95 = vector.multi_reduction <add>, %94, %cst_42 [1, 2, 3] : vector<1x8x16x16xf32> to vector<1xf32>
    %96 = vector.shape_cast %95 : vector<1xf32> to vector<1x1x1x1xf32>
    %97 = vector.extract %96[0, 0, 0, 0] : f32 from vector<1x1x1x1xf32>
    %98 = arith.addf %90, %97 : f32
    %c1_i32 = arith.constant 1 : i32
    %99 = arith.addi %47, %c1_i32 : i32
    %c0_43 = arith.constant 0 : index
    %100 = arith.index_cast %99 : i32 to index
    %101 = memref.load %arg6[%c0_43, %100] : memref<1x8xf32, #tpu.memory_space<smem>>
    memref.store %98, %arg6[%c0_43, %100] : memref<1x8xf32, #tpu.memory_space<smem>>
    %102 = vector.extract_strided_slice %32 {offsets = [2, 0, 0, 0], sizes = [1, 8, 16, 16], strides = [1, 1, 1, 1]} : vector<8x8x16x16xf32> to vector<1x8x16x16xf32>
    %103 = vector.shape_cast %102 : vector<1x8x16x16xf32> to vector<8x16x16xf32>
    %104 = math.absf %103 : vector<8x16x16xf32>
    %105 = vector.shape_cast %104 : vector<8x16x16xf32> to vector<1x8x16x16xf32>
    %cst_44 = arith.constant dense<0.000000e+00> : vector<1xf32>
    %106 = vector.multi_reduction <add>, %105, %cst_44 [1, 2, 3] : vector<1x8x16x16xf32> to vector<1xf32>
    %107 = vector.shape_cast %106 : vector<1xf32> to vector<1x1x1x1xf32>
    %108 = vector.extract %107[0, 0, 0, 0] : f32 from vector<1x1x1x1xf32>
    %cst_45 = arith.constant 0.000000e+00 : f32
    %109 = arith.addf %cst_45, %108 : f32
    %110 = vector.extract_strided_slice %39 {offsets = [2, 0, 0, 0], sizes = [1, 8, 16, 16], strides = [1, 1, 1, 1]} : vector<8x8x16x16xf32> to vector<1x8x16x16xf32>
    %111 = vector.shape_cast %110 : vector<1x8x16x16xf32> to vector<8x16x16xf32>
    %112 = math.absf %111 : vector<8x16x16xf32>
    %113 = vector.shape_cast %112 : vector<8x16x16xf32> to vector<1x8x16x16xf32>
    %cst_46 = arith.constant dense<0.000000e+00> : vector<1xf32>
    %114 = vector.multi_reduction <add>, %113, %cst_46 [1, 2, 3] : vector<1x8x16x16xf32> to vector<1xf32>
    %115 = vector.shape_cast %114 : vector<1xf32> to vector<1x1x1x1xf32>
    %116 = vector.extract %115[0, 0, 0, 0] : f32 from vector<1x1x1x1xf32>
    %117 = arith.addf %109, %116 : f32
    %118 = vector.extract_strided_slice %46 {offsets = [2, 0, 0, 0], sizes = [1, 8, 16, 16], strides = [1, 1, 1, 1]} : vector<8x8x16x16xf32> to vector<1x8x16x16xf32>
    %119 = vector.shape_cast %118 : vector<1x8x16x16xf32> to vector<8x16x16xf32>
    %120 = math.absf %119 : vector<8x16x16xf32>
    %121 = vector.shape_cast %120 : vector<8x16x16xf32> to vector<1x8x16x16xf32>
    %cst_47 = arith.constant dense<0.000000e+00> : vector<1xf32>
    %122 = vector.multi_reduction <add>, %121, %cst_47 [1, 2, 3] : vector<1x8x16x16xf32> to vector<1xf32>
    %123 = vector.shape_cast %122 : vector<1xf32> to vector<1x1x1x1xf32>
    %124 = vector.extract %123[0, 0, 0, 0] : f32 from vector<1x1x1x1xf32>
    %125 = arith.addf %117, %124 : f32
    %c2_i32 = arith.constant 2 : i32
    %126 = arith.addi %47, %c2_i32 : i32
    %c0_48 = arith.constant 0 : index
    %127 = arith.index_cast %126 : i32 to index
    %128 = memref.load %arg6[%c0_48, %127] : memref<1x8xf32, #tpu.memory_space<smem>>
    memref.store %125, %arg6[%c0_48, %127] : memref<1x8xf32, #tpu.memory_space<smem>>
    %129 = vector.extract_strided_slice %32 {offsets = [3, 0, 0, 0], sizes = [1, 8, 16, 16], strides = [1, 1, 1, 1]} : vector<8x8x16x16xf32> to vector<1x8x16x16xf32>
    %130 = vector.shape_cast %129 : vector<1x8x16x16xf32> to vector<8x16x16xf32>
    %131 = math.absf %130 : vector<8x16x16xf32>
    %132 = vector.shape_cast %131 : vector<8x16x16xf32> to vector<1x8x16x16xf32>
    %cst_49 = arith.constant dense<0.000000e+00> : vector<1xf32>
    %133 = vector.multi_reduction <add>, %132, %cst_49 [1, 2, 3] : vector<1x8x16x16xf32> to vector<1xf32>
    %134 = vector.shape_cast %133 : vector<1xf32> to vector<1x1x1x1xf32>
    %135 = vector.extract %134[0, 0, 0, 0] : f32 from vector<1x1x1x1xf32>
    %cst_50 = arith.constant 0.000000e+00 : f32
    %136 = arith.addf %cst_50, %135 : f32
    %137 = vector.extract_strided_slice %39 {offsets = [3, 0, 0, 0], sizes = [1, 8, 16, 16], strides = [1, 1, 1, 1]} : vector<8x8x16x16xf32> to vector<1x8x16x16xf32>
    %138 = vector.shape_cast %137 : vector<1x8x16x16xf32> to vector<8x16x16xf32>
    %139 = math.absf %138 : vector<8x16x16xf32>
    %140 = vector.shape_cast %139 : vector<8x16x16xf32> to vector<1x8x16x16xf32>
    %cst_51 = arith.constant dense<0.000000e+00> : vector<1xf32>
    %141 = vector.multi_reduction <add>, %140, %cst_51 [1, 2, 3] : vector<1x8x16x16xf32> to vector<1xf32>
    %142 = vector.shape_cast %141 : vector<1xf32> to vector<1x1x1x1xf32>
    %143 = vector.extract %142[0, 0, 0, 0] : f32 from vector<1x1x1x1xf32>
    %144 = arith.addf %136, %143 : f32
    %145 = vector.extract_strided_slice %46 {offsets = [3, 0, 0, 0], sizes = [1, 8, 16, 16], strides = [1, 1, 1, 1]} : vector<8x8x16x16xf32> to vector<1x8x16x16xf32>
    %146 = vector.shape_cast %145 : vector<1x8x16x16xf32> to vector<8x16x16xf32>
    %147 = math.absf %146 : vector<8x16x16xf32>
    %148 = vector.shape_cast %147 : vector<8x16x16xf32> to vector<1x8x16x16xf32>
    %cst_52 = arith.constant dense<0.000000e+00> : vector<1xf32>
    %149 = vector.multi_reduction <add>, %148, %cst_52 [1, 2, 3] : vector<1x8x16x16xf32> to vector<1xf32>
    %150 = vector.shape_cast %149 : vector<1xf32> to vector<1x1x1x1xf32>
    %151 = vector.extract %150[0, 0, 0, 0] : f32 from vector<1x1x1x1xf32>
    %152 = arith.addf %144, %151 : f32
    %c3_i32 = arith.constant 3 : i32
    %153 = arith.addi %47, %c3_i32 : i32
    %c0_53 = arith.constant 0 : index
    %154 = arith.index_cast %153 : i32 to index
    %155 = memref.load %arg6[%c0_53, %154] : memref<1x8xf32, #tpu.memory_space<smem>>
    memref.store %152, %arg6[%c0_53, %154] : memref<1x8xf32, #tpu.memory_space<smem>>
    %156 = vector.extract_strided_slice %32 {offsets = [4, 0, 0, 0], sizes = [1, 8, 16, 16], strides = [1, 1, 1, 1]} : vector<8x8x16x16xf32> to vector<1x8x16x16xf32>
    %157 = vector.shape_cast %156 : vector<1x8x16x16xf32> to vector<8x16x16xf32>
    %158 = math.absf %157 : vector<8x16x16xf32>
    %159 = vector.shape_cast %158 : vector<8x16x16xf32> to vector<1x8x16x16xf32>
    %cst_54 = arith.constant dense<0.000000e+00> : vector<1xf32>
    %160 = vector.multi_reduction <add>, %159, %cst_54 [1, 2, 3] : vector<1x8x16x16xf32> to vector<1xf32>
    %161 = vector.shape_cast %160 : vector<1xf32> to vector<1x1x1x1xf32>
    %162 = vector.extract %161[0, 0, 0, 0] : f32 from vector<1x1x1x1xf32>
    %cst_55 = arith.constant 0.000000e+00 : f32
    %163 = arith.addf %cst_55, %162 : f32
    %164 = vector.extract_strided_slice %39 {offsets = [4, 0, 0, 0], sizes = [1, 8, 16, 16], strides = [1, 1, 1, 1]} : vector<8x8x16x16xf32> to vector<1x8x16x16xf32>
    %165 = vector.shape_cast %164 : vector<1x8x16x16xf32> to vector<8x16x16xf32>
    %166 = math.absf %165 : vector<8x16x16xf32>
    %167 = vector.shape_cast %166 : vector<8x16x16xf32> to vector<1x8x16x16xf32>
    %cst_56 = arith.constant dense<0.000000e+00> : vector<1xf32>
    %168 = vector.multi_reduction <add>, %167, %cst_56 [1, 2, 3] : vector<1x8x16x16xf32> to vector<1xf32>
    %169 = vector.shape_cast %168 : vector<1xf32> to vector<1x1x1x1xf32>
    %170 = vector.extract %169[0, 0, 0, 0] : f32 from vector<1x1x1x1xf32>
    %171 = arith.addf %163, %170 : f32
    %172 = vector.extract_strided_slice %46 {offsets = [4, 0, 0, 0], sizes = [1, 8, 16, 16], strides = [1, 1, 1, 1]} : vector<8x8x16x16xf32> to vector<1x8x16x16xf32>
    %173 = vector.shape_cast %172 : vector<1x8x16x16xf32> to vector<8x16x16xf32>
    %174 = math.absf %173 : vector<8x16x16xf32>
    %175 = vector.shape_cast %174 : vector<8x16x16xf32> to vector<1x8x16x16xf32>
    %cst_57 = arith.constant dense<0.000000e+00> : vector<1xf32>
    %176 = vector.multi_reduction <add>, %175, %cst_57 [1, 2, 3] : vector<1x8x16x16xf32> to vector<1xf32>
    %177 = vector.shape_cast %176 : vector<1xf32> to vector<1x1x1x1xf32>
    %178 = vector.extract %177[0, 0, 0, 0] : f32 from vector<1x1x1x1xf32>
    %179 = arith.addf %171, %178 : f32
    %c4_i32 = arith.constant 4 : i32
    %180 = arith.addi %47, %c4_i32 : i32
    %c0_58 = arith.constant 0 : index
    %181 = arith.index_cast %180 : i32 to index
    %182 = memref.load %arg6[%c0_58, %181] : memref<1x8xf32, #tpu.memory_space<smem>>
    memref.store %179, %arg6[%c0_58, %181] : memref<1x8xf32, #tpu.memory_space<smem>>
    %183 = vector.extract_strided_slice %32 {offsets = [5, 0, 0, 0], sizes = [1, 8, 16, 16], strides = [1, 1, 1, 1]} : vector<8x8x16x16xf32> to vector<1x8x16x16xf32>
    %184 = vector.shape_cast %183 : vector<1x8x16x16xf32> to vector<8x16x16xf32>
    %185 = math.absf %184 : vector<8x16x16xf32>
    %186 = vector.shape_cast %185 : vector<8x16x16xf32> to vector<1x8x16x16xf32>
    %cst_59 = arith.constant dense<0.000000e+00> : vector<1xf32>
    %187 = vector.multi_reduction <add>, %186, %cst_59 [1, 2, 3] : vector<1x8x16x16xf32> to vector<1xf32>
    %188 = vector.shape_cast %187 : vector<1xf32> to vector<1x1x1x1xf32>
    %189 = vector.extract %188[0, 0, 0, 0] : f32 from vector<1x1x1x1xf32>
    %cst_60 = arith.constant 0.000000e+00 : f32
    %190 = arith.addf %cst_60, %189 : f32
    %191 = vector.extract_strided_slice %39 {offsets = [5, 0, 0, 0], sizes = [1, 8, 16, 16], strides = [1, 1, 1, 1]} : vector<8x8x16x16xf32> to vector<1x8x16x16xf32>
    %192 = vector.shape_cast %191 : vector<1x8x16x16xf32> to vector<8x16x16xf32>
    %193 = math.absf %192 : vector<8x16x16xf32>
    %194 = vector.shape_cast %193 : vector<8x16x16xf32> to vector<1x8x16x16xf32>
    %cst_61 = arith.constant dense<0.000000e+00> : vector<1xf32>
    %195 = vector.multi_reduction <add>, %194, %cst_61 [1, 2, 3] : vector<1x8x16x16xf32> to vector<1xf32>
    %196 = vector.shape_cast %195 : vector<1xf32> to vector<1x1x1x1xf32>
    %197 = vector.extract %196[0, 0, 0, 0] : f32 from vector<1x1x1x1xf32>
    %198 = arith.addf %190, %197 : f32
    %199 = vector.extract_strided_slice %46 {offsets = [5, 0, 0, 0], sizes = [1, 8, 16, 16], strides = [1, 1, 1, 1]} : vector<8x8x16x16xf32> to vector<1x8x16x16xf32>
    %200 = vector.shape_cast %199 : vector<1x8x16x16xf32> to vector<8x16x16xf32>
    %201 = math.absf %200 : vector<8x16x16xf32>
    %202 = vector.shape_cast %201 : vector<8x16x16xf32> to vector<1x8x16x16xf32>
    %cst_62 = arith.constant dense<0.000000e+00> : vector<1xf32>
    %203 = vector.multi_reduction <add>, %202, %cst_62 [1, 2, 3] : vector<1x8x16x16xf32> to vector<1xf32>
    %204 = vector.shape_cast %203 : vector<1xf32> to vector<1x1x1x1xf32>
    %205 = vector.extract %204[0, 0, 0, 0] : f32 from vector<1x1x1x1xf32>
    %206 = arith.addf %198, %205 : f32
    %c5_i32 = arith.constant 5 : i32
    %207 = arith.addi %47, %c5_i32 : i32
    %c0_63 = arith.constant 0 : index
    %208 = arith.index_cast %207 : i32 to index
    %209 = memref.load %arg6[%c0_63, %208] : memref<1x8xf32, #tpu.memory_space<smem>>
    memref.store %206, %arg6[%c0_63, %208] : memref<1x8xf32, #tpu.memory_space<smem>>
    %210 = vector.extract_strided_slice %32 {offsets = [6, 0, 0, 0], sizes = [1, 8, 16, 16], strides = [1, 1, 1, 1]} : vector<8x8x16x16xf32> to vector<1x8x16x16xf32>
    %211 = vector.shape_cast %210 : vector<1x8x16x16xf32> to vector<8x16x16xf32>
    %212 = math.absf %211 : vector<8x16x16xf32>
    %213 = vector.shape_cast %212 : vector<8x16x16xf32> to vector<1x8x16x16xf32>
    %cst_64 = arith.constant dense<0.000000e+00> : vector<1xf32>
    %214 = vector.multi_reduction <add>, %213, %cst_64 [1, 2, 3] : vector<1x8x16x16xf32> to vector<1xf32>
    %215 = vector.shape_cast %214 : vector<1xf32> to vector<1x1x1x1xf32>
    %216 = vector.extract %215[0, 0, 0, 0] : f32 from vector<1x1x1x1xf32>
    %cst_65 = arith.constant 0.000000e+00 : f32
    %217 = arith.addf %cst_65, %216 : f32
    %218 = vector.extract_strided_slice %39 {offsets = [6, 0, 0, 0], sizes = [1, 8, 16, 16], strides = [1, 1, 1, 1]} : vector<8x8x16x16xf32> to vector<1x8x16x16xf32>
    %219 = vector.shape_cast %218 : vector<1x8x16x16xf32> to vector<8x16x16xf32>
    %220 = math.absf %219 : vector<8x16x16xf32>
    %221 = vector.shape_cast %220 : vector<8x16x16xf32> to vector<1x8x16x16xf32>
    %cst_66 = arith.constant dense<0.000000e+00> : vector<1xf32>
    %222 = vector.multi_reduction <add>, %221, %cst_66 [1, 2, 3] : vector<1x8x16x16xf32> to vector<1xf32>
    %223 = vector.shape_cast %222 : vector<1xf32> to vector<1x1x1x1xf32>
    %224 = vector.extract %223[0, 0, 0, 0] : f32 from vector<1x1x1x1xf32>
    %225 = arith.addf %217, %224 : f32
    %226 = vector.extract_strided_slice %46 {offsets = [6, 0, 0, 0], sizes = [1, 8, 16, 16], strides = [1, 1, 1, 1]} : vector<8x8x16x16xf32> to vector<1x8x16x16xf32>
    %227 = vector.shape_cast %226 : vector<1x8x16x16xf32> to vector<8x16x16xf32>
    %228 = math.absf %227 : vector<8x16x16xf32>
    %229 = vector.shape_cast %228 : vector<8x16x16xf32> to vector<1x8x16x16xf32>
    %cst_67 = arith.constant dense<0.000000e+00> : vector<1xf32>
    %230 = vector.multi_reduction <add>, %229, %cst_67 [1, 2, 3] : vector<1x8x16x16xf32> to vector<1xf32>
    %231 = vector.shape_cast %230 : vector<1xf32> to vector<1x1x1x1xf32>
    %232 = vector.extract %231[0, 0, 0, 0] : f32 from vector<1x1x1x1xf32>
    %233 = arith.addf %225, %232 : f32
    %c6_i32 = arith.constant 6 : i32
    %234 = arith.addi %47, %c6_i32 : i32
    %c0_68 = arith.constant 0 : index
    %235 = arith.index_cast %234 : i32 to index
    %236 = memref.load %arg6[%c0_68, %235] : memref<1x8xf32, #tpu.memory_space<smem>>
    memref.store %233, %arg6[%c0_68, %235] : memref<1x8xf32, #tpu.memory_space<smem>>
    %237 = vector.extract_strided_slice %32 {offsets = [7, 0, 0, 0], sizes = [1, 8, 16, 16], strides = [1, 1, 1, 1]} : vector<8x8x16x16xf32> to vector<1x8x16x16xf32>
    %238 = vector.shape_cast %237 : vector<1x8x16x16xf32> to vector<8x16x16xf32>
    %239 = math.absf %238 : vector<8x16x16xf32>
    %240 = vector.shape_cast %239 : vector<8x16x16xf32> to vector<1x8x16x16xf32>
    %cst_69 = arith.constant dense<0.000000e+00> : vector<1xf32>
    %241 = vector.multi_reduction <add>, %240, %cst_69 [1, 2, 3] : vector<1x8x16x16xf32> to vector<1xf32>
    %242 = vector.shape_cast %241 : vector<1xf32> to vector<1x1x1x1xf32>
    %243 = vector.extract %242[0, 0, 0, 0] : f32 from vector<1x1x1x1xf32>
    %cst_70 = arith.constant 0.000000e+00 : f32
    %244 = arith.addf %cst_70, %243 : f32
    %245 = vector.extract_strided_slice %39 {offsets = [7, 0, 0, 0], sizes = [1, 8, 16, 16], strides = [1, 1, 1, 1]} : vector<8x8x16x16xf32> to vector<1x8x16x16xf32>
    %246 = vector.shape_cast %245 : vector<1x8x16x16xf32> to vector<8x16x16xf32>
    %247 = math.absf %246 : vector<8x16x16xf32>
    %248 = vector.shape_cast %247 : vector<8x16x16xf32> to vector<1x8x16x16xf32>
    %cst_71 = arith.constant dense<0.000000e+00> : vector<1xf32>
    %249 = vector.multi_reduction <add>, %248, %cst_71 [1, 2, 3] : vector<1x8x16x16xf32> to vector<1xf32>
    %250 = vector.shape_cast %249 : vector<1xf32> to vector<1x1x1x1xf32>
    %251 = vector.extract %250[0, 0, 0, 0] : f32 from vector<1x1x1x1xf32>
    %252 = arith.addf %244, %251 : f32
    %253 = vector.extract_strided_slice %46 {offsets = [7, 0, 0, 0], sizes = [1, 8, 16, 16], strides = [1, 1, 1, 1]} : vector<8x8x16x16xf32> to vector<1x8x16x16xf32>
    %254 = vector.shape_cast %253 : vector<1x8x16x16xf32> to vector<8x16x16xf32>
    %255 = math.absf %254 : vector<8x16x16xf32>
    %256 = vector.shape_cast %255 : vector<8x16x16xf32> to vector<1x8x16x16xf32>
    %cst_72 = arith.constant dense<0.000000e+00> : vector<1xf32>
    %257 = vector.multi_reduction <add>, %256, %cst_72 [1, 2, 3] : vector<1x8x16x16xf32> to vector<1xf32>
    %258 = vector.shape_cast %257 : vector<1xf32> to vector<1x1x1x1xf32>
    %259 = vector.extract %258[0, 0, 0, 0] : f32 from vector<1x1x1x1xf32>
    %260 = arith.addf %252, %259 : f32
    %c7_i32 = arith.constant 7 : i32
    %261 = arith.addi %47, %c7_i32 : i32
    %c0_73 = arith.constant 0 : index
    %262 = arith.index_cast %261 : i32 to index
    %263 = memref.load %arg6[%c0_73, %262] : memref<1x8xf32, #tpu.memory_space<smem>>
    memref.store %260, %arg6[%c0_73, %262] : memref<1x8xf32, #tpu.memory_space<smem>>
    return
  }
  func.func @transform_0(%arg0: i32) -> (i32, i32, i32, i32) {
    %c0_i32 = arith.constant 0 : i32
    %c0_i32_0 = arith.constant 0 : i32
    %c0_i32_1 = arith.constant 0 : i32
    %c0_i32_2 = arith.constant 0 : i32
    return %arg0, %c0_i32, %c0_i32_0, %c0_i32_1 : i32, i32, i32, i32
  }
  func.func @transform_1(%arg0: i32) -> (i32, i32) {
    %c0_i32 = arith.constant 0 : i32
    %c0_i32_0 = arith.constant 0 : i32
    %c0_i32_1 = arith.constant 0 : i32
    return %c0_i32, %c0_i32_0 : i32, i32
  }
  func.func @transform_2(%arg0: i32) -> (i32, i32) {
    %c0_i32 = arith.constant 0 : i32
    %c0_i32_0 = arith.constant 0 : i32
    %c0_i32_1 = arith.constant 0 : i32
    return %c0_i32, %c0_i32_0 : i32, i32
  }
  func.func @transform_3(%arg0: i32) -> (i32, i32) {
    %c0_i32 = arith.constant 0 : i32
    %c0_i32_0 = arith.constant 0 : i32
    %c0_i32_1 = arith.constant 0 : i32
    return %c0_i32, %c0_i32_0 : i32, i32
  }
  func.func @transform_4(%arg0: i32) -> (i32, i32) {
    %c0_i32 = arith.constant 0 : i32
    %c0_i32_0 = arith.constant 0 : i32
    %c0_i32_1 = arith.constant 0 : i32
    return %c0_i32, %c0_i32_0 : i32, i32
  }
  func.func @transform_5(%arg0: i32) -> (i32, i32) {
    %c0_i32 = arith.constant 0 : i32
    %c0_i32_0 = arith.constant 0 : i32
    %c0_i32_1 = arith.constant 0 : i32
    return %c0_i32, %c0_i32_0 : i32, i32
  }
}

</mosaic_0001>

<bundles_post_ra>
// kernel: tpu_custom_call.1
= control target key start
LH: loop header
LB: loop body
LE: loop exit
PB: predicated region body
PF: predicated region fallthrough
CT: control target
= control target key end

     0   :  { %10 = vsyncpa [#allocation4], 0  ;;  %s44533_s0 = inlined_call_operand.hbm [shape: f32[8,8,16,16], index: 0, kind: input, shape index: {}]   ;;  %s44534_s1 = inlined_call_operand.hbm [shape: f32[16,16], index: 1, kind: input, shape index: {}]   ;;  %s44535_s2 = inlined_call_operand.hbm [shape: f32[16,16], index: 2, kind: input, shape index: {}]   ;;  %s44536_s3 = inlined_call_operand.hbm [shape: f32[16,16], index: 3, kind: input, shape index: {}]   ;;  %s44537_s4 = inlined_call_operand.hbm [shape: f32[16,16], index: 4, kind: input, shape index: {}]   ;;  %s44538_s5 = inlined_call_operand.hbm [shape: f32[1,8], index: 5, kind: output, shape index: {}]  }
   0x1   :  { %11 = vsyncpa [#allocation7], 0 }
   0x2   :  { %12 = vsyncpa [#allocation10], 0 }
   0x3   :  { %13 = vsyncpa [#allocation5], 0  ;;  %s39028_s18 = smov [#allocation6]   ;;  %s39029_s20 = smov [#allocation9]  }
   0x4   :  { %s31_s19 = sshll.u32 %s39028_s18, 4  ;;  %s55_s21 = sshll.u32 %s39029_s20, 4  ;;  %s32_s19 = int_to_ptr.vmem [resolvable:$true] %s31_s19  ;;  %s56_s21 = int_to_ptr.vmem [resolvable:$true] %s55_s21 }
   0x5   :  { %s38920_s22 = scalar_lea.vmem %s32_s19, 256  ;;  %p38925_p1 = scmp.lt.s32.totalorder %s32_s19, %s32_s19 }
   0x6   :  { %p38921_p0 = scmp.ne.s32.totalorder %s32_s19, %s38920_s22  ;;  %p38926_p2 = scmp.lt.s32.totalorder %s38920_s22, %s38920_s22 }
   0x8   :  { %p38927_p3 = por %p38926_p2, %p38925_p1 }
   0xa   :  { %p38928_p4 = pnand %p38927_p3, %p38921_p0 }
   0xc   :  { %38931 = shalt.err (!%p38928_p4)
}
   0xd   :  { %s39030_s23 = smov 128   ;;  %s39031_s24 = smov 8  }
   0xe   :  { %37 = dma.hbm_to_vmem [thread:$0]  %s44534_s1, 256, %s32_s19, [#allocation7], %s39030_s23, %s39030_s23, %s39031_s24  }
   0xf   :  { %s38940_s27 = scalar_lea.vmem %s56_s21, 256  ;;  %p38945_p6 = scmp.lt.s32.totalorder %s56_s21, %s56_s21 }
  0x10   :  { %p38941_p5 = scmp.ne.s32.totalorder %s56_s21, %s38940_s27  ;;  %p38946_p7 = scmp.lt.s32.totalorder %s38940_s27, %s38940_s27 }
  0x12   :  { %p38947_p8 = por %p38946_p7, %p38945_p6 }
  0x14   :  { %p38948_p9 = pnand %p38947_p8, %p38941_p5 }
  0x16   :  { %38951 = shalt.err (!%p38948_p9)
}
  0x17   :  { %61 = dma.hbm_to_vmem [thread:$0]  %s44536_s3, 256, %s56_s21, [#allocation10], %s39030_s23, %s39030_s23, %s39031_s24  }
  0x18   :  { %s39032_s30 = smov [#allocation3]   ;;  %s39033_s7 = smov [#allocation8]  }
  0x19   :  { %s19_s6 = sshll.u32 %s39032_s30, 4  ;;  %s43_s8 = sshll.u32 %s39033_s7, 4  ;;  %s20_s6 = int_to_ptr.vmem [resolvable:$true] %s19_s6  ;;  %s44_s8 = int_to_ptr.vmem [resolvable:$true] %s43_s8 }
  0x1a   :  { %s38960_s1 = scalar_lea.vmem %s20_s6, 16384  ;;  %p38965_p11 = scmp.lt.s32.totalorder %s20_s6, %s20_s6 }
  0x1b   :  { %p38961_p10 = scmp.ne.s32.totalorder %s20_s6, %s38960_s1  ;;  %p38966_p12 = scmp.lt.s32.totalorder %s38960_s1, %s38960_s1 }
  0x1d   :  { %p38967_p13 = por %p38966_p12, %p38965_p11 }
  0x1f   :  { %p38968_p0 = pnand %p38967_p13, %p38961_p10 }
  0x21   :  { %38971 = shalt.err (!%p38968_p0)
}
  0x22   :  { %25 = dma.hbm_to_vmem [thread:$0]  %s44533_s0, 16384, %s20_s6, [#allocation4], %s39030_s23, %s39030_s23, %s39031_s24  }
  0x23   :  { %s38980_s3 = scalar_lea.vmem %s44_s8, 256  ;;  %p38985_p2 = scmp.lt.s32.totalorder %s44_s8, %s44_s8 }
  0x24   :  { %p38981_p1 = scmp.ne.s32.totalorder %s44_s8, %s38980_s3  ;;  %p38986_p3 = scmp.lt.s32.totalorder %s38980_s3, %s38980_s3 }
  0x26   :  { %p38987_p4 = por %p38986_p3, %p38985_p2 }
  0x28   :  { %p38988_p5 = pnand %p38987_p4, %p38981_p1 }
  0x2a   :  { %38991 = shalt.err (!%p38988_p5)
}
  0x2b   :  { %49 = dma.hbm_to_vmem [thread:$0]  %s44535_s2, 256, %s44_s8, [#allocation7], %s39030_s23, %s39030_s23, %s39031_s24  }
  0x2c   :  { %s39034_s13 = smov [#allocation11]  }
  0x2d   :  { %s67_s14 = sshll.u32 %s39034_s13, 4  ;;  %s68_s14 = int_to_ptr.vmem [resolvable:$true] %s67_s14 }
  0x2e   :  { %s39000_s15 = scalar_lea.vmem %s68_s14, 256  ;;  %p39005_p7 = scmp.lt.s32.totalorder %s68_s14, %s68_s14 }
  0x2f   :  { %p39001_p6 = scmp.ne.s32.totalorder %s68_s14, %s39000_s15  ;;  %p39006_p8 = scmp.lt.s32.totalorder %s39000_s15, %s39000_s15 }
  0x31   :  { %p39007_p9 = por %p39006_p8, %p39005_p7 }
  0x33   :  { %p39008_p10 = pnand %p39007_p9, %p39001_p6 }
  0x35   :  { %39011 = shalt.err (!%p39008_p10)
}
  0x36   :  { %73 = dma.hbm_to_vmem [thread:$0]  %s44537_s4, 256, %s68_s14, [#allocation10], %s39030_s23, %s39030_s23, %s39031_s24  }
  0x37   :  { %39020 = dma.done.wait [#allocation4], 16384  }
  0x38   :  { %39021 = vsyncadd [#allocation4], 4294950912 }
  0x39   :  { %39022 = dma.done.wait [#allocation7], 512  }
  0x3a   :  { %39023 = vsyncadd [#allocation7], 4294966784 }
  0x3b   :  { %39024 = dma.done.wait [#allocation10], 512  }
  0x3c   :  { %39025 = vsyncadd [#allocation10], 4294966784  ;;  %vm97_vm0 = vcmask 130048   ;;  %v39035_v0 = vmov 0.0   ;;  %v39129_v1 = vld [vmem:[#allocation6 + $0x8] sm:$0xff]  ;;  %v39131_v2 = vld [vmem:[#allocation6] sm:$0xff] }
  0x3d   :  { %98 = vst.msk [vmem:[#allocation2] sm:$0xff] %vm97_vm0, %v39035_v0  ;;  %99 = vst.msk [vmem:[#allocation2 + $0x8] sm:$0xff] %vm97_vm0, %v39035_v0  ;;  %v131_v3 = vld [vmem:[#allocation3] sm:$0xff]  ;;  %35879 = vmatprep.subr.mxu0 %v39129_v1  ;;  %35886 = vmatprep.subr.mxu1 %v39129_v1  ;;  %v133_v6 = vld [vmem:[#allocation3 + $0x10] sm:$0xff] }
  0x3e   :  { %100 = vst.msk [vmem:[#allocation2 + $0xa0] sm:$0xff] %vm97_vm0, %v39035_v0  ;;  %101 = vst.msk [vmem:[#allocation2 + $0xa8] sm:$0xff] %vm97_vm0, %v39035_v0  ;;  %35880 = vmatpush3.msra.mxu0 %v39129_v1  ;;  %v132_v7 = vld [vmem:[#allocation3 + $0x8] sm:$0xff]  ;;  %v134_v8 = vld [vmem:[#allocation3 + $0x18] sm:$0xff]  ;;  %35887 = vmatpush3.msra.mxu1 %v39129_v1 }
  0x3f   :  { %102 = vst.msk [vmem:[#allocation2 + $0x140] sm:$0xff] %vm97_vm0, %v39035_v0  ;;  %103 = vst.msk [vmem:[#allocation2 + $0x148] sm:$0xff] %vm97_vm0, %v39035_v0  ;;  %v135_v9 = vld [vmem:[#allocation3 + $0x20] sm:$0xff]  ;;  %35881 = vmatprep.subr.mxu0 %v39131_v2  ;;  %v137_v10 = vld [vmem:[#allocation3 + $0x30] sm:$0xff]  ;;  %35888 = vmatprep.subr.mxu1 %v39131_v2 }
  0x40   :  { %104 = vst.msk [vmem:[#allocation2 + $0x1e0] sm:$0xff] %vm97_vm0, %v39035_v0  ;;  %105 = vst.msk [vmem:[#allocation2 + $0x1e8] sm:$0xff] %vm97_vm0, %v39035_v0  ;;  %v136_v11 = vld [vmem:[#allocation3 + $0x28] sm:$0xff]  ;;  %v138_v12 = vld [vmem:[#allocation3 + $0x38] sm:$0xff]  ;;  %35882 = vmatpush3.msra.mxu0 %v39131_v2  ;;  %35889 = vmatpush3.msra.mxu1 %v39131_v2 }
  0x41   :  { %106 = vst.msk [vmem:[#allocation2 + $0x280] sm:$0xff] %vm97_vm0, %v39035_v0  ;;  %107 = vst.msk [vmem:[#allocation2 + $0x288] sm:$0xff] %vm97_vm0, %v39035_v0  ;;  %v139_v13 = vld [vmem:[#allocation3 + $0x40] sm:$0xff]  ;;  %v141_v14 = vld [vmem:[#allocation3 + $0x50] sm:$0xff]  ;;  %35893 = vmatprep.subr.mxu0 %v39129_v1  ;;  %35900 = vmatprep.subr.mxu1 %v39129_v1 }
  0x42   :  { %108 = vst.msk [vmem:[#allocation2 + $0x320] sm:$0xff] %vm97_vm0, %v39035_v0  ;;  %109 = vst.msk [vmem:[#allocation2 + $0x328] sm:$0xff] %vm97_vm0, %v39035_v0  ;;  %v140_v15 = vld [vmem:[#allocation3 + $0x48] sm:$0xff]  ;;  %v142_v16 = vld [vmem:[#allocation3 + $0x58] sm:$0xff] }
  0x43   :  { %110 = vst.msk [vmem:[#allocation2 + $0x3c0] sm:$0xff] %vm97_vm0, %v39035_v0  ;;  %111 = vst.msk [vmem:[#allocation2 + $0x3c8] sm:$0xff] %vm97_vm0, %v39035_v0  ;;  %v143_v17 = vld [vmem:[#allocation3 + $0x60] sm:$0xff]  ;;  %v145_v18 = vld [vmem:[#allocation3 + $0x70] sm:$0xff] }
  0x44   :  { %112 = vst.msk [vmem:[#allocation2 + $0x460] sm:$0xff] %vm97_vm0, %v39035_v0  ;;  %113 = vst.msk [vmem:[#allocation2 + $0x468] sm:$0xff] %vm97_vm0, %v39035_v0  ;;  %v388_v4 = vld [vmem:[#allocation2] sm:$0xff]  ;;  %v389_v5 = vld [vmem:[#allocation2 + $0x8] sm:$0xff] }
  0x45   :  { %115 = vst.msk [vmem:[#allocation2 + $0x90] sm:$0xff] %vm97_vm0, %v39035_v0  ;;  %116 = vst.msk [vmem:[#allocation2 + $0x98] sm:$0xff] %vm97_vm0, %v39035_v0  ;;  %35883 = vmatprep.mubr.msk.f32.mxu0 %vm97_vm0, %v388_v4  ;;  %v144_v19 = vld [vmem:[#allocation3 + $0x68] sm:$0xff]  ;;  %v146_v20 = vld [vmem:[#allocation3 + $0x78] sm:$0xff] }
  0x46   :  { %117 = vst.msk [vmem:[#allocation2 + $0x130] sm:$0xff] %vm97_vm0, %v39035_v0  ;;  %118 = vst.msk [vmem:[#allocation2 + $0x138] sm:$0xff] %vm97_vm0, %v39035_v0  ;;  %35884 = vmatmul.mubr.msk.f32.vlgmr.msra.gmra.mxu0 %vm97_vm0, %v389_v5  ;;  %v147_v22 = vld [vmem:[#allocation3 + $0x80] sm:$0xff]  ;;  %v149_v23 = vld [vmem:[#allocation3 + $0x90] sm:$0xff] }
  0x47   :  { %119 = vst.msk [vmem:[#allocation2 + $0x1d0] sm:$0xff] %vm97_vm0, %v39035_v0  ;;  %120 = vst.msk [vmem:[#allocation2 + $0x1d8] sm:$0xff] %vm97_vm0, %v39035_v0  ;;  %35894 = vmatpush3.msra.mxu0 %v39129_v1  ;;  %v148_v25 = vld [vmem:[#allocation3 + $0x88] sm:$0xff]  ;;  %v150_v26 = vld [vmem:[#allocation3 + $0x98] sm:$0xff] }
  0x48   :  { %121 = vst.msk [vmem:[#allocation2 + $0x270] sm:$0xff] %vm97_vm0, %v39035_v0  ;;  %122 = vst.msk [vmem:[#allocation2 + $0x278] sm:$0xff] %vm97_vm0, %v39035_v0  ;;  %35895 = vmatprep.subr.mxu0 %v39131_v2  ;;  %v151_v33 = vld [vmem:[#allocation3 + $0xa0] sm:$0xff]  ;;  %v153_v34 = vld [vmem:[#allocation3 + $0xb0] sm:$0xff] }
  0x49   :  { %123 = vst.msk [vmem:[#allocation2 + $0x310] sm:$0xff] %vm97_vm0, %v39035_v0  ;;  %124 = vst.msk [vmem:[#allocation2 + $0x318] sm:$0xff] %vm97_vm0, %v39035_v0  ;;  %35896 = vmatpush3.msra.mxu0 %v39131_v2  ;;  %v152_v35 = vld [vmem:[#allocation3 + $0xa8] sm:$0xff]  ;;  %v154_v36 = vld [vmem:[#allocation3 + $0xb8] sm:$0xff] }
  0x4a   :  { %125 = vst.msk [vmem:[#allocation2 + $0x3b0] sm:$0xff] %vm97_vm0, %v39035_v0  ;;  %126 = vst.msk [vmem:[#allocation2 + $0x3b8] sm:$0xff] %vm97_vm0, %v39035_v0  ;;  %35907 = vmatprep.subr.mxu0 %v39129_v1  ;;  %v155_v37 = vld [vmem:[#allocation3 + $0xc0] sm:$0xff]  ;;  %v157_v40 = vld [vmem:[#allocation3 + $0xd0] sm:$0xff] }
  0x4b   :  { %127 = vst.msk [vmem:[#allocation2 + $0x450] sm:$0xff] %vm97_vm0, %v39035_v0  ;;  %128 = vst.msk [vmem:[#allocation2 + $0x458] sm:$0xff] %vm97_vm0, %v39035_v0  ;;  %v156_v41 = vld [vmem:[#allocation3 + $0xc8] sm:$0xff]  ;;  %v158_v42 = vld [vmem:[#allocation3 + $0xd8] sm:$0xff] }
  0x4c   :  { %129 = vst.msk [vmem:[#allocation2 + $0x4f0] sm:$0xff] %vm97_vm0, %v39035_v0  ;;  %130 = vst.msk [vmem:[#allocation2 + $0x4f8] sm:$0xff] %vm97_vm0, %v39035_v0  ;;  %v159_v43 = vld [vmem:[#allocation3 + $0xe0] sm:$0xff]  ;;  %v161_v44 = vld [vmem:[#allocation3 + $0xf0] sm:$0xff] }
  0x4d   :  { %260 = vst.msk [vmem:[#allocation2 + $0x10] sm:$0xff] %vm97_vm0, %v131_v3  ;;  %262 = vst.msk [vmem:[#allocation2 + $0x20] sm:$0xff] %vm97_vm0, %v133_v6  ;;  %v160_v45 = vld [vmem:[#allocation3 + $0xe8] sm:$0xff]  ;;  %v162_v46 = vld [vmem:[#allocation3 + $0xf8] sm:$0xff] }
  0x4e   :  { %261 = vst.msk [vmem:[#allocation2 + $0x18] sm:$0xff] %vm97_vm0, %v132_v7  ;;  %263 = vst.msk [vmem:[#allocation2 + $0x28] sm:$0xff] %vm97_vm0, %v134_v8  ;;  %v163_v49 = vld [vmem:[#allocation3 + $0x100] sm:$0xff]  ;;  %v165_v50 = vld [vmem:[#allocation3 + $0x110] sm:$0xff] }
  0x4f   :  { %264 = vst.msk [vmem:[#allocation2 + $0x30] sm:$0xff] %vm97_vm0, %v135_v9  ;;  %266 = vst.msk [vmem:[#allocation2 + $0x40] sm:$0xff] %vm97_vm0, %v137_v10  ;;  %v164_v51 = vld [vmem:[#allocation3 + $0x108] sm:$0xff]  ;;  %v166_v52 = vld [vmem:[#allocation3 + $0x118] sm:$0xff] }
  0x50   :  { %265 = vst.msk [vmem:[#allocation2 + $0x38] sm:$0xff] %vm97_vm0, %v136_v11  ;;  %267 = vst.msk [vmem:[#allocation2 + $0x48] sm:$0xff] %vm97_vm0, %v138_v12  ;;  %v167_v55 = vld [vmem:[#allocation3 + $0x120] sm:$0xff]  ;;  %v169_v56 = vld [vmem:[#allocation3 + $0x130] sm:$0xff] }
  0x51   :  { %268 = vst.msk [vmem:[#allocation2 + $0x50] sm:$0xff] %vm97_vm0, %v139_v13  ;;  %270 = vst.msk [vmem:[#allocation2 + $0x60] sm:$0xff] %vm97_vm0, %v141_v14  ;;  %v168_v57 = vld [vmem:[#allocation3 + $0x128] sm:$0xff]  ;;  %v170_v58 = vld [vmem:[#allocation3 + $0x138] sm:$0xff] }
  0x52   :  { %269 = vst.msk [vmem:[#allocation2 + $0x58] sm:$0xff] %vm97_vm0, %v140_v15  ;;  %271 = vst.msk [vmem:[#allocation2 + $0x68] sm:$0xff] %vm97_vm0, %v142_v16  ;;  %v171_v61 = vld [vmem:[#allocation3 + $0x140] sm:$0xff]  ;;  %v173_v62 = vld [vmem:[#allocation3 + $0x150] sm:$0xff] }
  0x53   :  { %272 = vst.msk [vmem:[#allocation2 + $0x70] sm:$0xff] %vm97_vm0, %v143_v17  ;;  %274 = vst.msk [vmem:[#allocation2 + $0x80] sm:$0xff] %vm97_vm0, %v145_v18  ;;  %v172_v63 = vld [vmem:[#allocation3 + $0x148] sm:$0xff]  ;;  %v174_v0 = vld [vmem:[#allocation3 + $0x158] sm:$0xff] }
  0x54   :  { %273 = vst.msk [vmem:[#allocation2 + $0x78] sm:$0xff] %vm97_vm0, %v144_v19  ;;  %275 = vst.msk [vmem:[#allocation2 + $0x88] sm:$0xff] %vm97_vm0, %v146_v20  ;;  %v390_v21 = vld [vmem:[#allocation2 + $0x10] sm:$0xff]  ;;  %v392_v24 = vld [vmem:[#allocation2 + $0x20] sm:$0xff] }
  0x55   :  { %35890 = vmatprep.mubr.msk.f32.mxu1 %vm97_vm0, %v390_v21  ;;  %276 = vst.msk [vmem:[#allocation2 + $0xb0] sm:$0xff] %vm97_vm0, %v147_v22  ;;  %278 = vst.msk [vmem:[#allocation2 + $0xc0] sm:$0xff] %vm97_vm0, %v149_v23  ;;  %35897 = vmatprep.mubr.msk.f32.mxu0 %vm97_vm0, %v392_v24  ;;  %v391_v27 = vld [vmem:[#allocation2 + $0x18] sm:$0xff]  ;;  %v393_v28 = vld [vmem:[#allocation2 + $0x28] sm:$0xff] }
  0x56   :  { %277 = vst.msk [vmem:[#allocation2 + $0xb8] sm:$0xff] %vm97_vm0, %v148_v25  ;;  %279 = vst.msk [vmem:[#allocation2 + $0xc8] sm:$0xff] %vm97_vm0, %v150_v26  ;;  %35891 = vmatmul.mubr.msk.f32.vlgmr.msra.gmra.mxu1 %vm97_vm0, %v391_v27  ;;  %35898 = vmatmul.mubr.msk.f32.vlgmr.msra.gmra.mxu0 %vm97_vm0, %v393_v28  ;;  %v394_v29 = vld [vmem:[#allocation2 + $0x30] sm:$0xff]  ;;  %v396_v30 = vld [vmem:[#allocation2 + $0x40] sm:$0xff] }
  0x57   :  { %35901 = vmatpush3.msra.mxu1 %v39129_v1  ;;  %35908 = vmatpush3.msra.mxu0 %v39129_v1  ;;  %v395_v31 = vld [vmem:[#allocation2 + $0x38] sm:$0xff]  ;;  %v397_v32 = vld [vmem:[#allocation2 + $0x48] sm:$0xff]  ;;  %280 = vst.msk [vmem:[#allocation2 + $0xd0] sm:$0xff] %vm97_vm0, %v151_v33  ;;  %282 = vst.msk [vmem:[#allocation2 + $0xe0] sm:$0xff] %vm97_vm0, %v153_v34 }
  0x58   :  { %35902 = vmatprep.subr.mxu1 %v39131_v2  ;;  %35909 = vmatprep.subr.mxu0 %v39131_v2  ;;  %281 = vst.msk [vmem:[#allocation2 + $0xd8] sm:$0xff] %vm97_vm0, %v152_v35  ;;  %283 = vst.msk [vmem:[#allocation2 + $0xe8] sm:$0xff] %vm97_vm0, %v154_v36  ;;  %v398_v38 = vld [vmem:[#allocation2 + $0x50] sm:$0xff]  ;;  %v400_v39 = vld [vmem:[#allocation2 + $0x60] sm:$0xff] }
  0x59   :  { %35903 = vmatpush3.msra.mxu1 %v39131_v2  ;;  %35910 = vmatpush3.msra.mxu0 %v39131_v2  ;;  %284 = vst.msk [vmem:[#allocation2 + $0xf0] sm:$0xff] %vm97_vm0, %v155_v37  ;;  %286 = vst.msk [vmem:[#allocation2 + $0x100] sm:$0xff] %vm97_vm0, %v157_v40  ;;  %v399_v47 = vld [vmem:[#allocation2 + $0x58] sm:$0xff]  ;;  %v401_v48 = vld [vmem:[#allocation2 + $0x68] sm:$0xff] }
  0x5a   :  { %35904 = vmatprep.mubr.msk.f32.mxu1 %vm97_vm0, %v394_v29  ;;  %35911 = vmatprep.mubr.msk.f32.mxu0 %vm97_vm0, %v396_v30  ;;  %285 = vst.msk [vmem:[#allocation2 + $0xf8] sm:$0xff] %vm97_vm0, %v156_v41  ;;  %287 = vst.msk [vmem:[#allocation2 + $0x108] sm:$0xff] %vm97_vm0, %v158_v42  ;;  %v402_v53 = vld [vmem:[#allocation2 + $0x70] sm:$0xff]  ;;  %v404_v54 = vld [vmem:[#allocation2 + $0x80] sm:$0xff] }
  0x5b   :  { %35914 = vmatprep.subr.mxu1 %v39129_v1  ;;  %35921 = vmatprep.subr.mxu0 %v39129_v1  ;;  %288 = vst.msk [vmem:[#allocation2 + $0x110] sm:$0xff] %vm97_vm0, %v159_v43  ;;  %290 = vst.msk [vmem:[#allocation2 + $0x120] sm:$0xff] %vm97_vm0, %v161_v44  ;;  %v403_v59 = vld [vmem:[#allocation2 + $0x78] sm:$0xff]  ;;  %v405_v60 = vld [vmem:[#allocation2 + $0x88] sm:$0xff] }
  0x5c   :  { %35905 = vmatmul.mubr.msk.f32.vlgmr.msra.gmra.mxu1 %vm97_vm0, %v395_v31  ;;  %35912 = vmatmul.mubr.msk.f32.vlgmr.msra.gmra.mxu0 %vm97_vm0, %v397_v32  ;;  %289 = vst.msk [vmem:[#allocation2 + $0x118] sm:$0xff] %vm97_vm0, %v160_v45  ;;  %291 = vst.msk [vmem:[#allocation2 + $0x128] sm:$0xff] %vm97_vm0, %v162_v46  ;;  %v406_v3 = vld [vmem:[#allocation2 + $0x90] sm:$0xff]  ;;  %v408_v4 = vld [vmem:[#allocation2 + $0xa0] sm:$0xff] }
  0x5d   :  { %35915 = vmatpush3.msra.mxu1 %v39129_v1  ;;  %35922 = vmatpush3.msra.mxu0 %v39129_v1  ;;  %292 = vst.msk [vmem:[#allocation2 + $0x150] sm:$0xff] %vm97_vm0, %v163_v49  ;;  %294 = vst.msk [vmem:[#allocation2 + $0x160] sm:$0xff] %vm97_vm0, %v165_v50  ;;  %v175_v5 = vld [vmem:[#allocation3 + $0x160] sm:$0xff]  ;;  %v177_v6 = vld [vmem:[#allocation3 + $0x170] sm:$0xff] }
  0x5e   :  { %35916 = vmatprep.subr.mxu1 %v39131_v2  ;;  %35923 = vmatprep.subr.mxu0 %v39131_v2  ;;  %293 = vst.msk [vmem:[#allocation2 + $0x158] sm:$0xff] %vm97_vm0, %v164_v51  ;;  %295 = vst.msk [vmem:[#allocation2 + $0x168] sm:$0xff] %vm97_vm0, %v166_v52  ;;  %v176_v7 = vld [vmem:[#allocation3 + $0x168] sm:$0xff]  ;;  %v178_v8 = vld [vmem:[#allocation3 + $0x178] sm:$0xff] }
  0x5f   :  { %35917 = vmatpush3.msra.mxu1 %v39131_v2  ;;  %35924 = vmatpush3.msra.mxu0 %v39131_v2  ;;  %296 = vst.msk [vmem:[#allocation2 + $0x170] sm:$0xff] %vm97_vm0, %v167_v55  ;;  %298 = vst.msk [vmem:[#allocation2 + $0x180] sm:$0xff] %vm97_vm0, %v169_v56  ;;  %v407_v9 = vld [vmem:[#allocation2 + $0x98] sm:$0xff]  ;;  %v409_v10 = vld [vmem:[#allocation2 + $0xa8] sm:$0xff] }
  0x60   :  { %35918 = vmatprep.mubr.msk.f32.mxu1 %vm97_vm0, %v398_v38  ;;  %35925 = vmatprep.mubr.msk.f32.mxu0 %vm97_vm0, %v400_v39  ;;  %297 = vst.msk [vmem:[#allocation2 + $0x178] sm:$0xff] %vm97_vm0, %v168_v57  ;;  %299 = vst.msk [vmem:[#allocation2 + $0x188] sm:$0xff] %vm97_vm0, %v170_v58  ;;  %v179_v11 = vld [vmem:[#allocation3 + $0x180] sm:$0xff]  ;;  %v181_v12 = vld [vmem:[#allocation3 + $0x190] sm:$0xff] }
  0x61   :  { %35928 = vmatprep.subr.mxu1 %v39129_v1  ;;  %35935 = vmatprep.subr.mxu0 %v39129_v1  ;;  %300 = vst.msk [vmem:[#allocation2 + $0x190] sm:$0xff] %vm97_vm0, %v171_v61  ;;  %302 = vst.msk [vmem:[#allocation2 + $0x1a0] sm:$0xff] %vm97_vm0, %v173_v62  ;;  %v180_v13 = vld [vmem:[#allocation3 + $0x188] sm:$0xff]  ;;  %v182_v14 = vld [vmem:[#allocation3 + $0x198] sm:$0xff] }
  0x62   :  { %35919 = vmatmul.mubr.msk.f32.vlgmr.msra.gmra.mxu1 %vm97_vm0, %v399_v47  ;;  %35926 = vmatmul.mubr.msk.f32.vlgmr.msra.gmra.mxu0 %vm97_vm0, %v401_v48  ;;  %301 = vst.msk [vmem:[#allocation2 + $0x198] sm:$0xff] %vm97_vm0, %v172_v63  ;;  %303 = vst.msk [vmem:[#allocation2 + $0x1a8] sm:$0xff] %vm97_vm0, %v174_v0  ;;  %v410_v15 = vld [vmem:[#allocation2 + $0xb0] sm:$0xff]  ;;  %v412_v16 = vld [vmem:[#allocation2 + $0xc0] sm:$0xff] }
  0x63   :  { %35929 = vmatpush3.msra.mxu1 %v39129_v1  ;;  %35936 = vmatpush3.msra.mxu0 %v39129_v1  ;;  %304 = vst.msk [vmem:[#allocation2 + $0x1b0] sm:$0xff] %vm97_vm0, %v175_v5  ;;  %306 = vst.msk [vmem:[#allocation2 + $0x1c0] sm:$0xff] %vm97_vm0, %v177_v6  ;;  %v411_v17 = vld [vmem:[#allocation2 + $0xb8] sm:$0xff]  ;;  %v183_v18 = vld [vmem:[#allocation3 + $0x1a0] sm:$0xff] }
  0x64   :  { %35930 = vmatprep.subr.mxu1 %v39131_v2  ;;  %35937 = vmatprep.subr.mxu0 %v39131_v2  ;;  %305 = vst.msk [vmem:[#allocation2 + $0x1b8] sm:$0xff] %vm97_vm0, %v176_v7  ;;  %307 = vst.msk [vmem:[#allocation2 + $0x1c8] sm:$0xff] %vm97_vm0, %v178_v8  ;;  %v185_v19 = vld [vmem:[#allocation3 + $0x1b0] sm:$0xff]  ;;  %v413_v20 = vld [vmem:[#allocation2 + $0xc8] sm:$0xff] }
  0x65   :  { %35931 = vmatpush3.msra.mxu1 %v39131_v2  ;;  %35938 = vmatpush3.msra.mxu0 %v39131_v2  ;;  %308 = vst.msk [vmem:[#allocation2 + $0x1f0] sm:$0xff] %vm97_vm0, %v179_v11  ;;  %310 = vst.msk [vmem:[#allocation2 + $0x200] sm:$0xff] %vm97_vm0, %v181_v12  ;;  %v184_v21 = vld [vmem:[#allocation3 + $0x1a8] sm:$0xff]  ;;  %v186_v22 = vld [vmem:[#allocation3 + $0x1b8] sm:$0xff] }
  0x66   :  { %35932 = vmatprep.mubr.msk.f32.mxu1 %vm97_vm0, %v402_v53  ;;  %35939 = vmatprep.mubr.msk.f32.mxu0 %vm97_vm0, %v404_v54  ;;  %309 = vst.msk [vmem:[#allocation2 + $0x1f8] sm:$0xff] %vm97_vm0, %v180_v13  ;;  %311 = vst.msk [vmem:[#allocation2 + $0x208] sm:$0xff] %vm97_vm0, %v182_v14  ;;  %v414_v23 = vld [vmem:[#allocation2 + $0xd0] sm:$0xff]  ;;  %v187_v24 = vld [vmem:[#allocation3 + $0x1c0] sm:$0xff] }
  0x67   :  { %35942 = vmatprep.subr.mxu1 %v39129_v1  ;;  %35949 = vmatprep.subr.mxu0 %v39129_v1  ;;  %312 = vst.msk [vmem:[#allocation2 + $0x210] sm:$0xff] %vm97_vm0, %v183_v18  ;;  %314 = vst.msk [vmem:[#allocation2 + $0x220] sm:$0xff] %vm97_vm0, %v185_v19  ;;  %v189_v25 = vld [vmem:[#allocation3 + $0x1d0] sm:$0xff]  ;;  %v188_v26 = vld [vmem:[#allocation3 + $0x1c8] sm:$0xff] }
  0x68   :  { %35933 = vmatmul.mubr.msk.f32.vlgmr.msra.gmra.mxu1 %vm97_vm0, %v403_v59  ;;  %35940 = vmatmul.mubr.msk.f32.vlgmr.msra.gmra.mxu0 %vm97_vm0, %v405_v60  ;;  %313 = vst.msk [vmem:[#allocation2 + $0x218] sm:$0xff] %vm97_vm0, %v184_v21  ;;  %315 = vst.msk [vmem:[#allocation2 + $0x228] sm:$0xff] %vm97_vm0, %v186_v22  ;;  %v190_v27 = vld [vmem:[#allocation3 + $0x1d8] sm:$0xff]  ;;  %v191_v28 = vld [vmem:[#allocation3 + $0x1e0] sm:$0xff] }
  0x69   :  { %35943 = vmatpush3.msra.mxu1 %v39129_v1  ;;  %35950 = vmatpush3.msra.mxu0 %v39129_v1  ;;  %316 = vst.msk [vmem:[#allocation2 + $0x230] sm:$0xff] %vm97_vm0, %v187_v24  ;;  %318 = vst.msk [vmem:[#allocation2 + $0x240] sm:$0xff] %vm97_vm0, %v189_v25  ;;  %v193_v29 = vld [vmem:[#allocation3 + $0x1f0] sm:$0xff]  ;;  %v416_v30 = vld [vmem:[#allocation2 + $0xe0] sm:$0xff] }
  0x6a   :  { %35944 = vmatprep.subr.mxu1 %v39131_v2  ;;  %35951 = vmatprep.subr.mxu0 %v39131_v2  ;;  %317 = vst.msk [vmem:[#allocation2 + $0x238] sm:$0xff] %vm97_vm0, %v188_v26  ;;  %319 = vst.msk [vmem:[#allocation2 + $0x248] sm:$0xff] %vm97_vm0, %v190_v27  ;;  %v192_v31 = vld [vmem:[#allocation3 + $0x1e8] sm:$0xff]  ;;  %v194_v32 = vld [vmem:[#allocation3 + $0x1f8] sm:$0xff] }
  0x6b   :  { %35945 = vmatpush3.msra.mxu1 %v39131_v2  ;;  %35952 = vmatpush3.msra.mxu0 %v39131_v2  ;;  %320 = vst.msk [vmem:[#allocation2 + $0x250] sm:$0xff] %vm97_vm0, %v191_v28  ;;  %322 = vst.msk [vmem:[#allocation2 + $0x260] sm:$0xff] %vm97_vm0, %v193_v29  ;;  %v415_v33 = vld [vmem:[#allocation2 + $0xd8] sm:$0xff]  ;;  %v417_v34 = vld [vmem:[#allocation2 + $0xe8] sm:$0xff] }
  0x6c   :  { %35946 = vmatprep.mubr.msk.f32.mxu1 %vm97_vm0, %v406_v3  ;;  %35953 = vmatprep.mubr.msk.f32.mxu0 %vm97_vm0, %v408_v4  ;;  %321 = vst.msk [vmem:[#allocation2 + $0x258] sm:$0xff] %vm97_vm0, %v192_v31  ;;  %323 = vst.msk [vmem:[#allocation2 + $0x268] sm:$0xff] %vm97_vm0, %v194_v32  ;;  %v195_v35 = vld [vmem:[#allocation3 + $0x200] sm:$0xff]  ;;  %v197_v36 = vld [vmem:[#allocation3 + $0x210] sm:$0xff] }
  0x6d   :  { %35956 = vmatprep.subr.mxu1 %v39129_v1  ;;  %35963 = vmatprep.subr.mxu0 %v39129_v1  ;;  %324 = vst.msk [vmem:[#allocation2 + $0x290] sm:$0xff] %vm97_vm0, %v195_v35  ;;  %v196_v37 = vld [vmem:[#allocation3 + $0x208] sm:$0xff]  ;;  %v198_v38 = vld [vmem:[#allocation3 + $0x218] sm:$0xff]  ;;  %v418_v39 = vld [vmem:[#allocation2 + $0xf0] sm:$0xff] }
  0x6e   :  { %35947 = vmatmul.mubr.msk.f32.vlgmr.msra.gmra.mxu1 %vm97_vm0, %v407_v9  ;;  %35954 = vmatmul.mubr.msk.f32.vlgmr.msra.gmra.mxu0 %vm97_vm0, %v409_v10  ;;  %v420_v40 = vld [vmem:[#allocation2 + $0x100] sm:$0xff]  ;;  %326 = vst.msk [vmem:[#allocation2 + $0x2a0] sm:$0xff] %vm97_vm0, %v197_v36  ;;  %325 = vst.msk [vmem:[#allocation2 + $0x298] sm:$0xff] %vm97_vm0, %v196_v37  ;;  %v419_v41 = vld [vmem:[#allocation2 + $0xf8] sm:$0xff] }
  0x6f   :  { %35957 = vmatpush3.msra.mxu1 %v39129_v1  ;;  %35964 = vmatpush3.msra.mxu0 %v39129_v1  ;;  %327 = vst.msk [vmem:[#allocation2 + $0x2a8] sm:$0xff] %vm97_vm0, %v198_v38  ;;  %v421_v42 = vld [vmem:[#allocation2 + $0x108] sm:$0xff]  ;;  %v199_v43 = vld [vmem:[#allocation3 + $0x220] sm:$0xff]  ;;  %v201_v44 = vld [vmem:[#allocation3 + $0x230] sm:$0xff] }
  0x70   :  { %35958 = vmatprep.subr.mxu1 %v39131_v2  ;;  %35965 = vmatprep.subr.mxu0 %v39131_v2  ;;  %328 = vst.msk [vmem:[#allocation2 + $0x2b0] sm:$0xff] %vm97_vm0, %v199_v43  ;;  %v200_v45 = vld [vmem:[#allocation3 + $0x228] sm:$0xff]  ;;  %v202_v46 = vld [vmem:[#allocation3 + $0x238] sm:$0xff]  ;;  %v422_v47 = vld [vmem:[#allocation2 + $0x110] sm:$0xff] }
  0x71   :  { %35959 = vmatpush3.msra.mxu1 %v39131_v2  ;;  %35966 = vmatpush3.msra.mxu0 %v39131_v2  ;;  %330 = vst.msk [vmem:[#allocation2 + $0x2c0] sm:$0xff] %vm97_vm0, %v201_v44  ;;  %329 = vst.msk [vmem:[#allocation2 + $0x2b8] sm:$0xff] %vm97_vm0, %v200_v45  ;;  %v203_v48 = vld [vmem:[#allocation3 + $0x240] sm:$0xff]  ;;  %v205_v49 = vld [vmem:[#allocation3 + $0x250] sm:$0xff] }
  0x72   :  { %35960 = vmatprep.mubr.msk.f32.mxu1 %vm97_vm0, %v410_v15  ;;  %35967 = vmatprep.mubr.msk.f32.mxu0 %vm97_vm0, %v412_v16  ;;  %331 = vst.msk [vmem:[#allocation2 + $0x2c8] sm:$0xff] %vm97_vm0, %v202_v46  ;;  %v204_v50 = vld [vmem:[#allocation3 + $0x248] sm:$0xff]  ;;  %332 = vst.msk [vmem:[#allocation2 + $0x2d0] sm:$0xff] %vm97_vm0, %v203_v48  ;;  %v206_v51 = vld [vmem:[#allocation3 + $0x258] sm:$0xff] }
  0x73   :  { %35970 = vmatprep.subr.mxu1 %v39129_v1  ;;  %35977 = vmatprep.subr.mxu0 %v39129_v1  ;;  %334 = vst.msk [vmem:[#allocation2 + $0x2e0] sm:$0xff] %vm97_vm0, %v205_v49  ;;  %333 = vst.msk [vmem:[#allocation2 + $0x2d8] sm:$0xff] %vm97_vm0, %v204_v50  ;;  %v207_v52 = vld [vmem:[#allocation3 + $0x260] sm:$0xff]  ;;  %v209_v53 = vld [vmem:[#allocation3 + $0x270] sm:$0xff] }
  0x74   :  { %35961 = vmatmul.mubr.msk.f32.vlgmr.msra.gmra.mxu1 %vm97_vm0, %v411_v17  ;;  %35968 = vmatmul.mubr.msk.f32.vlgmr.msra.gmra.mxu0 %vm97_vm0, %v413_v20  ;;  %v424_v54 = vld [vmem:[#allocation2 + $0x120] sm:$0xff]  ;;  %335 = vst.msk [vmem:[#allocation2 + $0x2e8] sm:$0xff] %vm97_vm0, %v206_v51  ;;  %336 = vst.msk [vmem:[#allocation2 + $0x2f0] sm:$0xff] %vm97_vm0, %v207_v52  ;;  %v208_v55 = vld [vmem:[#allocation3 + $0x268] sm:$0xff] }
  0x75   :  { %35971 = vmatpush3.msra.mxu1 %v39129_v1  ;;  %35978 = vmatpush3.msra.mxu0 %v39129_v1  ;;  %338 = vst.msk [vmem:[#allocation2 + $0x300] sm:$0xff] %vm97_vm0, %v209_v53  ;;  %v210_v56 = vld [vmem:[#allocation3 + $0x278] sm:$0xff]  ;;  %337 = vst.msk [vmem:[#allocation2 + $0x2f8] sm:$0xff] %vm97_vm0, %v208_v55  ;;  %v425_v58 = vld [vmem:[#allocation2 + $0x128] sm:$0xff] }
  0x76   :  { %35972 = vmatprep.subr.mxu1 %v39131_v2  ;;  %35979 = vmatprep.subr.mxu0 %v39131_v2  ;;  %339 = vst.msk [vmem:[#allocation2 + $0x308] sm:$0xff] %vm97_vm0, %v210_v56  ;;  %v423_v57 = vld [vmem:[#allocation2 + $0x118] sm:$0xff]  ;;  %v211_v59 = vld [vmem:[#allocation3 + $0x280] sm:$0xff]  ;;  %v213_v60 = vld [vmem:[#allocation3 + $0x290] sm:$0xff] }
  0x77   :  { %35973 = vmatpush3.msra.mxu1 %v39131_v2  ;;  %35980 = vmatpush3.msra.mxu0 %v39131_v2  ;;  %340 = vst.msk [vmem:[#allocation2 + $0x330] sm:$0xff] %vm97_vm0, %v211_v59  ;;  %342 = vst.msk [vmem:[#allocation2 + $0x340] sm:$0xff] %vm97_vm0, %v213_v60  ;;  %v212_v61 = vld [vmem:[#allocation3 + $0x288] sm:$0xff]  ;;  %v214_v62 = vld [vmem:[#allocation3 + $0x298] sm:$0xff] }
  0x78   :  { %35974 = vmatprep.mubr.msk.f32.mxu1 %vm97_vm0, %v414_v23  ;;  %35981 = vmatprep.mubr.msk.f32.mxu0 %vm97_vm0, %v416_v30  ;;  %341 = vst.msk [vmem:[#allocation2 + $0x338] sm:$0xff] %vm97_vm0, %v212_v61  ;;  %343 = vst.msk [vmem:[#allocation2 + $0x348] sm:$0xff] %vm97_vm0, %v214_v62  ;;  %v426_v63 = vld [vmem:[#allocation2 + $0x130] sm:$0xff]  ;;  %v428_v0 = vld [vmem:[#allocation2 + $0x140] sm:$0xff] }
  0x79   :  { %35984 = vmatprep.subr.mxu1 %v39129_v1  ;;  %35991 = vmatprep.subr.mxu0 %v39129_v1  ;;  %v427_v3 = vld [vmem:[#allocation2 + $0x138] sm:$0xff]  ;;  %v429_v4 = vld [vmem:[#allocation2 + $0x148] sm:$0xff]  ;;  %v215_v5 = vld [vmem:[#allocation3 + $0x2a0] sm:$0xff] }
  0x7a   :  { %35975 = vmatmul.mubr.msk.f32.vlgmr.msra.gmra.mxu1 %vm97_vm0, %v415_v33  ;;  %35982 = vmatmul.mubr.msk.f32.vlgmr.msra.gmra.mxu0 %vm97_vm0, %v417_v34  ;;  %344 = vst.msk [vmem:[#allocation2 + $0x350] sm:$0xff] %vm97_vm0, %v215_v5  ;;  %v217_v6 = vld [vmem:[#allocation3 + $0x2b0] sm:$0xff]  ;;  %v216_v7 = vld [vmem:[#allocation3 + $0x2a8] sm:$0xff]  ;;  %v218_v8 = vld [vmem:[#allocation3 + $0x2b8] sm:$0xff] }
  0x7b   :  { %35985 = vmatpush3.msra.mxu1 %v39129_v1  ;;  %35992 = vmatpush3.msra.mxu0 %v39129_v1  ;;  %346 = vst.msk [vmem:[#allocation2 + $0x360] sm:$0xff] %vm97_vm0, %v217_v6  ;;  %345 = vst.msk [vmem:[#allocation2 + $0x358] sm:$0xff] %vm97_vm0, %v216_v7  ;;  %v219_v9 = vld [vmem:[#allocation3 + $0x2c0] sm:$0xff]  ;;  %v221_v10 = vld [vmem:[#allocation3 + $0x2d0] sm:$0xff] }
  0x7c   :  { %35986 = vmatprep.subr.mxu1 %v39131_v2  ;;  %35993 = vmatprep.subr.mxu0 %v39131_v2  ;;  %347 = vst.msk [vmem:[#allocation2 + $0x368] sm:$0xff] %vm97_vm0, %v218_v8  ;;  %v220_v11 = vld [vmem:[#allocation3 + $0x2c8] sm:$0xff]  ;;  %348 = vst.msk [vmem:[#allocation2 + $0x370] sm:$0xff] %vm97_vm0, %v219_v9  ;;  %v222_v12 = vld [vmem:[#allocation3 + $0x2d8] sm:$0xff] }
  0x7d   :  { %35987 = vmatpush3.msra.mxu1 %v39131_v2  ;;  %35994 = vmatpush3.msra.mxu0 %v39131_v2  ;;  %350 = vst.msk [vmem:[#allocation2 + $0x380] sm:$0xff] %vm97_vm0, %v221_v10  ;;  %349 = vst.msk [vmem:[#allocation2 + $0x378] sm:$0xff] %vm97_vm0, %v220_v11  ;;  %v430_v13 = vld [vmem:[#allocation2 + $0x150] sm:$0xff]  ;;  %v432_v14 = vld [vmem:[#allocation2 + $0x160] sm:$0xff] }
  0x7e   :  { %35988 = vmatprep.mubr.msk.f32.mxu1 %vm97_vm0, %v418_v39  ;;  %35995 = vmatprep.mubr.msk.f32.mxu0 %vm97_vm0, %v420_v40  ;;  %351 = vst.msk [vmem:[#allocation2 + $0x388] sm:$0xff] %vm97_vm0, %v222_v12  ;;  %v223_v15 = vld [vmem:[#allocation3 + $0x2e0] sm:$0xff]  ;;  %v225_v16 = vld [vmem:[#allocation3 + $0x2f0] sm:$0xff]  ;;  %v224_v17 = vld [vmem:[#allocation3 + $0x2e8] sm:$0xff] }
  0x7f   :  { %35998 = vmatprep.subr.mxu1 %v39129_v1  ;;  %36005 = vmatprep.subr.mxu0 %v39129_v1  ;;  %352 = vst.msk [vmem:[#allocation2 + $0x390] sm:$0xff] %vm97_vm0, %v223_v15  ;;  %v226_v18 = vld [vmem:[#allocation3 + $0x2f8] sm:$0xff]  ;;  %v433_v20 = vld [vmem:[#allocation2 + $0x168] sm:$0xff]  ;;  %354 = vst.msk [vmem:[#allocation2 + $0x3a0] sm:$0xff] %vm97_vm0, %v225_v16 }
  0x80   :  { %35989 = vmatmul.mubr.msk.f32.vlgmr.msra.gmra.mxu1 %vm97_vm0, %v419_v41  ;;  %35996 = vmatmul.mubr.msk.f32.vlgmr.msra.gmra.mxu0 %vm97_vm0, %v421_v42  ;;  %v431_v19 = vld [vmem:[#allocation2 + $0x158] sm:$0xff]  ;;  %353 = vst.msk [vmem:[#allocation2 + $0x398] sm:$0xff] %vm97_vm0, %v224_v17  ;;  %355 = vst.msk [vmem:[#allocation2 + $0x3a8] sm:$0xff] %vm97_vm0, %v226_v18  ;;  %v227_v21 = vld [vmem:[#allocation3 + $0x300] sm:$0xff] }
  0x81   :  { %35999 = vmatpush3.msra.mxu1 %v39129_v1  ;;  %36006 = vmatpush3.msra.mxu0 %v39129_v1  ;;  %v229_v22 = vld [vmem:[#allocation3 + $0x310] sm:$0xff]  ;;  %356 = vst.msk [vmem:[#allocation2 + $0x3d0] sm:$0xff] %vm97_vm0, %v227_v21  ;;  %v228_v23 = vld [vmem:[#allocation3 + $0x308] sm:$0xff]  ;;  %v230_v24 = vld [vmem:[#allocation3 + $0x318] sm:$0xff] }
  0x82   :  { %36000 = vmatprep.subr.mxu1 %v39131_v2  ;;  %36007 = vmatprep.subr.mxu0 %v39131_v2  ;;  %358 = vst.msk [vmem:[#allocation2 + $0x3e0] sm:$0xff] %vm97_vm0, %v229_v22  ;;  %357 = vst.msk [vmem:[#allocation2 + $0x3d8] sm:$0xff] %vm97_vm0, %v228_v23  ;;  %v434_v25 = vld [vmem:[#allocation2 + $0x170] sm:$0xff]  ;;  %v436_v26 = vld [vmem:[#allocation2 + $0x180] sm:$0xff] }
  0x83   :  { %36001 = vmatpush3.msra.mxu1 %v39131_v2  ;;  %36008 = vmatpush3.msra.mxu0 %v39131_v2  ;;  %359 = vst.msk [vmem:[#allocation2 + $0x3e8] sm:$0xff] %vm97_vm0, %v230_v24  ;;  %v435_v27 = vld [vmem:[#allocation2 + $0x178] sm:$0xff]  ;;  %v231_v28 = vld [vmem:[#allocation3 + $0x320] sm:$0xff]  ;;  %v233_v29 = vld [vmem:[#allocation3 + $0x330] sm:$0xff] }
  0x84   :  { %36002 = vmatprep.mubr.msk.f32.mxu1 %vm97_vm0, %v422_v47  ;;  %36009 = vmatprep.mubr.msk.f32.mxu0 %vm97_vm0, %v424_v54  ;;  %v437_v30 = vld [vmem:[#allocation2 + $0x188] sm:$0xff]  ;;  %360 = vst.msk [vmem:[#allocation2 + $0x3f0] sm:$0xff] %vm97_vm0, %v231_v28  ;;  %362 = vst.msk [vmem:[#allocation2 + $0x400] sm:$0xff] %vm97_vm0, %v233_v29  ;;  %v234_v32 = vld [vmem:[#allocation3 + $0x338] sm:$0xff] }
  0x85   :  { %36012 = vmatprep.subr.mxu1 %v39129_v1  ;;  %36019 = vmatprep.subr.mxu0 %v39129_v1  ;;  %v232_v31 = vld [vmem:[#allocation3 + $0x328] sm:$0xff]  ;;  %363 = vst.msk [vmem:[#allocation2 + $0x408] sm:$0xff] %vm97_vm0, %v234_v32  ;;  %v235_v33 = vld [vmem:[#allocation3 + $0x340] sm:$0xff]  ;;  %v237_v34 = vld [vmem:[#allocation3 + $0x350] sm:$0xff] }
  0x86   :  { %36003 = vmatmul.mubr.msk.f32.vlgmr.msra.gmra.mxu1 %vm97_vm0, %v423_v57  ;;  %36010 = vmatmul.mubr.msk.f32.vlgmr.msra.gmra.mxu0 %vm97_vm0, %v425_v58  ;;  %361 = vst.msk [vmem:[#allocation2 + $0x3f8] sm:$0xff] %vm97_vm0, %v232_v31  ;;  %v236_v35 = vld [vmem:[#allocation3 + $0x348] sm:$0xff]  ;;  %364 = vst.msk [vmem:[#allocation2 + $0x410] sm:$0xff] %vm97_vm0, %v235_v33  ;;  %v238_v36 = vld [vmem:[#allocation3 + $0x358] sm:$0xff] }
  0x87   :  { %36013 = vmatpush3.msra.mxu1 %v39129_v1  ;;  %36020 = vmatpush3.msra.mxu0 %v39129_v1  ;;  %366 = vst.msk [vmem:[#allocation2 + $0x420] sm:$0xff] %vm97_vm0, %v237_v34  ;;  %365 = vst.msk [vmem:[#allocation2 + $0x418] sm:$0xff] %vm97_vm0, %v236_v35  ;;  %v438_v37 = vld [vmem:[#allocation2 + $0x190] sm:$0xff]  ;;  %v440_v38 = vld [vmem:[#allocation2 + $0x1a0] sm:$0xff] }
  0x88   :  { %36014 = vmatprep.subr.mxu1 %v39131_v2  ;;  %36021 = vmatprep.subr.mxu0 %v39131_v2  ;;  %367 = vst.msk [vmem:[#allocation2 + $0x428] sm:$0xff] %vm97_vm0, %v238_v36  ;;  %v239_v39 = vld [vmem:[#allocation3 + $0x360] sm:$0xff]  ;;  %v241_v40 = vld [vmem:[#allocation3 + $0x370] sm:$0xff]  ;;  %v240_v41 = vld [vmem:[#allocation3 + $0x368] sm:$0xff] }
  0x89   :  { %36015 = vmatpush3.msra.mxu1 %v39131_v2  ;;  %36022 = vmatpush3.msra.mxu0 %v39131_v2  ;;  %368 = vst.msk [vmem:[#allocation2 + $0x430] sm:$0xff] %vm97_vm0, %v239_v39  ;;  %v242_v42 = vld [vmem:[#allocation3 + $0x378] sm:$0xff]  ;;  %v441_v44 = vld [vmem:[#allocation2 + $0x1a8] sm:$0xff]  ;;  %370 = vst.msk [vmem:[#allocation2 + $0x440] sm:$0xff] %vm97_vm0, %v241_v40 }
  0x8a   :  { %36016 = vmatprep.mubr.msk.f32.mxu1 %vm97_vm0, %v426_v63  ;;  %36023 = vmatprep.mubr.msk.f32.mxu0 %vm97_vm0, %v428_v0  ;;  %v439_v43 = vld [vmem:[#allocation2 + $0x198] sm:$0xff]  ;;  %369 = vst.msk [vmem:[#allocation2 + $0x438] sm:$0xff] %vm97_vm0, %v240_v41  ;;  %371 = vst.msk [vmem:[#allocation2 + $0x448] sm:$0xff] %vm97_vm0, %v242_v42  ;;  %v243_v45 = vld [vmem:[#allocation3 + $0x380] sm:$0xff] }
  0x8b   :  { %36026 = vmatprep.subr.mxu1 %v39129_v1  ;;  %36033 = vmatprep.subr.mxu0 %v39129_v1  ;;  %372 = vst.msk [vmem:[#allocation2 + $0x470] sm:$0xff] %vm97_vm0, %v243_v45  ;;  %v245_v46 = vld [vmem:[#allocation3 + $0x390] sm:$0xff]  ;;  %v444_v48 = vld [vmem:[#allocation2 + $0x1c0] sm:$0xff]  ;;  %v443_v49 = vld [vmem:[#allocation2 + $0x1b8] sm:$0xff] }
  0x8c   :  { %36017 = vmatmul.mubr.msk.f32.vlgmr.msra.gmra.mxu1 %vm97_vm0, %v427_v3  ;;  %36024 = vmatmul.mubr.msk.f32.vlgmr.msra.gmra.mxu0 %vm97_vm0, %v429_v4  ;;  %v442_v47 = vld [vmem:[#allocation2 + $0x1b0] sm:$0xff]  ;;  %374 = vst.msk [vmem:[#allocation2 + $0x480] sm:$0xff] %vm97_vm0, %v245_v46  ;;  %v445_v50 = vld [vmem:[#allocation2 + $0x1c8] sm:$0xff]  ;;  %v246_v52 = vld [vmem:[#allocation3 + $0x398] sm:$0xff] }
  0x8d   :  { %36027 = vmatpush3.msra.mxu1 %v39129_v1  ;;  %36034 = vmatpush3.msra.mxu0 %v39129_v1  ;;  %v244_v51 = vld [vmem:[#allocation3 + $0x388] sm:$0xff]  ;;  %v247_v53 = vld [vmem:[#allocation3 + $0x3a0] sm:$0xff]  ;;  %v446_v54 = vld [vmem:[#allocation2 + $0x1d0] sm:$0xff]  ;;  %375 = vst.msk [vmem:[#allocation2 + $0x488] sm:$0xff] %vm97_vm0, %v246_v52 }
  0x8e   :  { %36028 = vmatprep.subr.mxu1 %v39131_v2  ;;  %36035 = vmatprep.subr.mxu0 %v39131_v2  ;;  %373 = vst.msk [vmem:[#allocation2 + $0x478] sm:$0xff] %vm97_vm0, %v244_v51  ;;  %376 = vst.msk [vmem:[#allocation2 + $0x490] sm:$0xff] %vm97_vm0, %v247_v53  ;;  %v249_v55 = vld [vmem:[#allocation3 + $0x3b0] sm:$0xff]  ;;  %v448_v56 = vld [vmem:[#allocation2 + $0x1e0] sm:$0xff] }
  0x8f   :  { %36029 = vmatpush3.msra.mxu1 %v39131_v2  ;;  %36036 = vmatpush3.msra.mxu0 %v39131_v2  ;;  %378 = vst.msk [vmem:[#allocation2 + $0x4a0] sm:$0xff] %vm97_vm0, %v249_v55  ;;  %v248_v57 = vld [vmem:[#allocation3 + $0x3a8] sm:$0xff]  ;;  %v250_v58 = vld [vmem:[#allocation3 + $0x3b8] sm:$0xff]  ;;  %v251_v61 = vld [vmem:[#allocation3 + $0x3c0] sm:$0xff] }
  0x90   :  { %36030 = vmatprep.mubr.msk.f32.mxu1 %vm97_vm0, %v430_v13  ;;  %36037 = vmatprep.mubr.msk.f32.mxu0 %vm97_vm0, %v432_v14  ;;  %377 = vst.msk [vmem:[#allocation2 + $0x498] sm:$0xff] %vm97_vm0, %v248_v57  ;;  %379 = vst.msk [vmem:[#allocation2 + $0x4a8] sm:$0xff] %vm97_vm0, %v250_v58  ;;  %v447_v59 = vld [vmem:[#allocation2 + $0x1d8] sm:$0xff]  ;;  %v449_v60 = vld [vmem:[#allocation2 + $0x1e8] sm:$0xff] }
  0x91   :  { %36040 = vmatprep.subr.mxu1 %v39129_v1  ;;  %36047 = vmatprep.subr.mxu0 %v39129_v1  ;;  %v253_v62 = vld [vmem:[#allocation3 + $0x3d0] sm:$0xff]  ;;  %380 = vst.msk [vmem:[#allocation2 + $0x4b0] sm:$0xff] %vm97_vm0, %v251_v61  ;;  %v452_v0 = vld [vmem:[#allocation2 + $0x200] sm:$0xff]  ;;  %v252_v3 = vld [vmem:[#allocation3 + $0x3c8] sm:$0xff] }
  0x92   :  { %36031 = vmatmul.mubr.msk.f32.vlgmr.msra.gmra.mxu1 %vm97_vm0, %v431_v19  ;;  %36038 = vmatmul.mubr.msk.f32.vlgmr.msra.gmra.mxu0 %vm97_vm0, %v433_v20  ;;  %382 = vst.msk [vmem:[#allocation2 + $0x4c0] sm:$0xff] %vm97_vm0, %v253_v62  ;;  %v450_v63 = vld [vmem:[#allocation2 + $0x1f0] sm:$0xff]  ;;  %v254_v4 = vld [vmem:[#allocation3 + $0x3d8] sm:$0xff]  ;;  %v453_v6 = vld [vmem:[#allocation2 + $0x208] sm:$0xff] }
  0x93   :  { %36041 = vmatpush3.msra.mxu1 %v39129_v1  ;;  %36048 = vmatpush3.msra.mxu0 %v39129_v1  ;;  %v451_v5 = vld [vmem:[#allocation2 + $0x1f8] sm:$0xff]  ;;  %381 = vst.msk [vmem:[#allocation2 + $0x4b8] sm:$0xff] %vm97_vm0, %v252_v3  ;;  %383 = vst.msk [vmem:[#allocation2 + $0x4c8] sm:$0xff] %vm97_vm0, %v254_v4  ;;  %v255_v7 = vld [vmem:[#allocation3 + $0x3e0] sm:$0xff] }
  0x94   :  { %36042 = vmatprep.subr.mxu1 %v39131_v2  ;;  %36049 = vmatprep.subr.mxu0 %v39131_v2  ;;  %v257_v8 = vld [vmem:[#allocation3 + $0x3f0] sm:$0xff]  ;;  %384 = vst.msk [vmem:[#allocation2 + $0x4d0] sm:$0xff] %vm97_vm0, %v255_v7  ;;  %v456_v9 = vld [vmem:[#allocation2 + $0x220] sm:$0xff]  ;;  %v256_v10 = vld [vmem:[#allocation3 + $0x3e8] sm:$0xff] }
  0x95   :  { %36043 = vmatpush3.msra.mxu1 %v39131_v2  ;;  %36050 = vmatpush3.msra.mxu0 %v39131_v2  ;;  %386 = vst.msk [vmem:[#allocation2 + $0x4e0] sm:$0xff] %vm97_vm0, %v257_v8  ;;  %v39463_v11 = vld [vmem:[#allocation6] sm:$0xff]  ;;  %385 = vst.msk [vmem:[#allocation2 + $0x4d8] sm:$0xff] %vm97_vm0, %v256_v10  ;;  %v258_v12 = vld [vmem:[#allocation3 + $0x3f8] sm:$0xff] }
  0x96   :  { %36044 = vmatprep.mubr.msk.f32.mxu1 %vm97_vm0, %v434_v25  ;;  %36051 = vmatprep.mubr.msk.f32.mxu0 %vm97_vm0, %v436_v26  ;;  %v455_v13 = vld [vmem:[#allocation2 + $0x218] sm:$0xff]  ;;  %v457_v14 = vld [vmem:[#allocation2 + $0x228] sm:$0xff]  ;;  %387 = vst.msk [vmem:[#allocation2 + $0x4e8] sm:$0xff] %vm97_vm0, %v258_v12  ;;  %v458_v15 = vld [vmem:[#allocation2 + $0x230] sm:$0xff] }
  0x97   :  { %36054 = vmatprep.subr.mxu1 %v39129_v1  ;;  %36061 = vmatprep.subr.mxu0 %v39129_v1  ;;  %v460_v16 = vld [vmem:[#allocation2 + $0x240] sm:$0xff]  ;;  %v459_v17 = vld [vmem:[#allocation2 + $0x238] sm:$0xff]  ;;  %v461_v18 = vld [vmem:[#allocation2 + $0x248] sm:$0xff] }
  0x98   :  { %36045 = vmatmul.mubr.msk.f32.vlgmr.msra.gmra.mxu1 %vm97_vm0, %v435_v27  ;;  %36052 = vmatmul.mubr.msk.f32.vlgmr.msra.gmra.mxu0 %vm97_vm0, %v437_v30  ;;  %v462_v19 = vld [vmem:[#allocation2 + $0x250] sm:$0xff]  ;;  %v464_v20 = vld [vmem:[#allocation2 + $0x260] sm:$0xff]  ;;  %v463_v21 = vld [vmem:[#allocation2 + $0x258] sm:$0xff] }
  0x99   :  { %36055 = vmatpush3.msra.mxu1 %v39129_v1  ;;  %36062 = vmatpush3.msra.mxu0 %v39129_v1  ;;  %v465_v22 = vld [vmem:[#allocation2 + $0x268] sm:$0xff]  ;;  %v466_v23 = vld [vmem:[#allocation2 + $0x270] sm:$0xff]  ;;  %v468_v24 = vld [vmem:[#allocation2 + $0x280] sm:$0xff] }
  0x9a   :  { %36056 = vmatprep.subr.mxu1 %v39131_v2  ;;  %36063 = vmatprep.subr.mxu0 %v39131_v2  ;;  %v467_v25 = vld [vmem:[#allocation2 + $0x278] sm:$0xff]  ;;  %v469_v26 = vld [vmem:[#allocation2 + $0x288] sm:$0xff]  ;;  %v470_v27 = vld [vmem:[#allocation2 + $0x290] sm:$0xff] }
  0x9b   :  { %36057 = vmatpush3.msra.mxu1 %v39131_v2  ;;  %36064 = vmatpush3.msra.mxu0 %v39131_v2  ;;  %v472_v28 = vld [vmem:[#allocation2 + $0x2a0] sm:$0xff]  ;;  %v471_v29 = vld [vmem:[#allocation2 + $0x298] sm:$0xff]  ;;  %v473_v30 = vld [vmem:[#allocation2 + $0x2a8] sm:$0xff] }
  0x9c   :  { %36058 = vmatprep.mubr.msk.f32.mxu1 %vm97_vm0, %v438_v37  ;;  %36065 = vmatprep.mubr.msk.f32.mxu0 %vm97_vm0, %v440_v38  ;;  %v474_v31 = vld [vmem:[#allocation2 + $0x2b0] sm:$0xff]  ;;  %v476_v32 = vld [vmem:[#allocation2 + $0x2c0] sm:$0xff]  ;;  %v475_v33 = vld [vmem:[#allocation2 + $0x2b8] sm:$0xff] }
  0x9d   :  { %36068 = vmatprep.subr.mxu1 %v39129_v1  ;;  %36075 = vmatprep.subr.mxu0 %v39129_v1  ;;  %v477_v34 = vld [vmem:[#allocation2 + $0x2c8] sm:$0xff]  ;;  %v478_v35 = vld [vmem:[#allocation2 + $0x2d0] sm:$0xff]  ;;  %v480_v36 = vld [vmem:[#allocation2 + $0x2e0] sm:$0xff] }
  0x9e   :  { %36059 = vmatmul.mubr.msk.f32.vlgmr.msra.gmra.mxu1 %vm97_vm0, %v439_v43  ;;  %36066 = vmatmul.mubr.msk.f32.vlgmr.msra.gmra.mxu0 %vm97_vm0, %v441_v44  ;;  %v479_v37 = vld [vmem:[#allocation2 + $0x2d8] sm:$0xff]  ;;  %v481_v38 = vld [vmem:[#allocation2 + $0x2e8] sm:$0xff]  ;;  %v482_v39 = vld [vmem:[#allocation2 + $0x2f0] sm:$0xff] }
  0x9f   :  { %36069 = vmatpush3.msra.mxu1 %v39129_v1  ;;  %36076 = vmatpush3.msra.mxu0 %v39129_v1  ;;  %v484_v40 = vld [vmem:[#allocation2 + $0x300] sm:$0xff]  ;;  %v483_v41 = vld [vmem:[#allocation2 + $0x2f8] sm:$0xff]  ;;  %v485_v42 = vld [vmem:[#allocation2 + $0x308] sm:$0xff] }
  0xa0   :  { %36070 = vmatprep.subr.mxu1 %v39131_v2  ;;  %36077 = vmatprep.subr.mxu0 %v39131_v2  ;;  %v486_v43 = vld [vmem:[#allocation2 + $0x310] sm:$0xff]  ;;  %v488_v44 = vld [vmem:[#allocation2 + $0x320] sm:$0xff]  ;;  %v487_v45 = vld [vmem:[#allocation2 + $0x318] sm:$0xff] }
  0xa1   :  { %36071 = vmatpush3.msra.mxu1 %v39131_v2  ;;  %36078 = vmatpush3.msra.mxu0 %v39131_v2  ;;  %v489_v46 = vld [vmem:[#allocation2 + $0x328] sm:$0xff]  ;;  %v494_v51 = vld [vmem:[#allocation2 + $0x350] sm:$0xff]  ;;  %v496_v52 = vld [vmem:[#allocation2 + $0x360] sm:$0xff] }
  0xa2   :  { %36072 = vmatprep.mubr.msk.f32.mxu1 %vm97_vm0, %v442_v47  ;;  %36079 = vmatprep.mubr.msk.f32.mxu0 %vm97_vm0, %v444_v48  ;;  %v490_v47 = vld [vmem:[#allocation2 + $0x330] sm:$0xff]  ;;  %v492_v48 = vld [vmem:[#allocation2 + $0x340] sm:$0xff]  ;;  %v495_v53 = vld [vmem:[#allocation2 + $0x358] sm:$0xff] }
  0xa3   :  { %36082 = vmatprep.subr.mxu1 %v39129_v1  ;;  %36089 = vmatprep.subr.mxu0 %v39129_v1  ;;  %v498_v55 = vld [vmem:[#allocation2 + $0x370] sm:$0xff]  ;;  %v499_v57 = vld [vmem:[#allocation2 + $0x378] sm:$0xff]  ;;  %v501_v58 = vld [vmem:[#allocation2 + $0x388] sm:$0xff] }
  0xa4   :  { %36073 = vmatmul.mubr.msk.f32.vlgmr.msra.gmra.mxu1 %vm97_vm0, %v443_v49  ;;  %36080 = vmatmul.mubr.msk.f32.vlgmr.msra.gmra.mxu0 %vm97_vm0, %v445_v50  ;;  %v491_v49 = vld [vmem:[#allocation2 + $0x338] sm:$0xff]  ;;  %v493_v50 = vld [vmem:[#allocation2 + $0x348] sm:$0xff] }
  0xa5   :  { %36083 = vmatpush3.msra.mxu1 %v39129_v1  ;;  %36090 = vmatpush3.msra.mxu0 %v39129_v1  ;;  %v503_v61 = vld [vmem:[#allocation2 + $0x398] sm:$0xff]  ;;  %v505_v62 = vld [vmem:[#allocation2 + $0x3a8] sm:$0xff] }
  0xa6   :  { %36084 = vmatprep.subr.mxu1 %v39131_v2  ;;  %36091 = vmatprep.subr.mxu0 %v39131_v2  ;;  %v507_v3 = vld [vmem:[#allocation2 + $0x3b8] sm:$0xff]  ;;  %v509_v4 = vld [vmem:[#allocation2 + $0x3c8] sm:$0xff] }
  0xa7   :  { %36085 = vmatpush3.msra.mxu1 %v39131_v2  ;;  %36092 = vmatpush3.msra.mxu0 %v39131_v2  ;;  %v511_v7 = vld [vmem:[#allocation2 + $0x3d8] sm:$0xff]  ;;  %v513_v8 = vld [vmem:[#allocation2 + $0x3e8] sm:$0xff] }
  0xa8   :  { %36086 = vmatprep.mubr.msk.f32.mxu1 %vm97_vm0, %v446_v54  ;;  %36093 = vmatprep.mubr.msk.f32.mxu0 %vm97_vm0, %v448_v56  ;;  %v497_v54 = vld [vmem:[#allocation2 + $0x368] sm:$0xff]  ;;  %v500_v56 = vld [vmem:[#allocation2 + $0x380] sm:$0xff]  ;;  %v515_v10 = vld [vmem:[#allocation2 + $0x3f8] sm:$0xff] }
  0xa9   :  { %36096 = vmatprep.subr.mxu1 %v39129_v1  ;;  %36103 = vmatprep.subr.mxu0 %v39129_v1  ;;  %v517_v12 = vld [vmem:[#allocation2 + $0x408] sm:$0xff] }
  0xaa   :  { %36087 = vmatmul.mubr.msk.f32.vlgmr.msra.gmra.mxu1 %vm97_vm0, %v447_v59  ;;  %36094 = vmatmul.mubr.msk.f32.vlgmr.msra.gmra.mxu0 %vm97_vm0, %v449_v60  ;;  %v502_v59 = vld [vmem:[#allocation2 + $0x390] sm:$0xff]  ;;  %v504_v60 = vld [vmem:[#allocation2 + $0x3a0] sm:$0xff] }
  0xab   :  { %36097 = vmatpush3.msra.mxu1 %v39129_v1  ;;  %36104 = vmatpush3.msra.mxu0 %v39129_v1  ;;  %v39453_v1 = vld [vmem:[#allocation6 + $0x8] sm:$0xff] }
  0xac   :  { %36098 = vmatprep.subr.mxu1 %v39131_v2  ;;  %36105 = vmatprep.subr.mxu0 %v39131_v2 }
  0xad   :  { %36099 = vmatpush3.msra.mxu1 %v39131_v2  ;;  %36106 = vmatpush3.msra.mxu0 %v39131_v2  ;;  %v454_v2 = vld [vmem:[#allocation2 + $0x210] sm:$0xff] }
  0xae   :  { %36100 = vmatprep.mubr.msk.f32.mxu1 %vm97_vm0, %v450_v63  ;;  %36107 = vmatprep.mubr.msk.f32.mxu0 %vm97_vm0, %v452_v0  ;;  %v506_v63 = vld [vmem:[#allocation2 + $0x3b0] sm:$0xff]  ;;  %v508_v0 = vld [vmem:[#allocation2 + $0x3c0] sm:$0xff] }
  0xaf   :  { %36110 = vmatprep.subr.mxu1 %v39453_v1  ;;  %36117 = vmatprep.subr.mxu0 %v39453_v1 }
  0xb0   :  { %36101 = vmatmul.mubr.msk.f32.vlgmr.msra.gmra.mxu1 %vm97_vm0, %v451_v5  ;;  %36108 = vmatmul.mubr.msk.f32.vlgmr.msra.gmra.mxu0 %vm97_vm0, %v453_v6  ;;  %v510_v5 = vld [vmem:[#allocation2 + $0x3d0] sm:$0xff]  ;;  %v512_v6 = vld [vmem:[#allocation2 + $0x3e0] sm:$0xff] }
  0xb1   :  { %36111 = vmatpush3.msra.mxu1 %v39453_v1  ;;  %36118 = vmatpush3.msra.mxu0 %v39453_v1 }
  0xb2   :  { %36112 = vmatprep.subr.mxu1 %v39463_v11  ;;  %36119 = vmatprep.subr.mxu0 %v39463_v11 }
  0xb3   :  { %36113 = vmatpush3.msra.mxu1 %v39463_v11  ;;  %36120 = vmatpush3.msra.mxu0 %v39463_v11 }
  0xb4   :  { %36114 = vmatprep.mubr.msk.f32.mxu1 %vm97_vm0, %v454_v2  ;;  %36121 = vmatprep.mubr.msk.f32.mxu0 %vm97_vm0, %v456_v9  ;;  %v514_v2 = vld [vmem:[#allocation2 + $0x3f0] sm:$0xff]  ;;  %v516_v9 = vld [vmem:[#allocation2 + $0x400] sm:$0xff] }
  0xb5   :  { %36124 = vmatprep.subr.mxu1 %v39453_v1  ;;  %36131 = vmatprep.subr.mxu0 %v39453_v1 }
  0xb6   :  { %36115 = vmatmul.mubr.msk.f32.vlgmr.msra.gmra.mxu1 %vm97_vm0, %v455_v13  ;;  %36122 = vmatmul.mubr.msk.f32.vlgmr.msra.gmra.mxu0 %vm97_vm0, %v457_v14  ;;  %v518_v14 = vld [vmem:[#allocation2 + $0x410] sm:$0xff] }
  0xb7   :  { %36125 = vmatpush3.msra.mxu1 %v39453_v1  ;;  %36132 = vmatpush3.msra.mxu0 %v39453_v1 }
  0xb8   :  { %36126 = vmatprep.subr.mxu1 %v39463_v11  ;;  %36133 = vmatprep.subr.mxu0 %v39463_v11 }
  0xb9   :  { %36127 = vmatpush3.msra.mxu1 %v39463_v11  ;;  %36134 = vmatpush3.msra.mxu0 %v39463_v11 }
  0xba   :  { %36128 = vmatprep.mubr.msk.f32.mxu1 %vm97_vm0, %v458_v15  ;;  %36135 = vmatprep.mubr.msk.f32.mxu0 %vm97_vm0, %v460_v16  ;;  %v520_v15 = vld [vmem:[#allocation2 + $0x420] sm:$0xff] }
  0xbb   :  { %36138 = vmatprep.subr.mxu1 %v39453_v1  ;;  %36145 = vmatprep.subr.mxu0 %v39453_v1 }
  0xbc   :  { %36129 = vmatmul.mubr.msk.f32.vlgmr.msra.gmra.mxu1 %vm97_vm0, %v459_v17  ;;  %36136 = vmatmul.mubr.msk.f32.vlgmr.msra.gmra.mxu0 %vm97_vm0, %v461_v18  ;;  %v519_v17 = vld [vmem:[#allocation2 + $0x418] sm:$0xff]  ;;  %v521_v18 = vld [vmem:[#allocation2 + $0x428] sm:$0xff] }
  0xbd   :  { %36139 = vmatpush3.msra.mxu1 %v39453_v1  ;;  %36146 = vmatpush3.msra.mxu0 %v39453_v1 }
  0xbe   :  { %36140 = vmatprep.subr.mxu1 %v39463_v11  ;;  %36147 = vmatprep.subr.mxu0 %v39463_v11 }
  0xbf   :  { %36141 = vmatpush3.msra.mxu1 %v39463_v11  ;;  %36148 = vmatpush3.msra.mxu0 %v39463_v11 }
  0xc0   :  { %36142 = vmatprep.mubr.msk.f32.mxu1 %vm97_vm0, %v462_v19  ;;  %36149 = vmatprep.mubr.msk.f32.mxu0 %vm97_vm0, %v464_v20 }
  0xc1   :  { %36152 = vmatprep.subr.mxu1 %v39453_v1  ;;  %36159 = vmatprep.subr.mxu0 %v39453_v1 }
  0xc2   :  { %36143 = vmatmul.mubr.msk.f32.vlgmr.msra.gmra.mxu1 %vm97_vm0, %v463_v21  ;;  %36150 = vmatmul.mubr.msk.f32.vlgmr.msra.gmra.mxu0 %vm97_vm0, %v465_v22  ;;  %v522_v21 = vld [vmem:[#allocation2 + $0x430] sm:$0xff]  ;;  %v524_v22 = vld [vmem:[#allocation2 + $0x440] sm:$0xff] }
  0xc3   :  { %36153 = vmatpush3.msra.mxu1 %v39453_v1  ;;  %36160 = vmatpush3.msra.mxu0 %v39453_v1 }
  0xc4   :  { %36154 = vmatprep.subr.mxu1 %v39463_v11  ;;  %36161 = vmatprep.subr.mxu0 %v39463_v11 }
  0xc5   :  { %36155 = vmatpush3.msra.mxu1 %v39463_v11  ;;  %36162 = vmatpush3.msra.mxu0 %v39463_v11 }
  0xc6   :  { %36156 = vmatprep.mubr.msk.f32.mxu1 %vm97_vm0, %v466_v23  ;;  %36163 = vmatprep.mubr.msk.f32.mxu0 %vm97_vm0, %v468_v24 }
  0xc7   :  { %36166 = vmatprep.subr.mxu1 %v39453_v1  ;;  %36173 = vmatprep.subr.mxu0 %v39453_v1 }
  0xc8   :  { %36157 = vmatmul.mubr.msk.f32.vlgmr.msra.gmra.mxu1 %vm97_vm0, %v467_v25  ;;  %36164 = vmatmul.mubr.msk.f32.vlgmr.msra.gmra.mxu0 %vm97_vm0, %v469_v26  ;;  %v523_v25 = vld [vmem:[#allocation2 + $0x438] sm:$0xff]  ;;  %v525_v26 = vld [vmem:[#allocation2 + $0x448] sm:$0xff] }
  0xc9   :  { %36167 = vmatpush3.msra.mxu1 %v39453_v1  ;;  %36174 = vmatpush3.msra.mxu0 %v39453_v1 }
  0xca   :  { %36168 = vmatprep.subr.mxu1 %v39463_v11  ;;  %36175 = vmatprep.subr.mxu0 %v39463_v11 }
  0xcb   :  { %36169 = vmatpush3.msra.mxu1 %v39463_v11  ;;  %36176 = vmatpush3.msra.mxu0 %v39463_v11 }
  0xcc   :  { %36170 = vmatprep.mubr.msk.f32.mxu1 %vm97_vm0, %v470_v27  ;;  %36177 = vmatprep.mubr.msk.f32.mxu0 %vm97_vm0, %v472_v28 }
  0xcd   :  { %36180 = vmatprep.subr.mxu1 %v39453_v1  ;;  %36187 = vmatprep.subr.mxu0 %v39453_v1 }
  0xce   :  { %36171 = vmatmul.mubr.msk.f32.vlgmr.msra.gmra.mxu1 %vm97_vm0, %v471_v29  ;;  %36178 = vmatmul.mubr.msk.f32.vlgmr.msra.gmra.mxu0 %vm97_vm0, %v473_v30  ;;  %v526_v29 = vld [vmem:[#allocation2 + $0x450] sm:$0xff]  ;;  %v528_v30 = vld [vmem:[#allocation2 + $0x460] sm:$0xff] }
  0xcf   :  { %36181 = vmatpush3.msra.mxu1 %v39453_v1  ;;  %36188 = vmatpush3.msra.mxu0 %v39453_v1 }
  0xd0   :  { %36182 = vmatprep.subr.mxu1 %v39463_v11  ;;  %36189 = vmatprep.subr.mxu0 %v39463_v11 }
  0xd1   :  { %36183 = vmatpush3.msra.mxu1 %v39463_v11  ;;  %36190 = vmatpush3.msra.mxu0 %v39463_v11 }
  0xd2   :  { %36184 = vmatprep.mubr.msk.f32.mxu1 %vm97_vm0, %v474_v31  ;;  %36191 = vmatprep.mubr.msk.f32.mxu0 %vm97_vm0, %v476_v32 }
  0xd3   :  { %36194 = vmatprep.subr.mxu1 %v39453_v1  ;;  %36201 = vmatprep.subr.mxu0 %v39453_v1 }
  0xd4   :  { %36185 = vmatmul.mubr.msk.f32.vlgmr.msra.gmra.mxu1 %vm97_vm0, %v475_v33  ;;  %36192 = vmatmul.mubr.msk.f32.vlgmr.msra.gmra.mxu0 %vm97_vm0, %v477_v34  ;;  %v527_v33 = vld [vmem:[#allocation2 + $0x458] sm:$0xff]  ;;  %v529_v34 = vld [vmem:[#allocation2 + $0x468] sm:$0xff] }
  0xd5   :  { %36195 = vmatpush3.msra.mxu1 %v39453_v1  ;;  %36202 = vmatpush3.msra.mxu0 %v39453_v1 }
  0xd6   :  { %36196 = vmatprep.subr.mxu1 %v39463_v11  ;;  %36203 = vmatprep.subr.mxu0 %v39463_v11 }
  0xd7   :  { %36197 = vmatpush3.msra.mxu1 %v39463_v11  ;;  %36204 = vmatpush3.msra.mxu0 %v39463_v11 }
  0xd8   :  { %36198 = vmatprep.mubr.msk.f32.mxu1 %vm97_vm0, %v478_v35  ;;  %36205 = vmatprep.mubr.msk.f32.mxu0 %vm97_vm0, %v480_v36 }
  0xd9   :  { %36208 = vmatprep.subr.mxu1 %v39453_v1  ;;  %36215 = vmatprep.subr.mxu0 %v39453_v1 }
  0xda   :  { %36199 = vmatmul.mubr.msk.f32.vlgmr.msra.gmra.mxu1 %vm97_vm0, %v479_v37  ;;  %36206 = vmatmul.mubr.msk.f32.vlgmr.msra.gmra.mxu0 %vm97_vm0, %v481_v38  ;;  %v530_v37 = vld [vmem:[#allocation2 + $0x470] sm:$0xff]  ;;  %v532_v38 = vld [vmem:[#allocation2 + $0x480] sm:$0xff] }
  0xdb   :  { %36209 = vmatpush3.msra.mxu1 %v39453_v1  ;;  %36216 = vmatpush3.msra.mxu0 %v39453_v1 }
  0xdc   :  { %36210 = vmatprep.subr.mxu1 %v39463_v11  ;;  %36217 = vmatprep.subr.mxu0 %v39463_v11 }
  0xdd   :  { %36211 = vmatpush3.msra.mxu1 %v39463_v11  ;;  %36218 = vmatpush3.msra.mxu0 %v39463_v11 }
  0xde   :  { %36212 = vmatprep.mubr.msk.f32.mxu1 %vm97_vm0, %v482_v39  ;;  %36219 = vmatprep.mubr.msk.f32.mxu0 %vm97_vm0, %v484_v40 }
  0xdf   :  { %36222 = vmatprep.subr.mxu1 %v39453_v1  ;;  %36229 = vmatprep.subr.mxu0 %v39453_v1 }
  0xe0   :  { %36213 = vmatmul.mubr.msk.f32.vlgmr.msra.gmra.mxu1 %vm97_vm0, %v483_v41  ;;  %36220 = vmatmul.mubr.msk.f32.vlgmr.msra.gmra.mxu0 %vm97_vm0, %v485_v42  ;;  %v531_v41 = vld [vmem:[#allocation2 + $0x478] sm:$0xff]  ;;  %v533_v42 = vld [vmem:[#allocation2 + $0x488] sm:$0xff] }
  0xe1   :  { %36223 = vmatpush3.msra.mxu1 %v39453_v1  ;;  %36230 = vmatpush3.msra.mxu0 %v39453_v1 }
  0xe2   :  { %36224 = vmatprep.subr.mxu1 %v39463_v11  ;;  %36231 = vmatprep.subr.mxu0 %v39463_v11 }
  0xe3   :  { %36225 = vmatpush3.msra.mxu1 %v39463_v11  ;;  %36232 = vmatpush3.msra.mxu0 %v39463_v11 }
  0xe4   :  { %36226 = vmatprep.mubr.msk.f32.mxu1 %vm97_vm0, %v486_v43  ;;  %36233 = vmatprep.mubr.msk.f32.mxu0 %vm97_vm0, %v488_v44 }
  0xe5   :  { %36236 = vmatprep.subr.mxu1 %v39453_v1  ;;  %36243 = vmatprep.subr.mxu0 %v39453_v1 }
  0xe6   :  { %36227 = vmatmul.mubr.msk.f32.vlgmr.msra.gmra.mxu1 %vm97_vm0, %v487_v45  ;;  %36234 = vmatmul.mubr.msk.f32.vlgmr.msra.gmra.mxu0 %vm97_vm0, %v489_v46  ;;  %v534_v45 = vld [vmem:[#allocation2 + $0x490] sm:$0xff]  ;;  %v536_v46 = vld [vmem:[#allocation2 + $0x4a0] sm:$0xff] }
  0xe7   :  { %36237 = vmatpush3.msra.mxu1 %v39453_v1  ;;  %36244 = vmatpush3.msra.mxu0 %v39453_v1 }
  0xe8   :  { %36238 = vmatprep.subr.mxu1 %v39463_v11  ;;  %36245 = vmatprep.subr.mxu0 %v39463_v11 }
  0xe9   :  { %36239 = vmatpush3.msra.mxu1 %v39463_v11  ;;  %36246 = vmatpush3.msra.mxu0 %v39463_v11 }
  0xea   :  { %36240 = vmatprep.mubr.msk.f32.mxu1 %vm97_vm0, %v490_v47  ;;  %36247 = vmatprep.mubr.msk.f32.mxu0 %vm97_vm0, %v492_v48 }
  0xeb   :  { %36250 = vmatprep.subr.mxu1 %v39453_v1  ;;  %36257 = vmatprep.subr.mxu0 %v39453_v1 }
  0xec   :  { %36241 = vmatmul.mubr.msk.f32.vlgmr.msra.gmra.mxu1 %vm97_vm0, %v491_v49  ;;  %36248 = vmatmul.mubr.msk.f32.vlgmr.msra.gmra.mxu0 %vm97_vm0, %v493_v50  ;;  %v535_v49 = vld [vmem:[#allocation2 + $0x498] sm:$0xff]  ;;  %v537_v50 = vld [vmem:[#allocation2 + $0x4a8] sm:$0xff] }
  0xed   :  { %36251 = vmatpush3.msra.mxu1 %v39453_v1  ;;  %36258 = vmatpush3.msra.mxu0 %v39453_v1 }
  0xee   :  { %36252 = vmatprep.subr.mxu1 %v39463_v11  ;;  %36259 = vmatprep.subr.mxu0 %v39463_v11 }
  0xef   :  { %36253 = vmatpush3.msra.mxu1 %v39463_v11  ;;  %36260 = vmatpush3.msra.mxu0 %v39463_v11 }
  0xf0   :  { %36254 = vmatprep.mubr.msk.f32.mxu1 %vm97_vm0, %v494_v51  ;;  %36261 = vmatprep.mubr.msk.f32.mxu0 %vm97_vm0, %v496_v52 }
  0xf1   :  { %36264 = vmatprep.subr.mxu1 %v39453_v1  ;;  %36271 = vmatprep.subr.mxu0 %v39453_v1 }
  0xf2   :  { %36255 = vmatmul.mubr.msk.f32.vlgmr.msra.gmra.mxu1 %vm97_vm0, %v495_v53  ;;  %36262 = vmatmul.mubr.msk.f32.vlgmr.msra.gmra.mxu0 %vm97_vm0, %v497_v54  ;;  %v538_v53 = vld [vmem:[#allocation2 + $0x4b0] sm:$0xff]  ;;  %v540_v54 = vld [vmem:[#allocation2 + $0x4c0] sm:$0xff] }
  0xf3   :  { %36265 = vmatpush3.msra.mxu1 %v39453_v1  ;;  %36272 = vmatpush3.msra.mxu0 %v39453_v1 }
  0xf4   :  { %36266 = vmatprep.subr.mxu1 %v39463_v11  ;;  %36273 = vmatprep.subr.mxu0 %v39463_v11 }
  0xf5   :  { %36267 = vmatpush3.msra.mxu1 %v39463_v11  ;;  %36274 = vmatpush3.msra.mxu0 %v39463_v11 }
  0xf6   :  { %36268 = vmatprep.mubr.msk.f32.mxu1 %vm97_vm0, %v498_v55  ;;  %36275 = vmatprep.mubr.msk.f32.mxu0 %vm97_vm0, %v500_v56 }
  0xf7   :  { %36278 = vmatprep.subr.mxu1 %v39453_v1  ;;  %36285 = vmatprep.subr.mxu0 %v39453_v1 }
  0xf8   :  { %36269 = vmatmul.mubr.msk.f32.vlgmr.msra.gmra.mxu1 %vm97_vm0, %v499_v57  ;;  %36276 = vmatmul.mubr.msk.f32.vlgmr.msra.gmra.mxu0 %vm97_vm0, %v501_v58  ;;  %v539_v57 = vld [vmem:[#allocation2 + $0x4b8] sm:$0xff]  ;;  %v541_v58 = vld [vmem:[#allocation2 + $0x4c8] sm:$0xff] }
  0xf9   :  { %36279 = vmatpush3.msra.mxu1 %v39453_v1  ;;  %36286 = vmatpush3.msra.mxu0 %v39453_v1 }
  0xfa   :  { %36280 = vmatprep.subr.mxu1 %v39463_v11  ;;  %36287 = vmatprep.subr.mxu0 %v39463_v11 }
  0xfb   :  { %36281 = vmatpush3.msra.mxu1 %v39463_v11  ;;  %36288 = vmatpush3.msra.mxu0 %v39463_v11 }
  0xfc   :  { %36282 = vmatprep.mubr.msk.f32.mxu1 %vm97_vm0, %v502_v59  ;;  %36289 = vmatprep.mubr.msk.f32.mxu0 %vm97_vm0, %v504_v60 }
  0xfd   :  { %36292 = vmatprep.subr.mxu1 %v39453_v1  ;;  %36299 = vmatprep.subr.mxu0 %v39453_v1 }
  0xfe   :  { %36283 = vmatmul.mubr.msk.f32.vlgmr.msra.gmra.mxu1 %vm97_vm0, %v503_v61  ;;  %36290 = vmatmul.mubr.msk.f32.vlgmr.msra.gmra.mxu0 %vm97_vm0, %v505_v62  ;;  %v542_v61 = vld [vmem:[#allocation2 + $0x4d0] sm:$0xff]  ;;  %v544_v62 = vld [vmem:[#allocation2 + $0x4e0] sm:$0xff] }
  0xff   :  { %36293 = vmatpush3.msra.mxu1 %v39453_v1  ;;  %36300 = vmatpush3.msra.mxu0 %v39453_v1 }
 0x100   :  { %36294 = vmatprep.subr.mxu1 %v39463_v11  ;;  %36301 = vmatprep.subr.mxu0 %v39463_v11 }
 0x101   :  { %36295 = vmatpush3.msra.mxu1 %v39463_v11  ;;  %36302 = vmatpush3.msra.mxu0 %v39463_v11 }
 0x102   :  { %36296 = vmatprep.mubr.msk.f32.mxu1 %vm97_vm0, %v506_v63  ;;  %36303 = vmatprep.mubr.msk.f32.mxu0 %vm97_vm0, %v508_v0  ;;  %v39781_v63 = vld [vmem:[#allocation8 + $0x8] sm:$0xff] }
 0x103   :  { %36306 = vmatprep.subr.mxu1 %v39453_v1  ;;  %36313 = vmatprep.subr.mxu0 %v39453_v1 }
 0x104   :  { %36297 = vmatmul.mubr.msk.f32.vlgmr.msra.gmra.mxu1 %vm97_vm0, %v507_v3  ;;  %36304 = vmatmul.mubr.msk.f32.vlgmr.msra.gmra.mxu0 %vm97_vm0, %v509_v4  ;;  %v543_v4 = vld [vmem:[#allocation2 + $0x4d8] sm:$0xff] }
 0x105   :  { %36307 = vmatpush3.msra.mxu1 %v39453_v1  ;;  %36314 = vmatpush3.msra.mxu0 %v39453_v1 }
 0x106   :  { %36308 = vmatprep.subr.mxu1 %v39463_v11  ;;  %36315 = vmatprep.subr.mxu0 %v39463_v11  ;;  %v39657_v13 = vpop.f32.mrf.mxu0 }
 0x107   :  { %36309 = vmatpush3.msra.mxu1 %v39463_v11  ;;  %36316 = vmatpush3.msra.mxu0 %v39463_v11 }
 0x108   :  { %36310 = vmatprep.mubr.msk.f32.mxu1 %vm97_vm0, %v510_v5  ;;  %36317 = vmatprep.mubr.msk.f32.mxu0 %vm97_vm0, %v512_v6  ;;  %v39663_v16 = vpop.f32.mrf.mxu0  ;;  %v545_v5 = vld [vmem:[#allocation2 + $0x4e8] sm:$0xff]  ;;  %v39793_v6 = vld [vmem:[#allocation8] sm:$0xff] }
 0x109   :  { %36320 = vmatprep.subr.mxu1 %v39453_v1  ;;  %36327 = vmatprep.subr.mxu0 %v39453_v1 }
 0x10a   :  { %36311 = vmatmul.mubr.msk.f32.vlgmr.msra.gmra.mxu1 %vm97_vm0, %v511_v7  ;;  %36318 = vmatmul.mubr.msk.f32.vlgmr.msra.gmra.mxu0 %vm97_vm0, %v513_v8 }
 0x10b   :  { %36321 = vmatpush3.msra.mxu1 %v39453_v1  ;;  %36328 = vmatpush3.msra.mxu0 %v39453_v1 }
 0x10c   :  { %36322 = vmatprep.subr.mxu1 %v39463_v11  ;;  %36329 = vmatprep.subr.mxu0 %v39463_v11 }
 0x10d   :  { %36323 = vmatpush3.msra.mxu1 %v39463_v11  ;;  %36330 = vmatpush3.msra.mxu0 %v39463_v11 }
 0x10e   :  { %36324 = vmatprep.mubr.msk.f32.mxu1 %vm97_vm0, %v514_v2  ;;  %36331 = vmatprep.mubr.msk.f32.mxu0 %vm97_vm0, %v516_v9  ;;  %v546_v2 = vld [vmem:[#allocation2 + $0x4f0] sm:$0xff] }
 0x10f   :  { %36334 = vmatprep.subr.mxu1 %v39453_v1  ;;  %36341 = vmatprep.subr.mxu0 %v39453_v1 }
 0x110   :  { %36325 = vmatmul.mubr.msk.f32.vlgmr.msra.gmra.mxu1 %vm97_vm0, %v515_v10  ;;  %36332 = vmatmul.mubr.msk.f32.vlgmr.msra.gmra.mxu0 %vm97_vm0, %v517_v12  ;;  %v547_v12 = vld [vmem:[#allocation2 + $0x4f8] sm:$0xff] }
 0x111   :  { %36335 = vmatpush3.msra.mxu1 %v39453_v1  ;;  %36342 = vmatpush3.msra.mxu0 %v39453_v1 }
 0x112   :  { %36336 = vmatprep.subr.mxu1 %v39463_v11  ;;  %36343 = vmatprep.subr.mxu0 %v39463_v11 }
 0x113   :  { %36337 = vmatpush3.msra.mxu1 %v39463_v11  ;;  %36344 = vmatpush3.msra.mxu0 %v39463_v11 }
 0x114   :  { %36338 = vmatprep.mubr.msk.f32.mxu1 %vm97_vm0, %v518_v14  ;;  %36345 = vmatprep.mubr.msk.f32.mxu0 %vm97_vm0, %v520_v15  ;;  %v38738_v14 = vld [vmem:[#allocation2] sm:$0xff] }
 0x115   :  { %36348 = vmatprep.subr.mxu1 %v39453_v1  ;;  %36355 = vmatprep.subr.mxu0 %v39453_v1 }
 0x116   :  { %36339 = vmatmul.mubr.msk.f32.vlgmr.msra.gmra.mxu1 %vm97_vm0, %v519_v17  ;;  %36346 = vmatmul.mubr.msk.f32.vlgmr.msra.gmra.mxu0 %vm97_vm0, %v521_v18  ;;  %v39673_v19 = vpop.f32.mrf.mxu1  ;;  %v39675_v20 = vpop.f32.mrf.mxu0 }
 0x117   :  { %36349 = vmatpush3.msra.mxu1 %v39453_v1  ;;  %36356 = vmatpush3.msra.mxu0 %v39453_v1 }
 0x118   :  { %36350 = vmatprep.subr.mxu1 %v39463_v11  ;;  %36357 = vmatprep.subr.mxu0 %v39463_v11  ;;  %v39681_v23 = vpop.f32.mrf.mxu1  ;;  %v39683_v24 = vpop.f32.mrf.mxu0 }
 0x119   :  { %36351 = vmatpush3.msra.mxu1 %v39463_v11  ;;  %36358 = vmatpush3.msra.mxu0 %v39463_v11 }
 0x11a   :  { %36352 = vmatprep.mubr.msk.f32.mxu1 %vm97_vm0, %v522_v21  ;;  %36359 = vmatprep.mubr.msk.f32.mxu0 %vm97_vm0, %v524_v22  ;;  %v38740_v21 = vld [vmem:[#allocation2 + $0x10] sm:$0xff]  ;;  %v38741_v22 = vld [vmem:[#allocation2 + $0x20] sm:$0xff] }
 0x11b   :  { %36362 = vmatprep.subr.mxu1 %v39453_v1  ;;  %36369 = vmatprep.subr.mxu0 %v39453_v1 }
 0x11c   :  { %36353 = vmatmul.mubr.msk.f32.vlgmr.msra.gmra.mxu1 %vm97_vm0, %v523_v25  ;;  %36360 = vmatmul.mubr.msk.f32.vlgmr.msra.gmra.mxu0 %vm97_vm0, %v525_v26  ;;  %v39693_v27 = vpop.f32.mrf.mxu1  ;;  %v39695_v28 = vpop.f32.mrf.mxu0  ;;  %v38742_v25 = vld [vmem:[#allocation2 + $0x18] sm:$0xff]  ;;  %v38743_v26 = vld [vmem:[#allocation2 + $0x28] sm:$0xff] }
 0x11d   :  { %36363 = vmatpush3.msra.mxu1 %v39453_v1  ;;  %36370 = vmatpush3.msra.mxu0 %v39453_v1 }
 0x11e   :  { %36364 = vmatprep.subr.mxu1 %v39463_v11  ;;  %36371 = vmatprep.subr.mxu0 %v39463_v11  ;;  %v39701_v31 = vpop.f32.mrf.mxu1  ;;  %v39703_v32 = vpop.f32.mrf.mxu0 }
 0x11f   :  { %36365 = vmatpush3.msra.mxu1 %v39463_v11  ;;  %36372 = vmatpush3.msra.mxu0 %v39463_v11 }
 0x120   :  { %36366 = vmatprep.mubr.msk.f32.mxu1 %vm97_vm0, %v526_v29  ;;  %36373 = vmatprep.mubr.msk.f32.mxu0 %vm97_vm0, %v528_v30 }
 0x121   :  { %36376 = vmatprep.subr.mxu1 %v39453_v1  ;;  %36383 = vmatprep.subr.mxu0 %v39453_v1 }
 0x122   :  { %36367 = vmatmul.mubr.msk.f32.vlgmr.msra.gmra.mxu1 %vm97_vm0, %v527_v33  ;;  %36374 = vmatmul.mubr.msk.f32.vlgmr.msra.gmra.mxu0 %vm97_vm0, %v529_v34  ;;  %v39713_v35 = vpop.f32.mrf.mxu1  ;;  %v39715_v36 = vpop.f32.mrf.mxu0 }
 0x123   :  { %36377 = vmatpush3.msra.mxu1 %v39453_v1  ;;  %36384 = vmatpush3.msra.mxu0 %v39453_v1 }
 0x124   :  { %36378 = vmatprep.subr.mxu1 %v39463_v11  ;;  %36385 = vmatprep.subr.mxu0 %v39463_v11  ;;  %v39721_v39 = vpop.f32.mrf.mxu1  ;;  %v39723_v40 = vpop.f32.mrf.mxu0 }
 0x125   :  { %36379 = vmatpush3.msra.mxu1 %v39463_v11  ;;  %36386 = vmatpush3.msra.mxu0 %v39463_v11 }
 0x126   :  { %36380 = vmatprep.mubr.msk.f32.mxu1 %vm97_vm0, %v530_v37  ;;  %36387 = vmatprep.mubr.msk.f32.mxu0 %vm97_vm0, %v532_v38  ;;  %v38744_v37 = vld [vmem:[#allocation2 + $0x30] sm:$0xff]  ;;  %v38745_v38 = vld [vmem:[#allocation2 + $0x40] sm:$0xff] }
 0x127   :  { %36390 = vmatprep.subr.mxu1 %v39453_v1  ;;  %36397 = vmatprep.subr.mxu0 %v39453_v1 }
 0x128   :  { %36381 = vmatmul.mubr.msk.f32.vlgmr.msra.gmra.mxu1 %vm97_vm0, %v531_v41  ;;  %36388 = vmatmul.mubr.msk.f32.vlgmr.msra.gmra.mxu0 %vm97_vm0, %v533_v42  ;;  %v39733_v43 = vpop.f32.mrf.mxu1  ;;  %v39735_v44 = vpop.f32.mrf.mxu0  ;;  %v38746_v41 = vld [vmem:[#allocation2 + $0x38] sm:$0xff]  ;;  %v38747_v42 = vld [vmem:[#allocation2 + $0x48] sm:$0xff] }
 0x129   :  { %36391 = vmatpush3.msra.mxu1 %v39453_v1  ;;  %36398 = vmatpush3.msra.mxu0 %v39453_v1 }
 0x12a   :  { %36392 = vmatprep.subr.mxu1 %v39463_v11  ;;  %36399 = vmatprep.subr.mxu0 %v39463_v11  ;;  %v39741_v47 = vpop.f32.mrf.mxu1  ;;  %v39743_v48 = vpop.f32.mrf.mxu0 }
 0x12b   :  { %36393 = vmatpush3.msra.mxu1 %v39463_v11  ;;  %36400 = vmatpush3.msra.mxu0 %v39463_v11 }
 0x12c   :  { %36394 = vmatprep.mubr.msk.f32.mxu1 %vm97_vm0, %v534_v45  ;;  %36401 = vmatprep.mubr.msk.f32.mxu0 %vm97_vm0, %v536_v46 }
 0x12d   :  { %36404 = vmatprep.subr.mxu1 %v39453_v1  ;;  %36411 = vmatprep.subr.mxu0 %v39453_v1 }
 0x12e   :  { %36395 = vmatmul.mubr.msk.f32.vlgmr.msra.gmra.mxu1 %vm97_vm0, %v535_v49  ;;  %36402 = vmatmul.mubr.msk.f32.vlgmr.msra.gmra.mxu0 %vm97_vm0, %v537_v50  ;;  %v39753_v51 = vpop.f32.mrf.mxu1  ;;  %v39755_v52 = vpop.f32.mrf.mxu0 }
 0x12f   :  { %36405 = vmatpush3.msra.mxu1 %v39453_v1  ;;  %36412 = vmatpush3.msra.mxu0 %v39453_v1 }
 0x130   :  { %36406 = vmatprep.subr.mxu1 %v39463_v11  ;;  %36413 = vmatprep.subr.mxu0 %v39463_v11  ;;  %v39761_v55 = vpop.f32.mrf.mxu1  ;;  %v39763_v56 = vpop.f32.mrf.mxu0 }
 0x131   :  { %36407 = vmatpush3.msra.mxu1 %v39463_v11  ;;  %36414 = vmatpush3.msra.mxu0 %v39463_v11 }
 0x132   :  { %36408 = vmatprep.mubr.msk.f32.mxu1 %vm97_vm0, %v538_v53  ;;  %36415 = vmatprep.mubr.msk.f32.mxu0 %vm97_vm0, %v540_v54  ;;  %v38748_v53 = vld [vmem:[#allocation2 + $0x50] sm:$0xff]  ;;  %v38749_v54 = vld [vmem:[#allocation2 + $0x60] sm:$0xff] }
 0x133   :  { %36418 = vmatprep.subr.mxu1 %v39453_v1  ;;  %36425 = vmatprep.subr.mxu0 %v39453_v1 }
 0x134   :  { %36409 = vmatmul.mubr.msk.f32.vlgmr.msra.gmra.mxu1 %vm97_vm0, %v539_v57  ;;  %36416 = vmatmul.mubr.msk.f32.vlgmr.msra.gmra.mxu0 %vm97_vm0, %v541_v58  ;;  %v39773_v59 = vpop.f32.mrf.mxu1  ;;  %v39775_v60 = vpop.f32.mrf.mxu0  ;;  %v38750_v57 = vld [vmem:[#allocation2 + $0x58] sm:$0xff]  ;;  %v38751_v58 = vld [vmem:[#allocation2 + $0x68] sm:$0xff] }
 0x135   :  { %36419 = vmatpush3.msra.mxu1 %v39453_v1  ;;  %36426 = vmatpush3.msra.mxu0 %v39453_v1 }
 0x136   :  { %36420 = vmatprep.subr.mxu1 %v39463_v11  ;;  %36427 = vmatprep.subr.mxu0 %v39463_v11  ;;  %v39783_v0 = vpop.f32.mrf.mxu1  ;;  %v39785_v3 = vpop.f32.mrf.mxu0 }
 0x137   :  { %36421 = vmatpush3.msra.mxu1 %v39463_v11  ;;  %36428 = vmatpush3.msra.mxu0 %v39463_v11 }
 0x138   :  { %36422 = vmatprep.mubr.msk.f32.mxu1 %vm97_vm0, %v542_v61  ;;  %36429 = vmatprep.mubr.msk.f32.mxu0 %vm97_vm0, %v544_v62 }
 0x139   :  { %36432 = vmatprep.subr.mxu1 %v39453_v1  ;;  %36439 = vmatprep.subr.mxu0 %v39781_v63 }
 0x13a   :  { %36423 = vmatmul.mubr.msk.f32.vlgmr.msra.gmra.mxu1 %vm97_vm0, %v543_v4  ;;  %36430 = vmatmul.mubr.msk.f32.vlgmr.msra.gmra.mxu0 %vm97_vm0, %v545_v5  ;;  %v39797_v7 = vpop.f32.mrf.mxu1  ;;  %v39799_v8 = vpop.f32.mrf.mxu0 }
 0x13b   :  { %36433 = vmatpush3.msra.mxu1 %v39453_v1  ;;  %36440 = vmatpush3.msra.mxu0 %v39781_v63  ;;  %v38739_v1 = vld [vmem:[#allocation2 + $0x8] sm:$0xff] }
 0x13c   :  { %36434 = vmatprep.subr.mxu1 %v39463_v11  ;;  %36441 = vmatprep.subr.mxu0 %v39793_v6  ;;  %v39805_v9 = vpop.f32.mrf.mxu1  ;;  %v39807_v10 = vpop.f32.mrf.mxu0 }
 0x13d   :  { %36435 = vmatpush3.msra.mxu1 %v39463_v11  ;;  %36442 = vmatpush3.msra.mxu0 %v39793_v6 }
 0x13e   :  { %36436 = vmatprep.mubr.msk.f32.mxu1 %vm97_vm0, %v546_v2  ;;  %36443 = vmatprep.mubr.msk.f32.mxu0 %vm97_vm0, %v38738_v14  ;;  %v38752_v2 = vld [vmem:[#allocation2 + $0x70] sm:$0xff]  ;;  %v38754_v14 = vld [vmem:[#allocation2 + $0x78] sm:$0xff] }
 0x13f   :  { %36446 = vmatprep.subr.mxu1 %v39781_v63  ;;  %36453 = vmatprep.subr.mxu0 %v39781_v63 }
 0x140   :  { %36437 = vmatmul.mubr.msk.f32.vlgmr.msra.gmra.mxu1 %vm97_vm0, %v547_v12  ;;  %36444 = vmatmul.mubr.msk.f32.vlgmr.msra.gmra.mxu0 %vm97_vm0, %v38739_v1  ;;  %v39817_v15 = vpop.f32.mrf.mxu1  ;;  %v39819_v11 = vpop.f32.mrf.mxu0  ;;  %v38753_v12 = vld [vmem:[#allocation2 + $0x80] sm:$0xff]  ;;  %v38755_v1 = vld [vmem:[#allocation2 + $0x88] sm:$0xff] }
 0x141   :  { %36447 = vmatpush3.msra.mxu1 %v39781_v63  ;;  %36454 = vmatpush3.msra.mxu0 %v39781_v63 }
 0x142   :  { %36448 = vmatprep.subr.mxu1 %v39793_v6  ;;  %36455 = vmatprep.subr.mxu0 %v39793_v6  ;;  %v39825_v17 = vpop.f32.mrf.mxu1  ;;  %v39827_v18 = vpop.f32.mrf.mxu0 }
 0x143   :  { %36449 = vmatpush3.msra.mxu1 %v39793_v6  ;;  %36456 = vmatpush3.msra.mxu0 %v39793_v6 }
 0x144   :  { %36450 = vmatprep.mubr.msk.f32.mxu1 %vm97_vm0, %v38740_v21  ;;  %36457 = vmatprep.mubr.msk.f32.mxu0 %vm97_vm0, %v38741_v22 }
 0x145   :  { %36460 = vmatprep.subr.mxu1 %v39781_v63  ;;  %36467 = vmatprep.subr.mxu0 %v39781_v63 }
 0x146   :  { %36451 = vmatmul.mubr.msk.f32.vlgmr.msra.gmra.mxu1 %vm97_vm0, %v38742_v25  ;;  %36458 = vmatmul.mubr.msk.f32.vlgmr.msra.gmra.mxu0 %vm97_vm0, %v38743_v26  ;;  %v39837_v29 = vpop.f32.mrf.mxu1  ;;  %v39839_v30 = vpop.f32.mrf.mxu0 }
 0x147   :  { %36461 = vmatpush3.msra.mxu1 %v39781_v63  ;;  %36468 = vmatpush3.msra.mxu0 %v39781_v63 }
 0x148   :  { %36462 = vmatprep.subr.mxu1 %v39793_v6  ;;  %36469 = vmatprep.subr.mxu0 %v39793_v6  ;;  %v39845_v33 = vpop.f32.mrf.mxu1  ;;  %v39847_v34 = vpop.f32.mrf.mxu0 }
 0x149   :  { %36463 = vmatpush3.msra.mxu1 %v39793_v6  ;;  %36470 = vmatpush3.msra.mxu0 %v39793_v6 }
 0x14a   :  { %36464 = vmatprep.mubr.msk.f32.mxu1 %vm97_vm0, %v38744_v37  ;;  %36471 = vmatprep.mubr.msk.f32.mxu0 %vm97_vm0, %v38745_v38  ;;  %v38756_v37 = vld [vmem:[#allocation2 + $0x90] sm:$0xff]  ;;  %v38757_v38 = vld [vmem:[#allocation2 + $0xa0] sm:$0xff] }
 0x14b   :  { %36474 = vmatprep.subr.mxu1 %v39781_v63  ;;  %36481 = vmatprep.subr.mxu0 %v39781_v63 }
 0x14c   :  { %36465 = vmatmul.mubr.msk.f32.vlgmr.msra.gmra.mxu1 %vm97_vm0, %v38746_v41  ;;  %36472 = vmatmul.mubr.msk.f32.vlgmr.msra.gmra.mxu0 %vm97_vm0, %v38747_v42  ;;  %v39857_v45 = vpop.f32.mrf.mxu1  ;;  %v39859_v46 = vpop.f32.mrf.mxu0  ;;  %v38758_v41 = vld [vmem:[#allocation2 + $0x98] sm:$0xff]  ;;  %v38759_v42 = vld [vmem:[#allocation2 + $0xa8] sm:$0xff] }
 0x14d   :  { %36475 = vmatpush3.msra.mxu1 %v39781_v63  ;;  %36482 = vmatpush3.msra.mxu0 %v39781_v63 }
 0x14e   :  { %36476 = vmatprep.subr.mxu1 %v39793_v6  ;;  %36483 = vmatprep.subr.mxu0 %v39793_v6  ;;  %v39865_v49 = vpop.f32.mrf.mxu1  ;;  %v39867_v50 = vpop.f32.mrf.mxu0 }
 0x14f   :  { %36477 = vmatpush3.msra.mxu1 %v39793_v6  ;;  %36484 = vmatpush3.msra.mxu0 %v39793_v6 }
 0x150   :  { %36478 = vmatprep.mubr.msk.f32.mxu1 %vm97_vm0, %v38748_v53  ;;  %36485 = vmatprep.mubr.msk.f32.mxu0 %vm97_vm0, %v38749_v54 }
 0x151   :  { %36488 = vmatprep.subr.mxu1 %v39781_v63  ;;  %36495 = vmatprep.subr.mxu0 %v39781_v63 }
 0x152   :  { %36479 = vmatmul.mubr.msk.f32.vlgmr.msra.gmra.mxu1 %vm97_vm0, %v38750_v57  ;;  %36486 = vmatmul.mubr.msk.f32.vlgmr.msra.gmra.mxu0 %vm97_vm0, %v38751_v58  ;;  %v39877_v61 = vpop.f32.mrf.mxu1  ;;  %v39879_v62 = vpop.f32.mrf.mxu0 }
 0x153   :  { %36489 = vmatpush3.msra.mxu1 %v39781_v63  ;;  %36496 = vmatpush3.msra.mxu0 %v39781_v63 }
 0x154   :  { %36490 = vmatprep.subr.mxu1 %v39793_v6  ;;  %36497 = vmatprep.subr.mxu0 %v39793_v6  ;;  %v39885_v4 = vpop.f32.mrf.mxu1  ;;  %v39887_v5 = vpop.f32.mrf.mxu0 }
 0x155   :  { %44961 = vst [vmem:[#allocation17_spill] sm:$0xff] %v39885_v4  ;;  %44962 = vst [vmem:[#allocation18_spill] sm:$0xff] %v39887_v5  ;;  %36491 = vmatpush3.msra.mxu1 %v39793_v6  ;;  %36498 = vmatpush3.msra.mxu0 %v39793_v6 }
 0x156   :  { %36492 = vmatprep.mubr.msk.f32.mxu1 %vm97_vm0, %v38752_v2  ;;  %36499 = vmatprep.mubr.msk.f32.mxu0 %vm97_vm0, %v38753_v12  ;;  %v38760_v2 = vld [vmem:[#allocation2 + $0xb0] sm:$0xff]  ;;  %v38761_v12 = vld [vmem:[#allocation2 + $0xc0] sm:$0xff] }
 0x157   :  { %36502 = vmatprep.subr.mxu1 %v39781_v63  ;;  %36509 = vmatprep.subr.mxu0 %v39781_v63 }
 0x158   :  { %36493 = vmatmul.mubr.msk.f32.vlgmr.msra.gmra.mxu1 %vm97_vm0, %v38754_v14  ;;  %36500 = vmatmul.mubr.msk.f32.vlgmr.msra.gmra.mxu0 %vm97_vm0, %v38755_v1  ;;  %v39897_v21 = vpop.f32.mrf.mxu1  ;;  %v39899_v22 = vpop.f32.mrf.mxu0  ;;  %v38762_v14 = vld [vmem:[#allocation2 + $0xb8] sm:$0xff]  ;;  %v38763_v1 = vld [vmem:[#allocation2 + $0xc8] sm:$0xff] }
 0x159   :  { %44963 = vst [vmem:[#allocation19_spill] sm:$0xff] %v39897_v21  ;;  %44964 = vst [vmem:[#allocation20_spill] sm:$0xff] %v39899_v22  ;;  %36503 = vmatpush3.msra.mxu1 %v39781_v63  ;;  %36510 = vmatpush3.msra.mxu0 %v39781_v63 }
 0x15a   :  { %36504 = vmatprep.subr.mxu1 %v39793_v6  ;;  %36511 = vmatprep.subr.mxu0 %v39793_v6  ;;  %v39905_v25 = vpop.f32.mrf.mxu1  ;;  %v39907_v26 = vpop.f32.mrf.mxu0 }
 0x15b   :  { %44965 = vst [vmem:[#allocation21_spill] sm:$0xff] %v39905_v25  ;;  %44966 = vst [vmem:[#allocation22_spill] sm:$0xff] %v39907_v26  ;;  %36505 = vmatpush3.msra.mxu1 %v39793_v6  ;;  %36512 = vmatpush3.msra.mxu0 %v39793_v6 }
 0x15c   :  { %36506 = vmatprep.mubr.msk.f32.mxu1 %vm97_vm0, %v38756_v37  ;;  %36513 = vmatprep.mubr.msk.f32.mxu0 %vm97_vm0, %v38757_v38 }
 0x15d   :  { %36516 = vmatprep.subr.mxu1 %v39781_v63  ;;  %36523 = vmatprep.subr.mxu0 %v39781_v63 }
 0x15e   :  { %36507 = vmatmul.mubr.msk.f32.vlgmr.msra.gmra.mxu1 %vm97_vm0, %v38758_v41  ;;  %36514 = vmatmul.mubr.msk.f32.vlgmr.msra.gmra.mxu0 %vm97_vm0, %v38759_v42  ;;  %v39917_v53 = vpop.f32.mrf.mxu1  ;;  %v39919_v54 = vpop.f32.mrf.mxu0 }
 0x15f   :  { %44967 = vst [vmem:[#allocation23_spill] sm:$0xff] %v39917_v53  ;;  %44968 = vst [vmem:[#allocation24_spill] sm:$0xff] %v39919_v54  ;;  %36517 = vmatpush3.msra.mxu1 %v39781_v63  ;;  %36524 = vmatpush3.msra.mxu0 %v39781_v63 }
 0x160   :  { %36518 = vmatprep.subr.mxu1 %v39793_v6  ;;  %36525 = vmatprep.subr.mxu0 %v39793_v6  ;;  %v39925_v57 = vpop.f32.mrf.mxu1  ;;  %v39927_v58 = vpop.f32.mrf.mxu0 }
 0x161   :  { %44969 = vst [vmem:[#allocation25_spill] sm:$0xff] %v39925_v57  ;;  %44970 = vst [vmem:[#allocation26_spill] sm:$0xff] %v39927_v58  ;;  %36519 = vmatpush3.msra.mxu1 %v39793_v6  ;;  %36526 = vmatpush3.msra.mxu0 %v39793_v6 }
 0x162   :  { %36520 = vmatprep.mubr.msk.f32.mxu1 %vm97_vm0, %v38760_v2  ;;  %36527 = vmatprep.mubr.msk.f32.mxu0 %vm97_vm0, %v38761_v12  ;;  %v38764_v2 = vld [vmem:[#allocation2 + $0xd0] sm:$0xff]  ;;  %v38765_v12 = vld [vmem:[#allocation2 + $0xe0] sm:$0xff] }
 0x163   :  { %36530 = vmatprep.subr.mxu1 %v39781_v63  ;;  %36537 = vmatprep.subr.mxu0 %v39781_v63 }
 0x164   :  { %36521 = vmatmul.mubr.msk.f32.vlgmr.msra.gmra.mxu1 %vm97_vm0, %v38762_v14  ;;  %36528 = vmatmul.mubr.msk.f32.vlgmr.msra.gmra.mxu0 %vm97_vm0, %v38763_v1  ;;  %v39937_v37 = vpop.f32.mrf.mxu1  ;;  %v39939_v38 = vpop.f32.mrf.mxu0  ;;  %v38766_v14 = vld [vmem:[#allocation2 + $0xd8] sm:$0xff]  ;;  %v38767_v1 = vld [vmem:[#allocation2 + $0xe8] sm:$0xff] }
 0x165   :  { %44971 = vst [vmem:[#allocation27_spill] sm:$0xff] %v39937_v37  ;;  %44972 = vst [vmem:[#allocation28_spill] sm:$0xff] %v39939_v38  ;;  %36531 = vmatpush3.msra.mxu1 %v39781_v63  ;;  %36538 = vmatpush3.msra.mxu0 %v39781_v63  ;;  %v40421_v38 = vld [vmem:[#allocation8 + $0x8] sm:$0xff] }
 0x166   :  { %36532 = vmatprep.subr.mxu1 %v39793_v6  ;;  %36539 = vmatprep.subr.mxu0 %v39793_v6  ;;  %v39945_v41 = vpop.f32.mrf.mxu1  ;;  %v39947_v42 = vpop.f32.mrf.mxu0 }
 0x167   :  { %44973 = vst [vmem:[#allocation29_spill] sm:$0xff] %v39945_v41  ;;  %44974 = vst [vmem:[#allocation30_spill] sm:$0xff] %v39947_v42  ;;  %36533 = vmatpush3.msra.mxu1 %v39793_v6  ;;  %36540 = vmatpush3.msra.mxu0 %v39793_v6 }
 0x168   :  { %36534 = vmatprep.mubr.msk.f32.mxu1 %vm97_vm0, %v38764_v2  ;;  %36541 = vmatprep.mubr.msk.f32.mxu0 %vm97_vm0, %v38765_v12 }
 0x169   :  { %36544 = vmatprep.subr.mxu1 %v39781_v63  ;;  %36551 = vmatprep.subr.mxu0 %v39781_v63 }
 0x16a   :  { %36535 = vmatmul.mubr.msk.f32.vlgmr.msra.gmra.mxu1 %vm97_vm0, %v38766_v14  ;;  %36542 = vmatmul.mubr.msk.f32.vlgmr.msra.gmra.mxu0 %vm97_vm0, %v38767_v1  ;;  %v39957_v42 = vpop.f32.mrf.mxu1  ;;  %v39959_v41 = vpop.f32.mrf.mxu0  ;;  %v38768_v14 = vld [vmem:[#allocation2 + $0xf0] sm:$0xff]  ;;  %v38769_v1 = vld [vmem:[#allocation2 + $0x100] sm:$0xff] }
 0x16b   :  { %44975 = vst [vmem:[#allocation31_spill] sm:$0xff] %v39957_v42  ;;  %44976 = vst [vmem:[#allocation32_spill] sm:$0xff] %v39959_v41  ;;  %36545 = vmatpush3.msra.mxu1 %v39781_v63  ;;  %36552 = vmatpush3.msra.mxu0 %v39781_v63  ;;  %v38770_v41 = vld [vmem:[#allocation2 + $0xf8] sm:$0xff] }
 0x16c   :  { %36546 = vmatprep.subr.mxu1 %v39793_v6  ;;  %36553 = vmatprep.subr.mxu0 %v39793_v6  ;;  %v39965_v2 = vpop.f32.mrf.mxu1  ;;  %v39967_v12 = vpop.f32.mrf.mxu0 }
 0x16d   :  { %44977 = vst [vmem:[#allocation33_spill] sm:$0xff] %v39965_v2  ;;  %44978 = vst [vmem:[#allocation34_spill] sm:$0xff] %v39967_v12  ;;  %36547 = vmatpush3.msra.mxu1 %v39793_v6  ;;  %36554 = vmatpush3.msra.mxu0 %v39793_v6  ;;  %v38771_v2 = vld [vmem:[#allocation2 + $0x108] sm:$0xff] }
 0x16e   :  { %36548 = vmatprep.mubr.msk.f32.mxu1 %vm97_vm0, %v38768_v14  ;;  %36555 = vmatprep.mubr.msk.f32.mxu0 %vm97_vm0, %v38769_v1 }
 0x16f   :  { %36558 = vmatprep.subr.mxu1 %v39781_v63  ;;  %36565 = vmatprep.subr.mxu0 %v39781_v63 }
 0x170   :  { %36549 = vmatmul.mubr.msk.f32.vlgmr.msra.gmra.mxu1 %vm97_vm0, %v38770_v41  ;;  %36556 = vmatmul.mubr.msk.f32.vlgmr.msra.gmra.mxu0 %vm97_vm0, %v38771_v2  ;;  %v39977_v12 = vpop.f32.mrf.mxu1  ;;  %v39979_v42 = vpop.f32.mrf.mxu0  ;;  %v38772_v41 = vld [vmem:[#allocation2 + $0x110] sm:$0xff]  ;;  %v38773_v2 = vld [vmem:[#allocation2 + $0x120] sm:$0xff] }
 0x171   :  { %44979 = vst [vmem:[#allocation35_spill] sm:$0xff] %v39977_v12  ;;  %44980 = vst [vmem:[#allocation36_spill] sm:$0xff] %v39979_v42  ;;  %36559 = vmatpush3.msra.mxu1 %v39781_v63  ;;  %36566 = vmatpush3.msra.mxu0 %v39781_v63  ;;  %v38774_v42 = vld [vmem:[#allocation2 + $0x118] sm:$0xff] }
 0x172   :  { %36560 = vmatprep.subr.mxu1 %v39793_v6  ;;  %36567 = vmatprep.subr.mxu0 %v39793_v6  ;;  %v39985_v14 = vpop.f32.mrf.mxu1  ;;  %v39987_v1 = vpop.f32.mrf.mxu0 }
 0x173   :  { %44981 = vst [vmem:[#allocation37_spill] sm:$0xff] %v39985_v14  ;;  %44982 = vst [vmem:[#allocation38_spill] sm:$0xff] %v39987_v1  ;;  %36561 = vmatpush3.msra.mxu1 %v39793_v6  ;;  %36568 = vmatpush3.msra.mxu0 %v39793_v6  ;;  %v38775_v14 = vld [vmem:[#allocation2 + $0x128] sm:$0xff] }
 0x174   :  { %36562 = vmatprep.mubr.msk.f32.mxu1 %vm97_vm0, %v38772_v41  ;;  %36569 = vmatprep.mubr.msk.f32.mxu0 %vm97_vm0, %v38773_v2 }
 0x175   :  { %36572 = vmatprep.subr.mxu1 %v39781_v63  ;;  %36579 = vmatprep.subr.mxu0 %v39781_v63 }
 0x176   :  { %36563 = vmatmul.mubr.msk.f32.vlgmr.msra.gmra.mxu1 %vm97_vm0, %v38774_v42  ;;  %36570 = vmatmul.mubr.msk.f32.vlgmr.msra.gmra.mxu0 %vm97_vm0, %v38775_v14  ;;  %v39997_v1 = vpop.f32.mrf.mxu1  ;;  %v39999_v12 = vpop.f32.mrf.mxu0  ;;  %v38776_v42 = vld [vmem:[#allocation2 + $0x130] sm:$0xff]  ;;  %v38777_v14 = vld [vmem:[#allocation2 + $0x140] sm:$0xff] }
 0x177   :  { %44983 = vst [vmem:[#allocation39_spill] sm:$0xff] %v39997_v1  ;;  %44984 = vst [vmem:[#allocation40_spill] sm:$0xff] %v39999_v12  ;;  %36573 = vmatpush3.msra.mxu1 %v39781_v63  ;;  %36580 = vmatpush3.msra.mxu0 %v39781_v63  ;;  %v38778_v12 = vld [vmem:[#allocation2 + $0x138] sm:$0xff] }
 0x178   :  { %36574 = vmatprep.subr.mxu1 %v39793_v6  ;;  %36581 = vmatprep.subr.mxu0 %v39793_v6  ;;  %v40005_v41 = vpop.f32.mrf.mxu1  ;;  %v40007_v2 = vpop.f32.mrf.mxu0 }
 0x179   :  { %44985 = vst [vmem:[#allocation41_spill] sm:$0xff] %v40005_v41  ;;  %44986 = vst [vmem:[#allocation42_spill] sm:$0xff] %v40007_v2  ;;  %36575 = vmatpush3.msra.mxu1 %v39793_v6  ;;  %36582 = vmatpush3.msra.mxu0 %v39793_v6  ;;  %v38779_v41 = vld [vmem:[#allocation2 + $0x148] sm:$0xff] }
 0x17a   :  { %36576 = vmatprep.mubr.msk.f32.mxu1 %vm97_vm0, %v38776_v42  ;;  %36583 = vmatprep.mubr.msk.f32.mxu0 %vm97_vm0, %v38777_v14 }
 0x17b   :  { %36586 = vmatprep.subr.mxu1 %v39781_v63  ;;  %36593 = vmatprep.subr.mxu0 %v39781_v63 }
 0x17c   :  { %36577 = vmatmul.mubr.msk.f32.vlgmr.msra.gmra.mxu1 %vm97_vm0, %v38778_v12  ;;  %36584 = vmatmul.mubr.msk.f32.vlgmr.msra.gmra.mxu0 %vm97_vm0, %v38779_v41  ;;  %v40017_v2 = vpop.f32.mrf.mxu1  ;;  %v40019_v1 = vpop.f32.mrf.mxu0  ;;  %v38780_v12 = vld [vmem:[#allocation2 + $0x150] sm:$0xff]  ;;  %v38781_v41 = vld [vmem:[#allocation2 + $0x160] sm:$0xff] }
 0x17d   :  { %44987 = vst [vmem:[#allocation43_spill] sm:$0xff] %v40017_v2  ;;  %44988 = vst [vmem:[#allocation44_spill] sm:$0xff] %v40019_v1  ;;  %36587 = vmatpush3.msra.mxu1 %v39781_v63  ;;  %36594 = vmatpush3.msra.mxu0 %v39781_v63  ;;  %v38782_v1 = vld [vmem:[#allocation2 + $0x158] sm:$0xff] }
 0x17e   :  { %36588 = vmatprep.subr.mxu1 %v39793_v6  ;;  %36595 = vmatprep.subr.mxu0 %v39793_v6  ;;  %v40025_v42 = vpop.f32.mrf.mxu1  ;;  %v40027_v14 = vpop.f32.mrf.mxu0 }
 0x17f   :  { %44989 = vst [vmem:[#allocation45_spill] sm:$0xff] %v40025_v42  ;;  %44990 = vst [vmem:[#allocation46_spill] sm:$0xff] %v40027_v14  ;;  %36589 = vmatpush3.msra.mxu1 %v39793_v6  ;;  %36596 = vmatpush3.msra.mxu0 %v39793_v6  ;;  %v38783_v42 = vld [vmem:[#allocation2 + $0x168] sm:$0xff] }
 0x180   :  { %36590 = vmatprep.mubr.msk.f32.mxu1 %vm97_vm0, %v38780_v12  ;;  %36597 = vmatprep.mubr.msk.f32.mxu0 %vm97_vm0, %v38781_v41 }
 0x181   :  { %36600 = vmatprep.subr.mxu1 %v39781_v63  ;;  %36607 = vmatprep.subr.mxu0 %v39781_v63 }
 0x182   :  { %36591 = vmatmul.mubr.msk.f32.vlgmr.msra.gmra.mxu1 %vm97_vm0, %v38782_v1  ;;  %36598 = vmatmul.mubr.msk.f32.vlgmr.msra.gmra.mxu0 %vm97_vm0, %v38783_v42  ;;  %v40037_v14 = vpop.f32.mrf.mxu1  ;;  %v40039_v2 = vpop.f32.mrf.mxu0  ;;  %v38784_v1 = vld [vmem:[#allocation2 + $0x170] sm:$0xff]  ;;  %v38785_v42 = vld [vmem:[#allocation2 + $0x180] sm:$0xff] }
 0x183   :  { %44991 = vst [vmem:[#allocation47_spill] sm:$0xff] %v40037_v14  ;;  %44992 = vst [vmem:[#allocation48_spill] sm:$0xff] %v40039_v2  ;;  %36601 = vmatpush3.msra.mxu1 %v39781_v63  ;;  %36608 = vmatpush3.msra.mxu0 %v39781_v63  ;;  %v38786_v2 = vld [vmem:[#allocation2 + $0x178] sm:$0xff] }
 0x184   :  { %36602 = vmatprep.subr.mxu1 %v39793_v6  ;;  %36609 = vmatprep.subr.mxu0 %v39793_v6  ;;  %v40045_v12 = vpop.f32.mrf.mxu1  ;;  %v40047_v41 = vpop.f32.mrf.mxu0 }
 0x185   :  { %44993 = vst [vmem:[#allocation49_spill] sm:$0xff] %v40045_v12  ;;  %44994 = vst [vmem:[#allocation50_spill] sm:$0xff] %v40047_v41  ;;  %36603 = vmatpush3.msra.mxu1 %v39793_v6  ;;  %36610 = vmatpush3.msra.mxu0 %v39793_v6  ;;  %v38787_v12 = vld [vmem:[#allocation2 + $0x188] sm:$0xff] }
 0x186   :  { %36604 = vmatprep.mubr.msk.f32.mxu1 %vm97_vm0, %v38784_v1  ;;  %36611 = vmatprep.mubr.msk.f32.mxu0 %vm97_vm0, %v38785_v42 }
 0x187   :  { %36614 = vmatprep.subr.mxu1 %v39781_v63  ;;  %36621 = vmatprep.subr.mxu0 %v39781_v63 }
 0x188   :  { %36605 = vmatmul.mubr.msk.f32.vlgmr.msra.gmra.mxu1 %vm97_vm0, %v38786_v2  ;;  %36612 = vmatmul.mubr.msk.f32.vlgmr.msra.gmra.mxu0 %vm97_vm0, %v38787_v12  ;;  %v40057_v41 = vpop.f32.mrf.mxu1  ;;  %v40059_v14 = vpop.f32.mrf.mxu0  ;;  %v38788_v2 = vld [vmem:[#allocation2 + $0x190] sm:$0xff]  ;;  %v38789_v12 = vld [vmem:[#allocation2 + $0x1a0] sm:$0xff] }
 0x189   :  { %44995 = vst [vmem:[#allocation51_spill] sm:$0xff] %v40057_v41  ;;  %44996 = vst [vmem:[#allocation52_spill] sm:$0xff] %v40059_v14  ;;  %36615 = vmatpush3.msra.mxu1 %v39781_v63  ;;  %36622 = vmatpush3.msra.mxu0 %v39781_v63  ;;  %v38790_v14 = vld [vmem:[#allocation2 + $0x198] sm:$0xff] }
 0x18a   :  { %36616 = vmatprep.subr.mxu1 %v39793_v6  ;;  %36623 = vmatprep.subr.mxu0 %v39793_v6  ;;  %v40065_v1 = vpop.f32.mrf.mxu1  ;;  %v40067_v42 = vpop.f32.mrf.mxu0 }
 0x18b   :  { %44997 = vst [vmem:[#allocation53_spill] sm:$0xff] %v40065_v1  ;;  %44998 = vst [vmem:[#allocation54_spill] sm:$0xff] %v40067_v42  ;;  %36617 = vmatpush3.msra.mxu1 %v39793_v6  ;;  %36624 = vmatpush3.msra.mxu0 %v39793_v6  ;;  %v38791_v1 = vld [vmem:[#allocation2 + $0x1a8] sm:$0xff] }
 0x18c   :  { %36618 = vmatprep.mubr.msk.f32.mxu1 %vm97_vm0, %v38788_v2  ;;  %36625 = vmatprep.mubr.msk.f32.mxu0 %vm97_vm0, %v38789_v12 }
 0x18d   :  { %36628 = vmatprep.subr.mxu1 %v39781_v63  ;;  %36635 = vmatprep.subr.mxu0 %v39781_v63 }
 0x18e   :  { %36619 = vmatmul.mubr.msk.f32.vlgmr.msra.gmra.mxu1 %vm97_vm0, %v38790_v14  ;;  %36626 = vmatmul.mubr.msk.f32.vlgmr.msra.gmra.mxu0 %vm97_vm0, %v38791_v1  ;;  %v40077_v42 = vpop.f32.mrf.mxu1  ;;  %v40079_v41 = vpop.f32.mrf.mxu0  ;;  %v38792_v14 = vld [vmem:[#allocation2 + $0x1b0] sm:$0xff]  ;;  %v38793_v1 = vld [vmem:[#allocation2 + $0x1c0] sm:$0xff] }
 0x18f   :  { %44999 = vst [vmem:[#allocation55_spill] sm:$0xff] %v40077_v42  ;;  %45000 = vst [vmem:[#allocation56_spill] sm:$0xff] %v40079_v41  ;;  %36629 = vmatpush3.msra.mxu1 %v39781_v63  ;;  %36636 = vmatpush3.msra.mxu0 %v39781_v63  ;;  %v38794_v41 = vld [vmem:[#allocation2 + $0x1b8] sm:$0xff] }
 0x190   :  { %36630 = vmatprep.subr.mxu1 %v39793_v6  ;;  %36637 = vmatprep.subr.mxu0 %v39793_v6  ;;  %v40085_v2 = vpop.f32.mrf.mxu1  ;;  %v40087_v12 = vpop.f32.mrf.mxu0 }
 0x191   :  { %45001 = vst [vmem:[#allocation57_spill] sm:$0xff] %v40085_v2  ;;  %45002 = vst [vmem:[#allocation58_spill] sm:$0xff] %v40087_v12  ;;  %36631 = vmatpush3.msra.mxu1 %v39793_v6  ;;  %36638 = vmatpush3.msra.mxu0 %v39793_v6  ;;  %v38795_v2 = vld [vmem:[#allocation2 + $0x1c8] sm:$0xff] }
 0x192   :  { %36632 = vmatprep.mubr.msk.f32.mxu1 %vm97_vm0, %v38792_v14  ;;  %36639 = vmatprep.mubr.msk.f32.mxu0 %vm97_vm0, %v38793_v1 }
 0x193   :  { %36642 = vmatprep.subr.mxu1 %v39781_v63  ;;  %36649 = vmatprep.subr.mxu0 %v39781_v63 }
 0x194   :  { %36633 = vmatmul.mubr.msk.f32.vlgmr.msra.gmra.mxu1 %vm97_vm0, %v38794_v41  ;;  %36640 = vmatmul.mubr.msk.f32.vlgmr.msra.gmra.mxu0 %vm97_vm0, %v38795_v2  ;;  %v40097_v12 = vpop.f32.mrf.mxu1  ;;  %v40099_v42 = vpop.f32.mrf.mxu0  ;;  %v38796_v41 = vld [vmem:[#allocation2 + $0x1d0] sm:$0xff]  ;;  %v38797_v2 = vld [vmem:[#allocation2 + $0x1e0] sm:$0xff] }
 0x195   :  { %45003 = vst [vmem:[#allocation59_spill] sm:$0xff] %v40097_v12  ;;  %45004 = vst [vmem:[#allocation60_spill] sm:$0xff] %v40099_v42  ;;  %36643 = vmatpush3.msra.mxu1 %v39781_v63  ;;  %36650 = vmatpush3.msra.mxu0 %v39781_v63  ;;  %v38798_v42 = vld [vmem:[#allocation2 + $0x1d8] sm:$0xff] }
 0x196   :  { %36644 = vmatprep.subr.mxu1 %v39793_v6  ;;  %36651 = vmatprep.subr.mxu0 %v39793_v6  ;;  %v40105_v14 = vpop.f32.mrf.mxu1  ;;  %v40107_v1 = vpop.f32.mrf.mxu0 }
 0x197   :  { %45005 = vst [vmem:[#allocation61_spill] sm:$0xff] %v40105_v14  ;;  %45006 = vst [vmem:[#allocation62_spill] sm:$0xff] %v40107_v1  ;;  %36645 = vmatpush3.msra.mxu1 %v39793_v6  ;;  %36652 = vmatpush3.msra.mxu0 %v39793_v6  ;;  %v38799_v14 = vld [vmem:[#allocation2 + $0x1e8] sm:$0xff] }
 0x198   :  { %36646 = vmatprep.mubr.msk.f32.mxu1 %vm97_vm0, %v38796_v41  ;;  %36653 = vmatprep.mubr.msk.f32.mxu0 %vm97_vm0, %v38797_v2 }
 0x199   :  { %36656 = vmatprep.subr.mxu1 %v39781_v63  ;;  %36663 = vmatprep.subr.mxu0 %v39781_v63 }
 0x19a   :  { %36647 = vmatmul.mubr.msk.f32.vlgmr.msra.gmra.mxu1 %vm97_vm0, %v38798_v42  ;;  %36654 = vmatmul.mubr.msk.f32.vlgmr.msra.gmra.mxu0 %vm97_vm0, %v38799_v14  ;;  %v40117_v1 = vpop.f32.mrf.mxu1  ;;  %v40119_v12 = vpop.f32.mrf.mxu0  ;;  %v38800_v42 = vld [vmem:[#allocation2 + $0x1f0] sm:$0xff]  ;;  %v38801_v14 = vld [vmem:[#allocation2 + $0x200] sm:$0xff] }
 0x19b   :  { %45007 = vst [vmem:[#allocation63_spill] sm:$0xff] %v40117_v1  ;;  %45008 = vst [vmem:[#allocation64_spill] sm:$0xff] %v40119_v12  ;;  %36657 = vmatpush3.msra.mxu1 %v39781_v63  ;;  %36664 = vmatpush3.msra.mxu0 %v39781_v63  ;;  %v38802_v12 = vld [vmem:[#allocation2 + $0x1f8] sm:$0xff] }
 0x19c   :  { %36658 = vmatprep.subr.mxu1 %v39793_v6  ;;  %36665 = vmatprep.subr.mxu0 %v39793_v6  ;;  %v40125_v41 = vpop.f32.mrf.mxu1  ;;  %v40127_v2 = vpop.f32.mrf.mxu0 }
 0x19d   :  { %45009 = vst [vmem:[#allocation65_spill] sm:$0xff] %v40125_v41  ;;  %45010 = vst [vmem:[#allocation66_spill] sm:$0xff] %v40127_v2  ;;  %36659 = vmatpush3.msra.mxu1 %v39793_v6  ;;  %36666 = vmatpush3.msra.mxu0 %v39793_v6  ;;  %v38803_v41 = vld [vmem:[#allocation2 + $0x208] sm:$0xff] }
 0x19e   :  { %36660 = vmatprep.mubr.msk.f32.mxu1 %vm97_vm0, %v38800_v42  ;;  %36667 = vmatprep.mubr.msk.f32.mxu0 %vm97_vm0, %v38801_v14 }
 0x19f   :  { %36670 = vmatprep.subr.mxu1 %v39781_v63  ;;  %36677 = vmatprep.subr.mxu0 %v39781_v63 }
 0x1a0   :  { %36661 = vmatmul.mubr.msk.f32.vlgmr.msra.gmra.mxu1 %vm97_vm0, %v38802_v12  ;;  %36668 = vmatmul.mubr.msk.f32.vlgmr.msra.gmra.mxu0 %vm97_vm0, %v38803_v41  ;;  %v40137_v2 = vpop.f32.mrf.mxu1  ;;  %v40139_v1 = vpop.f32.mrf.mxu0  ;;  %v38804_v12 = vld [vmem:[#allocation2 + $0x210] sm:$0xff]  ;;  %v38805_v41 = vld [vmem:[#allocation2 + $0x220] sm:$0xff] }
 0x1a1   :  { %45011 = vst [vmem:[#allocation67_spill] sm:$0xff] %v40137_v2  ;;  %45012 = vst [vmem:[#allocation68_spill] sm:$0xff] %v40139_v1  ;;  %36671 = vmatpush3.msra.mxu1 %v39781_v63  ;;  %36678 = vmatpush3.msra.mxu0 %v39781_v63  ;;  %v38806_v1 = vld [vmem:[#allocation2 + $0x218] sm:$0xff] }
 0x1a2   :  { %36672 = vmatprep.subr.mxu1 %v39793_v6  ;;  %36679 = vmatprep.subr.mxu0 %v39793_v6  ;;  %v40145_v42 = vpop.f32.mrf.mxu1  ;;  %v40147_v14 = vpop.f32.mrf.mxu0 }
 0x1a3   :  { %45013 = vst [vmem:[#allocation69_spill] sm:$0xff] %v40145_v42  ;;  %45014 = vst [vmem:[#allocation70_spill] sm:$0xff] %v40147_v14  ;;  %36673 = vmatpush3.msra.mxu1 %v39793_v6  ;;  %36680 = vmatpush3.msra.mxu0 %v39793_v6  ;;  %v38807_v42 = vld [vmem:[#allocation2 + $0x228] sm:$0xff] }
 0x1a4   :  { %36674 = vmatprep.mubr.msk.f32.mxu1 %vm97_vm0, %v38804_v12  ;;  %36681 = vmatprep.mubr.msk.f32.mxu0 %vm97_vm0, %v38805_v41 }
 0x1a5   :  { %36684 = vmatprep.subr.mxu1 %v39781_v63  ;;  %36691 = vmatprep.subr.mxu0 %v39781_v63 }
 0x1a6   :  { %36675 = vmatmul.mubr.msk.f32.vlgmr.msra.gmra.mxu1 %vm97_vm0, %v38806_v1  ;;  %36682 = vmatmul.mubr.msk.f32.vlgmr.msra.gmra.mxu0 %vm97_vm0, %v38807_v42  ;;  %v40157_v14 = vpop.f32.mrf.mxu1  ;;  %v40159_v2 = vpop.f32.mrf.mxu0  ;;  %v38808_v1 = vld [vmem:[#allocation2 + $0x230] sm:$0xff]  ;;  %v38809_v42 = vld [vmem:[#allocation2 + $0x240] sm:$0xff] }
 0x1a7   :  { %45015 = vst [vmem:[#allocation71_spill] sm:$0xff] %v40157_v14  ;;  %45016 = vst [vmem:[#allocation72_spill] sm:$0xff] %v40159_v2  ;;  %36685 = vmatpush3.msra.mxu1 %v39781_v63  ;;  %36692 = vmatpush3.msra.mxu0 %v39781_v63  ;;  %v38810_v2 = vld [vmem:[#allocation2 + $0x238] sm:$0xff] }
 0x1a8   :  { %36686 = vmatprep.subr.mxu1 %v39793_v6  ;;  %36693 = vmatprep.subr.mxu0 %v39793_v6  ;;  %v40165_v12 = vpop.f32.mrf.mxu1  ;;  %v40167_v41 = vpop.f32.mrf.mxu0 }
 0x1a9   :  { %45017 = vst [vmem:[#allocation73_spill] sm:$0xff] %v40165_v12  ;;  %45018 = vst [vmem:[#allocation74_spill] sm:$0xff] %v40167_v41  ;;  %36687 = vmatpush3.msra.mxu1 %v39793_v6  ;;  %36694 = vmatpush3.msra.mxu0 %v39793_v6  ;;  %v38811_v12 = vld [vmem:[#allocation2 + $0x248] sm:$0xff] }
 0x1aa   :  { %36688 = vmatprep.mubr.msk.f32.mxu1 %vm97_vm0, %v38808_v1  ;;  %36695 = vmatprep.mubr.msk.f32.mxu0 %vm97_vm0, %v38809_v42 }
 0x1ab   :  { %36698 = vmatprep.subr.mxu1 %v39781_v63  ;;  %36705 = vmatprep.subr.mxu0 %v39781_v63 }
 0x1ac   :  { %36689 = vmatmul.mubr.msk.f32.vlgmr.msra.gmra.mxu1 %vm97_vm0, %v38810_v2  ;;  %36696 = vmatmul.mubr.msk.f32.vlgmr.msra.gmra.mxu0 %vm97_vm0, %v38811_v12  ;;  %v40177_v41 = vpop.f32.mrf.mxu1  ;;  %v40179_v14 = vpop.f32.mrf.mxu0  ;;  %v38812_v2 = vld [vmem:[#allocation2 + $0x250] sm:$0xff]  ;;  %v38813_v12 = vld [vmem:[#allocation2 + $0x260] sm:$0xff] }
 0x1ad   :  { %45019 = vst [vmem:[#allocation75_spill] sm:$0xff] %v40177_v41  ;;  %45020 = vst [vmem:[#allocation76_spill] sm:$0xff] %v40179_v14  ;;  %36699 = vmatpush3.msra.mxu1 %v39781_v63  ;;  %36706 = vmatpush3.msra.mxu0 %v39781_v63  ;;  %v38814_v14 = vld [vmem:[#allocation2 + $0x258] sm:$0xff] }
 0x1ae   :  { %36700 = vmatprep.subr.mxu1 %v39793_v6  ;;  %36707 = vmatprep.subr.mxu0 %v39793_v6  ;;  %v40185_v1 = vpop.f32.mrf.mxu1  ;;  %v40187_v42 = vpop.f32.mrf.mxu0 }
 0x1af   :  { %45021 = vst [vmem:[#allocation77_spill] sm:$0xff] %v40185_v1  ;;  %45022 = vst [vmem:[#allocation78_spill] sm:$0xff] %v40187_v42  ;;  %36701 = vmatpush3.msra.mxu1 %v39793_v6  ;;  %36708 = vmatpush3.msra.mxu0 %v39793_v6  ;;  %v38815_v1 = vld [vmem:[#allocation2 + $0x268] sm:$0xff] }
 0x1b0   :  { %36702 = vmatprep.mubr.msk.f32.mxu1 %vm97_vm0, %v38812_v2  ;;  %36709 = vmatprep.mubr.msk.f32.mxu0 %vm97_vm0, %v38813_v12 }
 0x1b1   :  { %36712 = vmatprep.subr.mxu1 %v39781_v63  ;;  %36719 = vmatprep.subr.mxu0 %v39781_v63 }
 0x1b2   :  { %36703 = vmatmul.mubr.msk.f32.vlgmr.msra.gmra.mxu1 %vm97_vm0, %v38814_v14  ;;  %36710 = vmatmul.mubr.msk.f32.vlgmr.msra.gmra.mxu0 %vm97_vm0, %v38815_v1  ;;  %v40197_v42 = vpop.f32.mrf.mxu1  ;;  %v40199_v41 = vpop.f32.mrf.mxu0  ;;  %v38816_v14 = vld [vmem:[#allocation2 + $0x270] sm:$0xff]  ;;  %v38817_v1 = vld [vmem:[#allocation2 + $0x280] sm:$0xff] }
 0x1b3   :  { %45023 = vst [vmem:[#allocation79_spill] sm:$0xff] %v40197_v42  ;;  %45024 = vst [vmem:[#allocation80_spill] sm:$0xff] %v40199_v41  ;;  %36713 = vmatpush3.msra.mxu1 %v39781_v63  ;;  %36720 = vmatpush3.msra.mxu0 %v39781_v63  ;;  %v38818_v41 = vld [vmem:[#allocation2 + $0x278] sm:$0xff] }
 0x1b4   :  { %36714 = vmatprep.subr.mxu1 %v39793_v6  ;;  %36721 = vmatprep.subr.mxu0 %v39793_v6  ;;  %v40205_v2 = vpop.f32.mrf.mxu1  ;;  %v40207_v12 = vpop.f32.mrf.mxu0 }
 0x1b5   :  { %45025 = vst [vmem:[#allocation81_spill] sm:$0xff] %v40205_v2  ;;  %45026 = vst [vmem:[#allocation82_spill] sm:$0xff] %v40207_v12  ;;  %36715 = vmatpush3.msra.mxu1 %v39793_v6  ;;  %36722 = vmatpush3.msra.mxu0 %v39793_v6  ;;  %v38819_v2 = vld [vmem:[#allocation2 + $0x288] sm:$0xff] }
 0x1b6   :  { %36716 = vmatprep.mubr.msk.f32.mxu1 %vm97_vm0, %v38816_v14  ;;  %36723 = vmatprep.mubr.msk.f32.mxu0 %vm97_vm0, %v38817_v1 }
 0x1b7   :  { %36726 = vmatprep.subr.mxu1 %v39781_v63  ;;  %36733 = vmatprep.subr.mxu0 %v39781_v63 }
 0x1b8   :  { %36717 = vmatmul.mubr.msk.f32.vlgmr.msra.gmra.mxu1 %vm97_vm0, %v38818_v41  ;;  %36724 = vmatmul.mubr.msk.f32.vlgmr.msra.gmra.mxu0 %vm97_vm0, %v38819_v2  ;;  %v40217_v12 = vpop.f32.mrf.mxu1  ;;  %v40219_v42 = vpop.f32.mrf.mxu0  ;;  %v38820_v41 = vld [vmem:[#allocation2 + $0x290] sm:$0xff]  ;;  %v38821_v2 = vld [vmem:[#allocation2 + $0x2a0] sm:$0xff] }
 0x1b9   :  { %45027 = vst [vmem:[#allocation83_spill] sm:$0xff] %v40217_v12  ;;  %45028 = vst [vmem:[#allocation84_spill] sm:$0xff] %v40219_v42  ;;  %36727 = vmatpush3.msra.mxu1 %v39781_v63  ;;  %36734 = vmatpush3.msra.mxu0 %v39781_v63  ;;  %v38822_v42 = vld [vmem:[#allocation2 + $0x298] sm:$0xff] }
 0x1ba   :  { %36728 = vmatprep.subr.mxu1 %v39793_v6  ;;  %36735 = vmatprep.subr.mxu0 %v39793_v6  ;;  %v40225_v14 = vpop.f32.mrf.mxu1  ;;  %v40227_v1 = vpop.f32.mrf.mxu0 }
 0x1bb   :  { %45029 = vst [vmem:[#allocation85_spill] sm:$0xff] %v40225_v14  ;;  %45030 = vst [vmem:[#allocation86_spill] sm:$0xff] %v40227_v1  ;;  %36729 = vmatpush3.msra.mxu1 %v39793_v6  ;;  %36736 = vmatpush3.msra.mxu0 %v39793_v6  ;;  %v38823_v14 = vld [vmem:[#allocation2 + $0x2a8] sm:$0xff] }
 0x1bc   :  { %36730 = vmatprep.mubr.msk.f32.mxu1 %vm97_vm0, %v38820_v41  ;;  %36737 = vmatprep.mubr.msk.f32.mxu0 %vm97_vm0, %v38821_v2 }
 0x1bd   :  { %36740 = vmatprep.subr.mxu1 %v39781_v63  ;;  %36747 = vmatprep.subr.mxu0 %v39781_v63 }
 0x1be   :  { %36731 = vmatmul.mubr.msk.f32.vlgmr.msra.gmra.mxu1 %vm97_vm0, %v38822_v42  ;;  %36738 = vmatmul.mubr.msk.f32.vlgmr.msra.gmra.mxu0 %vm97_vm0, %v38823_v14  ;;  %v40237_v1 = vpop.f32.mrf.mxu1  ;;  %v40239_v12 = vpop.f32.mrf.mxu0  ;;  %v38824_v42 = vld [vmem:[#allocation2 + $0x2b0] sm:$0xff]  ;;  %v38825_v14 = vld [vmem:[#allocation2 + $0x2c0] sm:$0xff] }
 0x1bf   :  { %45031 = vst [vmem:[#allocation87_spill] sm:$0xff] %v40237_v1  ;;  %45032 = vst [vmem:[#allocation88_spill] sm:$0xff] %v40239_v12  ;;  %36741 = vmatpush3.msra.mxu1 %v39781_v63  ;;  %36748 = vmatpush3.msra.mxu0 %v39781_v63  ;;  %v38826_v12 = vld [vmem:[#allocation2 + $0x2b8] sm:$0xff] }
 0x1c0   :  { %36742 = vmatprep.subr.mxu1 %v39793_v6  ;;  %36749 = vmatprep.subr.mxu0 %v39793_v6  ;;  %v40245_v41 = vpop.f32.mrf.mxu1  ;;  %v40247_v2 = vpop.f32.mrf.mxu0 }
 0x1c1   :  { %45033 = vst [vmem:[#allocation89_spill] sm:$0xff] %v40245_v41  ;;  %45034 = vst [vmem:[#allocation90_spill] sm:$0xff] %v40247_v2  ;;  %36743 = vmatpush3.msra.mxu1 %v39793_v6  ;;  %36750 = vmatpush3.msra.mxu0 %v39793_v6  ;;  %v38827_v41 = vld [vmem:[#allocation2 + $0x2c8] sm:$0xff] }
 0x1c2   :  { %36744 = vmatprep.mubr.msk.f32.mxu1 %vm97_vm0, %v38824_v42  ;;  %36751 = vmatprep.mubr.msk.f32.mxu0 %vm97_vm0, %v38825_v14 }
 0x1c3   :  { %36754 = vmatprep.subr.mxu1 %v39781_v63  ;;  %36761 = vmatprep.subr.mxu0 %v39781_v63 }
 0x1c4   :  { %36745 = vmatmul.mubr.msk.f32.vlgmr.msra.gmra.mxu1 %vm97_vm0, %v38826_v12  ;;  %36752 = vmatmul.mubr.msk.f32.vlgmr.msra.gmra.mxu0 %vm97_vm0, %v38827_v41  ;;  %v40257_v2 = vpop.f32.mrf.mxu1  ;;  %v40259_v1 = vpop.f32.mrf.mxu0  ;;  %v38828_v12 = vld [vmem:[#allocation2 + $0x2d0] sm:$0xff]  ;;  %v38829_v41 = vld [vmem:[#allocation2 + $0x2e0] sm:$0xff] }
 0x1c5   :  { %45035 = vst [vmem:[#allocation91_spill] sm:$0xff] %v40257_v2  ;;  %45036 = vst [vmem:[#allocation92_spill] sm:$0xff] %v40259_v1  ;;  %36755 = vmatpush3.msra.mxu1 %v39781_v63  ;;  %36762 = vmatpush3.msra.mxu0 %v39781_v63  ;;  %v38830_v1 = vld [vmem:[#allocation2 + $0x2d8] sm:$0xff] }
 0x1c6   :  { %36756 = vmatprep.subr.mxu1 %v39793_v6  ;;  %36763 = vmatprep.subr.mxu0 %v39793_v6  ;;  %v40265_v42 = vpop.f32.mrf.mxu1  ;;  %v40267_v14 = vpop.f32.mrf.mxu0 }
 0x1c7   :  { %45037 = vst [vmem:[#allocation93_spill] sm:$0xff] %v40265_v42  ;;  %45038 = vst [vmem:[#allocation94_spill] sm:$0xff] %v40267_v14  ;;  %36757 = vmatpush3.msra.mxu1 %v39793_v6  ;;  %36764 = vmatpush3.msra.mxu0 %v39793_v6  ;;  %v38831_v42 = vld [vmem:[#allocation2 + $0x2e8] sm:$0xff] }
 0x1c8   :  { %36758 = vmatprep.mubr.msk.f32.mxu1 %vm97_vm0, %v38828_v12  ;;  %36765 = vmatprep.mubr.msk.f32.mxu0 %vm97_vm0, %v38829_v41 }
 0x1c9   :  { %36768 = vmatprep.subr.mxu1 %v39781_v63  ;;  %36775 = vmatprep.subr.mxu0 %v39781_v63 }
 0x1ca   :  { %36759 = vmatmul.mubr.msk.f32.vlgmr.msra.gmra.mxu1 %vm97_vm0, %v38830_v1  ;;  %36766 = vmatmul.mubr.msk.f32.vlgmr.msra.gmra.mxu0 %vm97_vm0, %v38831_v42  ;;  %v40277_v14 = vpop.f32.mrf.mxu1  ;;  %v40279_v2 = vpop.f32.mrf.mxu0  ;;  %v38832_v1 = vld [vmem:[#allocation2 + $0x2f0] sm:$0xff]  ;;  %v38833_v42 = vld [vmem:[#allocation2 + $0x300] sm:$0xff] }
 0x1cb   :  { %45039 = vst [vmem:[#allocation95_spill] sm:$0xff] %v40277_v14  ;;  %45040 = vst [vmem:[#allocation96_spill] sm:$0xff] %v40279_v2  ;;  %36769 = vmatpush3.msra.mxu1 %v39781_v63  ;;  %36776 = vmatpush3.msra.mxu0 %v39781_v63  ;;  %v38834_v2 = vld [vmem:[#allocation2 + $0x2f8] sm:$0xff] }
 0x1cc   :  { %36770 = vmatprep.subr.mxu1 %v39793_v6  ;;  %36777 = vmatprep.subr.mxu0 %v39793_v6  ;;  %v40285_v12 = vpop.f32.mrf.mxu1  ;;  %v40287_v41 = vpop.f32.mrf.mxu0 }
 0x1cd   :  { %45041 = vst [vmem:[#allocation97_spill] sm:$0xff] %v40285_v12  ;;  %45042 = vst [vmem:[#allocation98_spill] sm:$0xff] %v40287_v41  ;;  %36771 = vmatpush3.msra.mxu1 %v39793_v6  ;;  %36778 = vmatpush3.msra.mxu0 %v39793_v6  ;;  %v38835_v12 = vld [vmem:[#allocation2 + $0x308] sm:$0xff] }
 0x1ce   :  { %36772 = vmatprep.mubr.msk.f32.mxu1 %vm97_vm0, %v38832_v1  ;;  %36779 = vmatprep.mubr.msk.f32.mxu0 %vm97_vm0, %v38833_v42 }
 0x1cf   :  { %36782 = vmatprep.subr.mxu1 %v39781_v63  ;;  %36789 = vmatprep.subr.mxu0 %v39781_v63 }
 0x1d0   :  { %36773 = vmatmul.mubr.msk.f32.vlgmr.msra.gmra.mxu1 %vm97_vm0, %v38834_v2  ;;  %36780 = vmatmul.mubr.msk.f32.vlgmr.msra.gmra.mxu0 %vm97_vm0, %v38835_v12  ;;  %v40297_v41 = vpop.f32.mrf.mxu1  ;;  %v40299_v14 = vpop.f32.mrf.mxu0  ;;  %v38836_v2 = vld [vmem:[#allocation2 + $0x310] sm:$0xff]  ;;  %v38837_v12 = vld [vmem:[#allocation2 + $0x320] sm:$0xff] }
 0x1d1   :  { %45043 = vst [vmem:[#allocation99_spill] sm:$0xff] %v40297_v41  ;;  %45044 = vst [vmem:[#allocation100_spill] sm:$0xff] %v40299_v14  ;;  %36783 = vmatpush3.msra.mxu1 %v39781_v63  ;;  %36790 = vmatpush3.msra.mxu0 %v39781_v63  ;;  %v38838_v14 = vld [vmem:[#allocation2 + $0x318] sm:$0xff] }
 0x1d2   :  { %36784 = vmatprep.subr.mxu1 %v39793_v6  ;;  %36791 = vmatprep.subr.mxu0 %v39793_v6  ;;  %v40305_v1 = vpop.f32.mrf.mxu1  ;;  %v40307_v42 = vpop.f32.mrf.mxu0 }
 0x1d3   :  { %45045 = vst [vmem:[#allocation101_spill] sm:$0xff] %v40305_v1  ;;  %45046 = vst [vmem:[#allocation102_spill] sm:$0xff] %v40307_v42  ;;  %36785 = vmatpush3.msra.mxu1 %v39793_v6  ;;  %36792 = vmatpush3.msra.mxu0 %v39793_v6  ;;  %v38839_v1 = vld [vmem:[#allocation2 + $0x328] sm:$0xff] }
 0x1d4   :  { %36786 = vmatprep.mubr.msk.f32.mxu1 %vm97_vm0, %v38836_v2  ;;  %36793 = vmatprep.mubr.msk.f32.mxu0 %vm97_vm0, %v38837_v12 }
 0x1d5   :  { %36796 = vmatprep.subr.mxu1 %v39781_v63  ;;  %36803 = vmatprep.subr.mxu0 %v39781_v63 }
 0x1d6   :  { %36787 = vmatmul.mubr.msk.f32.vlgmr.msra.gmra.mxu1 %vm97_vm0, %v38838_v14  ;;  %36794 = vmatmul.mubr.msk.f32.vlgmr.msra.gmra.mxu0 %vm97_vm0, %v38839_v1  ;;  %v40317_v42 = vpop.f32.mrf.mxu1  ;;  %v40319_v41 = vpop.f32.mrf.mxu0  ;;  %v38840_v14 = vld [vmem:[#allocation2 + $0x330] sm:$0xff]  ;;  %v38841_v1 = vld [vmem:[#allocation2 + $0x340] sm:$0xff] }
 0x1d7   :  { %45047 = vst [vmem:[#allocation103_spill] sm:$0xff] %v40317_v42  ;;  %45048 = vst [vmem:[#allocation104_spill] sm:$0xff] %v40319_v41  ;;  %36797 = vmatpush3.msra.mxu1 %v39781_v63  ;;  %36804 = vmatpush3.msra.mxu0 %v39781_v63  ;;  %v38842_v41 = vld [vmem:[#allocation2 + $0x338] sm:$0xff] }
 0x1d8   :  { %36798 = vmatprep.subr.mxu1 %v39793_v6  ;;  %36805 = vmatprep.subr.mxu0 %v39793_v6  ;;  %v40325_v2 = vpop.f32.mrf.mxu1  ;;  %v40327_v12 = vpop.f32.mrf.mxu0 }
 0x1d9   :  { %45049 = vst [vmem:[#allocation105_spill] sm:$0xff] %v40325_v2  ;;  %45050 = vst [vmem:[#allocation106_spill] sm:$0xff] %v40327_v12  ;;  %36799 = vmatpush3.msra.mxu1 %v39793_v6  ;;  %36806 = vmatpush3.msra.mxu0 %v39793_v6  ;;  %v38843_v2 = vld [vmem:[#allocation2 + $0x348] sm:$0xff] }
 0x1da   :  { %36800 = vmatprep.mubr.msk.f32.mxu1 %vm97_vm0, %v38840_v14  ;;  %36807 = vmatprep.mubr.msk.f32.mxu0 %vm97_vm0, %v38841_v1 }
 0x1db   :  { %36810 = vmatprep.subr.mxu1 %v39781_v63  ;;  %36817 = vmatprep.subr.mxu0 %v39781_v63 }
 0x1dc   :  { %36801 = vmatmul.mubr.msk.f32.vlgmr.msra.gmra.mxu1 %vm97_vm0, %v38842_v41  ;;  %36808 = vmatmul.mubr.msk.f32.vlgmr.msra.gmra.mxu0 %vm97_vm0, %v38843_v2  ;;  %v40337_v12 = vpop.f32.mrf.mxu1  ;;  %v40339_v42 = vpop.f32.mrf.mxu0  ;;  %v38844_v41 = vld [vmem:[#allocation2 + $0x350] sm:$0xff]  ;;  %v38845_v2 = vld [vmem:[#allocation2 + $0x360] sm:$0xff] }
 0x1dd   :  { %45051 = vst [vmem:[#allocation107_spill] sm:$0xff] %v40337_v12  ;;  %45052 = vst [vmem:[#allocation108_spill] sm:$0xff] %v40339_v42  ;;  %36811 = vmatpush3.msra.mxu1 %v39781_v63  ;;  %36818 = vmatpush3.msra.mxu0 %v39781_v63  ;;  %v38846_v42 = vld [vmem:[#allocation2 + $0x358] sm:$0xff] }
 0x1de   :  { %36812 = vmatprep.subr.mxu1 %v39793_v6  ;;  %36819 = vmatprep.subr.mxu0 %v39793_v6  ;;  %v40345_v14 = vpop.f32.mrf.mxu1  ;;  %v40347_v1 = vpop.f32.mrf.mxu0 }
 0x1df   :  { %45053 = vst [vmem:[#allocation109_spill] sm:$0xff] %v40345_v14  ;;  %45054 = vst [vmem:[#allocation110_spill] sm:$0xff] %v40347_v1  ;;  %36813 = vmatpush3.msra.mxu1 %v39793_v6  ;;  %36820 = vmatpush3.msra.mxu0 %v39793_v6  ;;  %v38847_v14 = vld [vmem:[#allocation2 + $0x368] sm:$0xff] }
 0x1e0   :  { %36814 = vmatprep.mubr.msk.f32.mxu1 %vm97_vm0, %v38844_v41  ;;  %36821 = vmatprep.mubr.msk.f32.mxu0 %vm97_vm0, %v38845_v2 }
 0x1e1   :  { %36824 = vmatprep.subr.mxu1 %v39781_v63  ;;  %36831 = vmatprep.subr.mxu0 %v39781_v63 }
 0x1e2   :  { %36815 = vmatmul.mubr.msk.f32.vlgmr.msra.gmra.mxu1 %vm97_vm0, %v38846_v42  ;;  %36822 = vmatmul.mubr.msk.f32.vlgmr.msra.gmra.mxu0 %vm97_vm0, %v38847_v14  ;;  %v40357_v1 = vpop.f32.mrf.mxu1  ;;  %v40359_v12 = vpop.f32.mrf.mxu0  ;;  %v38848_v42 = vld [vmem:[#allocation2 + $0x370] sm:$0xff]  ;;  %v38849_v14 = vld [vmem:[#allocation2 + $0x380] sm:$0xff] }
 0x1e3   :  { %45055 = vst [vmem:[#allocation111_spill] sm:$0xff] %v40357_v1  ;;  %45056 = vst [vmem:[#allocation112_spill] sm:$0xff] %v40359_v12  ;;  %36825 = vmatpush3.msra.mxu1 %v39781_v63  ;;  %36832 = vmatpush3.msra.mxu0 %v39781_v63  ;;  %v38850_v12 = vld [vmem:[#allocation2 + $0x378] sm:$0xff] }
 0x1e4   :  { %36826 = vmatprep.subr.mxu1 %v39793_v6  ;;  %36833 = vmatprep.subr.mxu0 %v39793_v6  ;;  %v40365_v41 = vpop.f32.mrf.mxu1  ;;  %v40367_v2 = vpop.f32.mrf.mxu0 }
 0x1e5   :  { %45057 = vst [vmem:[#allocation113_spill] sm:$0xff] %v40365_v41  ;;  %45058 = vst [vmem:[#allocation114_spill] sm:$0xff] %v40367_v2  ;;  %36827 = vmatpush3.msra.mxu1 %v39793_v6  ;;  %36834 = vmatpush3.msra.mxu0 %v39793_v6  ;;  %v38851_v41 = vld [vmem:[#allocation2 + $0x388] sm:$0xff] }
 0x1e6   :  { %36828 = vmatprep.mubr.msk.f32.mxu1 %vm97_vm0, %v38848_v42  ;;  %36835 = vmatprep.mubr.msk.f32.mxu0 %vm97_vm0, %v38849_v14 }
 0x1e7   :  { %36838 = vmatprep.subr.mxu1 %v39781_v63  ;;  %36845 = vmatprep.subr.mxu0 %v39781_v63 }
 0x1e8   :  { %36829 = vmatmul.mubr.msk.f32.vlgmr.msra.gmra.mxu1 %vm97_vm0, %v38850_v12  ;;  %36836 = vmatmul.mubr.msk.f32.vlgmr.msra.gmra.mxu0 %vm97_vm0, %v38851_v41  ;;  %v40377_v2 = vpop.f32.mrf.mxu1  ;;  %v40379_v1 = vpop.f32.mrf.mxu0  ;;  %v38852_v12 = vld [vmem:[#allocation2 + $0x390] sm:$0xff]  ;;  %v38853_v41 = vld [vmem:[#allocation2 + $0x3a0] sm:$0xff] }
 0x1e9   :  { %45059 = vst [vmem:[#allocation115_spill] sm:$0xff] %v40377_v2  ;;  %45060 = vst [vmem:[#allocation116_spill] sm:$0xff] %v40379_v1  ;;  %36839 = vmatpush3.msra.mxu1 %v39781_v63  ;;  %36846 = vmatpush3.msra.mxu0 %v39781_v63  ;;  %v38854_v1 = vld [vmem:[#allocation2 + $0x398] sm:$0xff] }
 0x1ea   :  { %36840 = vmatprep.subr.mxu1 %v39793_v6  ;;  %36847 = vmatprep.subr.mxu0 %v39793_v6  ;;  %v40385_v42 = vpop.f32.mrf.mxu1  ;;  %v40387_v14 = vpop.f32.mrf.mxu0 }
 0x1eb   :  { %45061 = vst [vmem:[#allocation117_spill] sm:$0xff] %v40385_v42  ;;  %45062 = vst [vmem:[#allocation118_spill] sm:$0xff] %v40387_v14  ;;  %36841 = vmatpush3.msra.mxu1 %v39793_v6  ;;  %36848 = vmatpush3.msra.mxu0 %v39793_v6  ;;  %v38855_v42 = vld [vmem:[#allocation2 + $0x3a8] sm:$0xff] }
 0x1ec   :  { %36842 = vmatprep.mubr.msk.f32.mxu1 %vm97_vm0, %v38852_v12  ;;  %36849 = vmatprep.mubr.msk.f32.mxu0 %vm97_vm0, %v38853_v41 }
 0x1ed   :  { %36852 = vmatprep.subr.mxu1 %v39781_v63  ;;  %36859 = vmatprep.subr.mxu0 %v39781_v63 }
 0x1ee   :  { %36843 = vmatmul.mubr.msk.f32.vlgmr.msra.gmra.mxu1 %vm97_vm0, %v38854_v1  ;;  %36850 = vmatmul.mubr.msk.f32.vlgmr.msra.gmra.mxu0 %vm97_vm0, %v38855_v42  ;;  %v40397_v14 = vpop.f32.mrf.mxu1  ;;  %v40399_v2 = vpop.f32.mrf.mxu0  ;;  %v38856_v1 = vld [vmem:[#allocation2 + $0x3b0] sm:$0xff]  ;;  %v38857_v42 = vld [vmem:[#allocation2 + $0x3c0] sm:$0xff] }
 0x1ef   :  { %45063 = vst [vmem:[#allocation119_spill] sm:$0xff] %v40397_v14  ;;  %45064 = vst [vmem:[#allocation120_spill] sm:$0xff] %v40399_v2  ;;  %36853 = vmatpush3.msra.mxu1 %v39781_v63  ;;  %36860 = vmatpush3.msra.mxu0 %v39781_v63  ;;  %v38858_v2 = vld [vmem:[#allocation2 + $0x3b8] sm:$0xff] }
 0x1f0   :  { %36854 = vmatprep.subr.mxu1 %v39793_v6  ;;  %36861 = vmatprep.subr.mxu0 %v39793_v6  ;;  %v40405_v12 = vpop.f32.mrf.mxu1  ;;  %v40407_v41 = vpop.f32.mrf.mxu0 }
 0x1f1   :  { %45065 = vst [vmem:[#allocation121_spill] sm:$0xff] %v40405_v12  ;;  %45066 = vst [vmem:[#allocation122_spill] sm:$0xff] %v40407_v41  ;;  %36855 = vmatpush3.msra.mxu1 %v39793_v6  ;;  %36862 = vmatpush3.msra.mxu0 %v39793_v6  ;;  %v38859_v12 = vld [vmem:[#allocation2 + $0x3c8] sm:$0xff] }
 0x1f2   :  { %36856 = vmatprep.mubr.msk.f32.mxu1 %vm97_vm0, %v38856_v1  ;;  %36863 = vmatprep.mubr.msk.f32.mxu0 %vm97_vm0, %v38857_v42  ;;  %v38862_v1 = vld [vmem:[#allocation2 + $0x3e0] sm:$0xff]  ;;  %v38863_v42 = vld [vmem:[#allocation2 + $0x3d8] sm:$0xff] }
 0x1f3   :  { %36866 = vmatprep.subr.mxu1 %v39781_v63  ;;  %36873 = vmatprep.subr.mxu0 %v39781_v63 }
 0x1f4   :  { %36857 = vmatmul.mubr.msk.f32.vlgmr.msra.gmra.mxu1 %vm97_vm0, %v38858_v2  ;;  %36864 = vmatmul.mubr.msk.f32.vlgmr.msra.gmra.mxu0 %vm97_vm0, %v38859_v12  ;;  %v40417_v41 = vpop.f32.mrf.mxu1  ;;  %v40419_v14 = vpop.f32.mrf.mxu0  ;;  %v38861_v12 = vld [vmem:[#allocation2 + $0x3d0] sm:$0xff] }
 0x1f5   :  { %45067 = vst [vmem:[#allocation123_spill] sm:$0xff] %v40417_v41  ;;  %45068 = vst [vmem:[#allocation124_spill] sm:$0xff] %v40419_v14  ;;  %36867 = vmatpush3.msra.mxu1 %v40421_v38  ;;  %36874 = vmatpush3.msra.mxu0 %v40421_v38 }
 0x1f6   :  { %36868 = vmatprep.subr.mxu1 %v39793_v6  ;;  %36875 = vmatprep.subr.mxu0 %v39793_v6  ;;  %v40427_v63 = vpop.f32.mrf.mxu1  ;;  %v40429_v2 = vpop.f32.mrf.mxu0 }
 0x1f7   :  { %45069 = vst [vmem:[#allocation125_spill] sm:$0xff] %v40427_v63  ;;  %45070 = vst [vmem:[#allocation126_spill] sm:$0xff] %v40429_v2  ;;  %36869 = vmatpush3.msra.mxu1 %v39793_v6  ;;  %36876 = vmatpush3.msra.mxu0 %v39793_v6  ;;  %v38864_v63 = vld [vmem:[#allocation2 + $0x3e8] sm:$0xff]  ;;  %v40445_v6 = vld [vmem:[#allocation8] sm:$0xff] }
 0x1f8   :  { %36870 = vmatprep.mubr.msk.f32.mxu1 %vm97_vm0, %v38861_v12  ;;  %36877 = vmatprep.mubr.msk.f32.mxu0 %vm97_vm0, %v38862_v1 }
 0x1f9   :  { %36880 = vmatprep.subr.mxu1 %v40421_v38  ;;  %36887 = vmatprep.subr.mxu0 %v40421_v38 }
 0x1fa   :  { %36871 = vmatmul.mubr.msk.f32.vlgmr.msra.gmra.mxu1 %vm97_vm0, %v38863_v42  ;;  %36878 = vmatmul.mubr.msk.f32.vlgmr.msra.gmra.mxu0 %vm97_vm0, %v38864_v63  ;;  %v40439_v2 = vpop.f32.mrf.mxu1  ;;  %v40441_v14 = vpop.f32.mrf.mxu0  ;;  %v38866_v63 = vld [vmem:[#allocation2 + $0x3f0] sm:$0xff]  ;;  %v38867_v42 = vld [vmem:[#allocation2 + $0x400] sm:$0xff] }
 0x1fb   :  { %45071 = vst [vmem:[#allocation127_spill] sm:$0xff] %v40439_v2  ;;  %45072 = vst [vmem:[#allocation128_spill] sm:$0xff] %v40441_v14  ;;  %36881 = vmatpush3.msra.mxu1 %v40421_v38  ;;  %36888 = vmatpush3.msra.mxu0 %v40421_v38  ;;  %v38868_v14 = vld [vmem:[#allocation2 + $0x3f8] sm:$0xff] }
 0x1fc   :  { %36882 = vmatprep.subr.mxu1 %v40445_v6  ;;  %36889 = vmatprep.subr.mxu0 %v40445_v6  ;;  %v40449_v12 = vpop.f32.mrf.mxu1  ;;  %v40451_v1 = vpop.f32.mrf.mxu0 }
 0x1fd   :  { %45073 = vst [vmem:[#allocation129_spill] sm:$0xff] %v40449_v12  ;;  %45074 = vst [vmem:[#allocation130_spill] sm:$0xff] %v40451_v1  ;;  %36883 = vmatpush3.msra.mxu1 %v40445_v6  ;;  %36890 = vmatpush3.msra.mxu0 %v40445_v6  ;;  %v38869_v12 = vld [vmem:[#allocation2 + $0x408] sm:$0xff] }
 0x1fe   :  { %36884 = vmatprep.mubr.msk.f32.mxu1 %vm97_vm0, %v38866_v63  ;;  %36891 = vmatprep.mubr.msk.f32.mxu0 %vm97_vm0, %v38867_v42 }
 0x1ff   :  { %36894 = vmatprep.subr.mxu1 %v40421_v38  ;;  %36901 = vmatprep.subr.mxu0 %v40421_v38 }
 0x200   :  { %36885 = vmatmul.mubr.msk.f32.vlgmr.msra.gmra.mxu1 %vm97_vm0, %v38868_v14  ;;  %36892 = vmatmul.mubr.msk.f32.vlgmr.msra.gmra.mxu0 %vm97_vm0, %v38869_v12  ;;  %v40461_v1 = vpop.f32.mrf.mxu1  ;;  %v40463_v2 = vpop.f32.mrf.mxu0  ;;  %v38870_v14 = vld [vmem:[#allocation2 + $0x410] sm:$0xff]  ;;  %v38871_v12 = vld [vmem:[#allocation2 + $0x420] sm:$0xff] }
 0x201   :  { %45075 = vst [vmem:[#allocation131_spill] sm:$0xff] %v40461_v1  ;;  %45076 = vst [vmem:[#allocation132_spill] sm:$0xff] %v40463_v2  ;;  %36895 = vmatpush3.msra.mxu1 %v40421_v38  ;;  %36902 = vmatpush3.msra.mxu0 %v40421_v38  ;;  %v38872_v2 = vld [vmem:[#allocation2 + $0x418] sm:$0xff] }
 0x202   :  { %36896 = vmatprep.subr.mxu1 %v40445_v6  ;;  %36903 = vmatprep.subr.mxu0 %v40445_v6  ;;  %v40469_v63 = vpop.f32.mrf.mxu1  ;;  %v40471_v42 = vpop.f32.mrf.mxu0 }
 0x203   :  { %45077 = vst [vmem:[#allocation133_spill] sm:$0xff] %v40469_v63  ;;  %45078 = vst [vmem:[#allocation134_spill] sm:$0xff] %v40471_v42  ;;  %36897 = vmatpush3.msra.mxu1 %v40445_v6  ;;  %36904 = vmatpush3.msra.mxu0 %v40445_v6  ;;  %v38873_v63 = vld [vmem:[#allocation2 + $0x428] sm:$0xff] }
 0x204   :  { %36898 = vmatprep.mubr.msk.f32.mxu1 %vm97_vm0, %v38870_v14  ;;  %36905 = vmatprep.mubr.msk.f32.mxu0 %vm97_vm0, %v38871_v12 }
 0x205   :  { %36908 = vmatprep.subr.mxu1 %v40421_v38  ;;  %36915 = vmatprep.subr.mxu0 %v40421_v38 }
 0x206   :  { %36899 = vmatmul.mubr.msk.f32.vlgmr.msra.gmra.mxu1 %vm97_vm0, %v38872_v2  ;;  %36906 = vmatmul.mubr.msk.f32.vlgmr.msra.gmra.mxu0 %vm97_vm0, %v38873_v63  ;;  %v40481_v42 = vpop.f32.mrf.mxu1  ;;  %v40483_v1 = vpop.f32.mrf.mxu0  ;;  %v38874_v2 = vld [vmem:[#allocation2 + $0x430] sm:$0xff]  ;;  %v38875_v63 = vld [vmem:[#allocation2 + $0x440] sm:$0xff] }
 0x207   :  { %45079 = vst [vmem:[#allocation135_spill] sm:$0xff] %v40481_v42  ;;  %45080 = vst [vmem:[#allocation136_spill] sm:$0xff] %v40483_v1  ;;  %36909 = vmatpush3.msra.mxu1 %v40421_v38  ;;  %36916 = vmatpush3.msra.mxu0 %v40421_v38  ;;  %v38876_v1 = vld [vmem:[#allocation2 + $0x438] sm:$0xff] }
 0x208   :  { %36910 = vmatprep.subr.mxu1 %v40445_v6  ;;  %36917 = vmatprep.subr.mxu0 %v40445_v6  ;;  %v40489_v14 = vpop.f32.mrf.mxu1  ;;  %v40491_v12 = vpop.f32.mrf.mxu0 }
 0x209   :  { %45081 = vst [vmem:[#allocation137_spill] sm:$0xff] %v40489_v14  ;;  %45082 = vst [vmem:[#allocation138_spill] sm:$0xff] %v40491_v12  ;;  %36911 = vmatpush3.msra.mxu1 %v40445_v6  ;;  %36918 = vmatpush3.msra.mxu0 %v40445_v6  ;;  %v38877_v14 = vld [vmem:[#allocation2 + $0x448] sm:$0xff] }
 0x20a   :  { %36912 = vmatprep.mubr.msk.f32.mxu1 %vm97_vm0, %v38874_v2  ;;  %36919 = vmatprep.mubr.msk.f32.mxu0 %vm97_vm0, %v38875_v63 }
 0x20b   :  { %36922 = vmatprep.subr.mxu1 %v40421_v38  ;;  %36929 = vmatprep.subr.mxu0 %v40421_v38 }
 0x20c   :  { %36913 = vmatmul.mubr.msk.f32.vlgmr.msra.gmra.mxu1 %vm97_vm0, %v38876_v1  ;;  %36920 = vmatmul.mubr.msk.f32.vlgmr.msra.gmra.mxu0 %vm97_vm0, %v38877_v14  ;;  %v40501_v12 = vpop.f32.mrf.mxu1  ;;  %v40503_v42 = vpop.f32.mrf.mxu0  ;;  %v38878_v1 = vld [vmem:[#allocation2 + $0x450] sm:$0xff]  ;;  %v38879_v14 = vld [vmem:[#allocation2 + $0x460] sm:$0xff] }
 0x20d   :  { %45083 = vst [vmem:[#allocation139_spill] sm:$0xff] %v40501_v12  ;;  %45084 = vst [vmem:[#allocation140_spill] sm:$0xff] %v40503_v42  ;;  %36923 = vmatpush3.msra.mxu1 %v40421_v38  ;;  %36930 = vmatpush3.msra.mxu0 %v40421_v38  ;;  %v38880_v42 = vld [vmem:[#allocation2 + $0x458] sm:$0xff] }
 0x20e   :  { %36924 = vmatprep.subr.mxu1 %v40445_v6  ;;  %36931 = vmatprep.subr.mxu0 %v40445_v6  ;;  %v40509_v2 = vpop.f32.mrf.mxu1  ;;  %v40511_v63 = vpop.f32.mrf.mxu0 }
 0x20f   :  { %45085 = vst [vmem:[#allocation141_spill] sm:$0xff] %v40509_v2  ;;  %45086 = vst [vmem:[#allocation142_spill] sm:$0xff] %v40511_v63  ;;  %36925 = vmatpush3.msra.mxu1 %v40445_v6  ;;  %36932 = vmatpush3.msra.mxu0 %v40445_v6  ;;  %v38881_v2 = vld [vmem:[#allocation2 + $0x468] sm:$0xff] }
 0x210   :  { %36926 = vmatprep.mubr.msk.f32.mxu1 %vm97_vm0, %v38878_v1  ;;  %36933 = vmatprep.mubr.msk.f32.mxu0 %vm97_vm0, %v38879_v14 }
 0x211   :  { %36936 = vmatprep.subr.mxu1 %v40421_v38  ;;  %36943 = vmatprep.subr.mxu0 %v40421_v38 }
 0x212   :  { %36927 = vmatmul.mubr.msk.f32.vlgmr.msra.gmra.mxu1 %vm97_vm0, %v38880_v42  ;;  %36934 = vmatmul.mubr.msk.f32.vlgmr.msra.gmra.mxu0 %vm97_vm0, %v38881_v2  ;;  %v40521_v63 = vpop.f32.mrf.mxu1  ;;  %v40523_v12 = vpop.f32.mrf.mxu0  ;;  %v38882_v42 = vld [vmem:[#allocation2 + $0x470] sm:$0xff]  ;;  %v38883_v2 = vld [vmem:[#allocation2 + $0x480] sm:$0xff] }
 0x213   :  { %45087 = vst [vmem:[#allocation143_spill] sm:$0xff] %v40521_v63  ;;  %45088 = vst [vmem:[#allocation144_spill] sm:$0xff] %v40523_v12  ;;  %36937 = vmatpush3.msra.mxu1 %v40421_v38  ;;  %36944 = vmatpush3.msra.mxu0 %v40421_v38  ;;  %v38884_v12 = vld [vmem:[#allocation2 + $0x478] sm:$0xff] }
 0x214   :  { %36938 = vmatprep.subr.mxu1 %v40445_v6  ;;  %36945 = vmatprep.subr.mxu0 %v40445_v6  ;;  %v40529_v1 = vpop.f32.mrf.mxu1  ;;  %v40531_v14 = vpop.f32.mrf.mxu0 }
 0x215   :  { %45089 = vst [vmem:[#allocation145_spill] sm:$0xff] %v40529_v1  ;;  %45090 = vst [vmem:[#allocation146_spill] sm:$0xff] %v40531_v14  ;;  %36939 = vmatpush3.msra.mxu1 %v40445_v6  ;;  %36946 = vmatpush3.msra.mxu0 %v40445_v6  ;;  %v38885_v1 = vld [vmem:[#allocation2 + $0x488] sm:$0xff] }
 0x216   :  { %36940 = vmatprep.mubr.msk.f32.mxu1 %vm97_vm0, %v38882_v42  ;;  %36947 = vmatprep.mubr.msk.f32.mxu0 %vm97_vm0, %v38883_v2 }
 0x217   :  { %36950 = vmatprep.subr.mxu1 %v40421_v38  ;;  %36957 = vmatprep.subr.mxu0 %v40421_v38 }
 0x218   :  { %36941 = vmatmul.mubr.msk.f32.vlgmr.msra.gmra.mxu1 %vm97_vm0, %v38884_v12  ;;  %36948 = vmatmul.mubr.msk.f32.vlgmr.msra.gmra.mxu0 %vm97_vm0, %v38885_v1  ;;  %v40541_v14 = vpop.f32.mrf.mxu1  ;;  %v40543_v63 = vpop.f32.mrf.mxu0  ;;  %v38886_v12 = vld [vmem:[#allocation2 + $0x490] sm:$0xff]  ;;  %v38887_v1 = vld [vmem:[#allocation2 + $0x4a0] sm:$0xff] }
 0x219   :  { %45091 = vst [vmem:[#allocation147_spill] sm:$0xff] %v40541_v14  ;;  %45092 = vst [vmem:[#allocation148_spill] sm:$0xff] %v40543_v63  ;;  %36951 = vmatpush3.msra.mxu1 %v40421_v38  ;;  %36958 = vmatpush3.msra.mxu0 %v40421_v38  ;;  %v38888_v63 = vld [vmem:[#allocation2 + $0x498] sm:$0xff] }
 0x21a   :  { %36952 = vmatprep.subr.mxu1 %v40445_v6  ;;  %36959 = vmatprep.subr.mxu0 %v40445_v6  ;;  %v40549_v42 = vpop.f32.mrf.mxu1  ;;  %v40551_v2 = vpop.f32.mrf.mxu0 }
 0x21b   :  { %45093 = vst [vmem:[#allocation149_spill] sm:$0xff] %v40549_v42  ;;  %45094 = vst [vmem:[#allocation150_spill] sm:$0xff] %v40551_v2  ;;  %36953 = vmatpush3.msra.mxu1 %v40445_v6  ;;  %36960 = vmatpush3.msra.mxu0 %v40445_v6  ;;  %v38889_v42 = vld [vmem:[#allocation2 + $0x4a8] sm:$0xff] }
 0x21c   :  { %36954 = vmatprep.mubr.msk.f32.mxu1 %vm97_vm0, %v38886_v12  ;;  %36961 = vmatprep.mubr.msk.f32.mxu0 %vm97_vm0, %v38887_v1 }
 0x21d   :  { %36964 = vmatprep.subr.mxu1 %v40421_v38  ;;  %36971 = vmatprep.subr.mxu0 %v40421_v38 }
 0x21e   :  { %36955 = vmatmul.mubr.msk.f32.vlgmr.msra.gmra.mxu1 %vm97_vm0, %v38888_v63  ;;  %36962 = vmatmul.mubr.msk.f32.vlgmr.msra.gmra.mxu0 %vm97_vm0, %v38889_v42  ;;  %v40561_v2 = vpop.f32.mrf.mxu1  ;;  %v40563_v14 = vpop.f32.mrf.mxu0  ;;  %v38890_v63 = vld [vmem:[#allocation2 + $0x4b0] sm:$0xff]  ;;  %v38891_v42 = vld [vmem:[#allocation2 + $0x4c0] sm:$0xff] }
 0x21f   :  { %45095 = vst [vmem:[#allocation151_spill] sm:$0xff] %v40561_v2  ;;  %45096 = vst [vmem:[#allocation152_spill] sm:$0xff] %v40563_v14  ;;  %36965 = vmatpush3.msra.mxu1 %v40421_v38  ;;  %36972 = vmatpush3.msra.mxu0 %v40421_v38  ;;  %v38892_v14 = vld [vmem:[#allocation2 + $0x4b8] sm:$0xff] }
 0x220   :  { %36966 = vmatprep.subr.mxu1 %v40445_v6  ;;  %36973 = vmatprep.subr.mxu0 %v40445_v6  ;;  %v40569_v12 = vpop.f32.mrf.mxu1  ;;  %v40571_v1 = vpop.f32.mrf.mxu0 }
 0x221   :  { %45097 = vst [vmem:[#allocation153_spill] sm:$0xff] %v40569_v12  ;;  %45098 = vst [vmem:[#allocation154_spill] sm:$0xff] %v40571_v1  ;;  %36967 = vmatpush3.msra.mxu1 %v40445_v6  ;;  %36974 = vmatpush3.msra.mxu0 %v40445_v6  ;;  %v38893_v12 = vld [vmem:[#allocation2 + $0x4c8] sm:$0xff] }
 0x222   :  { %36968 = vmatprep.mubr.msk.f32.mxu1 %vm97_vm0, %v38890_v63  ;;  %36975 = vmatprep.mubr.msk.f32.mxu0 %vm97_vm0, %v38891_v42 }
 0x223   :  { %36978 = vmatprep.subr.mxu1 %v40421_v38  ;;  %36985 = vmatprep.subr.mxu0 %v40421_v38 }
 0x224   :  { %36969 = vmatmul.mubr.msk.f32.vlgmr.msra.gmra.mxu1 %vm97_vm0, %v38892_v14  ;;  %36976 = vmatmul.mubr.msk.f32.vlgmr.msra.gmra.mxu0 %vm97_vm0, %v38893_v12  ;;  %v40581_v1 = vpop.f32.mrf.mxu1  ;;  %v40583_v2 = vpop.f32.mrf.mxu0  ;;  %v38894_v14 = vld [vmem:[#allocation2 + $0x4d0] sm:$0xff]  ;;  %v38895_v12 = vld [vmem:[#allocation2 + $0x4e0] sm:$0xff] }
 0x225   :  { %45099 = vst [vmem:[#allocation155_spill] sm:$0xff] %v40581_v1  ;;  %45100 = vst [vmem:[#allocation156_spill] sm:$0xff] %v40583_v2  ;;  %36979 = vmatpush3.msra.mxu1 %v40421_v38  ;;  %36986 = vmatpush3.msra.mxu0 %v40421_v38  ;;  %v38896_v2 = vld [vmem:[#allocation2 + $0x4d8] sm:$0xff] }
 0x226   :  { %36980 = vmatprep.subr.mxu1 %v40445_v6  ;;  %36987 = vmatprep.subr.mxu0 %v40445_v6  ;;  %v40589_v63 = vpop.f32.mrf.mxu1  ;;  %v40591_v42 = vpop.f32.mrf.mxu0 }
 0x227   :  { %45101 = vst [vmem:[#allocation157_spill] sm:$0xff] %v40589_v63  ;;  %45102 = vst [vmem:[#allocation158_spill] sm:$0xff] %v40591_v42  ;;  %36981 = vmatpush3.msra.mxu1 %v40445_v6  ;;  %36988 = vmatpush3.msra.mxu0 %v40445_v6  ;;  %v38897_v63 = vld [vmem:[#allocation2 + $0x4e8] sm:$0xff] }
 0x228   :  { %36982 = vmatprep.mubr.msk.f32.mxu1 %vm97_vm0, %v38894_v14  ;;  %36989 = vmatprep.mubr.msk.f32.mxu0 %vm97_vm0, %v38895_v12  ;;  %v40607_v14 = vld [vmem:[#allocation9] sm:$0xff] }
 0x229   :  { %36992 = vmatprep.subr.mxu1 %v40421_v38  ;;  %36999 = vmatprep.subr.mxu0 %v39657_v13 }
 0x22a   :  { %36983 = vmatmul.mubr.msk.f32.vlgmr.msra.gmra.mxu1 %vm97_vm0, %v38896_v2  ;;  %36990 = vmatmul.mubr.msk.f32.vlgmr.msra.gmra.mxu0 %vm97_vm0, %v38897_v63  ;;  %v40601_v42 = vpop.f32.mrf.mxu1  ;;  %v40603_v1 = vpop.f32.mrf.mxu0  ;;  %v40617_v63 = vld [vmem:[#allocation9 + $0x8] sm:$0xff] }
 0x22b   :  { %45103 = vst [vmem:[#allocation159_spill] sm:$0xff] %v40601_v42  ;;  %45104 = vst [vmem:[#allocation160_spill] sm:$0xff] %v40603_v1  ;;  %36993 = vmatpush3.msra.mxu1 %v40421_v38  ;;  %37000 = vmatpush3.msra.mxu0 %v39657_v13  ;;  %v38898_v1 = vld [vmem:[#allocation2 + $0x4f0] sm:$0xff]  ;;  %v38899_v38 = vld [vmem:[#allocation2 + $0x4f8] sm:$0xff] }
 0x22c   :  { %36994 = vmatprep.subr.mxu1 %v40445_v6  ;;  %37001 = vmatprep.subr.mxu0 %v39663_v16  ;;  %v40611_v12 = vpop.f32.mrf.mxu1  ;;  %v40613_v2 = vpop.f32.mrf.mxu0 }
 0x22d   :  { %45105 = vst [vmem:[#allocation161_spill] sm:$0xff] %v40611_v12  ;;  %45106 = vst [vmem:[#allocation162_spill] sm:$0xff] %v40613_v2  ;;  %36995 = vmatpush3.msra.mxu1 %v40445_v6  ;;  %37002 = vmatpush3.msra.mxu0 %v39663_v16 }
 0x22e   :  { %36996 = vmatprep.mubr.msk.f32.mxu1 %vm97_vm0, %v38898_v1  ;;  %37003 = vmatprep.mubr.msk.f32.mxu0 %vm97_vm0, %v40607_v14 }
 0x22f   :  { %37006 = vmatprep.subr.mxu1 %v39673_v19  ;;  %37013 = vmatprep.subr.mxu0 %v39675_v20 }
 0x230   :  { %36997 = vmatmul.mubr.msk.f32.vlgmr.msra.gmra.mxu1 %vm97_vm0, %v38899_v38  ;;  %37004 = vmatmul.mubr.msk.f32.vlgmr.msra.gmra.mxu0 %vm97_vm0, %v40617_v63  ;;  %v40627_v6 = vpop.f32.mrf.mxu1  ;;  %v40629_v2 = vpop.f32.mrf.mxu0 }
 0x231   :  { %45107 = vst [vmem:[#allocation163_spill] sm:$0xff] %v40627_v6  ;;  %45108 = vst [vmem:[#allocation164_spill] sm:$0xff] %v40629_v2  ;;  %37007 = vmatpush3.msra.mxu1 %v39673_v19  ;;  %37014 = vmatpush3.msra.mxu0 %v39675_v20  ;;  %v45163_v6 = vld [vmem:[#allocation30_spill] sm:$0xff] }
 0x232   :  { %37008 = vmatprep.subr.mxu1 %v39681_v23  ;;  %37015 = vmatprep.subr.mxu0 %v39683_v24  ;;  %v40635_v1 = vpop.f32.mrf.mxu1  ;;  %v40637_v12 = vpop.f32.mrf.mxu0 }
 0x233   :  { %45109 = vst [vmem:[#allocation165_spill] sm:$0xff] %v40635_v1  ;;  %45110 = vst [vmem:[#allocation166_spill] sm:$0xff] %v40637_v12  ;;  %37009 = vmatpush3.msra.mxu1 %v39681_v23  ;;  %37016 = vmatpush3.msra.mxu0 %v39683_v24 }
 0x234   :  { %37010 = vmatprep.mubr.msk.f32.mxu1 %vm97_vm0, %v40607_v14  ;;  %37017 = vmatprep.mubr.msk.f32.mxu0 %vm97_vm0, %v40607_v14 }
 0x235   :  { %37020 = vmatprep.subr.mxu1 %v39693_v27  ;;  %37027 = vmatprep.subr.mxu0 %v39695_v28 }
 0x236   :  { %37011 = vmatmul.mubr.msk.f32.vlgmr.msra.gmra.mxu1 %vm97_vm0, %v40617_v63  ;;  %37018 = vmatmul.mubr.msk.f32.vlgmr.msra.gmra.mxu0 %vm97_vm0, %v40617_v63  ;;  %v40651_v38 = vpop.f32.mrf.mxu1  ;;  %v40653_v12 = vpop.f32.mrf.mxu0 }
 0x237   :  { %45111 = vst [vmem:[#allocation167_spill] sm:$0xff] %v40651_v38  ;;  %45112 = vst [vmem:[#allocation168_spill] sm:$0xff] %v40653_v12  ;;  %37021 = vmatpush3.msra.mxu1 %v39693_v27  ;;  %37028 = vmatpush3.msra.mxu0 %v39695_v28 }
 0x238   :  { %37022 = vmatprep.subr.mxu1 %v39701_v31  ;;  %37029 = vmatprep.subr.mxu0 %v39703_v32  ;;  %v40659_v1 = vpop.f32.mrf.mxu1  ;;  %v40661_v2 = vpop.f32.mrf.mxu0 }
 0x239   :  { %45113 = vst [vmem:[#allocation169_spill] sm:$0xff] %v40659_v1  ;;  %45114 = vst [vmem:[#allocation170_spill] sm:$0xff] %v40661_v2  ;;  %37023 = vmatpush3.msra.mxu1 %v39701_v31  ;;  %37030 = vmatpush3.msra.mxu0 %v39703_v32 }
 0x23a   :  { %37024 = vmatprep.mubr.msk.f32.mxu1 %vm97_vm0, %v40607_v14  ;;  %37031 = vmatprep.mubr.msk.f32.mxu0 %vm97_vm0, %v40607_v14 }
 0x23b   :  { %37034 = vmatprep.subr.mxu1 %v39713_v35  ;;  %37041 = vmatprep.subr.mxu0 %v39715_v36 }
 0x23c   :  { %37025 = vmatmul.mubr.msk.f32.vlgmr.msra.gmra.mxu1 %vm97_vm0, %v40617_v63  ;;  %37032 = vmatmul.mubr.msk.f32.vlgmr.msra.gmra.mxu0 %vm97_vm0, %v40617_v63  ;;  %v40675_v2 = vpop.f32.mrf.mxu1  ;;  %v40677_v1 = vpop.f32.mrf.mxu0 }
 0x23d   :  { %45115 = vst [vmem:[#allocation171_spill] sm:$0xff] %v40675_v2  ;;  %45116 = vst [vmem:[#allocation172_spill] sm:$0xff] %v40677_v1  ;;  %37035 = vmatpush3.msra.mxu1 %v39713_v35  ;;  %37042 = vmatpush3.msra.mxu0 %v39715_v36 }
 0x23e   :  { %37036 = vmatprep.subr.mxu1 %v39721_v39  ;;  %37043 = vmatprep.subr.mxu0 %v39723_v40  ;;  %v40683_v12 = vpop.f32.mrf.mxu1  ;;  %v40685_v38 = vpop.f32.mrf.mxu0 }
 0x23f   :  { %45117 = vst [vmem:[#allocation173_spill] sm:$0xff] %v40683_v12  ;;  %45118 = vst [vmem:[#allocation174_spill] sm:$0xff] %v40685_v38  ;;  %37037 = vmatpush3.msra.mxu1 %v39721_v39  ;;  %37044 = vmatpush3.msra.mxu0 %v39723_v40 }
 0x240   :  { %37038 = vmatprep.mubr.msk.f32.mxu1 %vm97_vm0, %v40607_v14  ;;  %37045 = vmatprep.mubr.msk.f32.mxu0 %vm97_vm0, %v40607_v14 }
 0x241   :  { %37048 = vmatprep.subr.mxu1 %v39733_v43  ;;  %37055 = vmatprep.subr.mxu0 %v39735_v44 }
 0x242   :  { %37039 = vmatmul.mubr.msk.f32.vlgmr.msra.gmra.mxu1 %vm97_vm0, %v40617_v63  ;;  %37046 = vmatmul.mubr.msk.f32.vlgmr.msra.gmra.mxu0 %vm97_vm0, %v40617_v63  ;;  %v40699_v38 = vpop.f32.mrf.mxu1  ;;  %v40701_v12 = vpop.f32.mrf.mxu0 }
 0x243   :  { %45119 = vst [vmem:[#allocation175_spill] sm:$0xff] %v40699_v38  ;;  %45120 = vst [vmem:[#allocation176_spill] sm:$0xff] %v40701_v12  ;;  %37049 = vmatpush3.msra.mxu1 %v39733_v43  ;;  %37056 = vmatpush3.msra.mxu0 %v39735_v44 }
 0x244   :  { %37050 = vmatprep.subr.mxu1 %v39741_v47  ;;  %37057 = vmatprep.subr.mxu0 %v39743_v48  ;;  %v40707_v1 = vpop.f32.mrf.mxu1  ;;  %v40709_v2 = vpop.f32.mrf.mxu0 }
 0x245   :  { %45121 = vst [vmem:[#allocation177_spill] sm:$0xff] %v40707_v1  ;;  %45122 = vst [vmem:[#allocation178_spill] sm:$0xff] %v40709_v2  ;;  %37051 = vmatpush3.msra.mxu1 %v39741_v47  ;;  %37058 = vmatpush3.msra.mxu0 %v39743_v48 }
 0x246   :  { %37052 = vmatprep.mubr.msk.f32.mxu1 %vm97_vm0, %v40607_v14  ;;  %37059 = vmatprep.mubr.msk.f32.mxu0 %vm97_vm0, %v40607_v14 }
 0x247   :  { %37062 = vmatprep.subr.mxu1 %v39753_v51  ;;  %37069 = vmatprep.subr.mxu0 %v39755_v52 }
 0x248   :  { %37053 = vmatmul.mubr.msk.f32.vlgmr.msra.gmra.mxu1 %vm97_vm0, %v40617_v63  ;;  %37060 = vmatmul.mubr.msk.f32.vlgmr.msra.gmra.mxu0 %vm97_vm0, %v40617_v63  ;;  %v40723_v2 = vpop.f32.mrf.mxu1  ;;  %v40725_v1 = vpop.f32.mrf.mxu0 }
 0x249   :  { %45123 = vst [vmem:[#allocation179_spill] sm:$0xff] %v40723_v2  ;;  %45124 = vst [vmem:[#allocation180_spill] sm:$0xff] %v40725_v1  ;;  %37063 = vmatpush3.msra.mxu1 %v39753_v51  ;;  %37070 = vmatpush3.msra.mxu0 %v39755_v52 }
 0x24a   :  { %37064 = vmatprep.subr.mxu1 %v39761_v55  ;;  %37071 = vmatprep.subr.mxu0 %v39763_v56  ;;  %v40731_v12 = vpop.f32.mrf.mxu1  ;;  %v40733_v38 = vpop.f32.mrf.mxu0 }
 0x24b   :  { %45125 = vst [vmem:[#allocation181_spill] sm:$0xff] %v40731_v12  ;;  %45126 = vst [vmem:[#allocation182_spill] sm:$0xff] %v40733_v38  ;;  %37065 = vmatpush3.msra.mxu1 %v39761_v55  ;;  %37072 = vmatpush3.msra.mxu0 %v39763_v56 }
 0x24c   :  { %37066 = vmatprep.mubr.msk.f32.mxu1 %vm97_vm0, %v40607_v14  ;;  %37073 = vmatprep.mubr.msk.f32.mxu0 %vm97_vm0, %v40607_v14 }
 0x24d   :  { %37076 = vmatprep.subr.mxu1 %v39773_v59  ;;  %37083 = vmatprep.subr.mxu0 %v39775_v60 }
 0x24e   :  { %37067 = vmatmul.mubr.msk.f32.vlgmr.msra.gmra.mxu1 %vm97_vm0, %v40617_v63  ;;  %37074 = vmatmul.mubr.msk.f32.vlgmr.msra.gmra.mxu0 %vm97_vm0, %v40617_v63  ;;  %v40747_v38 = vpop.f32.mrf.mxu1  ;;  %v40749_v12 = vpop.f32.mrf.mxu0 }
 0x24f   :  { %45127 = vst [vmem:[#allocation183_spill] sm:$0xff] %v40747_v38  ;;  %45128 = vst [vmem:[#allocation184_spill] sm:$0xff] %v40749_v12  ;;  %37077 = vmatpush3.msra.mxu1 %v39773_v59  ;;  %37084 = vmatpush3.msra.mxu0 %v39775_v60 }
 0x250   :  { %37078 = vmatprep.subr.mxu1 %v39783_v0  ;;  %37085 = vmatprep.subr.mxu0 %v39785_v3  ;;  %v40755_v1 = vpop.f32.mrf.mxu1  ;;  %v40757_v2 = vpop.f32.mrf.mxu0 }
 0x251   :  { %45129 = vst [vmem:[#allocation185_spill] sm:$0xff] %v40755_v1  ;;  %45130 = vst [vmem:[#allocation186_spill] sm:$0xff] %v40757_v2  ;;  %37079 = vmatpush3.msra.mxu1 %v39783_v0  ;;  %37086 = vmatpush3.msra.mxu0 %v39785_v3 }
 0x252   :  { %37080 = vmatprep.mubr.msk.f32.mxu1 %vm97_vm0, %v40607_v14  ;;  %37087 = vmatprep.mubr.msk.f32.mxu0 %vm97_vm0, %v40607_v14 }
 0x253   :  { %37090 = vmatprep.subr.mxu1 %v39797_v7  ;;  %37097 = vmatprep.subr.mxu0 %v39799_v8 }
 0x254   :  { %37081 = vmatmul.mubr.msk.f32.vlgmr.msra.gmra.mxu1 %vm97_vm0, %v40617_v63  ;;  %37088 = vmatmul.mubr.msk.f32.vlgmr.msra.gmra.mxu0 %vm97_vm0, %v40617_v63  ;;  %v40771_v2 = vpop.f32.mrf.mxu1  ;;  %v40773_v1 = vpop.f32.mrf.mxu0 }
 0x255   :  { %45131 = vst [vmem:[#allocation187_spill] sm:$0xff] %v40771_v2  ;;  %45132 = vst [vmem:[#allocation188_spill] sm:$0xff] %v40773_v1  ;;  %37091 = vmatpush3.msra.mxu1 %v39797_v7  ;;  %37098 = vmatpush3.msra.mxu0 %v39799_v8 }
 0x256   :  { %37092 = vmatprep.subr.mxu1 %v39805_v9  ;;  %37099 = vmatprep.subr.mxu0 %v39807_v10  ;;  %v40779_v12 = vpop.f32.mrf.mxu1  ;;  %v40781_v38 = vpop.f32.mrf.mxu0 }
 0x257   :  { %45133 = vst [vmem:[#allocation189_spill] sm:$0xff] %v40779_v12  ;;  %45134 = vst [vmem:[#allocation190_spill] sm:$0xff] %v40781_v38  ;;  %37093 = vmatpush3.msra.mxu1 %v39805_v9  ;;  %37100 = vmatpush3.msra.mxu0 %v39807_v10 }
 0x258   :  { %37094 = vmatprep.mubr.msk.f32.mxu1 %vm97_vm0, %v40607_v14  ;;  %37101 = vmatprep.mubr.msk.f32.mxu0 %vm97_vm0, %v40607_v14 }
 0x259   :  { %37104 = vmatprep.subr.mxu1 %v39817_v15  ;;  %37111 = vmatprep.subr.mxu0 %v39819_v11 }
 0x25a   :  { %37095 = vmatmul.mubr.msk.f32.vlgmr.msra.gmra.mxu1 %vm97_vm0, %v40617_v63  ;;  %37102 = vmatmul.mubr.msk.f32.vlgmr.msra.gmra.mxu0 %vm97_vm0, %v40617_v63  ;;  %v40795_v38 = vpop.f32.mrf.mxu1  ;;  %v40797_v12 = vpop.f32.mrf.mxu0 }
 0x25b   :  { %45135 = vst [vmem:[#allocation191_spill] sm:$0xff] %v40795_v38  ;;  %45136 = vst [vmem:[#allocation192_spill] sm:$0xff] %v40797_v12  ;;  %37105 = vmatpush3.msra.mxu1 %v39817_v15  ;;  %37112 = vmatpush3.msra.mxu0 %v39819_v11 }
 0x25c   :  { %37106 = vmatprep.subr.mxu1 %v39825_v17  ;;  %37113 = vmatprep.subr.mxu0 %v39827_v18  ;;  %v40803_v1 = vpop.f32.mrf.mxu1  ;;  %v40805_v2 = vpop.f32.mrf.mxu0 }
 0x25d   :  { %45137 = vst [vmem:[#allocation193_spill] sm:$0xff] %v40803_v1  ;;  %45138 = vst [vmem:[#allocation194_spill] sm:$0xff] %v40805_v2  ;;  %37107 = vmatpush3.msra.mxu1 %v39825_v17  ;;  %37114 = vmatpush3.msra.mxu0 %v39827_v18 }
 0x25e   :  { %37108 = vmatprep.mubr.msk.f32.mxu1 %vm97_vm0, %v40607_v14  ;;  %37115 = vmatprep.mubr.msk.f32.mxu0 %vm97_vm0, %v40607_v14 }
 0x25f   :  { %37118 = vmatprep.subr.mxu1 %v39837_v29  ;;  %37125 = vmatprep.subr.mxu0 %v39839_v30 }
 0x260   :  { %37109 = vmatmul.mubr.msk.f32.vlgmr.msra.gmra.mxu1 %vm97_vm0, %v40617_v63  ;;  %37116 = vmatmul.mubr.msk.f32.vlgmr.msra.gmra.mxu0 %vm97_vm0, %v40617_v63  ;;  %v40819_v2 = vpop.f32.mrf.mxu1  ;;  %v40821_v1 = vpop.f32.mrf.mxu0 }
 0x261   :  { %45139 = vst [vmem:[#allocation195_spill] sm:$0xff] %v40819_v2  ;;  %45140 = vst [vmem:[#allocation196_spill] sm:$0xff] %v40821_v1  ;;  %37119 = vmatpush3.msra.mxu1 %v39837_v29  ;;  %37126 = vmatpush3.msra.mxu0 %v39839_v30 }
 0x262   :  { %37120 = vmatprep.subr.mxu1 %v39845_v33  ;;  %37127 = vmatprep.subr.mxu0 %v39847_v34  ;;  %v40827_v12 = vpop.f32.mrf.mxu1  ;;  %v40829_v38 = vpop.f32.mrf.mxu0 }
 0x263   :  { %45141 = vst [vmem:[#allocation197_spill] sm:$0xff] %v40827_v12  ;;  %45142 = vst [vmem:[#allocation198_spill] sm:$0xff] %v40829_v38  ;;  %37121 = vmatpush3.msra.mxu1 %v39845_v33  ;;  %37128 = vmatpush3.msra.mxu0 %v39847_v34 }
 0x264   :  { %37122 = vmatprep.mubr.msk.f32.mxu1 %vm97_vm0, %v40607_v14  ;;  %37129 = vmatprep.mubr.msk.f32.mxu0 %vm97_vm0, %v40607_v14 }
 0x265   :  { %37132 = vmatprep.subr.mxu1 %v39857_v45  ;;  %37139 = vmatprep.subr.mxu0 %v39859_v46 }
 0x266   :  { %37123 = vmatmul.mubr.msk.f32.vlgmr.msra.gmra.mxu1 %vm97_vm0, %v40617_v63  ;;  %37130 = vmatmul.mubr.msk.f32.vlgmr.msra.gmra.mxu0 %vm97_vm0, %v40617_v63  ;;  %v40843_v38 = vpop.f32.mrf.mxu1  ;;  %v40845_v12 = vpop.f32.mrf.mxu0 }
 0x267   :  { %45143 = vst [vmem:[#allocation199_spill] sm:$0xff] %v40843_v38  ;;  %45144 = vst [vmem:[#allocation200_spill] sm:$0xff] %v40845_v12  ;;  %37133 = vmatpush3.msra.mxu1 %v39857_v45  ;;  %37140 = vmatpush3.msra.mxu0 %v39859_v46 }
 0x268   :  { %37134 = vmatprep.subr.mxu1 %v39865_v49  ;;  %37141 = vmatprep.subr.mxu0 %v39867_v50  ;;  %v40851_v1 = vpop.f32.mrf.mxu1  ;;  %v40853_v2 = vpop.f32.mrf.mxu0 }
 0x269   :  { %45145 = vst [vmem:[#allocation201_spill] sm:$0xff] %v40851_v1  ;;  %45146 = vst [vmem:[#allocation202_spill] sm:$0xff] %v40853_v2  ;;  %37135 = vmatpush3.msra.mxu1 %v39865_v49  ;;  %37142 = vmatpush3.msra.mxu0 %v39867_v50 }
 0x26a   :  { %37136 = vmatprep.mubr.msk.f32.mxu1 %vm97_vm0, %v40607_v14  ;;  %37143 = vmatprep.mubr.msk.f32.mxu0 %vm97_vm0, %v40607_v14 }
 0x26b   :  { %37146 = vmatprep.subr.mxu1 %v39877_v61  ;;  %37153 = vmatprep.subr.mxu0 %v39879_v62 }
 0x26c   :  { %37137 = vmatmul.mubr.msk.f32.vlgmr.msra.gmra.mxu1 %vm97_vm0, %v40617_v63  ;;  %37144 = vmatmul.mubr.msk.f32.vlgmr.msra.gmra.mxu0 %vm97_vm0, %v40617_v63  ;;  %v40867_v2 = vpop.f32.mrf.mxu1  ;;  %v40869_v1 = vpop.f32.mrf.mxu0 }
 0x26d   :  { %45147 = vst [vmem:[#allocation203_spill] sm:$0xff] %v40867_v2  ;;  %45148 = vst [vmem:[#allocation204_spill] sm:$0xff] %v40869_v1  ;;  %37147 = vmatpush3.msra.mxu1 %v39877_v61  ;;  %37154 = vmatpush3.msra.mxu0 %v39879_v62 }
 0x26e   :  { %37148 = vmatprep.subr.mxu1 %v39885_v4  ;;  %37155 = vmatprep.subr.mxu0 %v39887_v5  ;;  %v40875_v12 = vpop.f32.mrf.mxu1  ;;  %v40877_v38 = vpop.f32.mrf.mxu0 }
 0x26f   :  { %45149 = vst [vmem:[#allocation205_spill] sm:$0xff] %v40875_v12  ;;  %45150 = vst [vmem:[#allocation206_spill] sm:$0xff] %v40877_v38  ;;  %37149 = vmatpush3.msra.mxu1 %v39885_v4  ;;  %37156 = vmatpush3.msra.mxu0 %v39887_v5  ;;  %v45330_v5 = vld [vmem:[#allocation118_spill] sm:$0xff] }
 0x270   :  { %37150 = vmatprep.mubr.msk.f32.mxu1 %vm97_vm0, %v40607_v14  ;;  %37157 = vmatprep.mubr.msk.f32.mxu0 %vm97_vm0, %v40607_v14 }
 0x271   :  { %37160 = vmatprep.subr.mxu1 %v39897_v21  ;;  %37167 = vmatprep.subr.mxu0 %v39899_v22 }
 0x272   :  { %37151 = vmatmul.mubr.msk.f32.vlgmr.msra.gmra.mxu1 %vm97_vm0, %v40617_v63  ;;  %37158 = vmatmul.mubr.msk.f32.vlgmr.msra.gmra.mxu0 %vm97_vm0, %v40617_v63  ;;  %v40891_v38 = vpop.f32.mrf.mxu1  ;;  %v40893_v12 = vpop.f32.mrf.mxu0 }
 0x273   :  { %45151 = vst [vmem:[#allocation207_spill] sm:$0xff] %v40891_v38  ;;  %45152 = vst [vmem:[#allocation208_spill] sm:$0xff] %v40893_v12  ;;  %37161 = vmatpush3.msra.mxu1 %v39897_v21  ;;  %37168 = vmatpush3.msra.mxu0 %v39899_v22 }
 0x274   :  { %37162 = vmatprep.subr.mxu1 %v39905_v25  ;;  %37169 = vmatprep.subr.mxu0 %v39907_v26  ;;  %v40899_v1 = vpop.f32.mrf.mxu1  ;;  %v40901_v2 = vpop.f32.mrf.mxu0 }
 0x275   :  { %45153 = vst [vmem:[#allocation209_spill] sm:$0xff] %v40899_v1  ;;  %45154 = vst [vmem:[#allocation210_spill] sm:$0xff] %v40901_v2  ;;  %37163 = vmatpush3.msra.mxu1 %v39905_v25  ;;  %37170 = vmatpush3.msra.mxu0 %v39907_v26  ;;  %v45324_v26 = vld [vmem:[#allocation114_spill] sm:$0xff] }
 0x276   :  { %37164 = vmatprep.mubr.msk.f32.mxu1 %vm97_vm0, %v40607_v14  ;;  %37171 = vmatprep.mubr.msk.f32.mxu0 %vm97_vm0, %v40607_v14 }
 0x277   :  { %37174 = vmatprep.subr.mxu1 %v39917_v53  ;;  %37181 = vmatprep.subr.mxu0 %v39919_v54 }
 0x278   :  { %37165 = vmatmul.mubr.msk.f32.vlgmr.msra.gmra.mxu1 %vm97_vm0, %v40617_v63  ;;  %37172 = vmatmul.mubr.msk.f32.vlgmr.msra.gmra.mxu0 %vm97_vm0, %v40617_v63  ;;  %v40915_v2 = vpop.f32.mrf.mxu1  ;;  %v40917_v1 = vpop.f32.mrf.mxu0 }
 0x279   :  { %45155 = vst [vmem:[#allocation211_spill] sm:$0xff] %v40915_v2  ;;  %45156 = vst [vmem:[#allocation212_spill] sm:$0xff] %v40917_v1  ;;  %37175 = vmatpush3.msra.mxu1 %v39917_v53  ;;  %37182 = vmatpush3.msra.mxu0 %v39919_v54  ;;  %v45159_v1 = vld [vmem:[#allocation28_spill] sm:$0xff]  ;;  %v45162_v2 = vld [vmem:[#allocation29_spill] sm:$0xff] }
 0x27a   :  { %37176 = vmatprep.subr.mxu1 %v39925_v57  ;;  %37183 = vmatprep.subr.mxu0 %v39927_v58  ;;  %v40923_v12 = vpop.f32.mrf.mxu1  ;;  %v40925_v38 = vpop.f32.mrf.mxu0 }
 0x27b   :  { %45157 = vst [vmem:[#allocation213_spill] sm:$0xff] %v40923_v12  ;;  %45158 = vst [vmem:[#allocation214_spill] sm:$0xff] %v40925_v38  ;;  %37177 = vmatpush3.msra.mxu1 %v39925_v57  ;;  %37184 = vmatpush3.msra.mxu0 %v39927_v58 }
 0x27c   :  { %37178 = vmatprep.mubr.msk.f32.mxu1 %vm97_vm0, %v40607_v14  ;;  %37185 = vmatprep.mubr.msk.f32.mxu0 %vm97_vm0, %v40607_v14 }
 0x27d   :  { %37188 = vmatprep.subr.mxu1 %v39937_v37  ;;  %37195 = vmatprep.subr.mxu0 %v45159_v1 }
 0x27e   :  { %37179 = vmatmul.mubr.msk.f32.vlgmr.msra.gmra.mxu1 %vm97_vm0, %v40617_v63  ;;  %37186 = vmatmul.mubr.msk.f32.vlgmr.msra.gmra.mxu0 %vm97_vm0, %v40617_v63  ;;  %v40939_v38 = vpop.f32.mrf.mxu1  ;;  %v40941_v12 = vpop.f32.mrf.mxu0 }
 0x27f   :  { %45160 = vst [vmem:[#allocation215_spill] sm:$0xff] %v40939_v38  ;;  %45161 = vst [vmem:[#allocation216_spill] sm:$0xff] %v40941_v12  ;;  %37189 = vmatpush3.msra.mxu1 %v39937_v37  ;;  %37196 = vmatpush3.msra.mxu0 %v45159_v1  ;;  %v45166_v12 = vld [vmem:[#allocation31_spill] sm:$0xff]  ;;  %v45167_v38 = vld [vmem:[#allocation32_spill] sm:$0xff] }
 0x280   :  { %37190 = vmatprep.subr.mxu1 %v45162_v2  ;;  %37197 = vmatprep.subr.mxu0 %v45163_v6  ;;  %v40947_v42 = vpop.f32.mrf.mxu1  ;;  %v40949_v58 = vpop.f32.mrf.mxu0 }
 0x281   :  { %45164 = vst [vmem:[#allocation217_spill] sm:$0xff] %v40947_v42  ;;  %45165 = vst [vmem:[#allocation218_spill] sm:$0xff] %v40949_v58  ;;  %37191 = vmatpush3.msra.mxu1 %v45162_v2  ;;  %37198 = vmatpush3.msra.mxu0 %v45163_v6  ;;  %v45170_v6 = vld [vmem:[#allocation33_spill] sm:$0xff]  ;;  %v45171_v2 = vld [vmem:[#allocation34_spill] sm:$0xff] }
 0x282   :  { %37192 = vmatprep.mubr.msk.f32.mxu1 %vm97_vm0, %v40607_v14  ;;  %37199 = vmatprep.mubr.msk.f32.mxu0 %vm97_vm0, %v40607_v14 }
 0x283   :  { %37202 = vmatprep.subr.mxu1 %v45166_v12  ;;  %37209 = vmatprep.subr.mxu0 %v45167_v38 }
 0x284   :  { %37193 = vmatmul.mubr.msk.f32.vlgmr.msra.gmra.mxu1 %vm97_vm0, %v40617_v63  ;;  %37200 = vmatmul.mubr.msk.f32.vlgmr.msra.gmra.mxu0 %vm97_vm0, %v40617_v63  ;;  %v40963_v58 = vpop.f32.mrf.mxu1  ;;  %v40965_v42 = vpop.f32.mrf.mxu0 }
 0x285   :  { %45168 = vst [vmem:[#allocation219_spill] sm:$0xff] %v40963_v58  ;;  %45169 = vst [vmem:[#allocation220_spill] sm:$0xff] %v40965_v42  ;;  %37203 = vmatpush3.msra.mxu1 %v45166_v12  ;;  %37210 = vmatpush3.msra.mxu0 %v45167_v38  ;;  %v45174_v42 = vld [vmem:[#allocation35_spill] sm:$0xff]  ;;  %v45175_v58 = vld [vmem:[#allocation36_spill] sm:$0xff] }
 0x286   :  { %37204 = vmatprep.subr.mxu1 %v45170_v6  ;;  %37211 = vmatprep.subr.mxu0 %v45171_v2  ;;  %v40971_v1 = vpop.f32.mrf.mxu1  ;;  %v40973_v37 = vpop.f32.mrf.mxu0 }
 0x287   :  { %45172 = vst [vmem:[#allocation221_spill] sm:$0xff] %v40971_v1  ;;  %45173 = vst [vmem:[#allocation222_spill] sm:$0xff] %v40973_v37  ;;  %37205 = vmatpush3.msra.mxu1 %v45170_v6  ;;  %37212 = vmatpush3.msra.mxu0 %v45171_v2  ;;  %v45178_v2 = vld [vmem:[#allocation37_spill] sm:$0xff]  ;;  %v45179_v6 = vld [vmem:[#allocation38_spill] sm:$0xff] }
 0x288   :  { %37206 = vmatprep.mubr.msk.f32.mxu1 %vm97_vm0, %v40607_v14  ;;  %37213 = vmatprep.mubr.msk.f32.mxu0 %vm97_vm0, %v40607_v14 }
 0x289   :  { %37216 = vmatprep.subr.mxu1 %v45174_v42  ;;  %37223 = vmatprep.subr.mxu0 %v45175_v58 }
 0x28a   :  { %37207 = vmatmul.mubr.msk.f32.vlgmr.msra.gmra.mxu1 %vm97_vm0, %v40617_v63  ;;  %37214 = vmatmul.mubr.msk.f32.vlgmr.msra.gmra.mxu0 %vm97_vm0, %v40617_v63  ;;  %v40987_v37 = vpop.f32.mrf.mxu1  ;;  %v40989_v1 = vpop.f32.mrf.mxu0 }
 0x28b   :  { %45176 = vst [vmem:[#allocation223_spill] sm:$0xff] %v40987_v37  ;;  %45177 = vst [vmem:[#allocation224_spill] sm:$0xff] %v40989_v1  ;;  %37217 = vmatpush3.msra.mxu1 %v45174_v42  ;;  %37224 = vmatpush3.msra.mxu0 %v45175_v58  ;;  %v45182_v1 = vld [vmem:[#allocation39_spill] sm:$0xff]  ;;  %v45183_v37 = vld [vmem:[#allocation40_spill] sm:$0xff] }
 0x28c   :  { %37218 = vmatprep.subr.mxu1 %v45178_v2  ;;  %37225 = vmatprep.subr.mxu0 %v45179_v6  ;;  %v40995_v38 = vpop.f32.mrf.mxu1  ;;  %v40997_v12 = vpop.f32.mrf.mxu0 }
 0x28d   :  { %45180 = vst [vmem:[#allocation225_spill] sm:$0xff] %v40995_v38  ;;  %45181 = vst [vmem:[#allocation226_spill] sm:$0xff] %v40997_v12  ;;  %37219 = vmatpush3.msra.mxu1 %v45178_v2  ;;  %37226 = vmatpush3.msra.mxu0 %v45179_v6  ;;  %v45186_v6 = vld [vmem:[#allocation41_spill] sm:$0xff]  ;;  %v45187_v2 = vld [vmem:[#allocation42_spill] sm:$0xff] }
 0x28e   :  { %37220 = vmatprep.mubr.msk.f32.mxu1 %vm97_vm0, %v40607_v14  ;;  %37227 = vmatprep.mubr.msk.f32.mxu0 %vm97_vm0, %v40607_v14 }
 0x28f   :  { %37230 = vmatprep.subr.mxu1 %v45182_v1  ;;  %37237 = vmatprep.subr.mxu0 %v45183_v37 }
 0x290   :  { %37221 = vmatmul.mubr.msk.f32.vlgmr.msra.gmra.mxu1 %vm97_vm0, %v40617_v63  ;;  %37228 = vmatmul.mubr.msk.f32.vlgmr.msra.gmra.mxu0 %vm97_vm0, %v40617_v63  ;;  %v41011_v12 = vpop.f32.mrf.mxu1  ;;  %v41013_v38 = vpop.f32.mrf.mxu0 }
 0x291   :  { %45184 = vst [vmem:[#allocation227_spill] sm:$0xff] %v41011_v12  ;;  %45185 = vst [vmem:[#allocation228_spill] sm:$0xff] %v41013_v38  ;;  %37231 = vmatpush3.msra.mxu1 %v45182_v1  ;;  %37238 = vmatpush3.msra.mxu0 %v45183_v37  ;;  %v45190_v38 = vld [vmem:[#allocation43_spill] sm:$0xff]  ;;  %v45191_v12 = vld [vmem:[#allocation44_spill] sm:$0xff] }
 0x292   :  { %37232 = vmatprep.subr.mxu1 %v45186_v6  ;;  %37239 = vmatprep.subr.mxu0 %v45187_v2  ;;  %v41019_v58 = vpop.f32.mrf.mxu1  ;;  %v41021_v42 = vpop.f32.mrf.mxu0 }
 0x293   :  { %45188 = vst [vmem:[#allocation229_spill] sm:$0xff] %v41019_v58  ;;  %45189 = vst [vmem:[#allocation230_spill] sm:$0xff] %v41021_v42  ;;  %37233 = vmatpush3.msra.mxu1 %v45186_v6  ;;  %37240 = vmatpush3.msra.mxu0 %v45187_v2  ;;  %v45194_v2 = vld [vmem:[#allocation45_spill] sm:$0xff]  ;;  %v45195_v6 = vld [vmem:[#allocation46_spill] sm:$0xff] }
 0x294   :  { %37234 = vmatprep.mubr.msk.f32.mxu1 %vm97_vm0, %v40607_v14  ;;  %37241 = vmatprep.mubr.msk.f32.mxu0 %vm97_vm0, %v40607_v14 }
 0x295   :  { %37244 = vmatprep.subr.mxu1 %v45190_v38  ;;  %37251 = vmatprep.subr.mxu0 %v45191_v12 }
 0x296   :  { %37235 = vmatmul.mubr.msk.f32.vlgmr.msra.gmra.mxu1 %vm97_vm0, %v40617_v63  ;;  %37242 = vmatmul.mubr.msk.f32.vlgmr.msra.gmra.mxu0 %vm97_vm0, %v40617_v63  ;;  %v41035_v42 = vpop.f32.mrf.mxu1  ;;  %v41037_v58 = vpop.f32.mrf.mxu0 }
 0x297   :  { %45192 = vst [vmem:[#allocation231_spill] sm:$0xff] %v41035_v42  ;;  %45193 = vst [vmem:[#allocation232_spill] sm:$0xff] %v41037_v58  ;;  %37245 = vmatpush3.msra.mxu1 %v45190_v38  ;;  %37252 = vmatpush3.msra.mxu0 %v45191_v12  ;;  %v45198_v58 = vld [vmem:[#allocation47_spill] sm:$0xff]  ;;  %v45199_v42 = vld [vmem:[#allocation48_spill] sm:$0xff] }
 0x298   :  { %37246 = vmatprep.subr.mxu1 %v45194_v2  ;;  %37253 = vmatprep.subr.mxu0 %v45195_v6  ;;  %v41043_v37 = vpop.f32.mrf.mxu1  ;;  %v41045_v1 = vpop.f32.mrf.mxu0 }
 0x299   :  { %45196 = vst [vmem:[#allocation233_spill] sm:$0xff] %v41043_v37  ;;  %45197 = vst [vmem:[#allocation234_spill] sm:$0xff] %v41045_v1  ;;  %37247 = vmatpush3.msra.mxu1 %v45194_v2  ;;  %37254 = vmatpush3.msra.mxu0 %v45195_v6  ;;  %v45202_v6 = vld [vmem:[#allocation49_spill] sm:$0xff]  ;;  %v45203_v2 = vld [vmem:[#allocation50_spill] sm:$0xff] }
 0x29a   :  { %37248 = vmatprep.mubr.msk.f32.mxu1 %vm97_vm0, %v40607_v14  ;;  %37255 = vmatprep.mubr.msk.f32.mxu0 %vm97_vm0, %v40607_v14 }
 0x29b   :  { %37258 = vmatprep.subr.mxu1 %v45198_v58  ;;  %37265 = vmatprep.subr.mxu0 %v45199_v42 }
 0x29c   :  { %37249 = vmatmul.mubr.msk.f32.vlgmr.msra.gmra.mxu1 %vm97_vm0, %v40617_v63  ;;  %37256 = vmatmul.mubr.msk.f32.vlgmr.msra.gmra.mxu0 %vm97_vm0, %v40617_v63  ;;  %v41059_v1 = vpop.f32.mrf.mxu1  ;;  %v41061_v37 = vpop.f32.mrf.mxu0 }
 0x29d   :  { %45200 = vst [vmem:[#allocation235_spill] sm:$0xff] %v41059_v1  ;;  %45201 = vst [vmem:[#allocation236_spill] sm:$0xff] %v41061_v37  ;;  %37259 = vmatpush3.msra.mxu1 %v45198_v58  ;;  %37266 = vmatpush3.msra.mxu0 %v45199_v42  ;;  %v45206_v37 = vld [vmem:[#allocation51_spill] sm:$0xff]  ;;  %v45207_v1 = vld [vmem:[#allocation52_spill] sm:$0xff] }
 0x29e   :  { %37260 = vmatprep.subr.mxu1 %v45202_v6  ;;  %37267 = vmatprep.subr.mxu0 %v45203_v2  ;;  %v41067_v12 = vpop.f32.mrf.mxu1  ;;  %v41069_v38 = vpop.f32.mrf.mxu0 }
 0x29f   :  { %45204 = vst [vmem:[#allocation237_spill] sm:$0xff] %v41067_v12  ;;  %45205 = vst [vmem:[#allocation238_spill] sm:$0xff] %v41069_v38  ;;  %37261 = vmatpush3.msra.mxu1 %v45202_v6  ;;  %37268 = vmatpush3.msra.mxu0 %v45203_v2  ;;  %v45210_v2 = vld [vmem:[#allocation53_spill] sm:$0xff]  ;;  %v45211_v6 = vld [vmem:[#allocation54_spill] sm:$0xff] }
 0x2a0   :  { %37262 = vmatprep.mubr.msk.f32.mxu1 %vm97_vm0, %v40607_v14  ;;  %37269 = vmatprep.mubr.msk.f32.mxu0 %vm97_vm0, %v40607_v14 }
 0x2a1   :  { %37272 = vmatprep.subr.mxu1 %v45206_v37  ;;  %37279 = vmatprep.subr.mxu0 %v45207_v1 }
 0x2a2   :  { %37263 = vmatmul.mubr.msk.f32.vlgmr.msra.gmra.mxu1 %vm97_vm0, %v40617_v63  ;;  %37270 = vmatmul.mubr.msk.f32.vlgmr.msra.gmra.mxu0 %vm97_vm0, %v40617_v63  ;;  %v41083_v38 = vpop.f32.mrf.mxu1  ;;  %v41085_v12 = vpop.f32.mrf.mxu0 }
 0x2a3   :  { %45208 = vst [vmem:[#allocation239_spill] sm:$0xff] %v41083_v38  ;;  %45209 = vst [vmem:[#allocation240_spill] sm:$0xff] %v41085_v12  ;;  %37273 = vmatpush3.msra.mxu1 %v45206_v37  ;;  %37280 = vmatpush3.msra.mxu0 %v45207_v1  ;;  %v45214_v12 = vld [vmem:[#allocation55_spill] sm:$0xff]  ;;  %v45215_v38 = vld [vmem:[#allocation56_spill] sm:$0xff] }
 0x2a4   :  { %37274 = vmatprep.subr.mxu1 %v45210_v2  ;;  %37281 = vmatprep.subr.mxu0 %v45211_v6  ;;  %v41091_v42 = vpop.f32.mrf.mxu1  ;;  %v41093_v58 = vpop.f32.mrf.mxu0 }
 0x2a5   :  { %45212 = vst [vmem:[#allocation241_spill] sm:$0xff] %v41091_v42  ;;  %45213 = vst [vmem:[#allocation242_spill] sm:$0xff] %v41093_v58  ;;  %37275 = vmatpush3.msra.mxu1 %v45210_v2  ;;  %37282 = vmatpush3.msra.mxu0 %v45211_v6  ;;  %v45218_v6 = vld [vmem:[#allocation57_spill] sm:$0xff]  ;;  %v45219_v2 = vld [vmem:[#allocation58_spill] sm:$0xff] }
 0x2a6   :  { %37276 = vmatprep.mubr.msk.f32.mxu1 %vm97_vm0, %v40607_v14  ;;  %37283 = vmatprep.mubr.msk.f32.mxu0 %vm97_vm0, %v40607_v14 }
 0x2a7   :  { %37286 = vmatprep.subr.mxu1 %v45214_v12  ;;  %37293 = vmatprep.subr.mxu0 %v45215_v38 }
 0x2a8   :  { %37277 = vmatmul.mubr.msk.f32.vlgmr.msra.gmra.mxu1 %vm97_vm0, %v40617_v63  ;;  %37284 = vmatmul.mubr.msk.f32.vlgmr.msra.gmra.mxu0 %vm97_vm0, %v40617_v63  ;;  %v41107_v58 = vpop.f32.mrf.mxu1  ;;  %v41109_v42 = vpop.f32.mrf.mxu0 }
 0x2a9   :  { %45216 = vst [vmem:[#allocation243_spill] sm:$0xff] %v41107_v58  ;;  %45217 = vst [vmem:[#allocation244_spill] sm:$0xff] %v41109_v42  ;;  %37287 = vmatpush3.msra.mxu1 %v45214_v12  ;;  %37294 = vmatpush3.msra.mxu0 %v45215_v38  ;;  %v45222_v42 = vld [vmem:[#allocation59_spill] sm:$0xff]  ;;  %v45223_v58 = vld [vmem:[#allocation60_spill] sm:$0xff] }
 0x2aa   :  { %37288 = vmatprep.subr.mxu1 %v45218_v6  ;;  %37295 = vmatprep.subr.mxu0 %v45219_v2  ;;  %v41115_v1 = vpop.f32.mrf.mxu1  ;;  %v41117_v37 = vpop.f32.mrf.mxu0 }
 0x2ab   :  { %45220 = vst [vmem:[#allocation245_spill] sm:$0xff] %v41115_v1  ;;  %45221 = vst [vmem:[#allocation246_spill] sm:$0xff] %v41117_v37  ;;  %37289 = vmatpush3.msra.mxu1 %v45218_v6  ;;  %37296 = vmatpush3.msra.mxu0 %v45219_v2  ;;  %v45226_v2 = vld [vmem:[#allocation61_spill] sm:$0xff]  ;;  %v45227_v6 = vld [vmem:[#allocation62_spill] sm:$0xff] }
 0x2ac   :  { %37290 = vmatprep.mubr.msk.f32.mxu1 %vm97_vm0, %v40607_v14  ;;  %37297 = vmatprep.mubr.msk.f32.mxu0 %vm97_vm0, %v40607_v14 }
 0x2ad   :  { %37300 = vmatprep.subr.mxu1 %v45222_v42  ;;  %37307 = vmatprep.subr.mxu0 %v45223_v58 }
 0x2ae   :  { %37291 = vmatmul.mubr.msk.f32.vlgmr.msra.gmra.mxu1 %vm97_vm0, %v40617_v63  ;;  %37298 = vmatmul.mubr.msk.f32.vlgmr.msra.gmra.mxu0 %vm97_vm0, %v40617_v63  ;;  %v41131_v37 = vpop.f32.mrf.mxu1  ;;  %v41133_v1 = vpop.f32.mrf.mxu0 }
 0x2af   :  { %45224 = vst [vmem:[#allocation247_spill] sm:$0xff] %v41131_v37  ;;  %45225 = vst [vmem:[#allocation248_spill] sm:$0xff] %v41133_v1  ;;  %37301 = vmatpush3.msra.mxu1 %v45222_v42  ;;  %37308 = vmatpush3.msra.mxu0 %v45223_v58  ;;  %v45230_v1 = vld [vmem:[#allocation63_spill] sm:$0xff]  ;;  %v45231_v37 = vld [vmem:[#allocation64_spill] sm:$0xff] }
 0x2b0   :  { %37302 = vmatprep.subr.mxu1 %v45226_v2  ;;  %37309 = vmatprep.subr.mxu0 %v45227_v6  ;;  %v41139_v38 = vpop.f32.mrf.mxu1  ;;  %v41141_v12 = vpop.f32.mrf.mxu0 }
 0x2b1   :  { %45228 = vst [vmem:[#allocation249_spill] sm:$0xff] %v41139_v38  ;;  %45229 = vst [vmem:[#allocation250_spill] sm:$0xff] %v41141_v12  ;;  %37303 = vmatpush3.msra.mxu1 %v45226_v2  ;;  %37310 = vmatpush3.msra.mxu0 %v45227_v6  ;;  %v45234_v6 = vld [vmem:[#allocation65_spill] sm:$0xff]  ;;  %v45235_v2 = vld [vmem:[#allocation66_spill] sm:$0xff] }
 0x2b2   :  { %37304 = vmatprep.mubr.msk.f32.mxu1 %vm97_vm0, %v40607_v14  ;;  %37311 = vmatprep.mubr.msk.f32.mxu0 %vm97_vm0, %v40607_v14 }
 0x2b3   :  { %37314 = vmatprep.subr.mxu1 %v45230_v1  ;;  %37321 = vmatprep.subr.mxu0 %v45231_v37 }
 0x2b4   :  { %37305 = vmatmul.mubr.msk.f32.vlgmr.msra.gmra.mxu1 %vm97_vm0, %v40617_v63  ;;  %37312 = vmatmul.mubr.msk.f32.vlgmr.msra.gmra.mxu0 %vm97_vm0, %v40617_v63  ;;  %v41155_v12 = vpop.f32.mrf.mxu1  ;;  %v41157_v38 = vpop.f32.mrf.mxu0 }
 0x2b5   :  { %45232 = vst [vmem:[#allocation251_spill] sm:$0xff] %v41155_v12  ;;  %45233 = vst [vmem:[#allocation252_spill] sm:$0xff] %v41157_v38  ;;  %37315 = vmatpush3.msra.mxu1 %v45230_v1  ;;  %37322 = vmatpush3.msra.mxu0 %v45231_v37  ;;  %v45238_v38 = vld [vmem:[#allocation67_spill] sm:$0xff]  ;;  %v45239_v12 = vld [vmem:[#allocation68_spill] sm:$0xff] }
 0x2b6   :  { %37316 = vmatprep.subr.mxu1 %v45234_v6  ;;  %37323 = vmatprep.subr.mxu0 %v45235_v2  ;;  %v41163_v58 = vpop.f32.mrf.mxu1  ;;  %v41165_v42 = vpop.f32.mrf.mxu0 }
 0x2b7   :  { %45236 = vst [vmem:[#allocation253_spill] sm:$0xff] %v41163_v58  ;;  %45237 = vst [vmem:[#allocation254_spill] sm:$0xff] %v41165_v42  ;;  %37317 = vmatpush3.msra.mxu1 %v45234_v6  ;;  %37324 = vmatpush3.msra.mxu0 %v45235_v2  ;;  %v45242_v2 = vld [vmem:[#allocation69_spill] sm:$0xff]  ;;  %v45243_v6 = vld [vmem:[#allocation70_spill] sm:$0xff] }
 0x2b8   :  { %37318 = vmatprep.mubr.msk.f32.mxu1 %vm97_vm0, %v40607_v14  ;;  %37325 = vmatprep.mubr.msk.f32.mxu0 %vm97_vm0, %v40607_v14 }
 0x2b9   :  { %37328 = vmatprep.subr.mxu1 %v45238_v38  ;;  %37335 = vmatprep.subr.mxu0 %v45239_v12 }
 0x2ba   :  { %37319 = vmatmul.mubr.msk.f32.vlgmr.msra.gmra.mxu1 %vm97_vm0, %v40617_v63  ;;  %37326 = vmatmul.mubr.msk.f32.vlgmr.msra.gmra.mxu0 %vm97_vm0, %v40617_v63  ;;  %v41179_v42 = vpop.f32.mrf.mxu1  ;;  %v41181_v58 = vpop.f32.mrf.mxu0 }
 0x2bb   :  { %45240 = vst [vmem:[#allocation255_spill] sm:$0xff] %v41179_v42  ;;  %45241 = vst [vmem:[#allocation256_spill] sm:$0xff] %v41181_v58  ;;  %37329 = vmatpush3.msra.mxu1 %v45238_v38  ;;  %37336 = vmatpush3.msra.mxu0 %v45239_v12  ;;  %v45246_v58 = vld [vmem:[#allocation71_spill] sm:$0xff]  ;;  %v45247_v42 = vld [vmem:[#allocation72_spill] sm:$0xff] }
 0x2bc   :  { %37330 = vmatprep.subr.mxu1 %v45242_v2  ;;  %37337 = vmatprep.subr.mxu0 %v45243_v6  ;;  %v41187_v37 = vpop.f32.mrf.mxu1  ;;  %v41189_v1 = vpop.f32.mrf.mxu0 }
 0x2bd   :  { %45244 = vst [vmem:[#allocation257_spill] sm:$0xff] %v41187_v37  ;;  %45245 = vst [vmem:[#allocation258_spill] sm:$0xff] %v41189_v1  ;;  %37331 = vmatpush3.msra.mxu1 %v45242_v2  ;;  %37338 = vmatpush3.msra.mxu0 %v45243_v6  ;;  %v45250_v6 = vld [vmem:[#allocation73_spill] sm:$0xff]  ;;  %v45251_v2 = vld [vmem:[#allocation74_spill] sm:$0xff] }
 0x2be   :  { %37332 = vmatprep.mubr.msk.f32.mxu1 %vm97_vm0, %v40607_v14  ;;  %37339 = vmatprep.mubr.msk.f32.mxu0 %vm97_vm0, %v40607_v14 }
 0x2bf   :  { %37342 = vmatprep.subr.mxu1 %v45246_v58  ;;  %37349 = vmatprep.subr.mxu0 %v45247_v42 }
 0x2c0   :  { %37333 = vmatmul.mubr.msk.f32.vlgmr.msra.gmra.mxu1 %vm97_vm0, %v40617_v63  ;;  %37340 = vmatmul.mubr.msk.f32.vlgmr.msra.gmra.mxu0 %vm97_vm0, %v40617_v63  ;;  %v41203_v1 = vpop.f32.mrf.mxu1  ;;  %v41205_v37 = vpop.f32.mrf.mxu0 }
 0x2c1   :  { %45248 = vst [vmem:[#allocation259_spill] sm:$0xff] %v41203_v1  ;;  %45249 = vst [vmem:[#allocation260_spill] sm:$0xff] %v41205_v37  ;;  %37343 = vmatpush3.msra.mxu1 %v45246_v58  ;;  %37350 = vmatpush3.msra.mxu0 %v45247_v42  ;;  %v45254_v37 = vld [vmem:[#allocation75_spill] sm:$0xff]  ;;  %v45255_v1 = vld [vmem:[#allocation76_spill] sm:$0xff] }
 0x2c2   :  { %37344 = vmatprep.subr.mxu1 %v45250_v6  ;;  %37351 = vmatprep.subr.mxu0 %v45251_v2  ;;  %v41211_v12 = vpop.f32.mrf.mxu1  ;;  %v41213_v38 = vpop.f32.mrf.mxu0 }
 0x2c3   :  { %45252 = vst [vmem:[#allocation261_spill] sm:$0xff] %v41211_v12  ;;  %45253 = vst [vmem:[#allocation262_spill] sm:$0xff] %v41213_v38  ;;  %37345 = vmatpush3.msra.mxu1 %v45250_v6  ;;  %37352 = vmatpush3.msra.mxu0 %v45251_v2  ;;  %v45258_v2 = vld [vmem:[#allocation77_spill] sm:$0xff]  ;;  %v45259_v6 = vld [vmem:[#allocation78_spill] sm:$0xff] }
 0x2c4   :  { %37346 = vmatprep.mubr.msk.f32.mxu1 %vm97_vm0, %v40607_v14  ;;  %37353 = vmatprep.mubr.msk.f32.mxu0 %vm97_vm0, %v40607_v14 }
 0x2c5   :  { %37356 = vmatprep.subr.mxu1 %v45254_v37  ;;  %37363 = vmatprep.subr.mxu0 %v45255_v1 }
 0x2c6   :  { %37347 = vmatmul.mubr.msk.f32.vlgmr.msra.gmra.mxu1 %vm97_vm0, %v40617_v63  ;;  %37354 = vmatmul.mubr.msk.f32.vlgmr.msra.gmra.mxu0 %vm97_vm0, %v40617_v63  ;;  %v41227_v38 = vpop.f32.mrf.mxu1  ;;  %v41229_v12 = vpop.f32.mrf.mxu0 }
 0x2c7   :  { %45256 = vst [vmem:[#allocation263_spill] sm:$0xff] %v41227_v38  ;;  %45257 = vst [vmem:[#allocation264_spill] sm:$0xff] %v41229_v12  ;;  %37357 = vmatpush3.msra.mxu1 %v45254_v37  ;;  %37364 = vmatpush3.msra.mxu0 %v45255_v1  ;;  %v45262_v12 = vld [vmem:[#allocation79_spill] sm:$0xff]  ;;  %v45263_v38 = vld [vmem:[#allocation80_spill] sm:$0xff] }
 0x2c8   :  { %37358 = vmatprep.subr.mxu1 %v45258_v2  ;;  %37365 = vmatprep.subr.mxu0 %v45259_v6  ;;  %v41235_v42 = vpop.f32.mrf.mxu1  ;;  %v41237_v58 = vpop.f32.mrf.mxu0 }
 0x2c9   :  { %45260 = vst [vmem:[#allocation265_spill] sm:$0xff] %v41235_v42  ;;  %45261 = vst [vmem:[#allocation266_spill] sm:$0xff] %v41237_v58  ;;  %37359 = vmatpush3.msra.mxu1 %v45258_v2  ;;  %37366 = vmatpush3.msra.mxu0 %v45259_v6  ;;  %v45266_v6 = vld [vmem:[#allocation81_spill] sm:$0xff]  ;;  %v45267_v2 = vld [vmem:[#allocation82_spill] sm:$0xff] }
 0x2ca   :  { %37360 = vmatprep.mubr.msk.f32.mxu1 %vm97_vm0, %v40607_v14  ;;  %37367 = vmatprep.mubr.msk.f32.mxu0 %vm97_vm0, %v40607_v14 }
 0x2cb   :  { %37370 = vmatprep.subr.mxu1 %v45262_v12  ;;  %37377 = vmatprep.subr.mxu0 %v45263_v38 }
 0x2cc   :  { %37361 = vmatmul.mubr.msk.f32.vlgmr.msra.gmra.mxu1 %vm97_vm0, %v40617_v63  ;;  %37368 = vmatmul.mubr.msk.f32.vlgmr.msra.gmra.mxu0 %vm97_vm0, %v40617_v63  ;;  %v41251_v58 = vpop.f32.mrf.mxu1  ;;  %v41253_v42 = vpop.f32.mrf.mxu0 }
 0x2cd   :  { %45264 = vst [vmem:[#allocation267_spill] sm:$0xff] %v41251_v58  ;;  %45265 = vst [vmem:[#allocation268_spill] sm:$0xff] %v41253_v42  ;;  %37371 = vmatpush3.msra.mxu1 %v45262_v12  ;;  %37378 = vmatpush3.msra.mxu0 %v45263_v38  ;;  %v45270_v42 = vld [vmem:[#allocation83_spill] sm:$0xff]  ;;  %v45271_v58 = vld [vmem:[#allocation84_spill] sm:$0xff] }
 0x2ce   :  { %37372 = vmatprep.subr.mxu1 %v45266_v6  ;;  %37379 = vmatprep.subr.mxu0 %v45267_v2  ;;  %v41259_v1 = vpop.f32.mrf.mxu1  ;;  %v41261_v37 = vpop.f32.mrf.mxu0 }
 0x2cf   :  { %45268 = vst [vmem:[#allocation269_spill] sm:$0xff] %v41259_v1  ;;  %45269 = vst [vmem:[#allocation270_spill] sm:$0xff] %v41261_v37  ;;  %37373 = vmatpush3.msra.mxu1 %v45266_v6  ;;  %37380 = vmatpush3.msra.mxu0 %v45267_v2  ;;  %v45274_v2 = vld [vmem:[#allocation85_spill] sm:$0xff]  ;;  %v45275_v6 = vld [vmem:[#allocation86_spill] sm:$0xff] }
 0x2d0   :  { %37374 = vmatprep.mubr.msk.f32.mxu1 %vm97_vm0, %v40607_v14  ;;  %37381 = vmatprep.mubr.msk.f32.mxu0 %vm97_vm0, %v40607_v14 }
 0x2d1   :  { %37384 = vmatprep.subr.mxu1 %v45270_v42  ;;  %37391 = vmatprep.subr.mxu0 %v45271_v58 }
 0x2d2   :  { %37375 = vmatmul.mubr.msk.f32.vlgmr.msra.gmra.mxu1 %vm97_vm0, %v40617_v63  ;;  %37382 = vmatmul.mubr.msk.f32.vlgmr.msra.gmra.mxu0 %vm97_vm0, %v40617_v63  ;;  %v41275_v37 = vpop.f32.mrf.mxu1  ;;  %v41277_v1 = vpop.f32.mrf.mxu0 }
 0x2d3   :  { %45272 = vst [vmem:[#allocation271_spill] sm:$0xff] %v41275_v37  ;;  %45273 = vst [vmem:[#allocation272_spill] sm:$0xff] %v41277_v1  ;;  %37385 = vmatpush3.msra.mxu1 %v45270_v42  ;;  %37392 = vmatpush3.msra.mxu0 %v45271_v58  ;;  %v45278_v1 = vld [vmem:[#allocation87_spill] sm:$0xff]  ;;  %v45279_v37 = vld [vmem:[#allocation88_spill] sm:$0xff] }
 0x2d4   :  { %37386 = vmatprep.subr.mxu1 %v45274_v2  ;;  %37393 = vmatprep.subr.mxu0 %v45275_v6  ;;  %v41283_v38 = vpop.f32.mrf.mxu1  ;;  %v41285_v12 = vpop.f32.mrf.mxu0 }
 0x2d5   :  { %45276 = vst [vmem:[#allocation273_spill] sm:$0xff] %v41283_v38  ;;  %45277 = vst [vmem:[#allocation274_spill] sm:$0xff] %v41285_v12  ;;  %37387 = vmatpush3.msra.mxu1 %v45274_v2  ;;  %37394 = vmatpush3.msra.mxu0 %v45275_v6  ;;  %v45282_v6 = vld [vmem:[#allocation89_spill] sm:$0xff]  ;;  %v45283_v2 = vld [vmem:[#allocation90_spill] sm:$0xff] }
 0x2d6   :  { %37388 = vmatprep.mubr.msk.f32.mxu1 %vm97_vm0, %v40607_v14  ;;  %37395 = vmatprep.mubr.msk.f32.mxu0 %vm97_vm0, %v40607_v14 }
 0x2d7   :  { %37398 = vmatprep.subr.mxu1 %v45278_v1  ;;  %37405 = vmatprep.subr.mxu0 %v45279_v37 }
 0x2d8   :  { %37389 = vmatmul.mubr.msk.f32.vlgmr.msra.gmra.mxu1 %vm97_vm0, %v40617_v63  ;;  %37396 = vmatmul.mubr.msk.f32.vlgmr.msra.gmra.mxu0 %vm97_vm0, %v40617_v63  ;;  %v41299_v12 = vpop.f32.mrf.mxu1  ;;  %v41301_v38 = vpop.f32.mrf.mxu0 }
 0x2d9   :  { %45280 = vst [vmem:[#allocation275_spill] sm:$0xff] %v41299_v12  ;;  %45281 = vst [vmem:[#allocation276_spill] sm:$0xff] %v41301_v38  ;;  %37399 = vmatpush3.msra.mxu1 %v45278_v1  ;;  %37406 = vmatpush3.msra.mxu0 %v45279_v37  ;;  %v45286_v38 = vld [vmem:[#allocation91_spill] sm:$0xff]  ;;  %v45287_v12 = vld [vmem:[#allocation92_spill] sm:$0xff] }
 0x2da   :  { %37400 = vmatprep.subr.mxu1 %v45282_v6  ;;  %37407 = vmatprep.subr.mxu0 %v45283_v2  ;;  %v41307_v58 = vpop.f32.mrf.mxu1  ;;  %v41309_v42 = vpop.f32.mrf.mxu0 }
 0x2db   :  { %45284 = vst [vmem:[#allocation277_spill] sm:$0xff] %v41307_v58  ;;  %45285 = vst [vmem:[#allocation278_spill] sm:$0xff] %v41309_v42  ;;  %37401 = vmatpush3.msra.mxu1 %v45282_v6  ;;  %37408 = vmatpush3.msra.mxu0 %v45283_v2  ;;  %v45290_v2 = vld [vmem:[#allocation93_spill] sm:$0xff]  ;;  %v45291_v6 = vld [vmem:[#allocation94_spill] sm:$0xff] }
 0x2dc   :  { %37402 = vmatprep.mubr.msk.f32.mxu1 %vm97_vm0, %v40607_v14  ;;  %37409 = vmatprep.mubr.msk.f32.mxu0 %vm97_vm0, %v40607_v14 }
 0x2dd   :  { %37412 = vmatprep.subr.mxu1 %v45286_v38  ;;  %37419 = vmatprep.subr.mxu0 %v45287_v12 }
 0x2de   :  { %37403 = vmatmul.mubr.msk.f32.vlgmr.msra.gmra.mxu1 %vm97_vm0, %v40617_v63  ;;  %37410 = vmatmul.mubr.msk.f32.vlgmr.msra.gmra.mxu0 %vm97_vm0, %v40617_v63  ;;  %v41323_v42 = vpop.f32.mrf.mxu1  ;;  %v41325_v58 = vpop.f32.mrf.mxu0 }
 0x2df   :  { %45288 = vst [vmem:[#allocation279_spill] sm:$0xff] %v41323_v42  ;;  %45289 = vst [vmem:[#allocation280_spill] sm:$0xff] %v41325_v58  ;;  %37413 = vmatpush3.msra.mxu1 %v45286_v38  ;;  %37420 = vmatpush3.msra.mxu0 %v45287_v12  ;;  %v45294_v58 = vld [vmem:[#allocation95_spill] sm:$0xff]  ;;  %v45295_v42 = vld [vmem:[#allocation96_spill] sm:$0xff] }
 0x2e0   :  { %37414 = vmatprep.subr.mxu1 %v45290_v2  ;;  %37421 = vmatprep.subr.mxu0 %v45291_v6  ;;  %v41331_v37 = vpop.f32.mrf.mxu1  ;;  %v41333_v1 = vpop.f32.mrf.mxu0 }
 0x2e1   :  { %45292 = vst [vmem:[#allocation281_spill] sm:$0xff] %v41331_v37  ;;  %45293 = vst [vmem:[#allocation282_spill] sm:$0xff] %v41333_v1  ;;  %37415 = vmatpush3.msra.mxu1 %v45290_v2  ;;  %37422 = vmatpush3.msra.mxu0 %v45291_v6  ;;  %v45298_v6 = vld [vmem:[#allocation97_spill] sm:$0xff]  ;;  %v45299_v2 = vld [vmem:[#allocation98_spill] sm:$0xff] }
 0x2e2   :  { %37416 = vmatprep.mubr.msk.f32.mxu1 %vm97_vm0, %v40607_v14  ;;  %37423 = vmatprep.mubr.msk.f32.mxu0 %vm97_vm0, %v40607_v14 }
 0x2e3   :  { %37426 = vmatprep.subr.mxu1 %v45294_v58  ;;  %37433 = vmatprep.subr.mxu0 %v45295_v42 }
 0x2e4   :  { %37417 = vmatmul.mubr.msk.f32.vlgmr.msra.gmra.mxu1 %vm97_vm0, %v40617_v63  ;;  %37424 = vmatmul.mubr.msk.f32.vlgmr.msra.gmra.mxu0 %vm97_vm0, %v40617_v63  ;;  %v41347_v1 = vpop.f32.mrf.mxu1  ;;  %v41349_v37 = vpop.f32.mrf.mxu0 }
 0x2e5   :  { %45296 = vst [vmem:[#allocation283_spill] sm:$0xff] %v41347_v1  ;;  %45297 = vst [vmem:[#allocation284_spill] sm:$0xff] %v41349_v37  ;;  %37427 = vmatpush3.msra.mxu1 %v45294_v58  ;;  %37434 = vmatpush3.msra.mxu0 %v45295_v42  ;;  %v45302_v37 = vld [vmem:[#allocation99_spill] sm:$0xff]  ;;  %v45303_v1 = vld [vmem:[#allocation100_spill] sm:$0xff] }
 0x2e6   :  { %37428 = vmatprep.subr.mxu1 %v45298_v6  ;;  %37435 = vmatprep.subr.mxu0 %v45299_v2  ;;  %v41355_v12 = vpop.f32.mrf.mxu1  ;;  %v41357_v38 = vpop.f32.mrf.mxu0 }
 0x2e7   :  { %45300 = vst [vmem:[#allocation285_spill] sm:$0xff] %v41355_v12  ;;  %45301 = vst [vmem:[#allocation286_spill] sm:$0xff] %v41357_v38  ;;  %37429 = vmatpush3.msra.mxu1 %v45298_v6  ;;  %37436 = vmatpush3.msra.mxu0 %v45299_v2  ;;  %v45306_v2 = vld [vmem:[#allocation101_spill] sm:$0xff] }
 0x2e8   :  { %37430 = vmatprep.mubr.msk.f32.mxu1 %vm97_vm0, %v40607_v14  ;;  %37437 = vmatprep.mubr.msk.f32.mxu0 %vm97_vm0, %v40607_v14  ;;  %v45307_v14 = vld [vmem:[#allocation102_spill] sm:$0xff] }
 0x2e9   :  { %37440 = vmatprep.subr.mxu1 %v45302_v37  ;;  %37447 = vmatprep.subr.mxu0 %v45303_v1 }
 0x2ea   :  { %37431 = vmatmul.mubr.msk.f32.vlgmr.msra.gmra.mxu1 %vm97_vm0, %v40617_v63  ;;  %37438 = vmatmul.mubr.msk.f32.vlgmr.msra.gmra.mxu0 %vm97_vm0, %v40617_v63  ;;  %v41371_v38 = vpop.f32.mrf.mxu1  ;;  %v41373_v12 = vpop.f32.mrf.mxu0  ;;  %v41385_v63 = vld [vmem:[#allocation9] sm:$0xff] }
 0x2eb   :  { %45304 = vst [vmem:[#allocation287_spill] sm:$0xff] %v41371_v38  ;;  %45305 = vst [vmem:[#allocation288_spill] sm:$0xff] %v41373_v12  ;;  %37441 = vmatpush3.msra.mxu1 %v45302_v37  ;;  %37448 = vmatpush3.msra.mxu0 %v45303_v1  ;;  %v45310_v12 = vld [vmem:[#allocation103_spill] sm:$0xff]  ;;  %v45311_v38 = vld [vmem:[#allocation104_spill] sm:$0xff] }
 0x2ec   :  { %37442 = vmatprep.subr.mxu1 %v45306_v2  ;;  %37449 = vmatprep.subr.mxu0 %v45307_v14  ;;  %v41379_v6 = vpop.f32.mrf.mxu1  ;;  %v41381_v42 = vpop.f32.mrf.mxu0  ;;  %v41393_v1 = vld [vmem:[#allocation9 + $0x8] sm:$0xff] }
 0x2ed   :  { %45308 = vst [vmem:[#allocation289_spill] sm:$0xff] %v41379_v6  ;;  %45309 = vst [vmem:[#allocation290_spill] sm:$0xff] %v41381_v42  ;;  %37443 = vmatpush3.msra.mxu1 %v45306_v2  ;;  %37450 = vmatpush3.msra.mxu0 %v45307_v14  ;;  %v45313_v14 = vld [vmem:[#allocation105_spill] sm:$0xff]  ;;  %v45314_v2 = vld [vmem:[#allocation106_spill] sm:$0xff] }
 0x2ee   :  { %37444 = vmatprep.mubr.msk.f32.mxu1 %vm97_vm0, %v41385_v63  ;;  %37451 = vmatprep.mubr.msk.f32.mxu0 %vm97_vm0, %v41385_v63 }
 0x2ef   :  { %37454 = vmatprep.subr.mxu1 %v45310_v12  ;;  %37461 = vmatprep.subr.mxu0 %v45311_v38 }
 0x2f0   :  { %37445 = vmatmul.mubr.msk.f32.vlgmr.msra.gmra.mxu1 %vm97_vm0, %v41393_v1  ;;  %37452 = vmatmul.mubr.msk.f32.vlgmr.msra.gmra.mxu0 %vm97_vm0, %v41393_v1  ;;  %v41399_v42 = vpop.f32.mrf.mxu1  ;;  %v41401_v6 = vpop.f32.mrf.mxu0 }
 0x2f1   :  { %45312 = vst [vmem:[#allocation291_spill] sm:$0xff] %v41399_v42  ;;  %37455 = vmatpush3.msra.mxu1 %v45310_v12  ;;  %37462 = vmatpush3.msra.mxu0 %v45311_v38  ;;  %v45316_v42 = vld [vmem:[#allocation107_spill] sm:$0xff]  ;;  %v45317_v38 = vld [vmem:[#allocation108_spill] sm:$0xff]  ;;  %v45319_v12 = vld [vmem:[#allocation110_spill] sm:$0xff] }
 0x2f2   :  { %37456 = vmatprep.subr.mxu1 %v45313_v14  ;;  %37463 = vmatprep.subr.mxu0 %v45314_v2  ;;  %v41407_v37 = vpop.f32.mrf.mxu1  ;;  %v41409_v58 = vpop.f32.mrf.mxu0 }
 0x2f3   :  { %45315 = vst [vmem:[#allocation292_spill] sm:$0xff] %v41407_v37  ;;  %37457 = vmatpush3.msra.mxu1 %v45313_v14  ;;  %37464 = vmatpush3.msra.mxu0 %v45314_v2  ;;  %v45318_v2 = vld [vmem:[#allocation109_spill] sm:$0xff] }
 0x2f4   :  { %37458 = vmatprep.mubr.msk.f32.mxu1 %vm97_vm0, %v41385_v63  ;;  %37465 = vmatprep.mubr.msk.f32.mxu0 %vm97_vm0, %v41385_v63 }
 0x2f5   :  { %37468 = vmatprep.subr.mxu1 %v45316_v42  ;;  %37475 = vmatprep.subr.mxu0 %v45317_v38 }
 0x2f6   :  { %37459 = vmatmul.mubr.msk.f32.vlgmr.msra.gmra.mxu1 %vm97_vm0, %v41393_v1  ;;  %37466 = vmatmul.mubr.msk.f32.vlgmr.msra.gmra.mxu0 %vm97_vm0, %v41393_v1  ;;  %v41423_v37 = vpop.f32.mrf.mxu1  ;;  %v41425_v14 = vpop.f32.mrf.mxu0 }
 0x2f7   :  { %37469 = vmatpush3.msra.mxu1 %v45316_v42  ;;  %37476 = vmatpush3.msra.mxu0 %v45317_v38  ;;  %v45320_v42 = vld [vmem:[#allocation111_spill] sm:$0xff]  ;;  %v45321_v38 = vld [vmem:[#allocation112_spill] sm:$0xff] }
 0x2f8   :  { %37470 = vmatprep.subr.mxu1 %v45318_v2  ;;  %37477 = vmatprep.subr.mxu0 %v45319_v12  ;;  %v41431_v57 = vpop.f32.mrf.mxu1  ;;  %v41433_v54 = vpop.f32.mrf.mxu0 }
 0x2f9   :  { %37471 = vmatpush3.msra.mxu1 %v45318_v2  ;;  %37478 = vmatpush3.msra.mxu0 %v45319_v12  ;;  %v45323_v12 = vld [vmem:[#allocation113_spill] sm:$0xff] }
 0x2fa   :  { %37472 = vmatprep.mubr.msk.f32.mxu1 %vm97_vm0, %v41385_v63  ;;  %37479 = vmatprep.mubr.msk.f32.mxu0 %vm97_vm0, %v41385_v63 }
 0x2fb   :  { %37482 = vmatprep.subr.mxu1 %v45320_v42  ;;  %37489 = vmatprep.subr.mxu0 %v45321_v38 }
 0x2fc   :  { %37473 = vmatmul.mubr.msk.f32.vlgmr.msra.gmra.mxu1 %vm97_vm0, %v41393_v1  ;;  %37480 = vmatmul.mubr.msk.f32.vlgmr.msra.gmra.mxu0 %vm97_vm0, %v41393_v1  ;;  %v41447_v53 = vpop.f32.mrf.mxu1  ;;  %v41449_v2 = vpop.f32.mrf.mxu0 }
 0x2fd   :  { %45322 = vst [vmem:[#allocation293_spill] sm:$0xff] %v41449_v2  ;;  %37483 = vmatpush3.msra.mxu1 %v45320_v42  ;;  %37490 = vmatpush3.msra.mxu0 %v45321_v38  ;;  %v45325_v42 = vld [vmem:[#allocation115_spill] sm:$0xff]  ;;  %v45326_v38 = vld [vmem:[#allocation116_spill] sm:$0xff] }
 0x2fe   :  { %37484 = vmatprep.subr.mxu1 %v45323_v12  ;;  %37491 = vmatprep.subr.mxu0 %v45324_v26  ;;  %v41455_v25 = vpop.f32.mrf.mxu1  ;;  %v41457_v22 = vpop.f32.mrf.mxu0 }
 0x2ff   :  { %37485 = vmatpush3.msra.mxu1 %v45323_v12  ;;  %37492 = vmatpush3.msra.mxu0 %v45324_v26  ;;  %v45329_v26 = vld [vmem:[#allocation117_spill] sm:$0xff] }
 0x300   :  { %37486 = vmatprep.mubr.msk.f32.mxu1 %vm97_vm0, %v41385_v63  ;;  %37493 = vmatprep.mubr.msk.f32.mxu0 %vm97_vm0, %v41385_v63 }
 0x301   :  { %37496 = vmatprep.subr.mxu1 %v45325_v42  ;;  %37503 = vmatprep.subr.mxu0 %v45326_v38 }
 0x302   :  { %37487 = vmatmul.mubr.msk.f32.vlgmr.msra.gmra.mxu1 %vm97_vm0, %v41393_v1  ;;  %37494 = vmatmul.mubr.msk.f32.vlgmr.msra.gmra.mxu0 %vm97_vm0, %v41393_v1  ;;  %v41471_v21 = vpop.f32.mrf.mxu1  ;;  %v41473_v12 = vpop.f32.mrf.mxu0 }
 0x303   :  { %45327 = vst [vmem:[#allocation294_spill] sm:$0xff] %v41471_v21  ;;  %45328 = vst [vmem:[#allocation295_spill] sm:$0xff] %v41473_v12  ;;  %37497 = vmatpush3.msra.mxu1 %v45325_v42  ;;  %37504 = vmatpush3.msra.mxu0 %v45326_v38  ;;  %v45333_v42 = vld [vmem:[#allocation119_spill] sm:$0xff]  ;;  %v45334_v38 = vld [vmem:[#allocation120_spill] sm:$0xff] }
 0x304   :  { %37498 = vmatprep.subr.mxu1 %v45329_v26  ;;  %37505 = vmatprep.subr.mxu0 %v45330_v5  ;;  %v41479_v4 = vpop.f32.mrf.mxu1  ;;  %v41481_v2 = vpop.f32.mrf.mxu0 }
 0x305   :  { %45331 = vst [vmem:[#allocation296_spill] sm:$0xff] %v41479_v4  ;;  %45332 = vst [vmem:[#allocation297_spill] sm:$0xff] %v41481_v2  ;;  %37499 = vmatpush3.msra.mxu1 %v45329_v26  ;;  %37506 = vmatpush3.msra.mxu0 %v45330_v5  ;;  %v45337_v5 = vld [vmem:[#allocation121_spill] sm:$0xff]  ;;  %v45338_v2 = vld [vmem:[#allocation122_spill] sm:$0xff] }
 0x306   :  { %37500 = vmatprep.mubr.msk.f32.mxu1 %vm97_vm0, %v41385_v63  ;;  %37507 = vmatprep.mubr.msk.f32.mxu0 %vm97_vm0, %v41385_v63 }
 0x307   :  { %37510 = vmatprep.subr.mxu1 %v45333_v42  ;;  %37517 = vmatprep.subr.mxu0 %v45334_v38 }
 0x308   :  { %37501 = vmatmul.mubr.msk.f32.vlgmr.msra.gmra.mxu1 %vm97_vm0, %v41393_v1  ;;  %37508 = vmatmul.mubr.msk.f32.vlgmr.msra.gmra.mxu0 %vm97_vm0, %v41393_v1  ;;  %v41495_v12 = vpop.f32.mrf.mxu1  ;;  %v41497_v26 = vpop.f32.mrf.mxu0 }
 0x309   :  { %45335 = vst [vmem:[#allocation298_spill] sm:$0xff] %v41495_v12  ;;  %45336 = vst [vmem:[#allocation299_spill] sm:$0xff] %v41497_v26  ;;  %37511 = vmatpush3.msra.mxu1 %v45333_v42  ;;  %37518 = vmatpush3.msra.mxu0 %v45334_v38  ;;  %v45341_v38 = vld [vmem:[#allocation124_spill] sm:$0xff]  ;;  %v45344_v26 = vld [vmem:[#allocation126_spill] sm:$0xff] }
 0x30a   :  { %37512 = vmatprep.subr.mxu1 %v45337_v5  ;;  %37519 = vmatprep.subr.mxu0 %v45338_v2  ;;  %v41503_v21 = vpop.f32.mrf.mxu1  ;;  %v41505_v4 = vpop.f32.mrf.mxu0 }
 0x30b   :  { %45339 = vst [vmem:[#allocation300_spill] sm:$0xff] %v41503_v21  ;;  %45340 = vst [vmem:[#allocation301_spill] sm:$0xff] %v41505_v4  ;;  %37513 = vmatpush3.msra.mxu1 %v45337_v5  ;;  %37520 = vmatpush3.msra.mxu0 %v45338_v2  ;;  %v45343_v2 = vld [vmem:[#allocation125_spill] sm:$0xff] }
 0x30c   :  { %37514 = vmatprep.mubr.msk.f32.mxu1 %vm97_vm0, %v41385_v63  ;;  %37521 = vmatprep.mubr.msk.f32.mxu0 %vm97_vm0, %v41385_v63 }
 0x30d   :  { %37524 = vmatprep.subr.mxu1 %v40417_v41  ;;  %37531 = vmatprep.subr.mxu0 %v45341_v38 }
 0x30e   :  { %37515 = vmatmul.mubr.msk.f32.vlgmr.msra.gmra.mxu1 %vm97_vm0, %v41393_v1  ;;  %37522 = vmatmul.mubr.msk.f32.vlgmr.msra.gmra.mxu0 %vm97_vm0, %v41393_v1  ;;  %v41519_v42 = vpop.f32.mrf.mxu1  ;;  %v41521_v5 = vpop.f32.mrf.mxu0 }
 0x30f   :  { %45342 = vst [vmem:[#allocation302_spill] sm:$0xff] %v41519_v42  ;;  %37525 = vmatpush3.msra.mxu1 %v40417_v41  ;;  %37532 = vmatpush3.msra.mxu0 %v45341_v38  ;;  %v45347_v41 = vld [vmem:[#allocation127_spill] sm:$0xff]  ;;  %v45348_v38 = vld [vmem:[#allocation128_spill] sm:$0xff] }
 0x310   :  { %37526 = vmatprep.subr.mxu1 %v45343_v2  ;;  %37533 = vmatprep.subr.mxu0 %v45344_v26  ;;  %v41527_v4 = vpop.f32.mrf.mxu1  ;;  %v41529_v12 = vpop.f32.mrf.mxu0 }
 0x311   :  { %45345 = vst [vmem:[#allocation303_spill] sm:$0xff] %v41527_v4  ;;  %45346 = vst [vmem:[#allocation304_spill] sm:$0xff] %v41529_v12  ;;  %37527 = vmatpush3.msra.mxu1 %v45343_v2  ;;  %37534 = vmatpush3.msra.mxu0 %v45344_v26  ;;  %v45351_v26 = vld [vmem:[#allocation129_spill] sm:$0xff]  ;;  %v45352_v4 = vld [vmem:[#allocation130_spill] sm:$0xff] }
 0x312   :  { %37528 = vmatprep.mubr.msk.f32.mxu1 %vm97_vm0, %v41385_v63  ;;  %37535 = vmatprep.mubr.msk.f32.mxu0 %vm97_vm0, %v41385_v63 }
 0x313   :  { %37538 = vmatprep.subr.mxu1 %v45347_v41  ;;  %37545 = vmatprep.subr.mxu0 %v45348_v38 }
 0x314   :  { %37529 = vmatmul.mubr.msk.f32.vlgmr.msra.gmra.mxu1 %vm97_vm0, %v41393_v1  ;;  %37536 = vmatmul.mubr.msk.f32.vlgmr.msra.gmra.mxu0 %vm97_vm0, %v41393_v1  ;;  %v41543_v42 = vpop.f32.mrf.mxu1  ;;  %v41545_v2 = vpop.f32.mrf.mxu0 }
 0x315   :  { %45349 = vst [vmem:[#allocation305_spill] sm:$0xff] %v41543_v42  ;;  %45350 = vst [vmem:[#allocation306_spill] sm:$0xff] %v41545_v2  ;;  %37539 = vmatpush3.msra.mxu1 %v45347_v41  ;;  %37546 = vmatpush3.msra.mxu0 %v45348_v38  ;;  %v45354_v41 = vld [vmem:[#allocation131_spill] sm:$0xff]  ;;  %v45356_v42 = vld [vmem:[#allocation133_spill] sm:$0xff] }
 0x316   :  { %37540 = vmatprep.subr.mxu1 %v45351_v26  ;;  %37547 = vmatprep.subr.mxu0 %v45352_v4  ;;  %v41551_v21 = vpop.f32.mrf.mxu1  ;;  %v41553_v12 = vpop.f32.mrf.mxu0 }
 0x317   :  { %45353 = vst [vmem:[#allocation307_spill] sm:$0xff] %v41553_v12  ;;  %37541 = vmatpush3.msra.mxu1 %v45351_v26  ;;  %37548 = vmatpush3.msra.mxu0 %v45352_v4  ;;  %v41573_v4 = vld [vmem:[#allocation11] sm:$0xff] }
 0x318   :  { %37542 = vmatprep.mubr.msk.f32.mxu1 %vm97_vm0, %v41385_v63  ;;  %37549 = vmatprep.mubr.msk.f32.mxu0 %vm97_vm0, %v41385_v63 }
 0x319   :  { %37552 = vmatprep.subr.mxu1 %v45354_v41  ;;  %37559 = vmatprep.subr.mxu0 %v39657_v13 }
 0x31a   :  { %37543 = vmatmul.mubr.msk.f32.vlgmr.msra.gmra.mxu1 %vm97_vm0, %v41393_v1  ;;  %37550 = vmatmul.mubr.msk.f32.vlgmr.msra.gmra.mxu0 %vm97_vm0, %v41393_v1  ;;  %v41567_v38 = vpop.f32.mrf.mxu1  ;;  %v41569_v26 = vpop.f32.mrf.mxu0 }
 0x31b   :  { %45355 = vst [vmem:[#allocation308_spill] sm:$0xff] %v41567_v38  ;;  %37553 = vmatpush3.msra.mxu1 %v45354_v41  ;;  %37560 = vmatpush3.msra.mxu0 %v39657_v13  ;;  %v41583_v38 = vld [vmem:[#allocation11 + $0x8] sm:$0xff]  ;;  %v31040_v41 = vmul.f32 -1.0, %v41409_v58 }
 0x31c   :  { %37554 = vmatprep.subr.mxu1 %v45356_v42  ;;  %37561 = vmatprep.subr.mxu0 %v39663_v16  ;;  %v41577_v2 = vpop.f32.mrf.mxu1  ;;  %v41579_v12 = vpop.f32.mrf.mxu0 }
 0x31d   :  { %37555 = vmatpush3.msra.mxu1 %v45356_v42  ;;  %37562 = vmatpush3.msra.mxu0 %v39663_v16 }
 0x31e   :  { %37556 = vmatprep.mubr.msk.f32.mxu1 %vm97_vm0, %v41385_v63  ;;  %37563 = vmatprep.mubr.msk.f32.mxu0 %vm97_vm0, %v41573_v4 }
 0x31f   :  { %37566 = vmatprep.subr.mxu1 %v39673_v19  ;;  %37573 = vmatprep.subr.mxu0 %v39675_v20 }
 0x320   :  { %37557 = vmatmul.mubr.msk.f32.vlgmr.msra.gmra.mxu1 %vm97_vm0, %v41393_v1  ;;  %37564 = vmatmul.mubr.msk.f32.vlgmr.msra.gmra.mxu0 %vm97_vm0, %v41583_v38  ;;  %v41595_v13 = vpop.f32.mrf.mxu1  ;;  %v41597_v16 = vpop.f32.mrf.mxu0  ;;  %v31041_v1 = vmul.f32 -1.0, %v41401_v6 }
 0x321   :  { %37567 = vmatpush3.msra.mxu1 %v39673_v19  ;;  %37574 = vmatpush3.msra.mxu0 %v39675_v20 }
 0x322   :  { %37568 = vmatprep.subr.mxu1 %v39681_v23  ;;  %37575 = vmatprep.subr.mxu0 %v39683_v24  ;;  %v41603_v63 = vpop.f32.mrf.mxu1  ;;  %v41605_v42 = vpop.f32.mrf.mxu0  ;;  %v31169_v58 = vadd.f32 %v41425_v14, %v31041_v1 }
 0x323   :  { %37569 = vmatpush3.msra.mxu1 %v39681_v23  ;;  %37576 = vmatpush3.msra.mxu0 %v39683_v24 }
 0x324   :  { %37570 = vmatprep.mubr.msk.f32.mxu1 %vm97_vm0, %v41573_v4  ;;  %37577 = vmatprep.mubr.msk.f32.mxu0 %vm97_vm0, %v41573_v4 }
 0x325   :  { %37580 = vmatprep.subr.mxu1 %v39693_v27  ;;  %37587 = vmatprep.subr.mxu0 %v39695_v28 }
 0x326   :  { %37571 = vmatmul.mubr.msk.f32.vlgmr.msra.gmra.mxu1 %vm97_vm0, %v41583_v38  ;;  %37578 = vmatmul.mubr.msk.f32.vlgmr.msra.gmra.mxu0 %vm97_vm0, %v41583_v38  ;;  %v41619_v19 = vpop.f32.mrf.mxu1  ;;  %v41621_v20 = vpop.f32.mrf.mxu0 }
 0x327   :  { %37581 = vmatpush3.msra.mxu1 %v39693_v27  ;;  %37588 = vmatpush3.msra.mxu0 %v39695_v28 }
 0x328   :  { %37582 = vmatprep.subr.mxu1 %v39701_v31  ;;  %37589 = vmatprep.subr.mxu0 %v39703_v32  ;;  %v41627_v23 = vpop.f32.mrf.mxu1  ;;  %v41629_v24 = vpop.f32.mrf.mxu0 }
 0x329   :  { %37583 = vmatpush3.msra.mxu1 %v39701_v31  ;;  %37590 = vmatpush3.msra.mxu0 %v39703_v32 }
 0x32a   :  { %37584 = vmatprep.mubr.msk.f32.mxu1 %vm97_vm0, %v41573_v4  ;;  %37591 = vmatprep.mubr.msk.f32.mxu0 %vm97_vm0, %v41573_v4 }
 0x32b   :  { %37594 = vmatprep.subr.mxu1 %v39713_v35  ;;  %37601 = vmatprep.subr.mxu0 %v39715_v36 }
 0x32c   :  { %37585 = vmatmul.mubr.msk.f32.vlgmr.msra.gmra.mxu1 %vm97_vm0, %v41583_v38  ;;  %37592 = vmatmul.mubr.msk.f32.vlgmr.msra.gmra.mxu0 %vm97_vm0, %v41583_v38  ;;  %v41643_v27 = vpop.f32.mrf.mxu1  ;;  %v41645_v28 = vpop.f32.mrf.mxu0 }
 0x32d   :  { %37595 = vmatpush3.msra.mxu1 %v39713_v35  ;;  %37602 = vmatpush3.msra.mxu0 %v39715_v36 }
 0x32e   :  { %37596 = vmatprep.subr.mxu1 %v39721_v39  ;;  %37603 = vmatprep.subr.mxu0 %v39723_v40  ;;  %v41651_v31 = vpop.f32.mrf.mxu1  ;;  %v41653_v32 = vpop.f32.mrf.mxu0 }
 0x32f   :  { %37597 = vmatpush3.msra.mxu1 %v39721_v39  ;;  %37604 = vmatpush3.msra.mxu0 %v39723_v40 }
 0x330   :  { %37598 = vmatprep.mubr.msk.f32.mxu1 %vm97_vm0, %v41573_v4  ;;  %37605 = vmatprep.mubr.msk.f32.mxu0 %vm97_vm0, %v41573_v4 }
 0x331   :  { %37608 = vmatprep.subr.mxu1 %v39733_v43  ;;  %37615 = vmatprep.subr.mxu0 %v39735_v44 }
 0x332   :  { %37599 = vmatmul.mubr.msk.f32.vlgmr.msra.gmra.mxu1 %vm97_vm0, %v41583_v38  ;;  %37606 = vmatmul.mubr.msk.f32.vlgmr.msra.gmra.mxu0 %vm97_vm0, %v41583_v38  ;;  %v41667_v35 = vpop.f32.mrf.mxu1  ;;  %v41669_v36 = vpop.f32.mrf.mxu0 }
 0x333   :  { %37609 = vmatpush3.msra.mxu1 %v39733_v43  ;;  %37616 = vmatpush3.msra.mxu0 %v39735_v44 }
 0x334   :  { %37610 = vmatprep.subr.mxu1 %v39741_v47  ;;  %37617 = vmatprep.subr.mxu0 %v39743_v48  ;;  %v41675_v39 = vpop.f32.mrf.mxu1  ;;  %v41677_v40 = vpop.f32.mrf.mxu0 }
 0x335   :  { %37611 = vmatpush3.msra.mxu1 %v39741_v47  ;;  %37618 = vmatpush3.msra.mxu0 %v39743_v48 }
 0x336   :  { %37612 = vmatprep.mubr.msk.f32.mxu1 %vm97_vm0, %v41573_v4  ;;  %37619 = vmatprep.mubr.msk.f32.mxu0 %vm97_vm0, %v41573_v4 }
 0x337   :  { %37622 = vmatprep.subr.mxu1 %v39753_v51  ;;  %37629 = vmatprep.subr.mxu0 %v39755_v52 }
 0x338   :  { %37613 = vmatmul.mubr.msk.f32.vlgmr.msra.gmra.mxu1 %vm97_vm0, %v41583_v38  ;;  %37620 = vmatmul.mubr.msk.f32.vlgmr.msra.gmra.mxu0 %vm97_vm0, %v41583_v38  ;;  %v41691_v43 = vpop.f32.mrf.mxu1  ;;  %v41693_v44 = vpop.f32.mrf.mxu0 }
 0x339   :  { %37623 = vmatpush3.msra.mxu1 %v39753_v51  ;;  %37630 = vmatpush3.msra.mxu0 %v39755_v52 }
 0x33a   :  { %37624 = vmatprep.subr.mxu1 %v39761_v55  ;;  %37631 = vmatprep.subr.mxu0 %v39763_v56  ;;  %v41699_v47 = vpop.f32.mrf.mxu1  ;;  %v41701_v48 = vpop.f32.mrf.mxu0 }
 0x33b   :  { %37625 = vmatpush3.msra.mxu1 %v39761_v55  ;;  %37632 = vmatpush3.msra.mxu0 %v39763_v56 }
 0x33c   :  { %37626 = vmatprep.mubr.msk.f32.mxu1 %vm97_vm0, %v41573_v4  ;;  %37633 = vmatprep.mubr.msk.f32.mxu0 %vm97_vm0, %v41573_v4 }
 0x33d   :  { %37636 = vmatprep.subr.mxu1 %v39773_v59  ;;  %37643 = vmatprep.subr.mxu0 %v39775_v60 }
 0x33e   :  { %37627 = vmatmul.mubr.msk.f32.vlgmr.msra.gmra.mxu1 %vm97_vm0, %v41583_v38  ;;  %37634 = vmatmul.mubr.msk.f32.vlgmr.msra.gmra.mxu0 %vm97_vm0, %v41583_v38  ;;  %v41715_v51 = vpop.f32.mrf.mxu1  ;;  %v41717_v52 = vpop.f32.mrf.mxu0 }
 0x33f   :  { %37637 = vmatpush3.msra.mxu1 %v39773_v59  ;;  %37644 = vmatpush3.msra.mxu0 %v39775_v60 }
 0x340   :  { %37638 = vmatprep.subr.mxu1 %v39783_v0  ;;  %37645 = vmatprep.subr.mxu0 %v39785_v3  ;;  %v41723_v55 = vpop.f32.mrf.mxu1  ;;  %v41725_v56 = vpop.f32.mrf.mxu0 }
 0x341   :  { %37639 = vmatpush3.msra.mxu1 %v39783_v0  ;;  %37646 = vmatpush3.msra.mxu0 %v39785_v3 }
 0x342   :  { %37640 = vmatprep.mubr.msk.f32.mxu1 %vm97_vm0, %v41573_v4  ;;  %37647 = vmatprep.mubr.msk.f32.mxu0 %vm97_vm0, %v41573_v4 }
 0x343   :  { %37650 = vmatprep.subr.mxu1 %v39797_v7  ;;  %37657 = vmatprep.subr.mxu0 %v39799_v8 }
 0x344   :  { %37641 = vmatmul.mubr.msk.f32.vlgmr.msra.gmra.mxu1 %vm97_vm0, %v41583_v38  ;;  %37648 = vmatmul.mubr.msk.f32.vlgmr.msra.gmra.mxu0 %vm97_vm0, %v41583_v38  ;;  %v41739_v59 = vpop.f32.mrf.mxu1  ;;  %v41741_v60 = vpop.f32.mrf.mxu0 }
 0x345   :  { %45357 = vst [vmem:[#allocation309_spill] sm:$0xff] %v41739_v59  ;;  %45358 = vst [vmem:[#allocation310_spill] sm:$0xff] %v41741_v60  ;;  %37651 = vmatpush3.msra.mxu1 %v39797_v7  ;;  %37658 = vmatpush3.msra.mxu0 %v39799_v8  ;;  %v45392_v60 = vld [vmem:[#allocation26_spill] sm:$0xff] }
 0x346   :  { %37652 = vmatprep.subr.mxu1 %v39805_v9  ;;  %37659 = vmatprep.subr.mxu0 %v39807_v10  ;;  %v41747_v0 = vpop.f32.mrf.mxu1  ;;  %v41749_v3 = vpop.f32.mrf.mxu0 }
 0x347   :  { %45359 = vst [vmem:[#allocation311_spill] sm:$0xff] %v41747_v0  ;;  %45360 = vst [vmem:[#allocation312_spill] sm:$0xff] %v41749_v3  ;;  %37653 = vmatpush3.msra.mxu1 %v39805_v9  ;;  %37660 = vmatpush3.msra.mxu0 %v39807_v10 }
 0x348   :  { %37654 = vmatprep.mubr.msk.f32.mxu1 %vm97_vm0, %v41573_v4  ;;  %37661 = vmatprep.mubr.msk.f32.mxu0 %vm97_vm0, %v41573_v4 }
 0x349   :  { %37664 = vmatprep.subr.mxu1 %v39817_v15  ;;  %37671 = vmatprep.subr.mxu0 %v39819_v11 }
 0x34a   :  { %37655 = vmatmul.mubr.msk.f32.vlgmr.msra.gmra.mxu1 %vm97_vm0, %v41583_v38  ;;  %37662 = vmatmul.mubr.msk.f32.vlgmr.msra.gmra.mxu0 %vm97_vm0, %v41583_v38  ;;  %v41763_v7 = vpop.f32.mrf.mxu1  ;;  %v41765_v8 = vpop.f32.mrf.mxu0 }
 0x34b   :  { %45361 = vst [vmem:[#allocation313_spill] sm:$0xff] %v41763_v7  ;;  %37665 = vmatpush3.msra.mxu1 %v39817_v15  ;;  %37672 = vmatpush3.msra.mxu0 %v39819_v11  ;;  %v31042_v15 = vmul.f32 -1.0, %v41431_v57  ;;  %v31168_v11 = vadd.f32 %v31040_v41, %v41433_v54  ;;  %v31044_v7 = vmul.f32 -1.0, %v41433_v54 }
 0x34c   :  { %37666 = vmatprep.subr.mxu1 %v39825_v17  ;;  %37673 = vmatprep.subr.mxu0 %v39827_v18  ;;  %v41771_v9 = vpop.f32.mrf.mxu1  ;;  %v41773_v10 = vpop.f32.mrf.mxu0 }
 0x34d   :  { %45362 = vst [vmem:[#allocation314_spill] sm:$0xff] %v41771_v9  ;;  %37667 = vmatpush3.msra.mxu1 %v39825_v17  ;;  %37674 = vmatpush3.msra.mxu0 %v39827_v18  ;;  %v31170_v57 = vadd.f32 %v31042_v15, %v41455_v25  ;;  %v32065_v9 = vand.u32 2147483647, %v31168_v11 }
 0x34e   :  { %37668 = vmatprep.mubr.msk.f32.mxu1 %vm97_vm0, %v41573_v4  ;;  %37675 = vmatprep.mubr.msk.f32.mxu0 %vm97_vm0, %v41573_v4 }
 0x34f   :  { %37678 = vmatprep.subr.mxu1 %v39837_v29  ;;  %37685 = vmatprep.subr.mxu0 %v39839_v30  ;;  %v32067_v1 = vand.u32 2147483647, %v31170_v57  ;;  %v32081_v15 = vsel %vm97_vm0, %v32065_v9, 0.0 }
 0x350   :  { %37669 = vmatmul.mubr.msk.f32.vlgmr.msra.gmra.mxu1 %vm97_vm0, %v41583_v38  ;;  %37676 = vmatmul.mubr.msk.f32.vlgmr.msra.gmra.mxu0 %vm97_vm0, %v41583_v38  ;;  %v41791_v17 = vpop.f32.mrf.mxu1  ;;  %v41793_v18 = vpop.f32.mrf.mxu0 }
 0x351   :  { %45363 = vst [vmem:[#allocation315_spill] sm:$0xff] %v41791_v17  ;;  %37679 = vmatpush3.msra.mxu1 %v39837_v29  ;;  %37686 = vmatpush3.msra.mxu0 %v39839_v30  ;;  %v31043_v29 = vmul.f32 -1.0, %v41423_v37  ;;  %v32066_v30 = vand.u32 2147483647, %v31169_v58 }
 0x352   :  { %37680 = vmatprep.subr.mxu1 %v39845_v33  ;;  %37687 = vmatprep.subr.mxu0 %v39847_v34  ;;  %v41801_v41 = vpop.f32.mrf.mxu1  ;;  %v41803_v6 = vpop.f32.mrf.mxu0 }
 0x353   :  { %37681 = vmatpush3.msra.mxu1 %v39845_v33  ;;  %37688 = vmatpush3.msra.mxu0 %v39847_v34  ;;  %v31171_v37 = vadd.f32 %v41447_v53, %v31043_v29  ;;  %v32082_v57 = vsel %vm97_vm0, %v32066_v30, 0.0  ;;  %v45369_v30 = vld [vmem:[#allocation293_spill] sm:$0xff] }
 0x354   :  { %37682 = vmatprep.mubr.msk.f32.mxu1 %vm97_vm0, %v41573_v4  ;;  %37689 = vmatprep.mubr.msk.f32.mxu0 %vm97_vm0, %v41573_v4  ;;  %v32083_v9 = vadd.f32 %v32082_v57, %v32081_v15  ;;  %v45370_v15 = vld [vmem:[#allocation17_spill] sm:$0xff] }
 0x355   :  { %37692 = vmatprep.subr.mxu1 %v39857_v45  ;;  %37699 = vmatprep.subr.mxu0 %v39859_v46  ;;  %v32068_v54 = vand.u32 2147483647, %v31171_v37 }
 0x356   :  { %37683 = vmatmul.mubr.msk.f32.vlgmr.msra.gmra.mxu1 %vm97_vm0, %v41583_v38  ;;  %37690 = vmatmul.mubr.msk.f32.vlgmr.msra.gmra.mxu0 %vm97_vm0, %v41583_v38  ;;  %v41818_v33 = vpop.f32.mrf.mxu1  ;;  %v41820_v34 = vpop.f32.mrf.mxu0 }
 0x357   :  { %45364 = vst [vmem:[#allocation316_spill] sm:$0xff] %v41818_v33  ;;  %45365 = vst [vmem:[#allocation317_spill] sm:$0xff] %v41820_v34  ;;  %37693 = vmatpush3.msra.mxu1 %v39857_v45  ;;  %37700 = vmatpush3.msra.mxu0 %v39859_v46  ;;  %v32084_v45 = vsel %vm97_vm0, %v32067_v1, 0.0  ;;  %v31045_v46 = vmul.f32 -1.0, %v41425_v14  ;;  %v45402_v33 = vld [vmem:[#allocation30_spill] sm:$0xff] }
 0x358   :  { %37694 = vmatprep.subr.mxu1 %v39865_v49  ;;  %37701 = vmatprep.subr.mxu0 %v39867_v50  ;;  %v41828_v11 = vpop.f32.mrf.mxu1  ;;  %v41830_v58 = vpop.f32.mrf.mxu0 }
 0x359   :  { %45366 = vst [vmem:[#allocation318_spill] sm:$0xff] %v41830_v58  ;;  %37695 = vmatpush3.msra.mxu1 %v39865_v49  ;;  %37702 = vmatpush3.msra.mxu0 %v39867_v50  ;;  %v31172_v49 = vadd.f32 %v31044_v7, %v41457_v22  ;;  %v32085_v50 = vadd.f32 %v32084_v45, %v32083_v9  ;;  %v45371_v7 = vld [vmem:[#allocation18_spill] sm:$0xff]  ;;  %v32086_v45 = vsel %vm97_vm0, %v32068_v54, 0.0  ;;  %v45401_v58 = vld [vmem:[#allocation29_spill] sm:$0xff] }
 0x35a   :  { %37696 = vmatprep.mubr.msk.f32.mxu1 %vm97_vm0, %v41573_v4  ;;  %37703 = vmatprep.mubr.msk.f32.mxu0 %vm97_vm0, %v41573_v4  ;;  %v31173_v1 = vadd.f32 %v45369_v30, %v31045_v46  ;;  %v45374_v46 = vld [vmem:[#allocation19_spill] sm:$0xff] }
 0x35b   :  { %37706 = vmatprep.subr.mxu1 %v39877_v61  ;;  %37713 = vmatprep.subr.mxu0 %v39879_v62  ;;  %v32069_v9 = vand.u32 2147483647, %v31172_v49 }
 0x35c   :  { %37697 = vmatmul.mubr.msk.f32.vlgmr.msra.gmra.mxu1 %vm97_vm0, %v41583_v38  ;;  %37704 = vmatmul.mubr.msk.f32.vlgmr.msra.gmra.mxu0 %vm97_vm0, %v41583_v38  ;;  %v41849_v14 = vpop.f32.mrf.mxu1  ;;  %v41851_v29 = vpop.f32.mrf.mxu0 }
 0x35d   :  { %45367 = vst [vmem:[#allocation319_spill] sm:$0xff] %v41849_v14  ;;  %45368 = vst [vmem:[#allocation320_spill] sm:$0xff] %v41851_v29  ;;  %37707 = vmatpush3.msra.mxu1 %v39877_v61  ;;  %37714 = vmatpush3.msra.mxu0 %v39879_v62  ;;  %v32087_v61 = vadd.f32 %v32086_v45, %v32085_v50  ;;  %v31046_v62 = vmul.f32 -1.0, %v41455_v25  ;;  %v45375_v29 = vld [vmem:[#allocation20_spill] sm:$0xff]  ;;  %v32088_v50 = vsel %vm97_vm0, %v32069_v9, 0.0  ;;  %v31047_v14 = vmul.f32 -1.0, %v41447_v53 }
 0x35e   :  { %37708 = vmatprep.subr.mxu1 %v45370_v15  ;;  %37715 = vmatprep.subr.mxu0 %v45371_v7  ;;  %v41858_v37 = vpop.f32.mrf.mxu1  ;;  %v41860_v57 = vpop.f32.mrf.mxu0  ;;  %v45378_v25 = vld [vmem:[#allocation296_spill] sm:$0xff] }
 0x35f   :  { %45372 = vst [vmem:[#allocation293_spill] sm:$0xff] %v41858_v37  ;;  %45373 = vst [vmem:[#allocation17_spill] sm:$0xff] %v41860_v57  ;;  %37709 = vmatpush3.msra.mxu1 %v45370_v15  ;;  %37716 = vmatpush3.msra.mxu0 %v45371_v7  ;;  %v32070_v57 = vand.u32 2147483647, %v31173_v1  ;;  %v31174_v15 = vadd.f32 %v31046_v62, %v45378_v25  ;;  %v31057_v1 = vmul.f32 -1.0, %v41521_v5  ;;  %v45379_v7 = vld [vmem:[#allocation304_spill] sm:$0xff] }
 0x360   :  { %37710 = vmatprep.mubr.msk.f32.mxu1 %vm97_vm0, %v41573_v4  ;;  %37717 = vmatprep.mubr.msk.f32.mxu0 %vm97_vm0, %v41573_v4  ;;  %v31056_v45 = vmul.f32 -1.0, %v45379_v7  ;;  %v32089_v3 = vadd.f32 %v32088_v50, %v32087_v61  ;;  %v45380_v37 = vld [vmem:[#allocation21_spill] sm:$0xff]  ;;  %v45384_v5 = vld [vmem:[#allocation307_spill] sm:$0xff] }
 0x361   :  { %37720 = vmatprep.subr.mxu1 %v45374_v46  ;;  %37727 = vmatprep.subr.mxu0 %v45375_v29  ;;  %v32090_v53 = vsel %vm97_vm0, %v32070_v57, 0.0  ;;  %v32071_v61 = vand.u32 2147483647, %v31174_v15  ;;  %v45386_v50 = vld [vmem:[#allocation23_spill] sm:$0xff] }
 0x362   :  { %37711 = vmatmul.mubr.msk.f32.vlgmr.msra.gmra.mxu1 %vm97_vm0, %v41583_v38  ;;  %37718 = vmatmul.mubr.msk.f32.vlgmr.msra.gmra.mxu0 %vm97_vm0, %v41583_v38  ;;  %v41876_v54 = vpop.f32.mrf.mxu1  ;;  %v41878_v49 = vpop.f32.mrf.mxu0  ;;  %v31184_v62 = vadd.f32 %v31056_v45, %v45384_v5  ;;  %v31048_v45 = vmul.f32 -1.0, %v41457_v22  ;;  %v45390_v22 = vld [vmem:[#allocation297_spill] sm:$0xff] }
 0x363   :  { %45376 = vst [vmem:[#allocation18_spill] sm:$0xff] %v41876_v54  ;;  %45377 = vst [vmem:[#allocation19_spill] sm:$0xff] %v41878_v49  ;;  %37721 = vmatpush3.msra.mxu1 %v45374_v46  ;;  %37728 = vmatpush3.msra.mxu0 %v45375_v29  ;;  %v45381_v54 = vld [vmem:[#allocation22_spill] sm:$0xff]  ;;  %v31058_v29 = vmul.f32 -1.0, %v41551_v21 }
 0x364   :  { %37722 = vmatprep.subr.mxu1 %v45380_v37  ;;  %37729 = vmatprep.subr.mxu0 %v45381_v54  ;;  %v41889_v49 = vpop.f32.mrf.mxu1  ;;  %v41891_v9 = vpop.f32.mrf.mxu0  ;;  %v45385_v46 = vld [vmem:[#allocation294_spill] sm:$0xff]  ;;  %v32238_v15 = vand.u32 2147483647, %v31184_v62  ;;  %v45394_v62 = vld [vmem:[#allocation305_spill] sm:$0xff] }
 0x365   :  { %45382 = vst [vmem:[#allocation20_spill] sm:$0xff] %v41889_v49  ;;  %45383 = vst [vmem:[#allocation296_spill] sm:$0xff] %v41891_v9  ;;  %37723 = vmatpush3.msra.mxu1 %v45380_v37  ;;  %37730 = vmatpush3.msra.mxu0 %v45381_v54  ;;  %v31175_v7 = vadd.f32 %v45385_v46, %v31047_v14  ;;  %v45387_v37 = vld [vmem:[#allocation24_spill] sm:$0xff]  ;;  %v45388_v54 = vld [vmem:[#allocation306_spill] sm:$0xff]  ;;  %v31186_v21 = vadd.f32 %v31058_v29, %v41577_v2 }
 0x366   :  { %37724 = vmatprep.mubr.msk.f32.mxu1 %vm97_vm0, %v41573_v4  ;;  %37731 = vmatprep.mubr.msk.f32.mxu0 %vm97_vm0, %v41573_v4  ;;  %v31185_v9 = vadd.f32 %v45388_v54, %v31057_v1  ;;  %v32091_v14 = vadd.f32 %v32090_v53, %v32089_v3  ;;  %v31049_v1 = vmul.f32 -1.0, %v45369_v30  ;;  %v31176_v3 = vadd.f32 %v31048_v45, %v45390_v22  ;;  %v45391_v53 = vld [vmem:[#allocation25_spill] sm:$0xff]  ;;  %v45395_v45 = vld [vmem:[#allocation27_spill] sm:$0xff] }
 0x367   :  { %37734 = vmatprep.subr.mxu1 %v45386_v50  ;;  %37741 = vmatprep.subr.mxu0 %v45387_v37  ;;  %v32072_v29 = vand.u32 2147483647, %v31175_v7  ;;  %v32240_v7 = vand.u32 2147483647, %v31186_v21 }
 0x368   :  { %37725 = vmatmul.mubr.msk.f32.vlgmr.msra.gmra.mxu1 %vm97_vm0, %v41583_v38  ;;  %37732 = vmatmul.mubr.msk.f32.vlgmr.msra.gmra.mxu0 %vm97_vm0, %v41583_v38  ;;  %v41912_v49 = vpop.f32.mrf.mxu1  ;;  %v41914_v57 = vpop.f32.mrf.mxu0  ;;  %v32239_v30 = vand.u32 2147483647, %v31185_v9 }
 0x369   :  { %45389 = vst [vmem:[#allocation304_spill] sm:$0xff] %v41912_v49  ;;  %37735 = vmatpush3.msra.mxu1 %v45386_v50  ;;  %37742 = vmatpush3.msra.mxu0 %v45387_v37  ;;  %v32092_v49 = vsel %vm97_vm0, %v32071_v61, 0.0  ;;  %v31059_v50 = vmul.f32 -1.0, %v45394_v62  ;;  %v32254_v61 = vsel %vm97_vm0, %v32238_v15, 0.0  ;;  %v45398_v62 = vld [vmem:[#allocation295_spill] sm:$0xff] }
 0x36a   :  { %37736 = vmatprep.subr.mxu1 %v45391_v53  ;;  %37743 = vmatprep.subr.mxu0 %v45392_v60  ;;  %v41922_v59 = vpop.f32.mrf.mxu1  ;;  %v41924_v34 = vpop.f32.mrf.mxu0  ;;  %v32093_v37 = vadd.f32 %v32092_v49, %v32091_v14  ;;  %v31177_v9 = vadd.f32 %v45398_v62, %v31049_v1  ;;  %v32073_v14 = vand.u32 2147483647, %v31176_v3  ;;  %v32255_v15 = vsel %vm97_vm0, %v32239_v30, 0.0 }
 0x36b   :  { %45393 = vst [vmem:[#allocation21_spill] sm:$0xff] %v41922_v59  ;;  %37737 = vmatpush3.msra.mxu1 %v45391_v53  ;;  %37744 = vmatpush3.msra.mxu0 %v45392_v60  ;;  %v45396_v59 = vld [vmem:[#allocation28_spill] sm:$0xff]  ;;  %v32094_v60 = vsel %vm97_vm0, %v32072_v29, 0.0  ;;  %v31060_v29 = vmul.f32 -1.0, %v45384_v5  ;;  %v32257_v1 = vsel %vm97_vm0, %v32240_v7, 0.0  ;;  %v32256_v17 = vadd.f32 %v32255_v15, %v32254_v61 }
 0x36c   :  { %37738 = vmatprep.mubr.msk.f32.mxu1 %vm97_vm0, %v41573_v4  ;;  %37745 = vmatprep.mubr.msk.f32.mxu0 %vm97_vm0, %v41573_v4  ;;  %v45397_v53 = vld [vmem:[#allocation308_spill] sm:$0xff]  ;;  %v31050_v3 = vmul.f32 -1.0, %v45378_v25 }
 0x36d   :  { %37748 = vmatprep.subr.mxu1 %v45395_v45  ;;  %37755 = vmatprep.subr.mxu0 %v45396_v59  ;;  %v31187_v0 = vadd.f32 %v45397_v53, %v31059_v50  ;;  %v32095_v50 = vadd.f32 %v32094_v60, %v32093_v37  ;;  %v31188_v30 = vadd.f32 %v31060_v29, %v41579_v12  ;;  %v32074_v37 = vand.u32 2147483647, %v31177_v9  ;;  %v45403_v25 = vld [vmem:[#allocation300_spill] sm:$0xff]  ;;  %v45408_v29 = vld [vmem:[#allocation33_spill] sm:$0xff] }
 0x36e   :  { %37739 = vmatmul.mubr.msk.f32.vlgmr.msra.gmra.mxu1 %vm97_vm0, %v41583_v38  ;;  %37746 = vmatmul.mubr.msk.f32.vlgmr.msra.gmra.mxu0 %vm97_vm0, %v41583_v38  ;;  %v41944_v49 = vpop.f32.mrf.mxu1  ;;  %v41946_v21 = vpop.f32.mrf.mxu0  ;;  %v32258_v7 = vadd.f32 %v32257_v1, %v32256_v17  ;;  %v31178_v61 = vadd.f32 %v31050_v3, %v45403_v25  ;;  %v31051_v17 = vmul.f32 -1.0, %v45385_v46  ;;  %v45409_v1 = vld [vmem:[#allocation34_spill] sm:$0xff] }
 0x36f   :  { %45399 = vst [vmem:[#allocation22_spill] sm:$0xff] %v41944_v49  ;;  %45400 = vst [vmem:[#allocation307_spill] sm:$0xff] %v41946_v21  ;;  %37749 = vmatpush3.msra.mxu1 %v45395_v45  ;;  %37756 = vmatpush3.msra.mxu0 %v45396_v59  ;;  %v31061_v59 = vmul.f32 -1.0, %v45388_v54  ;;  %v32241_v5 = vand.u32 2147483647, %v31187_v0  ;;  %v32096_v45 = vsel %vm97_vm0, %v32073_v14, 0.0 }
 0x370   :  { %37750 = vmatprep.subr.mxu1 %v45401_v58  ;;  %37757 = vmatprep.subr.mxu0 %v45402_v33  ;;  %v41955_v49 = vpop.f32.mrf.mxu1  ;;  %v41957_v21 = vpop.f32.mrf.mxu0  ;;  %v32097_v54 = vadd.f32 %v32096_v45, %v32095_v50  ;;  %v32242_v15 = vand.u32 2147483647, %v31188_v30  ;;  %v32098_v46 = vsel %vm97_vm0, %v32074_v37, 0.0  ;;  %v31052_v30 = vmul.f32 -1.0, %v45390_v22  ;;  %v45413_v37 = vld [vmem:[#allocation36_spill] sm:$0xff] }
 0x371   :  { %37751 = vmatpush3.msra.mxu1 %v45401_v58  ;;  %37758 = vmatpush3.msra.mxu0 %v45402_v33  ;;  %v45404_v58 = vld [vmem:[#allocation31_spill] sm:$0xff]  ;;  %v45405_v33 = vld [vmem:[#allocation32_spill] sm:$0xff]  ;;  %v32259_v9 = vsel %vm97_vm0, %v32241_v5, 0.0  ;;  %v31189_v14 = vadd.f32 %v41569_v26, %v31061_v59  ;;  %v31062_v59 = vmul.f32 -1.0, %v41577_v2  ;;  %v31053_v2 = vmul.f32 -1.0, %v45398_v62 }
 0x372   :  { %37752 = vmatprep.mubr.msk.f32.mxu1 %vm97_vm0, %v41573_v4  ;;  %37759 = vmatprep.mubr.msk.f32.mxu0 %vm97_vm0, %v41573_v4  ;;  %v32260_v50 = vadd.f32 %v32259_v9, %v32258_v7  ;;  %v32099_v5 = vadd.f32 %v32098_v46, %v32097_v54  ;;  %v45412_v7 = vld [vmem:[#allocation35_spill] sm:$0xff]  ;;  %v31063_v46 = vmul.f32 -1.0, %v45397_v53 }
 0x373   :  { %37762 = vmatprep.subr.mxu1 %v45404_v58  ;;  %37769 = vmatprep.subr.mxu0 %v45405_v33 }
 0x374   :  { %37753 = vmatmul.mubr.msk.f32.vlgmr.msra.gmra.mxu1 %vm97_vm0, %v41583_v38  ;;  %37760 = vmatmul.mubr.msk.f32.vlgmr.msra.gmra.mxu0 %vm97_vm0, %v41583_v38  ;;  %v41976_v0 = vpop.f32.mrf.mxu1  ;;  %v41978_v60 = vpop.f32.mrf.mxu0  ;;  %v31191_v53 = vadd.f32 %v41595_v13, %v31063_v46 }
 0x375   :  { %45406 = vst [vmem:[#allocation294_spill] sm:$0xff] %v41976_v0  ;;  %45407 = vst [vmem:[#allocation23_spill] sm:$0xff] %v41978_v60  ;;  %37763 = vmatpush3.msra.mxu1 %v45404_v58  ;;  %37770 = vmatpush3.msra.mxu0 %v45405_v33  ;;  %v45411_v60 = vld [vmem:[#allocation298_spill] sm:$0xff]  ;;  %v32075_v0 = vand.u32 2147483647, %v31178_v61  ;;  %v32261_v33 = vsel %vm97_vm0, %v32242_v15, 0.0 }
 0x376   :  { %37764 = vmatprep.subr.mxu1 %v45408_v29  ;;  %37771 = vmatprep.subr.mxu0 %v45409_v1  ;;  %v41987_v3 = vpop.f32.mrf.mxu1  ;;  %v41989_v45 = vpop.f32.mrf.mxu0  ;;  %v31179_v58 = vadd.f32 %v45411_v60, %v31051_v17  ;;  %v32243_v61 = vand.u32 2147483647, %v31189_v14  ;;  %v31190_v17 = vadd.f32 %v31062_v59, %v41603_v63  ;;  %v32262_v54 = vadd.f32 %v32261_v33, %v32260_v50  ;;  %v45415_v59 = vld [vmem:[#allocation37_spill] sm:$0xff] }
 0x377   :  { %45410 = vst [vmem:[#allocation24_spill] sm:$0xff] %v41989_v45  ;;  %37765 = vmatpush3.msra.mxu1 %v45408_v29  ;;  %37772 = vmatpush3.msra.mxu0 %v45409_v1  ;;  %v32100_v14 = vsel %vm97_vm0, %v32075_v0, 0.0  ;;  %v45414_v1 = vld [vmem:[#allocation301_spill] sm:$0xff]  ;;  %v45416_v45 = vld [vmem:[#allocation38_spill] sm:$0xff] }
 0x378   :  { %37766 = vmatprep.mubr.msk.f32.mxu1 %vm97_vm0, %v41573_v4  ;;  %37773 = vmatprep.mubr.msk.f32.mxu0 %vm97_vm0, %v41573_v4  ;;  %v32076_v29 = vand.u32 2147483647, %v31179_v58  ;;  %v31180_v15 = vadd.f32 %v31052_v30, %v45414_v1  ;;  %v32101_v62 = vadd.f32 %v32100_v14, %v32099_v5  ;;  %v32263_v58 = vsel %vm97_vm0, %v32243_v61, 0.0  ;;  %v45417_v30 = vld [vmem:[#allocation299_spill] sm:$0xff] }
 0x379   :  { %37776 = vmatprep.subr.mxu1 %v45412_v7  ;;  %37783 = vmatprep.subr.mxu0 %v45413_v37  ;;  %v32244_v0 = vand.u32 2147483647, %v31190_v17  ;;  %v32264_v5 = vadd.f32 %v32263_v58, %v32262_v54  ;;  %v31064_v61 = vmul.f32 -1.0, %v41579_v12  ;;  %v45418_v1 = vld [vmem:[#allocation39_spill] sm:$0xff]  ;;  %v31065_v17 = vmul.f32 -1.0, %v41569_v26  ;;  %v45422_v58 = vld [vmem:[#allocation42_spill] sm:$0xff] }
 0x37a   :  { %37767 = vmatmul.mubr.msk.f32.vlgmr.msra.gmra.mxu1 %vm97_vm0, %v41583_v38  ;;  %37774 = vmatmul.mubr.msk.f32.vlgmr.msra.gmra.mxu0 %vm97_vm0, %v41583_v38  ;;  %v42010_v9 = vpop.f32.mrf.mxu1  ;;  %v42012_v22 = vpop.f32.mrf.mxu0  ;;  %v32077_v14 = vand.u32 2147483647, %v31180_v15  ;;  %v32245_v12 = vand.u32 2147483647, %v31191_v53  ;;  %v45423_v53 = vld [vmem:[#allocation303_spill] sm:$0xff] }
 0x37b   :  { %37777 = vmatpush3.msra.mxu1 %v45412_v7  ;;  %37784 = vmatpush3.msra.mxu0 %v45413_v37  ;;  %v31181_v7 = vadd.f32 %v45417_v30, %v31053_v2  ;;  %v32102_v37 = vsel %vm97_vm0, %v32076_v29, 0.0  ;;  %v31054_v29 = vmul.f32 -1.0, %v45403_v25  ;;  %v32265_v15 = vsel %vm97_vm0, %v32244_v0, 0.0 }
 0x37c   :  { %37778 = vmatprep.subr.mxu1 %v45415_v59  ;;  %37785 = vmatprep.subr.mxu0 %v45416_v45  ;;  %v42021_v50 = vpop.f32.mrf.mxu1  ;;  %v42023_v33 = vpop.f32.mrf.mxu0  ;;  %v32103_v46 = vadd.f32 %v32102_v37, %v32101_v62  ;;  %v31192_v26 = vadd.f32 %v31064_v61, %v41605_v42  ;;  %v32266_v30 = vadd.f32 %v32265_v15, %v32264_v5  ;;  %v32104_v25 = vsel %vm97_vm0, %v32077_v14, 0.0  ;;  %v45424_v15 = vld [vmem:[#allocation43_spill] sm:$0xff] }
 0x37d   :  { %37779 = vmatpush3.msra.mxu1 %v45415_v59  ;;  %37786 = vmatpush3.msra.mxu0 %v45416_v45  ;;  %v45419_v45 = vld [vmem:[#allocation40_spill] sm:$0xff]  ;;  %v32078_v62 = vand.u32 2147483647, %v31181_v7  ;;  %v45421_v59 = vld [vmem:[#allocation41_spill] sm:$0xff]  ;;  %v31073_v0 = vmul.f32 -1.0, %v41645_v28  ;;  %v31072_v7 = vmul.f32 -1.0, %v41653_v32  ;;  %v31193_v5 = vadd.f32 %v41597_v16, %v31065_v17 }
 0x37e   :  { %37780 = vmatprep.mubr.msk.f32.mxu1 %vm97_vm0, %v41573_v4  ;;  %37787 = vmatprep.mubr.msk.f32.mxu0 %vm97_vm0, %v41573_v4  ;;  %v31055_v61 = vmul.f32 -1.0, %v45411_v60  ;;  %v32267_v14 = vsel %vm97_vm0, %v32245_v12, 0.0  ;;  %v31074_v28 = vmul.f32 -1.0, %v41675_v39  ;;  %v31066_v39 = vmul.f32 -1.0, %v41603_v63 }
 0x37f   :  { %37790 = vmatprep.subr.mxu1 %v45418_v1  ;;  %37797 = vmatprep.subr.mxu0 %v45419_v45  ;;  %v31200_v32 = vadd.f32 %v31072_v7, %v41677_v40  ;;  %v32106_v60 = vsel %vm97_vm0, %v32078_v62, 0.0  ;;  %v31201_v62 = vadd.f32 %v41669_v36, %v31073_v0  ;;  %v45429_v7 = vld [vmem:[#allocation46_spill] sm:$0xff] }
 0x380   :  { %37781 = vmatmul.mubr.msk.f32.vlgmr.msra.gmra.mxu1 %vm97_vm0, %v41583_v38  ;;  %37788 = vmatmul.mubr.msk.f32.vlgmr.msra.gmra.mxu0 %vm97_vm0, %v41583_v38  ;;  %v42043_v2 = vpop.f32.mrf.mxu1  ;;  %v42045_v54 = vpop.f32.mrf.mxu0 }
 0x381   :  { %45420 = vst [vmem:[#allocation306_spill] sm:$0xff] %v42045_v54  ;;  %37791 = vmatpush3.msra.mxu1 %v45418_v1  ;;  %37798 = vmatpush3.msra.mxu0 %v45419_v45  ;;  %v31182_v1 = vadd.f32 %v31054_v29, %v45423_v53  ;;  %v32105_v45 = vadd.f32 %v32104_v25, %v32103_v46  ;;  %v32246_v29 = vand.u32 2147483647, %v31192_v26  ;;  %v45426_v46 = vld [vmem:[#allocation302_spill] sm:$0xff]  ;;  %v45428_v53 = vld [vmem:[#allocation45_spill] sm:$0xff] }
 0x382   :  { %37792 = vmatprep.subr.mxu1 %v45421_v59  ;;  %37799 = vmatprep.subr.mxu0 %v45422_v58  ;;  %v42054_v37 = vpop.f32.mrf.mxu1  ;;  %v42056_v54 = vpop.f32.mrf.mxu0  ;;  %v31183_v17 = vadd.f32 %v45426_v46, %v31055_v61  ;;  %v32412_v0 = vand.u32 2147483647, %v31200_v32 }
 0x383   :  { %37793 = vmatpush3.msra.mxu1 %v45421_v59  ;;  %37800 = vmatpush3.msra.mxu0 %v45422_v58  ;;  %v45425_v59 = vld [vmem:[#allocation44_spill] sm:$0xff]  ;;  %v32268_v58 = vadd.f32 %v32267_v14, %v32266_v30  ;;  %v32079_v25 = vand.u32 2147483647, %v31182_v1  ;;  %v31202_v30 = vadd.f32 %v31074_v28, %v41699_v47  ;;  %v32107_v61 = vadd.f32 %v32106_v60, %v32105_v45  ;;  %v45431_v45 = vld [vmem:[#allocation47_spill] sm:$0xff] }
 0x384   :  { %37794 = vmatprep.mubr.msk.f32.mxu1 %vm97_vm0, %v41573_v4  ;;  %37801 = vmatprep.mubr.msk.f32.mxu0 %vm97_vm0, %v41573_v4  ;;  %v32247_v1 = vand.u32 2147483647, %v31193_v5  ;;  %v32269_v63 = vsel %vm97_vm0, %v32246_v29, 0.0  ;;  %v31067_v28 = vmul.f32 -1.0, %v41595_v13  ;;  %v45432_v5 = vld [vmem:[#allocation48_spill] sm:$0xff]  ;;  %v31075_v29 = vmul.f32 -1.0, %v41667_v35 }
 0x385   :  { %37804 = vmatprep.subr.mxu1 %v45424_v15  ;;  %37811 = vmatprep.subr.mxu0 %v45425_v59  ;;  %v32108_v60 = vsel %vm97_vm0, %v32079_v25, 0.0  ;;  %v32414_v32 = vand.u32 2147483647, %v31202_v30  ;;  %v32428_v25 = vsel %vm97_vm0, %v32412_v0, 0.0  ;;  %v31068_v30 = vmul.f32 -1.0, %v41605_v42 }
 0x386   :  { %37795 = vmatmul.mubr.msk.f32.vlgmr.msra.gmra.mxu1 %vm97_vm0, %v41583_v38  ;;  %37802 = vmatmul.mubr.msk.f32.vlgmr.msra.gmra.mxu0 %vm97_vm0, %v41583_v38  ;;  %v42081_v12 = vpop.f32.mrf.mxu1  ;;  %v42083_v26 = vpop.f32.mrf.mxu0  ;;  %v32109_v13 = vadd.f32 %v32108_v60, %v32107_v61  ;;  %v45434_v61 = vld [vmem:[#allocation50_spill] sm:$0xff]  ;;  %v31076_v42 = vmul.f32 -1.0, %v41677_v40  ;;  %v31077_v40 = vmul.f32 -1.0, %v41669_v36 }
 0x387   :  { %45427 = vst [vmem:[#allocation297_spill] sm:$0xff] %v42081_v12  ;;  %37805 = vmatpush3.msra.mxu1 %v45424_v15  ;;  %37812 = vmatpush3.msra.mxu0 %v45425_v59  ;;  %v31194_v15 = vadd.f32 %v31066_v39, %v41627_v23  ;;  %v32080_v59 = vand.u32 2147483647, %v31183_v17  ;;  %v32270_v12 = vadd.f32 %v32269_v63, %v32268_v58  ;;  %v32413_v39 = vand.u32 2147483647, %v31201_v62 }
 0x388   :  { %37806 = vmatprep.subr.mxu1 %v45428_v53  ;;  %37813 = vmatprep.subr.mxu0 %v45429_v7  ;;  %v42092_v14 = vpop.f32.mrf.mxu1  ;;  %v42094_v46 = vpop.f32.mrf.mxu0  ;;  %v31195_v17 = vadd.f32 %v41619_v19, %v31067_v28  ;;  %v31203_v62 = vadd.f32 %v41691_v43, %v31075_v29  ;;  %v45433_v28 = vld [vmem:[#allocation49_spill] sm:$0xff] }
 0x389   :  { %45430 = vst [vmem:[#allocation25_spill] sm:$0xff] %v42092_v14  ;;  %37807 = vmatpush3.msra.mxu1 %v45428_v53  ;;  %37814 = vmatpush3.msra.mxu0 %v45429_v7  ;;  %v32271_v7 = vsel %vm97_vm0, %v32247_v1, 0.0  ;;  %v32248_v35 = vand.u32 2147483647, %v31194_v15  ;;  %v32110_v60 = vsel %vm97_vm0, %v32080_v59, 0.0  ;;  %v31069_v15 = vmul.f32 -1.0, %v41597_v16 }
 0x38a   :  { %37808 = vmatprep.mubr.msk.f32.mxu1 %vm97_vm0, %v41573_v4  ;;  %37815 = vmatprep.mubr.msk.f32.mxu0 %vm97_vm0, %v41573_v4  ;;  %v32272_v63 = vadd.f32 %v32271_v7, %v32270_v12  ;;  %v32429_v0 = vsel %vm97_vm0, %v32413_v39, 0.0  ;;  %v32431_v12 = vsel %vm97_vm0, %v32414_v32, 0.0  ;;  %v32111_v16 = vadd.f32 %v32110_v60, %v32109_v13  ;;  %v45435_v7 = vld [vmem:[#allocation51_spill] sm:$0xff]  ;;  %v45436_v39 = vld [vmem:[#allocation52_spill] sm:$0xff]  ;;  %v45438_v60 = vld [vmem:[#allocation54_spill] sm:$0xff] }
 0x38b   :  { %37818 = vmatprep.subr.mxu1 %v45431_v45  ;;  %37825 = vmatprep.subr.mxu0 %v45432_v5  ;;  %v32430_v59 = vadd.f32 %v32429_v0, %v32428_v25  ;;  %v32273_v29 = vsel %vm97_vm0, %v32248_v35, 0.0  ;;  %v32415_v32 = vand.u32 2147483647, %v31203_v62  ;;  %v45437_v62 = vld [vmem:[#allocation53_spill] sm:$0xff] }
 0x38c   :  { %37809 = vmatmul.mubr.msk.f32.vlgmr.msra.gmra.mxu1 %vm97_vm0, %v41583_v38  ;;  %37816 = vmatmul.mubr.msk.f32.vlgmr.msra.gmra.mxu0 %vm97_vm0, %v41583_v38  ;;  %v42114_v58 = vpop.f32.mrf.mxu1  ;;  %v42116_v53 = vpop.f32.mrf.mxu0 }
 0x38d   :  { %37819 = vmatpush3.msra.mxu1 %v45431_v45  ;;  %37826 = vmatpush3.msra.mxu0 %v45432_v5  ;;  %v32249_v45 = vand.u32 2147483647, %v31195_v17  ;;  %v31196_v5 = vadd.f32 %v31068_v30, %v41629_v24  ;;  %v31204_v17 = vadd.f32 %v31076_v42, %v41701_v48  ;;  %v32274_v24 = vadd.f32 %v32273_v29, %v32272_v63 }
 0x38e   :  { %37820 = vmatprep.subr.mxu1 %v45433_v28  ;;  %37827 = vmatprep.subr.mxu0 %v45434_v61  ;;  %v42127_v14 = vpop.f32.mrf.mxu1  ;;  %v42129_v1 = vpop.f32.mrf.mxu0  ;;  %v32432_v13 = vadd.f32 %v32431_v12, %v32430_v59  ;;  %v31197_v30 = vadd.f32 %v41621_v20, %v31069_v15  ;;  %v32433_v20 = vsel %vm97_vm0, %v32415_v32, 0.0  ;;  %v31205_v15 = vadd.f32 %v41693_v44, %v31077_v40  ;;  %v45439_v59 = vld [vmem:[#allocation55_spill] sm:$0xff] }
 0x38f   :  { %37821 = vmatpush3.msra.mxu1 %v45433_v28  ;;  %37828 = vmatpush3.msra.mxu0 %v45434_v61  ;;  %v32250_v36 = vand.u32 2147483647, %v31196_v5  ;;  %v32275_v61 = vsel %vm97_vm0, %v32249_v45, 0.0  ;;  %v32416_v0 = vand.u32 2147483647, %v31204_v17  ;;  %v31071_v42 = vmul.f32 -1.0, %v41619_v19 }
 0x390   :  { %37822 = vmatprep.mubr.msk.f32.mxu1 %vm97_vm0, %v41573_v4  ;;  %37829 = vmatprep.mubr.msk.f32.mxu0 %vm97_vm0, %v41573_v4  ;;  %v32276_v12 = vadd.f32 %v32275_v61, %v32274_v24  ;;  %v31078_v5 = vmul.f32 -1.0, %v41699_v47  ;;  %v32434_v45 = vadd.f32 %v32433_v20, %v32432_v13  ;;  %v31070_v29 = vmul.f32 -1.0, %v41627_v23  ;;  %v45442_v20 = vld [vmem:[#allocation58_spill] sm:$0xff] }
 0x391   :  { %37832 = vmatprep.subr.mxu1 %v45435_v7  ;;  %37839 = vmatprep.subr.mxu0 %v45436_v39  ;;  %v42179_v19 = vadd.f32 %v41643_v27, %v31071_v42  ;;  %v32435_v23 = vsel %vm97_vm0, %v32416_v0, 0.0  ;;  %v31089_v27 = vmul.f32 -1.0, %v41765_v8  ;;  %v31088_v17 = vmul.f32 -1.0, %v41773_v10  ;;  %v42210_v10 = vld [vmem:[#allocation11] sm:$0xff] }
 0x392   :  { %37823 = vmatmul.mubr.msk.f32.vlgmr.msra.gmra.mxu1 %vm97_vm0, %v41583_v38  ;;  %37830 = vmatmul.mubr.msk.f32.vlgmr.msra.gmra.mxu0 %vm97_vm0, %v41583_v38  ;;  %v42151_v25 = vpop.f32.mrf.mxu1  ;;  %v42153_v35 = vpop.f32.mrf.mxu0  ;;  %v31206_v47 = vadd.f32 %v31078_v5, %v41723_v55  ;;  %v31198_v13 = vadd.f32 %v31070_v29, %v41651_v31  ;;  %v31090_v8 = vmul.f32 -1.0, %v41801_v41  ;;  %v45443_v41 = vld [vmem:[#allocation59_spill] sm:$0xff]  ;;  %v42224_v29 = vld [vmem:[#allocation11 + $0x8] sm:$0xff] }
 0x393   :  { %37833 = vmatpush3.msra.mxu1 %v45435_v7  ;;  %37840 = vmatpush3.msra.mxu0 %v45436_v39  ;;  %v32277_v7 = vsel %vm97_vm0, %v32250_v36, 0.0  ;;  %v45440_v39 = vld [vmem:[#allocation56_spill] sm:$0xff]  ;;  %v45441_v36 = vld [vmem:[#allocation57_spill] sm:$0xff]  ;;  %v31216_v31 = vadd.f32 %v31088_v17, %v41803_v6  ;;  %v32253_v0 = vand.u32 2147483647, %v42179_v19 }
 0x394   :  { %32112 = vadd.xlane.f32.xlu0 %v32111_v16  ;;  %37834 = vmatprep.subr.mxu1 %v45437_v62  ;;  %v42159_v63 = vpop.f32.mrf.mxu1  ;;  %v42161_v28 = vpop.f32.mrf.mxu0  ;;  %v32251_v16 = vand.u32 2147483647, %v31197_v30  ;;  %v32278_v24 = vadd.f32 %v32277_v7, %v32276_v12  ;;  %v31079_v30 = vmul.f32 -1.0, %v41691_v43  ;;  %v31217_v12 = vadd.f32 %v41793_v18, %v31089_v27 }
 0x395   :  { %37841 = vmatprep.subr.mxu0 %v45438_v60  ;;  %37835 = vmatpush3.msra.mxu1 %v45437_v62  ;;  %v32436_v62 = vadd.f32 %v32435_v23, %v32434_v45  ;;  %v31218_v5 = vadd.f32 %v31090_v8, %v41828_v11  ;;  %v32252_v45 = vand.u32 2147483647, %v31198_v13  ;;  %v31105_v23 = vmul.f32 -1.0, %v41914_v57  ;;  %v45450_v8 = vld [vmem:[#allocation62_spill] sm:$0xff] }
 0x396   :  { %37842 = vmatpush3.msra.mxu0 %v45438_v60  ;;  %37836 = vmatprep.mubr.msk.f32.mxu1 %vm97_vm0, %v41573_v4  ;;  %v31081_v60 = vmul.f32 -1.0, %v41693_v44  ;;  %v32279_v43 = vsel %vm97_vm0, %v32251_v16, 0.0  ;;  %v32418_v44 = vand.u32 2147483647, %v31206_v47  ;;  %v31080_v16 = vmul.f32 -1.0, %v41701_v48 }
 0x397   :  { %37843 = vmatprep.mubr.msk.f32.mxu0 %vm97_vm0, %v41573_v4  ;;  %37846 = vmatprep.subr.mxu1 %v45439_v59  ;;  %v32417_v4 = vand.u32 2147483647, %v31205_v15  ;;  %v31207_v15 = vadd.f32 %v41715_v51, %v31079_v30  ;;  %v32280_v19 = vadd.f32 %v32279_v43, %v32278_v24  ;;  %v32586_v48 = vand.u32 2147483647, %v31216_v31  ;;  %v45446_v24 = vld [vmem:[#allocation61_spill] sm:$0xff] }
 0x398   :  { %37853 = vmatprep.subr.mxu0 %v45440_v39  ;;  %37837 = vmatmul.mubr.msk.f32.vlgmr.msra.gmra.mxu1 %vm97_vm0, %v41583_v38  ;;  %v42185_v40 = vpop.f32.mrf.mxu1  ;;  %v42187_v32 = vpop.f32.mrf.mxu0  ;;  %v31104_v27 = vmul.f32 -1.0, %v41924_v34  ;;  %v32439_v13 = vsel %vm97_vm0, %v32418_v44, 0.0  ;;  %v31208_v30 = vadd.f32 %v31080_v16, %v41725_v56  ;;  %v32587_v34 = vand.u32 2147483647, %v31217_v12  ;;  %v45452_v12 = vld [vmem:[#allocation63_spill] sm:$0xff] }
 0x399   :  { %37844 = vmatmul.mubr.msk.f32.vlgmr.msra.gmra.mxu0 %vm97_vm0, %v41583_v38  ;;  %37847 = vmatpush3.msra.mxu1 %v45439_v59  ;;  %v32437_v42 = vsel %vm97_vm0, %v32417_v4, 0.0  ;;  %v45444_v59 = vld [vmem:[#allocation60_spill] sm:$0xff]  ;;  %v42233_v4 = vadd.f32 %v41717_v52, %v31081_v60  ;;  %v32419_v17 = vand.u32 2147483647, %v31207_v15  ;;  %v32588_v57 = vand.u32 2147483647, %v31218_v5 }
 0x39a   :  { %37854 = vmatpush3.msra.mxu0 %v45440_v39  ;;  %37848 = vmatprep.subr.mxu1 %v45441_v36  ;;  %v42199_v61 = vpop.f32.mrf.mxu1  ;;  %v42201_v38 = vpop.f32.mrf.mxu0  ;;  %v32438_v7 = vadd.f32 %v32437_v42, %v32436_v62  ;;  %v31106_v31 = vmul.f32 -1.0, %v41955_v49  ;;  %v31232_v43 = vadd.f32 %v31104_v27, %v41957_v21  ;;  %v32281_v44 = vsel %vm97_vm0, %v32252_v45, 0.0 }
 0x39b   :  { %37855 = vmatprep.subr.mxu0 %v45442_v20  ;;  %37849 = vmatpush3.msra.mxu1 %v45441_v36  ;;  %v45447_v36 = vld [vmem:[#allocation315_spill] sm:$0xff]  ;;  %v32283_v42 = vsel %vm97_vm0, %v32253_v0, 0.0  ;;  %v32282_v49 = vadd.f32 %v32281_v44, %v32280_v19  ;;  %v32602_v5 = vsel %vm97_vm0, %v32586_v48, 0.0  ;;  %v32421_v45 = vand.u32 2147483647, %v42233_v4 }
 0x39c   :  { %37856 = vmatpush3.msra.mxu0 %v45442_v20  ;;  %37850 = vmatprep.mubr.msk.f32.mxu1 %vm97_vm0, %v42210_v10  ;;  %v31091_v62 = vmul.f32 -1.0, %v45447_v36  ;;  %v32440_v15 = vadd.f32 %v32439_v13, %v32438_v7  ;;  %v31234_v27 = vadd.f32 %v31106_v31, %v41987_v3  ;;  %v31082_v0 = vmul.f32 -1.0, %v41723_v55  ;;  %v45454_v36 = vld [vmem:[#allocation64_spill] sm:$0xff] }
 0x39d   :  { %37857 = vmatprep.mubr.msk.f32.mxu0 %vm97_vm0, %v42210_v10  ;;  %37860 = vmatprep.subr.mxu1 %v45443_v41  ;;  %v32420_v13 = vand.u32 2147483647, %v31208_v30  ;;  %v32603_v48 = vsel %vm97_vm0, %v32587_v34, 0.0  ;;  %v31092_v4 = vmul.f32 -1.0, %v41803_v6  ;;  %v32605_v55 = vsel %vm97_vm0, %v32588_v57, 0.0  ;;  %v45456_v30 = vld [vmem:[#allocation65_spill] sm:$0xff] }
 0x39e   :  { %37867 = vmatprep.subr.mxu0 %v45444_v59  ;;  %37851 = vmatmul.mubr.msk.f32.vlgmr.msra.gmra.mxu1 %vm97_vm0, %v42224_v29  ;;  %v42228_v39 = vpop.f32.mrf.mxu1  ;;  %v42230_v47 = vpop.f32.mrf.mxu0  ;;  %v32604_v31 = vadd.f32 %v32603_v48, %v32602_v5  ;;  %v45459_v6 = vld [vmem:[#allocation318_spill] sm:$0xff]  ;;  %v31085_v48 = vmul.f32 -1.0, %v41717_v52 }
 0x39f   :  { %45445 = vst [vmem:[#allocation26_spill] sm:$0xff] %v42230_v47  ;;  %37858 = vmatmul.mubr.msk.f32.vlgmr.msra.gmra.mxu0 %vm97_vm0, %v42224_v29  ;;  %37861 = vmatpush3.msra.mxu1 %v45443_v41  ;;  %v45451_v41 = vld [vmem:[#allocation316_spill] sm:$0xff]  ;;  %v31220_v34 = vadd.f32 %v31092_v4, %v45459_v6  ;;  %v45460_v57 = vld [vmem:[#allocation22_spill] sm:$0xff]  ;;  %v45461_v47 = vld [vmem:[#allocation311_spill] sm:$0xff]  ;;  %v32443_v4 = vsel %vm97_vm0, %v32420_v13, 0.0 }
 0x3a0   :  { %37868 = vmatpush3.msra.mxu0 %v45444_v59  ;;  %37862 = vmatprep.subr.mxu1 %v45446_v24  ;;  %v42245_v60 = vpop.f32.mrf.mxu1  ;;  %v42247_v20 = vpop.f32.mrf.mxu0  ;;  %v31219_v16 = vadd.f32 %v45451_v41, %v31091_v62  ;;  %v45453_v59 = vld [vmem:[#allocation307_spill] sm:$0xff]  ;;  %v32606_v5 = vadd.f32 %v32605_v55, %v32604_v31 }
 0x3a1   :  { %45448 = vst [vmem:[#allocation305_spill] sm:$0xff] %v42245_v60  ;;  %45449 = vst [vmem:[#allocation27_spill] sm:$0xff] %v42247_v20  ;;  %37869 = vmatprep.subr.mxu0 %v45450_v8  ;;  %37863 = vmatpush3.msra.mxu1 %v45446_v24  ;;  %v31233_v7 = vadd.f32 %v45453_v59, %v31105_v23  ;;  %v32441_v24 = vsel %vm97_vm0, %v32419_v17, 0.0  ;;  %v32760_v23 = vand.u32 2147483647, %v31232_v43  ;;  %v31107_v43 = vmul.f32 -1.0, %v45460_v57 }
 0x3a2   :  { %37870 = vmatpush3.msra.mxu0 %v45450_v8  ;;  %37864 = vmatprep.mubr.msk.f32.mxu1 %vm97_vm0, %v42210_v10  ;;  %v32442_v17 = vadd.f32 %v32441_v24, %v32440_v15  ;;  %v31093_v8 = vmul.f32 -1.0, %v41793_v18  ;;  %v32589_v44 = vand.u32 2147483647, %v31219_v16  ;;  %v32762_v24 = vand.u32 2147483647, %v31234_v27  ;;  %v45463_v27 = vld [vmem:[#allocation294_spill] sm:$0xff] }
 0x3a3   :  { %37871 = vmatprep.mubr.msk.f32.mxu0 %vm97_vm0, %v42210_v10  ;;  %37874 = vmatprep.subr.mxu1 %v45452_v12  ;;  %v32761_v15 = vand.u32 2147483647, %v31233_v7  ;;  %v31210_v18 = vadd.f32 %v31082_v0, %v45461_v47  ;;  %v42297_v16 = vadd.f32 %v32283_v42, %v32282_v49  ;;  %v45462_v7 = vld [vmem:[#allocation67_spill] sm:$0xff]  ;;  %v31235_v0 = vadd.f32 %v45463_v27, %v31107_v43  ;;  %v45464_v57 = vld [vmem:[#allocation68_spill] sm:$0xff]  ;;  %v45465_v42 = vld [vmem:[#allocation317_spill] sm:$0xff] }
 0x3a4   :  { %37881 = vmatprep.subr.mxu0 %v45454_v36  ;;  %37865 = vmatmul.mubr.msk.f32.vlgmr.msra.gmra.mxu1 %vm97_vm0, %v42224_v29  ;;  %v42271_v62 = vpop.f32.mrf.mxu1  ;;  %v42273_v19 = vpop.f32.mrf.mxu0  ;;  %v32607_v52 = vsel %vm97_vm0, %v32589_v44, 0.0  ;;  %v31221_v49 = vadd.f32 %v45465_v42, %v31093_v8  ;;  %v32779_v31 = vsel %vm97_vm0, %v32762_v24, 0.0  ;;  %v45468_v43 = vld [vmem:[#allocation309_spill] sm:$0xff] }
 0x3a5   :  { %45455 = vst [vmem:[#allocation28_spill] sm:$0xff] %v42271_v62  ;;  %37872 = vmatmul.mubr.msk.f32.vlgmr.msra.gmra.mxu0 %vm97_vm0, %v42224_v29  ;;  %37875 = vmatpush3.msra.mxu1 %v45452_v12  ;;  %v45458_v12 = vld [vmem:[#allocation66_spill] sm:$0xff]  ;;  %v45469_v8 = vld [vmem:[#allocation69_spill] sm:$0xff]  ;;  %v32763_v24 = vand.u32 2147483647, %v31235_v0 }
 0x3a6   :  { %37882 = vmatpush3.msra.mxu0 %v45454_v36  ;;  %37876 = vmatprep.subr.mxu1 %v45456_v30  ;;  %v42284_v62 = vpop.f32.mrf.mxu1  ;;  %v42286_v20 = vpop.f32.mrf.mxu0  ;;  %v31083_v36 = vmul.f32 -1.0, %v41715_v51  ;;  %v32776_v51 = vsel %vm97_vm0, %v32760_v23, 0.0  ;;  %v32777_v23 = vsel %vm97_vm0, %v32761_v15, 0.0  ;;  %v31109_v15 = vmul.f32 -1.0, %v45453_v59  ;;  %v45474_v0 = vld [vmem:[#allocation293_spill] sm:$0xff] }
 0x3a7   :  { %45457 = vst [vmem:[#allocation308_spill] sm:$0xff] %v42284_v62  ;;  %37883 = vmatprep.subr.mxu0 %v45458_v12  ;;  %37877 = vmatpush3.msra.mxu1 %v45456_v30  ;;  %v32445_v30 = vsel %vm97_vm0, %v32421_v45, 0.0  ;;  %v32590_v45 = vand.u32 2147483647, %v31220_v34  ;;  %v32608_v62 = vadd.f32 %v32607_v52, %v32606_v5  ;;  %v45470_v34 = vld [vmem:[#allocation70_spill] sm:$0xff] }
 0x3a8   :  { %37884 = vmatpush3.msra.mxu0 %v45458_v12  ;;  %37878 = vmatprep.mubr.msk.f32.mxu1 %vm97_vm0, %v42210_v10  ;;  %v32444_v12 = vadd.f32 %v32443_v4, %v32442_v17  ;;  %v31108_v17 = vmul.f32 -1.0, %v41957_v21  ;;  %v31211_v44 = vadd.f32 %v45468_v43, %v31083_v36  ;;  %v32422_v4 = vand.u32 2147483647, %v31210_v18  ;;  %v45471_v36 = vld [vmem:[#allocation24_spill] sm:$0xff] }
 0x3a9   :  { %37885 = vmatprep.mubr.msk.f32.mxu0 %vm97_vm0, %v42210_v10  ;;  %37888 = vmatprep.subr.mxu1 %v45462_v7  ;;  %v31094_v21 = vmul.f32 -1.0, %v41828_v11  ;;  %v45473_v11 = vld [vmem:[#allocation71_spill] sm:$0xff]  ;;  %v32591_v59 = vand.u32 2147483647, %v31221_v49  ;;  %v31095_v49 = vmul.f32 -1.0, %v45451_v41  ;;  %v45479_v41 = vld [vmem:[#allocation73_spill] sm:$0xff] }
 0x3aa   :  { %37895 = vmatprep.subr.mxu0 %v45464_v57  ;;  %37879 = vmatmul.mubr.msk.f32.vlgmr.msra.gmra.mxu1 %vm97_vm0, %v42224_v29  ;;  %v42312_v13 = vpop.f32.mrf.mxu1  ;;  %v42314_v55 = vpop.f32.mrf.mxu0  ;;  %v31236_v18 = vadd.f32 %v31108_v17, %v45471_v36  ;;  %v32423_v17 = vand.u32 2147483647, %v31211_v44  ;;  %v45478_v44 = vld [vmem:[#allocation23_spill] sm:$0xff] }
 0x3ab   :  { %45466 = vst [vmem:[#allocation295_spill] sm:$0xff] %v42312_v13  ;;  %45467 = vst [vmem:[#allocation29_spill] sm:$0xff] %v42314_v55  ;;  %37886 = vmatmul.mubr.msk.f32.vlgmr.msra.gmra.mxu0 %vm97_vm0, %v42224_v29  ;;  %37889 = vmatpush3.msra.mxu1 %v45462_v7  ;;  %v32778_v13 = vadd.f32 %v32777_v23, %v32776_v51  ;;  %v31084_v7 = vmul.f32 -1.0, %v41725_v56  ;;  %v32446_v51 = vadd.f32 %v32445_v30, %v32444_v12  ;;  %v45475_v12 = vld [vmem:[#allocation312_spill] sm:$0xff] }
 0x3ac   :  { %37896 = vmatpush3.msra.mxu0 %v45464_v57  ;;  %37890 = vmatprep.subr.mxu1 %v45469_v8  ;;  %v42325_v60 = vpop.f32.mrf.mxu1  ;;  %v42327_v55 = vpop.f32.mrf.mxu0  ;;  %v45472_v57 = vld [vmem:[#allocation310_spill] sm:$0xff]  ;;  %v31087_v23 = vmul.f32 -1.0, %v45468_v43  ;;  %v32609_v56 = vsel %vm97_vm0, %v32590_v45, 0.0  ;;  %v32447_v30 = vsel %vm97_vm0, %v32422_v4, 0.0  ;;  %v32781_v45 = vsel %vm97_vm0, %v32763_v24, 0.0 }
 0x3ad   :  { %37897 = vmatprep.subr.mxu0 %v45470_v34  ;;  %37891 = vmatpush3.msra.mxu1 %v45469_v8  ;;  %v42336_v5 = vadd.f32 %v45472_v57, %v31085_v48  ;;  %v32780_v52 = vadd.f32 %v32779_v31, %v32778_v13  ;;  %v31222_v48 = vadd.f32 %v31094_v21, %v45474_v0  ;;  %v32764_v21 = vand.u32 2147483647, %v31236_v18  ;;  %v45480_v24 = vld [vmem:[#allocation74_spill] sm:$0xff]  ;;  %v45481_v18 = vld [vmem:[#allocation319_spill] sm:$0xff] }
 0x3ae   :  { %37898 = vmatpush3.msra.mxu0 %v45470_v34  ;;  %37892 = vmatprep.mubr.msk.f32.mxu1 %vm97_vm0, %v42210_v10  ;;  %v31212_v8 = vadd.f32 %v31084_v7, %v45475_v12  ;;  %v45476_v34 = vld [vmem:[#allocation72_spill] sm:$0xff]  ;;  %v32610_v13 = vadd.f32 %v32609_v56, %v32608_v62  ;;  %v31237_v4 = vadd.f32 %v45478_v44, %v31109_v15  ;;  %v31086_v62 = vmul.f32 -1.0, %v45461_v47 }
 0x3af   :  { %37899 = vmatprep.mubr.msk.f32.mxu0 %vm97_vm0, %v42210_v10  ;;  %37902 = vmatprep.subr.mxu1 %v45473_v11  ;;  %v32425_v7 = vand.u32 2147483647, %v42336_v5  ;;  %v32448_v57 = vadd.f32 %v32447_v30, %v32446_v51  ;;  %v32782_v56 = vadd.f32 %v32781_v45, %v32780_v52  ;;  %v32611_v15 = vsel %vm97_vm0, %v32591_v59, 0.0  ;;  %v45484_v45 = vld [vmem:[#allocation75_spill] sm:$0xff] }
 0x3b0   :  { %37909 = vmatprep.subr.mxu0 %v45476_v34  ;;  %37893 = vmatmul.mubr.msk.f32.vlgmr.msra.gmra.mxu1 %vm97_vm0, %v42224_v29  ;;  %v42352_v31 = vpop.f32.mrf.mxu1  ;;  %v42354_v43 = vpop.f32.mrf.mxu0  ;;  %v31223_v5 = vadd.f32 %v45481_v18, %v31095_v49  ;;  %v31110_v47 = vmul.f32 -1.0, %v41987_v3  ;;  %v32449_v51 = vsel %vm97_vm0, %v32423_v17, 0.0  ;;  %v32424_v30 = vand.u32 2147483647, %v31212_v8  ;;  %v45483_v8 = vld [vmem:[#allocation314_spill] sm:$0xff] }
 0x3b1   :  { %45477 = vst [vmem:[#allocation30_spill] sm:$0xff] %v42354_v43  ;;  %37900 = vmatmul.mubr.msk.f32.vlgmr.msra.gmra.mxu0 %vm97_vm0, %v42224_v29  ;;  %37903 = vmatpush3.msra.mxu1 %v45473_v11  ;;  %v32592_v43 = vand.u32 2147483647, %v31222_v48  ;;  %v31096_v59 = vmul.f32 -1.0, %v45459_v6  ;;  %v32765_v3 = vand.u32 2147483647, %v31237_v4  ;;  %v42389_v49 = vadd.f32 %v31086_v62, %v45483_v8 }
 0x3b2   :  { %37910 = vmatpush3.msra.mxu0 %v45476_v34  ;;  %32285 = vadd.xlane.f32.xlu1 %v42297_v16  ;;  %v42366_v12 = vpop.f32.mrf.mxu1  ;;  %v42368_v11 = vpop.f32.mrf.mxu0  ;;  %v45482_v16 = vld [vmem:[#allocation313_spill] sm:$0xff]  ;;  %v32612_v34 = vadd.f32 %v32611_v15, %v32610_v13  ;;  %v32783_v48 = vsel %vm97_vm0, %v32764_v21, 0.0  ;;  %v31238_v17 = vadd.f32 %v31110_v47, %v42021_v50  ;;  %v45485_v13 = vld [vmem:[#allocation76_spill] sm:$0xff]  ;;  %v32593_v6 = vand.u32 2147483647, %v31223_v5 }
 0x3b3   :  { %37904 = vmatprep.subr.mxu1 %v45479_v41  ;;  %37911 = vmatprep.subr.mxu0 %v45480_v24  ;;  %v42377_v52 = vadd.f32 %v45482_v16, %v31087_v23  ;;  %v32450_v23 = vadd.f32 %v32449_v51, %v32448_v57  ;;  %v32613_v4 = vsel %vm97_vm0, %v32592_v43, 0.0  ;;  %v45486_v21 = vld [vmem:[#allocation17_spill] sm:$0xff]  ;;  %v31111_v57 = vmul.f32 -1.0, %v45463_v27  ;;  %v45488_v43 = vld [vmem:[#allocation78_spill] sm:$0xff] }
 0x3b4   :  { %37905 = vmatpush3.msra.mxu1 %v45479_v41  ;;  %37912 = vmatpush3.msra.mxu0 %v45480_v24  ;;  %v31097_v41 = vmul.f32 -1.0, %v45465_v42  ;;  %v32784_v24 = vadd.f32 %v32783_v48, %v32782_v56  ;;  %v31224_v62 = vadd.f32 %v31096_v59, %v45486_v21  ;;  %v32453_v42 = vsel %vm97_vm0, %v32425_v7, 0.0  ;;  %v45487_v5 = vld [vmem:[#allocation77_spill] sm:$0xff] }
 0x3b5   :  { %37906 = vmatprep.mubr.msk.f32.mxu1 %vm97_vm0, %v42210_v10  ;;  %37913 = vmatprep.mubr.msk.f32.mxu0 %vm97_vm0, %v42210_v10  ;;  %v32614_v56 = vadd.f32 %v32613_v4, %v32612_v34  ;;  %v32451_v48 = vsel %vm97_vm0, %v32424_v30, 0.0  ;;  %v32785_v59 = vsel %vm97_vm0, %v32765_v3, 0.0  ;;  %v31239_v27 = vadd.f32 %v42010_v9, %v31111_v57  ;;  %v45489_v3 = vld [vmem:[#allocation320_spill] sm:$0xff]  ;;  %v45490_v4 = vld [vmem:[#allocation79_spill] sm:$0xff] }
 0x3b6   :  { %37916 = vmatprep.subr.mxu1 %v45484_v45  ;;  %37923 = vmatprep.subr.mxu0 %v45485_v13  ;;  %v42394_v15 = vpop.f32.mrf.mxu1  ;;  %v42396_v16 = vpop.f32.mrf.mxu0  ;;  %v32766_v7 = vand.u32 2147483647, %v31238_v17  ;;  %v32452_v8 = vadd.f32 %v32451_v48, %v32450_v23  ;;  %v32426_v34 = vand.u32 2147483647, %v42389_v49  ;;  %v32615_v30 = vsel %vm97_vm0, %v32593_v6, 0.0  ;;  %v45491_v49 = vld [vmem:[#allocation80_spill] sm:$0xff] }
 0x3b7   :  { %37907 = vmatmul.mubr.msk.f32.vlgmr.msra.gmra.mxu1 %vm97_vm0, %v42224_v29  ;;  %37914 = vmatmul.mubr.msk.f32.vlgmr.msra.gmra.mxu0 %vm97_vm0, %v42224_v29  ;;  %v31225_v17 = vadd.f32 %v45489_v3, %v31097_v41  ;;  %v32594_v23 = vand.u32 2147483647, %v31224_v62  ;;  %v31098_v57 = vmul.f32 -1.0, %v45474_v0  ;;  %v31121_v48 = vmul.f32 -1.0, %v42083_v26 }
 0x3b8   :  { %37917 = vmatpush3.msra.mxu1 %v45484_v45  ;;  %37924 = vmatpush3.msra.mxu0 %v45485_v13  ;;  %v42408_v47 = vpop.f32.mrf.mxu1  ;;  %v42410_v51 = vpop.f32.mrf.mxu0  ;;  %v32427_v45 = vand.u32 2147483647, %v42377_v52  ;;  %v32786_v13 = vadd.f32 %v32785_v59, %v32784_v24  ;;  %v31112_v52 = vmul.f32 -1.0, %v45471_v36  ;;  %v32616_v24 = vadd.f32 %v32615_v30, %v32614_v56 }
 0x3b9   :  { %37918 = vmatprep.subr.mxu1 %v45487_v5  ;;  %37925 = vmatprep.subr.mxu0 %v45488_v43  ;;  %v31113_v36 = vmul.f32 -1.0, %v45478_v44  ;;  %v32767_v41 = vand.u32 2147483647, %v31239_v27  ;;  %v32787_v0 = vsel %vm97_vm0, %v32766_v7, 0.0  ;;  %v32454_v26 = vadd.f32 %v32453_v42, %v32452_v8  ;;  %v45494_v27 = vld [vmem:[#allocation81_spill] sm:$0xff]  ;;  %v45495_v7 = vld [vmem:[#allocation82_spill] sm:$0xff] }
 0x3ba   :  { %37919 = vmatpush3.msra.mxu1 %v45487_v5  ;;  %37926 = vmatpush3.msra.mxu0 %v45488_v43  ;;  %v31120_v5 = vmul.f32 -1.0, %v42094_v46  ;;  %v31240_v6 = vadd.f32 %v31112_v52, %v42023_v33  ;;  %v32788_v46 = vadd.f32 %v32787_v0, %v32786_v13  ;;  %v31122_v62 = vmul.f32 -1.0, %v42127_v14 }
 0x3bb   :  { %37920 = vmatprep.mubr.msk.f32.mxu1 %vm97_vm0, %v42210_v10  ;;  %37927 = vmatprep.mubr.msk.f32.mxu0 %vm97_vm0, %v42210_v10  ;;  %v32595_v44 = vand.u32 2147483647, %v31225_v17  ;;  %v32617_v52 = vsel %vm97_vm0, %v32594_v23, 0.0  ;;  %v42457_v42 = vsel %vm97_vm0, %v32427_v45, 0.0  ;;  %v32455_v14 = vsel %vm97_vm0, %v32426_v34, 0.0 }
 0x3bc   :  { %37930 = vmatprep.subr.mxu1 %v45490_v4  ;;  %37937 = vmatprep.subr.mxu0 %v45491_v49  ;;  %v42433_v43 = vpop.f32.mrf.mxu1  ;;  %v42435_v59 = vpop.f32.mrf.mxu0  ;;  %v31248_v56 = vadd.f32 %v31120_v5, %v42129_v1  ;;  %v32618_v8 = vadd.f32 %v32617_v52, %v32616_v24  ;;  %v31249_v13 = vadd.f32 %v42116_v53, %v31121_v48  ;;  %v32789_v45 = vsel %vm97_vm0, %v32767_v41, 0.0  ;;  %v45497_v24 = vld [vmem:[#allocation83_spill] sm:$0xff]  ;;  %v45498_v48 = vld [vmem:[#allocation84_spill] sm:$0xff]  ;;  %v45500_v41 = vld [vmem:[#allocation18_spill] sm:$0xff] }
 0x3bd   :  { %45492 = vst [vmem:[#allocation300_spill] sm:$0xff] %v42433_v43  ;;  %45493 = vst [vmem:[#allocation31_spill] sm:$0xff] %v42435_v59  ;;  %37921 = vmatmul.mubr.msk.f32.vlgmr.msra.gmra.mxu1 %vm97_vm0, %v42224_v29  ;;  %37928 = vmatmul.mubr.msk.f32.vlgmr.msra.gmra.mxu0 %vm97_vm0, %v42224_v29  ;;  %v31250_v17 = vadd.f32 %v31122_v62, %v42159_v63  ;;  %v31241_v34 = vadd.f32 %v42012_v22, %v31113_v36  ;;  %v32768_v23 = vand.u32 2147483647, %v31240_v6 }
 0x3be   :  { %37931 = vmatpush3.msra.mxu1 %v45490_v4  ;;  %37938 = vmatpush3.msra.mxu0 %v45491_v49  ;;  %v42448_v30 = vpop.f32.mrf.mxu1  ;;  %v42450_v59 = vpop.f32.mrf.mxu0  ;;  %v45496_v4 = vld [vmem:[#allocation20_spill] sm:$0xff]  ;;  %v31099_v49 = vmul.f32 -1.0, %v45481_v18  ;;  %v42474_v5 = vadd.f32 %v32455_v14, %v32454_v26  ;;  %v32790_v18 = vadd.f32 %v32789_v45, %v32788_v46  ;;  %v32934_v0 = vand.u32 2147483647, %v31248_v56  ;;  %v45502_v45 = vld [vmem:[#allocation85_spill] sm:$0xff] }
 0x3bf   :  { %37932 = vmatprep.subr.mxu1 %v45494_v27  ;;  %37939 = vmatprep.subr.mxu0 %v45495_v7  ;;  %v31226_v43 = vadd.f32 %v31098_v57, %v45496_v4  ;;  %v31101_v57 = vmul.f32 -1.0, %v45489_v3  ;;  %v31114_v36 = vmul.f32 -1.0, %v42021_v50  ;;  %v31123_v26 = vmul.f32 -1.0, %v42114_v58 }
 0x3c0   :  { %37933 = vmatpush3.msra.mxu1 %v45494_v27  ;;  %37940 = vmatpush3.msra.mxu0 %v45495_v7  ;;  %v32619_v7 = vsel %vm97_vm0, %v32595_v44, 0.0  ;;  %v31227_v52 = vadd.f32 %v45500_v41, %v31099_v49  ;;  %v32935_v46 = vand.u32 2147483647, %v31249_v13  ;;  %v32936_v56 = vand.u32 2147483647, %v31250_v17 }
 0x3c1   :  { %37934 = vmatprep.mubr.msk.f32.mxu1 %vm97_vm0, %v42210_v10  ;;  %37941 = vmatprep.mubr.msk.f32.mxu0 %vm97_vm0, %v42210_v10  ;;  %v32596_v3 = vand.u32 2147483647, %v31226_v43  ;;  %v32620_v6 = vadd.f32 %v32619_v7, %v32618_v8  ;;  %v31100_v49 = vmul.f32 -1.0, %v45486_v21  ;;  %v45503_v43 = vld [vmem:[#allocation86_spill] sm:$0xff]  ;;  %v32769_v50 = vand.u32 2147483647, %v31241_v34 }
 0x3c2   :  { %37944 = vmatprep.subr.mxu1 %v45497_v24  ;;  %37951 = vmatprep.subr.mxu0 %v45498_v48  ;;  %v42476_v62 = vpop.f32.mrf.mxu1  ;;  %v42478_v27 = vpop.f32.mrf.mxu0  ;;  %v45504_v8 = vld [vmem:[#allocation19_spill] sm:$0xff]  ;;  %v32950_v13 = vsel %vm97_vm0, %v32934_v0, 0.0  ;;  %v31251_v21 = vadd.f32 %v42151_v25, %v31123_v26  ;;  %v32597_v17 = vand.u32 2147483647, %v31227_v52  ;;  %v45505_v34 = vld [vmem:[#allocation296_spill] sm:$0xff]  ;;  %v32951_v0 = vsel %vm97_vm0, %v32935_v46, 0.0 }
 0x3c3   :  { %45499 = vst [vmem:[#allocation32_spill] sm:$0xff] %v42476_v62  ;;  %37935 = vmatmul.mubr.msk.f32.vlgmr.msra.gmra.mxu1 %vm97_vm0, %v42224_v29  ;;  %37942 = vmatmul.mubr.msk.f32.vlgmr.msra.gmra.mxu0 %vm97_vm0, %v42224_v29  ;;  %v42500_v7 = vadd.f32 %v45504_v8, %v31101_v57  ;;  %v32621_v62 = vsel %vm97_vm0, %v32596_v3, 0.0  ;;  %v31124_v52 = vmul.f32 -1.0, %v42129_v1  ;;  %v32953_v3 = vsel %vm97_vm0, %v32936_v56, 0.0 }
 0x3c4   :  { %37945 = vmatpush3.msra.mxu1 %v45497_v24  ;;  %37952 = vmatpush3.msra.mxu0 %v45498_v48  ;;  %v42490_v44 = vpop.f32.mrf.mxu1  ;;  %v42492_v14 = vpop.f32.mrf.mxu0  ;;  %v32791_v24 = vsel %vm97_vm0, %v32768_v23, 0.0  ;;  %v31242_v48 = vadd.f32 %v31114_v36, %v42054_v37  ;;  %v31115_v23 = vmul.f32 -1.0, %v42010_v9  ;;  %v32622_v57 = vadd.f32 %v32621_v62, %v32620_v6  ;;  %v45506_v36 = vld [vmem:[#allocation87_spill] sm:$0xff] }
 0x3c5   :  { %45501 = vst [vmem:[#allocation33_spill] sm:$0xff] %v42490_v44  ;;  %37946 = vmatprep.subr.mxu1 %v45502_v45  ;;  %37953 = vmatprep.subr.mxu0 %v45503_v43  ;;  %v32792_v58 = vadd.f32 %v32791_v24, %v32790_v18  ;;  %v31228_v44 = vadd.f32 %v31100_v49, %v45505_v34  ;;  %v45507_v18 = vld [vmem:[#allocation88_spill] sm:$0xff]  ;;  %v32793_v9 = vsel %vm97_vm0, %v32769_v50, 0.0  ;;  %v31125_v56 = vmul.f32 -1.0, %v42116_v53 }
 0x3c6   :  { %37947 = vmatpush3.msra.mxu1 %v45502_v45  ;;  %37954 = vmatpush3.msra.mxu0 %v45503_v43  ;;  %v31243_v62 = vadd.f32 %v42043_v2, %v31115_v23  ;;  %v32770_v6 = vand.u32 2147483647, %v31242_v48  ;;  %v32952_v46 = vadd.f32 %v32951_v0, %v32950_v13  ;;  %v32937_v45 = vand.u32 2147483647, %v31251_v21  ;;  %v45508_v23 = vld [vmem:[#allocation89_spill] sm:$0xff]  ;;  %v45509_v48 = vld [vmem:[#allocation90_spill] sm:$0xff] }
 0x3c7   :  { %37948 = vmatprep.mubr.msk.f32.mxu1 %vm97_vm0, %v42210_v10  ;;  %37955 = vmatprep.mubr.msk.f32.mxu0 %vm97_vm0, %v42210_v10  ;;  %v32794_v1 = vadd.f32 %v32793_v9, %v32792_v58  ;;  %v31252_v43 = vadd.f32 %v31124_v52, %v42161_v28  ;;  %v32623_v50 = vsel %vm97_vm0, %v32597_v17, 0.0  ;;  %v32598_v34 = vand.u32 2147483647, %v31228_v44 }
 0x3c8   :  { %37958 = vmatprep.subr.mxu1 %v45506_v36  ;;  %37965 = vmatprep.subr.mxu0 %v45507_v18  ;;  %v42518_v26 = vpop.f32.mrf.mxu1  ;;  %v42520_v49 = vpop.f32.mrf.mxu0  ;;  %v31116_v13 = vmul.f32 -1.0, %v42023_v33  ;;  %v32599_v58 = vand.u32 2147483647, %v42500_v7  ;;  %v31102_v53 = vmul.f32 -1.0, %v45496_v4  ;;  %v32624_v21 = vadd.f32 %v32623_v50, %v32622_v57  ;;  %v45510_v57 = vld [vmem:[#allocation91_spill] sm:$0xff] }
 0x3c9   :  { %37949 = vmatmul.mubr.msk.f32.vlgmr.msra.gmra.mxu1 %vm97_vm0, %v42224_v29  ;;  %37956 = vmatmul.mubr.msk.f32.vlgmr.msra.gmra.mxu0 %vm97_vm0, %v42224_v29  ;;  %v32458_v17 = vadd.f32 %v42457_v42, %v42474_v5  ;;  %v31117_v33 = vmul.f32 -1.0, %v42012_v22  ;;  %v32771_v44 = vand.u32 2147483647, %v31243_v62  ;;  %v32795_v7 = vsel %vm97_vm0, %v32770_v6, 0.0  ;;  %v45512_v62 = vld [vmem:[#allocation21_spill] sm:$0xff] }
 0x3ca   :  { %37959 = vmatpush3.msra.mxu1 %v45506_v36  ;;  %37966 = vmatpush3.msra.mxu0 %v45507_v18  ;;  %v42532_v24 = vpop.f32.mrf.mxu1  ;;  %v42534_v8 = vpop.f32.mrf.mxu0  ;;  %v32954_v36 = vadd.f32 %v32953_v3, %v32952_v46  ;;  %v31244_v4 = vadd.f32 %v31116_v13, %v42056_v54  ;;  %v45511_v18 = vld [vmem:[#allocation92_spill] sm:$0xff]  ;;  %v32796_v0 = vadd.f32 %v32795_v7, %v32794_v1  ;;  %v32955_v42 = vsel %vm97_vm0, %v32937_v45, 0.0 }
 0x3cb   :  { %37960 = vmatprep.subr.mxu1 %v45508_v23  ;;  %37967 = vmatprep.subr.mxu0 %v45509_v48  ;;  %v31253_v5 = vadd.f32 %v42153_v35, %v31125_v56  ;;  %v32938_v52 = vand.u32 2147483647, %v31252_v43  ;;  %v32625_v22 = vsel %vm97_vm0, %v32598_v34, 0.0  ;;  %v31230_v6 = vadd.f32 %v31102_v53, %v45512_v62  ;;  %v45513_v34 = vld [vmem:[#allocation93_spill] sm:$0xff] }
 0x3cc   :  { %37961 = vmatpush3.msra.mxu1 %v45508_v23  ;;  %37968 = vmatpush3.msra.mxu0 %v45509_v48  ;;  %v32956_v54 = vadd.f32 %v32955_v42, %v32954_v36  ;;  %v31103_v46 = vmul.f32 -1.0, %v45500_v41  ;;  %v32626_v1 = vadd.f32 %v32625_v22, %v32624_v21  ;;  %v31126_v56 = vmul.f32 -1.0, %v42159_v63  ;;  %v45514_v48 = vld [vmem:[#allocation306_spill] sm:$0xff]  ;;  %v45519_v62 = vld [vmem:[#allocation25_spill] sm:$0xff] }
 0x3cd   :  { %37962 = vmatprep.mubr.msk.f32.mxu1 %vm97_vm0, %v42210_v10  ;;  %37969 = vmatprep.mubr.msk.f32.mxu0 %vm97_vm0, %v42210_v10  ;;  %v32627_v50 = vsel %vm97_vm0, %v32599_v58, 0.0  ;;  %v32797_v23 = vsel %vm97_vm0, %v32771_v44, 0.0  ;;  %v31245_v41 = vadd.f32 %v45514_v48, %v31117_v33  ;;  %v32772_v13 = vand.u32 2147483647, %v31244_v4  ;;  %v45515_v36 = vld [vmem:[#allocation94_spill] sm:$0xff]  ;;  %v45517_v4 = vld [vmem:[#allocation95_spill] sm:$0xff] }
 0x3ce   :  { %37972 = vmatprep.subr.mxu1 %v45510_v57  ;;  %37979 = vmatprep.subr.mxu0 %v45511_v18  ;;  %v42557_v3 = vpop.f32.mrf.mxu1  ;;  %v42559_v9 = vpop.f32.mrf.mxu0  ;;  %v32798_v53 = vadd.f32 %v32797_v23, %v32796_v0  ;;  %v32939_v63 = vand.u32 2147483647, %v31253_v5  ;;  %v32957_v21 = vsel %vm97_vm0, %v32938_v52, 0.0  ;;  %v31254_v7 = vadd.f32 %v31126_v56, %v42199_v61  ;;  %v45518_v52 = vld [vmem:[#allocation96_spill] sm:$0xff]  ;;  %v45520_v48 = vld [vmem:[#allocation97_spill] sm:$0xff] }
 0x3cf   :  { %37963 = vmatmul.mubr.msk.f32.vlgmr.msra.gmra.mxu1 %vm97_vm0, %v42224_v29  ;;  %37970 = vmatmul.mubr.msk.f32.vlgmr.msra.gmra.mxu0 %vm97_vm0, %v42224_v29  ;;  %v31118_v33 = vmul.f32 -1.0, %v42054_v37  ;;  %v32958_v44 = vadd.f32 %v32957_v21, %v32956_v54  ;;  %v31127_v0 = vmul.f32 -1.0, %v42151_v25  ;;  %v32773_v22 = vand.u32 2147483647, %v31245_v41 }
 0x3d0   :  { %37973 = vmatpush3.msra.mxu1 %v45510_v57  ;;  %37980 = vmatpush3.msra.mxu0 %v45511_v18  ;;  %v42571_v45 = vpop.f32.mrf.mxu1  ;;  %v42573_v43 = vpop.f32.mrf.mxu0  ;;  %v45516_v57 = vld [vmem:[#allocation304_spill] sm:$0xff]  ;;  %v32628_v18 = vadd.f32 %v32627_v50, %v32626_v1  ;;  %v32799_v37 = vsel %vm97_vm0, %v32772_v13, 0.0  ;;  %v32959_v54 = vsel %vm97_vm0, %v32939_v63, 0.0  ;;  %v32940_v1 = vand.u32 2147483647, %v31254_v7 }
 0x3d1   :  { %32459 = vadd.xlane.f32.xlu0 %v32458_v17  ;;  %37974 = vmatprep.subr.mxu1 %v45513_v34  ;;  %v31231_v58 = vadd.f32 %v45516_v57, %v31103_v46  ;;  %v32600_v17 = vand.u32 2147483647, %v31230_v6  ;;  %v31246_v6 = vadd.f32 %v31118_v33, %v45519_v62  ;;  %v32800_v25 = vadd.f32 %v32799_v37, %v32798_v53  ;;  %v45522_v57 = vld [vmem:[#allocation297_spill] sm:$0xff] }
 0x3d2   :  { %37981 = vmatprep.subr.mxu0 %v45515_v36  ;;  %37975 = vmatpush3.msra.mxu1 %v45513_v34  ;;  %v31255_v46 = vadd.f32 %v42185_v40, %v31127_v0  ;;  %v31119_v41 = vmul.f32 -1.0, %v42043_v2  ;;  %v32960_v13 = vadd.f32 %v32959_v54, %v32958_v44  ;;  %v31129_v63 = vmul.f32 -1.0, %v42153_v35  ;;  %v45524_v0 = vld [vmem:[#allocation100_spill] sm:$0xff]  ;;  %v45525_v54 = vld [vmem:[#allocation101_spill] sm:$0xff] }
 0x3d3   :  { %37982 = vmatpush3.msra.mxu0 %v45515_v36  ;;  %37976 = vmatprep.mubr.msk.f32.mxu1 %vm97_vm0, %v42210_v10  ;;  %v32601_v34 = vand.u32 2147483647, %v31231_v58  ;;  %v32629_v23 = vsel %vm97_vm0, %v32600_v17, 0.0  ;;  %v45521_v36 = vld [vmem:[#allocation98_spill] sm:$0xff]  ;;  %v31128_v21 = vmul.f32 -1.0, %v42161_v28  ;;  %v32801_v7 = vsel %vm97_vm0, %v32773_v22, 0.0 }
 0x3d4   :  { %37983 = vmatprep.mubr.msk.f32.mxu0 %vm97_vm0, %v42210_v10  ;;  %37986 = vmatprep.subr.mxu1 %v45517_v4  ;;  %v42592_v42 = vpop.f32.mrf.mxu1  ;;  %v42594_v5 = vpop.f32.mrf.mxu0  ;;  %v32630_v53 = vadd.f32 %v32629_v23, %v32628_v18  ;;  %v42623_v58 = vadd.f32 %v45522_v57, %v31119_v41  ;;  %v32774_v2 = vand.u32 2147483647, %v31246_v6  ;;  %v45523_v17 = vld [vmem:[#allocation99_spill] sm:$0xff]  ;;  %v32941_v33 = vand.u32 2147483647, %v31255_v46 }
 0x3d5   :  { %37993 = vmatprep.subr.mxu0 %v45518_v52  ;;  %37977 = vmatmul.mubr.msk.f32.vlgmr.msra.gmra.mxu1 %vm97_vm0, %v42224_v29  ;;  %v32961_v35 = vsel %vm97_vm0, %v32940_v1, 0.0  ;;  %v31256_v28 = vadd.f32 %v31128_v21, %v42201_v38  ;;  %v32802_v44 = vadd.f32 %v32801_v7, %v32800_v25  ;;  %v31257_v62 = vadd.f32 %v42187_v32, %v31129_v63 }
 0x3d6   :  { %37984 = vmatmul.mubr.msk.f32.vlgmr.msra.gmra.mxu0 %vm97_vm0, %v42224_v29  ;;  %37987 = vmatpush3.msra.mxu1 %v45517_v4  ;;  %v42606_v56 = vpop.f32.mrf.mxu1  ;;  %v42608_v50 = vpop.f32.mrf.mxu0  ;;  %v32962_v22 = vadd.f32 %v32961_v35, %v32960_v13  ;;  %v32775_v46 = vand.u32 2147483647, %v42623_v58  ;;  %v32803_v1 = vsel %vm97_vm0, %v32774_v2, 0.0  ;;  %v31136_v23 = vmul.f32 -1.0, %v42286_v20  ;;  %v45530_v35 = vld [vmem:[#allocation29_spill] sm:$0xff] }
 0x3d7   :  { %37994 = vmatpush3.msra.mxu0 %v45518_v52  ;;  %37988 = vmatprep.subr.mxu1 %v45520_v48  ;;  %v32631_v52 = vsel %vm97_vm0, %v32601_v34, 0.0  ;;  %v31137_v34 = vmul.f32 -1.0, %v42273_v19  ;;  %v31131_v41 = vmul.f32 -1.0, %v42185_v40  ;;  %v32963_v13 = vsel %vm97_vm0, %v32941_v33, 0.0  ;;  %v45527_v40 = vld [vmem:[#allocation103_spill] sm:$0xff]  ;;  %v45529_v33 = vld [vmem:[#allocation104_spill] sm:$0xff] }
 0x3d8   :  { %37995 = vmatprep.subr.mxu0 %v45521_v36  ;;  %37989 = vmatpush3.msra.mxu1 %v45520_v48  ;;  %v42641_v37 = vadd.f32 %v32631_v52, %v32630_v53  ;;  %v45526_v48 = vld [vmem:[#allocation102_spill] sm:$0xff]  ;;  %v32804_v53 = vadd.f32 %v32803_v1, %v32802_v44  ;;  %v31133_v63 = vmul.f32 -1.0, %v42187_v32  ;;  %v32964_v19 = vadd.f32 %v32963_v13, %v32962_v22 }
 0x3d9   :  { %37996 = vmatpush3.msra.mxu0 %v45521_v36  ;;  %37990 = vmatprep.mubr.msk.f32.mxu1 %vm97_vm0, %v42210_v10  ;;  %v32942_v36 = vand.u32 2147483647, %v31256_v28  ;;  %v31138_v20 = vmul.f32 -1.0, %v42325_v60  ;;  %v31264_v21 = vadd.f32 %v31136_v23, %v42327_v55  ;;  %v32943_v7 = vand.u32 2147483647, %v31257_v62  ;;  %v45534_v13 = vld [vmem:[#allocation106_spill] sm:$0xff] }
 0x3da   :  { %37997 = vmatprep.mubr.msk.f32.mxu0 %vm97_vm0, %v42210_v10  ;;  %38000 = vmatprep.subr.mxu1 %v45523_v17  ;;  %v42630_v4 = vpop.f32.mrf.mxu1  ;;  %v42632_v18 = vpop.f32.mrf.mxu0  ;;  %v31130_v57 = vmul.f32 -1.0, %v42199_v61  ;;  %v31153_v58 = vmul.f32 -1.0, %v42478_v27  ;;  %v31152_v2 = vmul.f32 -1.0, %v42492_v14  ;;  %v42678_v60 = vadd.f32 %v42228_v39, %v31131_v41  ;;  %v45531_v14 = vld [vmem:[#allocation305_spill] sm:$0xff] }
 0x3db   :  { %38007 = vmatprep.subr.mxu0 %v45524_v0  ;;  %37991 = vmatmul.mubr.msk.f32.vlgmr.msra.gmra.mxu1 %vm97_vm0, %v42224_v29  ;;  %v31265_v28 = vadd.f32 %v45530_v35, %v31137_v34  ;;  %v31266_v61 = vadd.f32 %v31138_v20, %v42366_v12  ;;  %v32965_v27 = vsel %vm97_vm0, %v32942_v36, 0.0  ;;  %v45533_v34 = vld [vmem:[#allocation26_spill] sm:$0xff]  ;;  %v33108_v41 = vand.u32 2147483647, %v31264_v21 }
 0x3dc   :  { %37998 = vmatmul.mubr.msk.f32.vlgmr.msra.gmra.mxu0 %vm97_vm0, %v42224_v29  ;;  %38001 = vmatpush3.msra.mxu1 %v45523_v17  ;;  %v42644_v6 = vpop.f32.mrf.mxu1  ;;  %v42646_v25 = vpop.f32.mrf.mxu0  ;;  %v31258_v44 = vadd.f32 %v31130_v57, %v45531_v14  ;;  %v31280_v52 = vadd.f32 %v31152_v2, %v42534_v8  ;;  %v32966_v1 = vadd.f32 %v32965_v27, %v32964_v19  ;;  %v31132_v36 = vmul.f32 -1.0, %v42201_v38  ;;  %v45536_v38 = vld [vmem:[#allocation107_spill] sm:$0xff] }
 0x3dd   :  { %38008 = vmatpush3.msra.mxu0 %v45524_v0  ;;  %38002 = vmatprep.subr.mxu1 %v45525_v54  ;;  %v31154_v0 = vmul.f32 -1.0, %v42532_v24  ;;  %v42696_v23 = vadd.f32 %v45533_v34, %v31133_v63  ;;  %v32967_v24 = vsel %vm97_vm0, %v32943_v7, 0.0  ;;  %v31281_v20 = vadd.f32 %v42520_v49, %v31153_v58  ;;  %v45535_v63 = vld [vmem:[#allocation295_spill] sm:$0xff] }
 0x3de   :  { %38009 = vmatprep.subr.mxu0 %v45526_v48  ;;  %38003 = vmatpush3.msra.mxu1 %v45525_v54  ;;  %v45532_v54 = vld [vmem:[#allocation105_spill] sm:$0xff]  ;;  %v31139_v19 = vmul.f32 -1.0, %v45535_v63  ;;  %v33109_v21 = vand.u32 2147483647, %v31265_v28  ;;  %v33110_v57 = vand.u32 2147483647, %v31266_v61  ;;  %v32968_v61 = vadd.f32 %v32967_v24, %v32966_v1 }
 0x3df   :  { %38010 = vmatpush3.msra.mxu0 %v45526_v48  ;;  %38004 = vmatprep.mubr.msk.f32.mxu1 %vm97_vm0, %v42210_v10  ;;  %v32805_v48 = vsel %vm97_vm0, %v32775_v46, 0.0  ;;  %v42709_v46 = vmul.f32 -1.0, %v42228_v39  ;;  %v32945_v7 = vand.u32 2147483647, %v42678_v60  ;;  %v32944_v58 = vand.u32 2147483647, %v31258_v44 }
 0x3e0   :  { %38011 = vmatprep.mubr.msk.f32.mxu0 %vm97_vm0, %v42210_v10  ;;  %38014 = vmatprep.subr.mxu1 %v45527_v40  ;;  %v42670_v17 = vpop.f32.mrf.mxu1  ;;  %v42672_v32 = vpop.f32.mrf.mxu0  ;;  %v42716_v2 = vadd.f32 %v32805_v48, %v32804_v53  ;;  %v45537_v39 = vld [vmem:[#allocation108_spill] sm:$0xff]  ;;  %v32947_v28 = vand.u32 2147483647, %v42696_v23  ;;  %v31267_v60 = vadd.f32 %v42352_v31, %v31139_v19  ;;  %v45538_v53 = vld [vmem:[#allocation27_spill] sm:$0xff]  ;;  %v33283_v34 = vand.u32 2147483647, %v31281_v20 }
 0x3e1   :  { %45528 = vst [vmem:[#allocation34_spill] sm:$0xff] %v42670_v17  ;;  %38021 = vmatprep.subr.mxu0 %v45529_v33  ;;  %38005 = vmatmul.mubr.msk.f32.vlgmr.msra.gmra.mxu1 %vm97_vm0, %v42224_v29  ;;  %v42732_v44 = vadd.f32 %v31132_v36, %v45538_v53  ;;  %v45539_v1 = vld [vmem:[#allocation109_spill] sm:$0xff]  ;;  %v31140_v24 = vmul.f32 -1.0, %v42327_v55  ;;  %v33127_v36 = vsel %vm97_vm0, %v33110_v57, 0.0  ;;  %v45540_v63 = vld [vmem:[#allocation110_spill] sm:$0xff]  ;;  %v31134_v55 = vmul.f32 -1.0, %v45531_v14 }
 0x3e2   :  { %38012 = vmatmul.mubr.msk.f32.vlgmr.msra.gmra.mxu0 %vm97_vm0, %v42224_v29  ;;  %38015 = vmatpush3.msra.mxu1 %v45527_v40  ;;  %v42689_v22 = vpop.f32.mrf.mxu1  ;;  %v42691_v62 = vpop.f32.mrf.mxu0  ;;  %v31282_v40 = vadd.f32 %v31154_v0, %v42571_v45 }
 0x3e3   :  { %38022 = vmatpush3.msra.mxu0 %v45529_v33  ;;  %38016 = vmatprep.subr.mxu1 %v45532_v54  ;;  %v33282_v33 = vand.u32 2147483647, %v31280_v52  ;;  %v31155_v52 = vmul.f32 -1.0, %v42518_v26  ;;  %v32969_v26 = vsel %vm97_vm0, %v32944_v58, 0.0  ;;  %v31268_v57 = vadd.f32 %v31140_v24, %v42368_v11  ;;  %v45541_v58 = vld [vmem:[#allocation111_spill] sm:$0xff]  ;;  %v45544_v24 = vld [vmem:[#allocation28_spill] sm:$0xff] }
 0x3e4   :  { %38023 = vmatprep.subr.mxu0 %v45534_v13  ;;  %38017 = vmatpush3.msra.mxu1 %v45532_v54  ;;  %v33124_v54 = vsel %vm97_vm0, %v33108_v41, 0.0  ;;  %v33284_v48 = vand.u32 2147483647, %v31282_v40  ;;  %v31141_v41 = vmul.f32 -1.0, %v45530_v35  ;;  %v32970_v35 = vadd.f32 %v32969_v26, %v32968_v61  ;;  %v45542_v61 = vld [vmem:[#allocation112_spill] sm:$0xff] }
 0x3e5   :  { %38024 = vmatpush3.msra.mxu0 %v45534_v13  ;;  %38018 = vmatprep.mubr.msk.f32.mxu1 %vm97_vm0, %v42210_v10  ;;  %v33298_v40 = vsel %vm97_vm0, %v33282_v33, 0.0  ;;  %v31283_v19 = vadd.f32 %v42557_v3, %v31155_v52  ;;  %v32946_v52 = vand.u32 2147483647, %v42732_v44 }
 0x3e6   :  { %38025 = vmatprep.mubr.msk.f32.mxu0 %vm97_vm0, %v42210_v10  ;;  %38028 = vmatprep.subr.mxu1 %v45536_v38  ;;  %v42718_v27 = vpop.f32.mrf.mxu1  ;;  %v42720_v0 = vpop.f32.mrf.mxu0 }
 0x3e7   :  { %38035 = vmatprep.subr.mxu0 %v45537_v39  ;;  %38019 = vmatmul.mubr.msk.f32.vlgmr.msra.gmra.mxu1 %vm97_vm0, %v42224_v29 }
 0x3e8   :  { %38026 = vmatmul.mubr.msk.f32.vlgmr.msra.gmra.mxu0 %vm97_vm0, %v42224_v29  ;;  %38029 = vmatpush3.msra.mxu1 %v45536_v38  ;;  %v42735_v13 = vpop.f32.mrf.mxu1  ;;  %v42737_v23 = vpop.f32.mrf.mxu0  ;;  %v33125_v29 = vsel %vm97_vm0, %v33109_v21, 0.0  ;;  %v33111_v21 = vand.u32 2147483647, %v31267_v60  ;;  %v42755_v38 = vld [vmem:[#allocation11] sm:$0xff]  ;;  %v42768_v60 = vld [vmem:[#allocation11 + $0x8] sm:$0xff] }
 0x3e9   :  { %38036 = vmatpush3.msra.mxu0 %v45537_v39  ;;  %38030 = vmatprep.subr.mxu1 %v45539_v1  ;;  %v33126_v20 = vadd.f32 %v33125_v29, %v33124_v54  ;;  %v33299_v39 = vsel %vm97_vm0, %v33283_v34, 0.0  ;;  %v31156_v54 = vmul.f32 -1.0, %v42534_v8  ;;  %v31157_v34 = vmul.f32 -1.0, %v42520_v49  ;;  %v45545_v49 = vld [vmem:[#allocation308_spill] sm:$0xff] }
 0x3ea   :  { %38037 = vmatprep.subr.mxu0 %v45540_v63  ;;  %38031 = vmatpush3.msra.mxu1 %v45539_v1  ;;  %v45543_v1 = vld [vmem:[#allocation30_spill] sm:$0xff]  ;;  %v33300_v8 = vadd.f32 %v33299_v39, %v33298_v40  ;;  %v33112_v40 = vand.u32 2147483647, %v31268_v57  ;;  %v32975_v39 = vsel %vm97_vm0, %v32947_v28, 0.0  ;;  %v31296_v17 = vmul.f32 2.0, %v42735_v13 }
 0x3eb   :  { %38038 = vmatpush3.msra.mxu0 %v45540_v63  ;;  %38032 = vmatprep.mubr.msk.f32.mxu1 %vm97_vm0, %v42210_v10  ;;  %v33128_v33 = vadd.f32 %v33127_v36, %v33126_v20  ;;  %v33301_v10 = vsel %vm97_vm0, %v33284_v48, 0.0  ;;  %v31269_v29 = vadd.f32 %v45543_v1, %v31141_v41  ;;  %v32971_v48 = vsel %vm97_vm0, %v32945_v7, 0.0 }
 0x3ec   :  { %38039 = vmatprep.mubr.msk.f32.mxu0 %vm97_vm0, %v42755_v38  ;;  %38042 = vmatprep.subr.mxu1 %v45541_v58  ;;  %v42763_v53 = vpop.f32.mrf.mxu1  ;;  %v42765_v14 = vpop.f32.mrf.mxu0  ;;  %v42781_v36 = vadd.f32 %v45544_v24, %v42709_v46  ;;  %v33285_v63 = vand.u32 2147483647, %v31283_v19  ;;  %v31284_v26 = vadd.f32 %v31156_v54, %v42573_v43  ;;  %v42791_v20 = vadd.f32 %v31134_v55, %v45545_v49  ;;  %v45546_v46 = vld [vmem:[#allocation113_spill] sm:$0xff]  ;;  %v45547_v19 = vld [vmem:[#allocation114_spill] sm:$0xff] }
 0x3ed   :  { %38049 = vmatprep.subr.mxu0 %v45542_v61  ;;  %38033 = vmatmul.mubr.msk.f32.vlgmr.msra.gmra.mxu1 %vm97_vm0, %v42768_v60  ;;  %v33129_v7 = vsel %vm97_vm0, %v33111_v21, 0.0  ;;  %v32972_v54 = vadd.f32 %v32971_v48, %v32970_v35  ;;  %v33113_v55 = vand.u32 2147483647, %v31269_v29  ;;  %v31142_v21 = vmul.f32 -1.0, %v42366_v12  ;;  %v45548_v12 = vld [vmem:[#allocation115_spill] sm:$0xff]  ;;  %v45549_v29 = vld [vmem:[#allocation116_spill] sm:$0xff] }
 0x3ee   :  { %38040 = vmatmul.mubr.msk.f32.vlgmr.msra.gmra.mxu0 %vm97_vm0, %v42768_v60  ;;  %38043 = vmatpush3.msra.mxu1 %v45541_v58  ;;  %v42784_v44 = vpop.f32.mrf.mxu1  ;;  %v42786_v41 = vpop.f32.mrf.mxu0  ;;  %v33302_v58 = vadd.f32 %v33301_v10, %v33300_v8  ;;  %v33130_v24 = vadd.f32 %v33129_v7, %v33128_v33  ;;  %v31285_v57 = vadd.f32 %v42559_v9, %v31157_v34  ;;  %v33303_v35 = vsel %vm97_vm0, %v33285_v63, 0.0 }
 0x3ef   :  { %38050 = vmatpush3.msra.mxu0 %v45542_v61  ;;  %32633 = vadd.xlane.f32.xlu1 %v42641_v37  ;;  %v32973_v37 = vsel %vm97_vm0, %v32946_v52, 0.0  ;;  %v33286_v33 = vand.u32 2147483647, %v31284_v26  ;;  %v31297_v10 = vmul.f32 2.0, %v42718_v27  ;;  %v32948_v34 = vand.u32 2147483647, %v42791_v20 }
 0x3f0   :  { %38044 = vmatprep.subr.mxu1 %v45546_v46  ;;  %38051 = vmatprep.subr.mxu0 %v45547_v19  ;;  %v33131_v8 = vsel %vm97_vm0, %v33112_v40, 0.0  ;;  %v31270_v48 = vadd.f32 %v31142_v21, %v42408_v47  ;;  %v33304_v49 = vadd.f32 %v33303_v35, %v33302_v58  ;;  %v32974_v63 = vadd.f32 %v32973_v37, %v32972_v54 }
 0x3f1   :  { %38045 = vmatpush3.msra.mxu1 %v45546_v46  ;;  %38052 = vmatpush3.msra.mxu0 %v45547_v19  ;;  %v33132_v26 = vadd.f32 %v33131_v8, %v33130_v24  ;;  %v31158_v7 = vmul.f32 -1.0, %v42571_v45  ;;  %v31424_v46 = vadd.f32 %v31296_v17, %v42691_v62  ;;  %v31143_v40 = vmul.f32 -1.0, %v42352_v31  ;;  %v45550_v24 = vld [vmem:[#allocation117_spill] sm:$0xff]  ;;  %v45551_v45 = vld [vmem:[#allocation118_spill] sm:$0xff] }
 0x3f2   :  { %38046 = vmatprep.mubr.msk.f32.mxu1 %vm97_vm0, %v42755_v38  ;;  %38053 = vmatprep.mubr.msk.f32.mxu0 %vm97_vm0, %v42755_v38  ;;  %v42810_v61 = vpop.f32.mrf.mxu1  ;;  %v42812_v52 = vpop.f32.mrf.mxu0  ;;  %v33133_v58 = vsel %vm97_vm0, %v33113_v55, 0.0  ;;  %v31144_v21 = vmul.f32 -1.0, %v42368_v11  ;;  %v33287_v54 = vand.u32 2147483647, %v31285_v57  ;;  %v33305_v17 = vsel %vm97_vm0, %v33286_v33, 0.0 }
 0x3f3   :  { %38056 = vmatprep.subr.mxu1 %v45548_v12  ;;  %38063 = vmatprep.subr.mxu0 %v45549_v29  ;;  %v31286_v62 = vadd.f32 %v31158_v7, %v42606_v56  ;;  %v31425_v37 = vadd.f32 %v42672_v32, %v31297_v10  ;;  %v31298_v35 = vmul.f32 2.0, %v42737_v23  ;;  %v31271_v31 = vadd.f32 %v42394_v15, %v31143_v40 }
 0x3f4   :  { %38047 = vmatmul.mubr.msk.f32.vlgmr.msra.gmra.mxu1 %vm97_vm0, %v42768_v60  ;;  %38054 = vmatmul.mubr.msk.f32.vlgmr.msra.gmra.mxu0 %vm97_vm0, %v42768_v60  ;;  %v42825_v19 = vpop.f32.mrf.mxu1  ;;  %v42827_v20 = vpop.f32.mrf.mxu0  ;;  %v33114_v11 = vand.u32 2147483647, %v31270_v48  ;;  %v31159_v55 = vmul.f32 -1.0, %v42557_v3  ;;  %v33306_v57 = vadd.f32 %v33305_v17, %v33304_v49  ;;  %v31145_v32 = vmul.f32 -1.0, %v45543_v1  ;;  %v45552_v48 = vld [vmem:[#allocation119_spill] sm:$0xff]  ;;  %v45553_v3 = vld [vmem:[#allocation120_spill] sm:$0xff] }
 0x3f5   :  { %38057 = vmatpush3.msra.mxu1 %v45548_v12  ;;  %38064 = vmatpush3.msra.mxu0 %v45549_v29  ;;  %v33134_v33 = vadd.f32 %v33133_v58, %v33132_v26  ;;  %v31272_v10 = vadd.f32 %v31144_v21, %v42410_v51  ;;  %v31552_v12 = vadd.f32 %v31424_v46, %v42737_v23  ;;  %v42858_v49 = vsel %vm97_vm0, %v32948_v34, 0.0 }
 0x3f6   :  { %38058 = vmatprep.subr.mxu1 %v45550_v24  ;;  %38065 = vmatprep.subr.mxu0 %v45551_v45  ;;  %v42860_v7 = vadd.f32 %v32975_v39, %v32974_v63  ;;  %v31287_v1 = vadd.f32 %v42592_v42, %v31159_v55  ;;  %v31299_v26 = vmul.f32 2.0, %v42720_v0  ;;  %v33307_v46 = vsel %vm97_vm0, %v33287_v54, 0.0  ;;  %v45554_v54 = vld [vmem:[#allocation121_spill] sm:$0xff] }
 0x3f7   :  { %38059 = vmatpush3.msra.mxu1 %v45550_v24  ;;  %38066 = vmatpush3.msra.mxu0 %v45551_v45  ;;  %v33288_v40 = vand.u32 2147483647, %v31286_v62  ;;  %v31553_v58 = vadd.f32 %v42720_v0, %v31425_v37  ;;  %v31426_v34 = vadd.f32 %v31298_v35, %v42735_v13  ;;  %v33115_v63 = vand.u32 2147483647, %v31271_v31  ;;  %v45555_v62 = vld [vmem:[#allocation122_spill] sm:$0xff] }
 0x3f8   :  { %38060 = vmatprep.mubr.msk.f32.mxu1 %vm97_vm0, %v42755_v38  ;;  %38067 = vmatprep.mubr.msk.f32.mxu0 %vm97_vm0, %v42755_v38  ;;  %v42851_v29 = vpop.f32.mrf.mxu1  ;;  %v42853_v8 = vpop.f32.mrf.mxu0  ;;  %v33135_v24 = vsel %vm97_vm0, %v33114_v11, 0.0  ;;  %v31160_v45 = vmul.f32 -1.0, %v42573_v43  ;;  %v33308_v17 = vadd.f32 %v33307_v46, %v33306_v57  ;;  %v31273_v13 = vadd.f32 %v42396_v16, %v31145_v32 }
 0x3f9   :  { %38070 = vmatprep.subr.mxu1 %v45552_v48  ;;  %38077 = vmatprep.subr.mxu0 %v45553_v3  ;;  %v33136_v37 = vadd.f32 %v33135_v24, %v33134_v33  ;;  %v33116_v35 = vand.u32 2147483647, %v31272_v10  ;;  %v32122_v55 = vand.u32 2147483647, %v31552_v12  ;;  %v31161_v31 = vmul.f32 -1.0, %v42559_v9 }
 0x3fa   :  { %38061 = vmatmul.mubr.msk.f32.vlgmr.msra.gmra.mxu1 %vm97_vm0, %v42768_v60  ;;  %38068 = vmatmul.mubr.msk.f32.vlgmr.msra.gmra.mxu0 %vm97_vm0, %v42768_v60  ;;  %v42871_v21 = vpop.f32.mrf.mxu1  ;;  %v42873_v39 = vpop.f32.mrf.mxu0  ;;  %v31288_v11 = vadd.f32 %v31160_v45, %v42608_v50  ;;  %v31427_v43 = vadd.f32 %v42718_v27, %v31299_v26  ;;  %v33309_v57 = vsel %vm97_vm0, %v33288_v40, 0.0  ;;  %v32123_v32 = vand.u32 2147483647, %v31553_v58  ;;  %v45557_v27 = vld [vmem:[#allocation124_spill] sm:$0xff] }
 0x3fb   :  { %38071 = vmatpush3.msra.mxu1 %v45552_v48  ;;  %38078 = vmatpush3.msra.mxu0 %v45553_v3  ;;  %v33289_v48 = vand.u32 2147483647, %v31287_v1  ;;  %v31300_v33 = vmul.f32 2.0, %v42784_v44  ;;  %v31554_v10 = vadd.f32 %v31426_v34, %v42784_v44  ;;  %v45556_v3 = vld [vmem:[#allocation123_spill] sm:$0xff]  ;;  %v31147_v1 = vmul.f32 -1.0, %v42394_v15 }
 0x3fc   :  { %38072 = vmatprep.subr.mxu1 %v45554_v54  ;;  %38079 = vmatprep.subr.mxu0 %v45555_v62  ;;  %v33137_v26 = vsel %vm97_vm0, %v33115_v63, 0.0  ;;  %v31146_v46 = vmul.f32 -1.0, %v42408_v47  ;;  %v33310_v40 = vadd.f32 %v33309_v57, %v33308_v17  ;;  %v33117_v58 = vand.u32 2147483647, %v31273_v13  ;;  %v45558_v13 = vld [vmem:[#allocation125_spill] sm:$0xff] }
 0x3fd   :  { %38073 = vmatpush3.msra.mxu1 %v45554_v54  ;;  %38080 = vmatpush3.msra.mxu0 %v45555_v62  ;;  %v33138_v34 = vadd.f32 %v33137_v26, %v33136_v37  ;;  %v33139_v24 = vsel %vm97_vm0, %v33116_v35, 0.0  ;;  %v32138_v45 = vsel %vm97_vm0, %v32122_v55, 0.0  ;;  %v33311_v47 = vsel %vm97_vm0, %v33289_v48, 0.0  ;;  %v45559_v37 = vld [vmem:[#allocation126_spill] sm:$0xff] }
 0x3fe   :  { %38074 = vmatprep.mubr.msk.f32.mxu1 %vm97_vm0, %v42755_v38  ;;  %38081 = vmatprep.mubr.msk.f32.mxu0 %vm97_vm0, %v42755_v38  ;;  %v42894_v12 = vpop.f32.mrf.mxu1  ;;  %v42896_v9 = vpop.f32.mrf.mxu0  ;;  %v31289_v63 = vadd.f32 %v42594_v5, %v31161_v31  ;;  %v33290_v17 = vand.u32 2147483647, %v31288_v11  ;;  %v31555_v62 = vadd.f32 %v42763_v53, %v31427_v43  ;;  %v32139_v35 = vsel %vm97_vm0, %v32123_v32, 0.0 }
 0x3ff   :  { %38084 = vmatprep.subr.mxu1 %v45556_v3  ;;  %38091 = vmatprep.subr.mxu0 %v45557_v27  ;;  %v31301_v55 = vmul.f32 2.0, %v42763_v53  ;;  %v32124_v57 = vand.u32 2147483647, %v31554_v10  ;;  %v31274_v31 = vadd.f32 %v31146_v46, %v42448_v30  ;;  %v31162_v48 = vmul.f32 -1.0, %v42606_v56  ;;  %v45560_v10 = vld [vmem:[#allocation300_spill] sm:$0xff]  ;;  %v45561_v56 = vld [vmem:[#allocation127_spill] sm:$0xff] }
 0x400   :  { %38075 = vmatmul.mubr.msk.f32.vlgmr.msra.gmra.mxu1 %vm97_vm0, %v42768_v60  ;;  %38082 = vmatmul.mubr.msk.f32.vlgmr.msra.gmra.mxu0 %vm97_vm0, %v42768_v60  ;;  %v42909_v54 = vpop.f32.mrf.mxu1  ;;  %v42911_v15 = vpop.f32.mrf.mxu0  ;;  %v33312_v11 = vadd.f32 %v33311_v47, %v33310_v40  ;;  %v32140_v43 = vadd.f32 %v32139_v35, %v32138_v45  ;;  %v33141_v32 = vsel %vm97_vm0, %v33117_v58, 0.0  ;;  %v45562_v40 = vld [vmem:[#allocation128_spill] sm:$0xff]  ;;  %v33291_v45 = vand.u32 2147483647, %v31289_v63 }
 0x401   :  { %38085 = vmatpush3.msra.mxu1 %v45556_v3  ;;  %38092 = vmatpush3.msra.mxu0 %v45557_v27  ;;  %v31428_v3 = vadd.f32 %v31300_v33, %v42737_v23  ;;  %v31148_v23 = vmul.f32 -1.0, %v42410_v51  ;;  %v33140_v33 = vadd.f32 %v33139_v24, %v33138_v34  ;;  %v42934_v27 = vadd.f32 %v45560_v10, %v31147_v1 }
 0x402   :  { %38086 = vmatprep.subr.mxu1 %v45558_v13  ;;  %38093 = vmatprep.subr.mxu0 %v45559_v37  ;;  %v33313_v47 = vsel %vm97_vm0, %v33290_v17, 0.0  ;;  %v32125_v58 = vand.u32 2147483647, %v31555_v62  ;;  %v31429_v51 = vadd.f32 %v42720_v0, %v31301_v55  ;;  %v32141_v1 = vsel %vm97_vm0, %v32124_v57, 0.0  ;;  %v45564_v0 = vld [vmem:[#allocation129_spill] sm:$0xff]  ;;  %v45565_v55 = vld [vmem:[#allocation130_spill] sm:$0xff] }
 0x403   :  { %38087 = vmatpush3.msra.mxu1 %v45558_v13  ;;  %38094 = vmatpush3.msra.mxu0 %v45559_v37  ;;  %v31290_v13 = vadd.f32 %v31162_v48, %v42644_v6  ;;  %v31302_v34 = vmul.f32 2.0, %v42786_v41  ;;  %v31556_v24 = vadd.f32 %v31428_v3, %v42786_v41  ;;  %v33118_v62 = vand.u32 2147483647, %v31274_v31 }
 0x404   :  { %38088 = vmatprep.mubr.msk.f32.mxu1 %vm97_vm0, %v42755_v38  ;;  %38095 = vmatprep.mubr.msk.f32.mxu0 %vm97_vm0, %v42755_v38  ;;  %v42936_v26 = vpop.f32.mrf.mxu1  ;;  %v42938_v46 = vpop.f32.mrf.mxu0  ;;  %v31163_v37 = vmul.f32 -1.0, %v42592_v42  ;;  %v33314_v35 = vadd.f32 %v33313_v47, %v33312_v11  ;;  %v32142_v48 = vadd.f32 %v32141_v1, %v32140_v43  ;;  %v31149_v57 = vmul.f32 -1.0, %v42396_v16 }
 0x405   :  { %38098 = vmatprep.subr.mxu1 %v45561_v56  ;;  %38105 = vmatprep.subr.mxu0 %v45562_v40  ;;  %v33119_v3 = vand.u32 2147483647, %v42934_v27  ;;  %v33142_v28 = vadd.f32 %v33141_v32, %v33140_v33  ;;  %v33315_v31 = vsel %vm97_vm0, %v33291_v45, 0.0  ;;  %v33292_v11 = vand.u32 2147483647, %v31290_v13 }
 0x406   :  { %38089 = vmatmul.mubr.msk.f32.vlgmr.msra.gmra.mxu1 %vm97_vm0, %v42768_v60  ;;  %38096 = vmatmul.mubr.msk.f32.vlgmr.msra.gmra.mxu0 %vm97_vm0, %v42768_v60  ;;  %v42952_v63 = vpop.f32.mrf.mxu1  ;;  %v42954_v17 = vpop.f32.mrf.mxu0  ;;  %v31291_v42 = vadd.f32 %v42630_v4, %v31163_v37  ;;  %v31303_v43 = vmul.f32 2.0, %v42765_v14  ;;  %v32143_v16 = vsel %vm97_vm0, %v32125_v58, 0.0  ;;  %v32126_v32 = vand.u32 2147483647, %v31556_v24 }
 0x407   :  { %45563 = vst [vmem:[#allocation298_spill] sm:$0xff] %v42954_v17  ;;  %38099 = vmatpush3.msra.mxu1 %v45561_v56  ;;  %38106 = vmatpush3.msra.mxu0 %v45562_v40  ;;  %v31276_v17 = vadd.f32 %v31148_v23, %v42450_v59  ;;  %v31557_v59 = vadd.f32 %v42765_v14, %v31429_v51  ;;  %v45566_v56 = vld [vmem:[#allocation131_spill] sm:$0xff]  ;;  %v45567_v40 = vld [vmem:[#allocation132_spill] sm:$0xff]  ;;  %v33143_v45 = vsel %vm97_vm0, %v33118_v62, 0.0  ;;  %v31164_v47 = vmul.f32 -1.0, %v42608_v50 }
 0x408   :  { %38100 = vmatprep.subr.mxu1 %v45564_v0  ;;  %38107 = vmatprep.subr.mxu0 %v45565_v55  ;;  %v31430_v23 = vadd.f32 %v31302_v34, %v42784_v44  ;;  %v33316_v13 = vadd.f32 %v33315_v31, %v33314_v35  ;;  %v32144_v1 = vadd.f32 %v32143_v16, %v32142_v48  ;;  %v45568_v44 = vld [vmem:[#allocation31_spill] sm:$0xff]  ;;  %v31165_v24 = vmul.f32 -1.0, %v42594_v5  ;;  %v45570_v31 = vld [vmem:[#allocation134_spill] sm:$0xff] }
 0x409   :  { %38101 = vmatpush3.msra.mxu1 %v45564_v0  ;;  %38108 = vmatpush3.msra.mxu0 %v45565_v55  ;;  %v31277_v58 = vadd.f32 %v45568_v44, %v31149_v57  ;;  %v33144_v51 = vadd.f32 %v33143_v45, %v33142_v28  ;;  %v33120_v34 = vand.u32 2147483647, %v31276_v17  ;;  %v33293_v50 = vand.u32 2147483647, %v31291_v42  ;;  %v45569_v28 = vld [vmem:[#allocation133_spill] sm:$0xff]  ;;  %v45572_v45 = vld [vmem:[#allocation136_spill] sm:$0xff] }
 0x40a   :  { %38102 = vmatprep.mubr.msk.f32.mxu1 %vm97_vm0, %v42755_v38  ;;  %38109 = vmatprep.mubr.msk.f32.mxu0 %vm97_vm0, %v42755_v38  ;;  %v42976_v33 = vpop.f32.mrf.mxu1  ;;  %v42978_v27 = vpop.f32.mrf.mxu0  ;;  %v33317_v62 = vsel %vm97_vm0, %v33292_v11, 0.0  ;;  %v31292_v35 = vadd.f32 %v31164_v47, %v42646_v25  ;;  %v31431_v48 = vadd.f32 %v42763_v53, %v31303_v43  ;;  %v32127_v5 = vand.u32 2147483647, %v31557_v59 }
 0x40b   :  { %38112 = vmatprep.subr.mxu1 %v45566_v56  ;;  %38119 = vmatprep.subr.mxu0 %v45567_v40  ;;  %v32145_v17 = vsel %vm97_vm0, %v32126_v32, 0.0  ;;  %v31304_v55 = vmul.f32 2.0, %v42825_v19  ;;  %v31558_v57 = vadd.f32 %v31430_v23, %v42825_v19  ;;  %v31151_v42 = vmul.f32 -1.0, %v45560_v10  ;;  %v43017_v10 = vld [vmem:[#allocation9] sm:$0xff] }
 0x40c   :  { %38103 = vmatmul.mubr.msk.f32.vlgmr.msra.gmra.mxu1 %vm97_vm0, %v42768_v60  ;;  %38110 = vmatmul.mubr.msk.f32.vlgmr.msra.gmra.mxu0 %vm97_vm0, %v42768_v60  ;;  %v42990_v37 = vpop.f32.mrf.mxu1  ;;  %v42992_v0 = vpop.f32.mrf.mxu0  ;;  %v33145_v25 = vsel %vm97_vm0, %v33119_v3, 0.0  ;;  %v33318_v53 = vadd.f32 %v33317_v62, %v33316_v13  ;;  %v32146_v11 = vadd.f32 %v32145_v17, %v32144_v1  ;;  %v31150_v43 = vmul.f32 -1.0, %v42448_v30  ;;  %v45571_v3 = vld [vmem:[#allocation135_spill] sm:$0xff] }
 0x40d   :  { %38113 = vmatpush3.msra.mxu1 %v45566_v56  ;;  %38120 = vmatpush3.msra.mxu0 %v45567_v40  ;;  %v33146_v16 = vadd.f32 %v33145_v25, %v33144_v51  ;;  %v33147_v59 = vsel %vm97_vm0, %v33120_v34, 0.0  ;;  %v33319_v56 = vsel %vm97_vm0, %v33293_v50, 0.0  ;;  %v33294_v40 = vand.u32 2147483647, %v31292_v35  ;;  %v45573_v34 = vld [vmem:[#allocation33_spill] sm:$0xff] }
 0x40e   :  { %32807 = vadd.xlane.f32.xlu0 %v42716_v2  ;;  %38114 = vmatprep.subr.mxu1 %v45569_v28  ;;  %v33121_v2 = vand.u32 2147483647, %v31277_v58  ;;  %v31305_v30 = vmul.f32 2.0, %v42810_v61  ;;  %v32147_v47 = vsel %vm97_vm0, %v32127_v5, 0.0  ;;  %v31559_v13 = vadd.f32 %v42810_v61, %v31431_v48 }
 0x40f   :  { %38121 = vmatprep.subr.mxu0 %v45570_v31  ;;  %38115 = vmatpush3.msra.mxu1 %v45569_v28  ;;  %v32128_v1 = vand.u32 2147483647, %v31558_v57  ;;  %v31432_v44 = vadd.f32 %v31304_v55, %v42786_v41  ;;  %v33320_v50 = vadd.f32 %v33319_v56, %v33318_v53  ;;  %v32148_v62 = vadd.f32 %v32147_v47, %v32146_v11  ;;  %v45574_v41 = vld [vmem:[#allocation137_spill] sm:$0xff]  ;;  %v45575_v28 = vld [vmem:[#allocation32_spill] sm:$0xff]  ;;  %v45576_v55 = vld [vmem:[#allocation138_spill] sm:$0xff] }
 0x410   :  { %38122 = vmatpush3.msra.mxu0 %v45570_v31  ;;  %38116 = vmatprep.mubr.msk.f32.mxu1 %vm97_vm0, %v42755_v38  ;;  %v43013_v32 = vpop.f32.mrf.mxu1  ;;  %v43015_v23 = vpop.f32.mrf.mxu0  ;;  %v31293_v38 = vadd.f32 %v42632_v18, %v31165_v24  ;;  %v43035_v18 = vld [vmem:[#allocation9 + $0x8] sm:$0xff]  ;;  %v31166_v24 = vmul.f32 -1.0, %v42644_v6  ;;  %v33149_v35 = vsel %vm97_vm0, %v33121_v2, 0.0  ;;  %v33148_v48 = vadd.f32 %v33147_v59, %v33146_v16 }
 0x411   :  { %38123 = vmatprep.mubr.msk.f32.mxu0 %vm97_vm0, %v43017_v10  ;;  %38126 = vmatprep.subr.mxu1 %v45571_v3  ;;  %v43046_v5 = vadd.f32 %v45575_v28, %v31151_v42  ;;  %v31307_v17 = vmul.f32 2.0, %v42812_v52  ;;  %v31433_v31 = vadd.f32 %v42765_v14, %v31305_v30  ;;  %v31306_v25 = vmul.f32 2.0, %v42827_v20 }
 0x412   :  { %38133 = vmatprep.subr.mxu0 %v45572_v45  ;;  %38117 = vmatmul.mubr.msk.f32.vlgmr.msra.gmra.mxu1 %vm97_vm0, %v42768_v60  ;;  %v43031_v58 = vpop.f32.mrf.mxu1  ;;  %v43033_v51 = vpop.f32.mrf.mxu0  ;;  %v31278_v60 = vadd.f32 %v31150_v43, %v45573_v34  ;;  %v33295_v57 = vand.u32 2147483647, %v31293_v38  ;;  %v31294_v6 = vadd.f32 %v31166_v24, %v42689_v22  ;;  %v33321_v42 = vsel %vm97_vm0, %v33294_v40, 0.0  ;;  %v45577_v22 = vld [vmem:[#allocation139_spill] sm:$0xff]  ;;  %v45578_v38 = vld [vmem:[#allocation140_spill] sm:$0xff] }
 0x413   :  { %38124 = vmatmul.mubr.msk.f32.vlgmr.msra.gmra.mxu0 %vm97_vm0, %v43035_v18  ;;  %38127 = vmatpush3.msra.mxu1 %v45571_v3  ;;  %v32129_v53 = vand.u32 2147483647, %v31559_v13  ;;  %v32149_v11 = vsel %vm97_vm0, %v32128_v1, 0.0  ;;  %v31560_v2 = vadd.f32 %v31432_v44, %v42827_v20  ;;  %v31167_v59 = vmul.f32 -1.0, %v42630_v4  ;;  %v45579_v4 = vld [vmem:[#allocation34_spill] sm:$0xff] }
 0x414   :  { %38134 = vmatpush3.msra.mxu0 %v45572_v45  ;;  %38128 = vmatprep.subr.mxu1 %v45574_v41  ;;  %v33122_v14 = vand.u32 2147483647, %v31278_v60  ;;  %v33322_v3 = vadd.f32 %v33321_v42, %v33320_v50  ;;  %v32150_v56 = vadd.f32 %v32149_v11, %v32148_v62  ;;  %v32978_v40 = vadd.f32 %v42858_v49, %v42860_v7  ;;  %v45580_v7 = vld [vmem:[#allocation141_spill] sm:$0xff] }
 0x415   :  { %38135 = vmatprep.subr.mxu0 %v45576_v55  ;;  %38129 = vmatpush3.msra.mxu1 %v45574_v41  ;;  %v33150_v30 = vadd.f32 %v33149_v35, %v33148_v48  ;;  %v31309_v45 = vmul.f32 2.0, %v42851_v29  ;;  %v31435_v47 = vadd.f32 %v42810_v61, %v31307_v17  ;;  %v31295_v44 = vadd.f32 %v45579_v4, %v31167_v59  ;;  %v45581_v41 = vld [vmem:[#allocation142_spill] sm:$0xff] }
 0x416   :  { %38136 = vmatpush3.msra.mxu0 %v45576_v55  ;;  %38130 = vmatprep.mubr.msk.f32.mxu1 %vm97_vm0, %v43017_v10  ;;  %v43060_v43 = vpop.f32.mrf.mxu1  ;;  %v43062_v16 = vpop.f32.mrf.mxu0  ;;  %v33296_v34 = vand.u32 2147483647, %v31294_v6  ;;  %v31561_v60 = vadd.f32 %v42812_v52, %v31433_v31  ;;  %v31434_v49 = vadd.f32 %v31306_v25, %v42825_v19  ;;  %v33323_v61 = vsel %vm97_vm0, %v33295_v57, 0.0 }
 0x417   :  { %38137 = vmatprep.mubr.msk.f32.mxu0 %vm97_vm0, %v43017_v10  ;;  %38140 = vmatprep.subr.mxu1 %v45577_v22  ;;  %v32151_v24 = vsel %vm97_vm0, %v32129_v53, 0.0  ;;  %v32130_v50 = vand.u32 2147483647, %v31560_v2  ;;  %v31308_v62 = vmul.f32 2.0, %v42871_v21  ;;  %v33123_v35 = vand.u32 2147483647, %v43046_v5 }
 0x418   :  { %38147 = vmatprep.subr.mxu0 %v45578_v38  ;;  %38131 = vmatmul.mubr.msk.f32.vlgmr.msra.gmra.mxu1 %vm97_vm0, %v43035_v18  ;;  %v43075_v13 = vpop.f32.mrf.mxu1  ;;  %v43077_v1 = vpop.f32.mrf.mxu0  ;;  %v33151_v48 = vsel %vm97_vm0, %v33122_v14, 0.0  ;;  %v32152_v19 = vadd.f32 %v32151_v24, %v32150_v56  ;;  %v33324_v28 = vadd.f32 %v33323_v61, %v33322_v3  ;;  %v31563_v55 = vadd.f32 %v42851_v29, %v31435_v47  ;;  %v45582_v5 = vld [vmem:[#allocation143_spill] sm:$0xff]  ;;  %v45583_v14 = vld [vmem:[#allocation144_spill] sm:$0xff]  ;;  %v45586_v24 = vld [vmem:[#allocation146_spill] sm:$0xff] }
 0x419   :  { %38138 = vmatmul.mubr.msk.f32.vlgmr.msra.gmra.mxu0 %vm97_vm0, %v43035_v18  ;;  %38141 = vmatpush3.msra.mxu1 %v45577_v22  ;;  %v33152_v17 = vadd.f32 %v33151_v48, %v33150_v30  ;;  %v31311_v57 = vmul.f32 2.0, %v42853_v8  ;;  %v31437_v6 = vadd.f32 %v42812_v52, %v31309_v45  ;;  %v33297_v42 = vand.u32 2147483647, %v31295_v44 }
 0x41a   :  { %38148 = vmatpush3.msra.mxu0 %v45578_v38  ;;  %38142 = vmatprep.subr.mxu1 %v45580_v7  ;;  %v33325_v53 = vsel %vm97_vm0, %v33296_v34, 0.0  ;;  %v32131_v11 = vand.u32 2147483647, %v31561_v60  ;;  %v31562_v2 = vadd.f32 %v31434_v49, %v42871_v21  ;;  %v32153_v52 = vsel %vm97_vm0, %v32130_v50, 0.0 }
 0x41b   :  { %38149 = vmatprep.subr.mxu0 %v45581_v41  ;;  %38143 = vmatpush3.msra.mxu1 %v45580_v7  ;;  %v31310_v59 = vmul.f32 2.0, %v42873_v39  ;;  %v31436_v3 = vadd.f32 %v31308_v62, %v42827_v20  ;;  %v45584_v45 = vand.u32 2147483647, %v42781_v36  ;;  %v33153_v4 = vsel %vm97_vm0, %v33123_v35, 0.0  ;;  %v45585_v20 = vld [vmem:[#allocation145_spill] sm:$0xff] }
 0x41c   :  { %38150 = vmatpush3.msra.mxu0 %v45581_v41  ;;  %38144 = vmatprep.mubr.msk.f32.mxu1 %vm97_vm0, %v43017_v10  ;;  %v43100_v31 = vpop.f32.mrf.mxu1  ;;  %v37705_v25 = vpop.f32.mrf.mxu0  ;;  %v32154_v44 = vadd.f32 %v32153_v52, %v32152_v19  ;;  %v33326_v34 = vadd.f32 %v33325_v53, %v33324_v28  ;;  %v32133_v60 = vand.u32 2147483647, %v31563_v55  ;;  %v31565_v49 = vadd.f32 %v42853_v8, %v31437_v6  ;;  %v45587_v28 = vld [vmem:[#allocation147_spill] sm:$0xff] }
 0x41d   :  { %38151 = vmatprep.mubr.msk.f32.mxu0 %vm97_vm0, %v43017_v10  ;;  %38154 = vmatprep.subr.mxu1 %v45582_v5  ;;  %v32113_v22 = vpop.xlane.xlu0 %32112  ;;  %v32979_v47 = vsel %vm97_vm0, %v45584_v45, 0.0  ;;  %v31439_v7 = vadd.f32 %v42851_v29, %v31311_v57  ;;  %v43130_v50 = vadd.f32 %v33153_v4, %v33152_v17  ;;  %v32132_v62 = vand.u32 2147483647, %v31562_v2  ;;  %v45590_v4 = vld [vmem:[#allocation150_spill] sm:$0xff] }
 0x41e   :  { %38161 = vmatprep.subr.mxu0 %v45583_v14  ;;  %38145 = vmatmul.mubr.msk.f32.vlgmr.msra.gmra.mxu1 %vm97_vm0, %v43035_v18  ;;  %v32114_v56 = vrot.slane %v32113_v22, 4  ;;  %v43113_v38 = vpop.f32.mrf.mxu1  ;;  %v20606_v30 = vpop.f32.mrf.mxu0  ;;  %v43128_v36 = vadd.f32 %v32979_v47, %v32978_v40  ;;  %v33327_v41 = vsel %vm97_vm0, %v33297_v42, 0.0  ;;  %v32155_v8 = vsel %vm97_vm0, %v32131_v11, 0.0 }
 0x41f   :  { %38152 = vmatmul.mubr.msk.f32.vlgmr.msra.gmra.mxu0 %vm97_vm0, %v43035_v18  ;;  %38155 = vmatpush3.msra.mxu1 %v45582_v5  ;;  %v31564_v29 = vadd.f32 %v31436_v3, %v42873_v39  ;;  %v31438_v48 = vadd.f32 %v31310_v59, %v42871_v21  ;;  %v32156_v17 = vadd.f32 %v32155_v8, %v32154_v44  ;;  %v45588_v5 = vld [vmem:[#allocation148_spill] sm:$0xff]  ;;  %v32159_v39 = vsel %vm97_vm0, %v32133_v60, 0.0  ;;  %v45589_v3 = vld [vmem:[#allocation149_spill] sm:$0xff] }
 0x420   :  { %38162 = vmatpush3.msra.mxu0 %v45583_v14  ;;  %38156 = vmatprep.subr.mxu1 %v45585_v20  ;;  %v32115_v61 = vadd.f32 %v32114_v56, %v32113_v22  ;;  %v43142_v55 = vadd.f32 %v33327_v41, %v33326_v34  ;;  %v32135_v21 = vand.u32 2147483647, %v31565_v49  ;;  %v43149_v42 = vadd.f32 %v42894_v12, %v31439_v7 }
 0x421   :  { %38163 = vmatprep.subr.mxu0 %v45586_v24  ;;  %38157 = vmatpush3.msra.mxu1 %v45585_v20  ;;  %v32157_v22 = vsel %vm97_vm0, %v32132_v62, 0.0  ;;  %v32134_v12 = vand.u32 2147483647, %v31564_v29  ;;  %v43161_v56 = vadd.f32 %v31438_v48, %v42909_v54  ;;  %v45591_v62 = vld [vmem:[#allocation151_spill] sm:$0xff] }
 0x422   :  { %38164 = vmatpush3.msra.mxu0 %v45586_v24  ;;  %38158 = vmatprep.mubr.msk.f32.mxu1 %vm97_vm0, %v43017_v10  ;;  %v32116_v35 = vrot.slane %v32115_v61, 2  ;;  %v37712_v19 = vpop.f32.mrf.mxu1  ;;  %v37719_v40 = vpop.f32.mrf.mxu0  ;;  %v32158_v44 = vadd.f32 %v32157_v22, %v32156_v17  ;;  %v43170_v60 = vsel %vm97_vm0, %v32135_v21, 0.0  ;;  %v32137_v54 = vand.u32 2147483647, %v43149_v42 }
 0x423   :  { %38165 = vmatprep.mubr.msk.f32.mxu0 %vm97_vm0, %v43017_v10  ;;  %38168 = vmatprep.subr.mxu1 %v45587_v28  ;;  %v31329_v57 = vmul.f32 2.0, %v37712_v19  ;;  %v31331_v6 = vmul.f32 2.0, %v37719_v40  ;;  %v32161_v48 = vsel %vm97_vm0, %v32134_v12, 0.0  ;;  %v45594_v12 = vld [vmem:[#allocation154_spill] sm:$0xff] }
 0x424   :  { %38175 = vmatprep.subr.mxu0 %v45588_v5  ;;  %38159 = vmatmul.mubr.msk.f32.vlgmr.msra.gmra.mxu1 %vm97_vm0, %v43035_v18  ;;  %v32117_v53 = vadd.f32 %v32116_v35, %v32115_v61  ;;  %v20681_v11 = vpop.f32.mrf.mxu1  ;;  %v43151_v2 = vpop.f32.mrf.mxu0  ;;  %v45592_v35 = vld [vmem:[#allocation152_spill] sm:$0xff] }
 0x425   :  { %38166 = vmatmul.mubr.msk.f32.vlgmr.msra.gmra.mxu0 %vm97_vm0, %v43035_v18  ;;  %38169 = vmatpush3.msra.mxu1 %v45587_v28  ;;  %v31457_v14 = vadd.f32 %v37705_v25, %v31329_v57  ;;  %v31328_v52 = vmul.f32 2.0, %v20681_v11  ;;  %v31330_v59 = vmul.f32 2.0, %v43151_v2  ;;  %v31459_v47 = vadd.f32 %v37712_v19, %v31331_v6 }
 0x426   :  { %38176 = vmatpush3.msra.mxu0 %v45588_v5  ;;  %38170 = vmatprep.subr.mxu1 %v45589_v3  ;;  %v32118_v45 = vrot.slane %v32117_v53, 1  ;;  %v31313_v25 = vmul.f32 2.0, %v42936_v26  ;;  %v32136_v19 = vand.u32 2147483647, %v43161_v56  ;;  %v31315_v28 = vmul.f32 2.0, %v42938_v46 }
 0x427   :  { %38177 = vmatprep.subr.mxu0 %v45590_v4  ;;  %38171 = vmatpush3.msra.mxu1 %v45589_v3  ;;  %v31585_v34 = vadd.f32 %v37719_v40, %v31457_v14  ;;  %v31456_v20 = vadd.f32 %v31328_v52, %v20606_v30  ;;  %v31458_v24 = vadd.f32 %v31330_v59, %v20681_v11  ;;  %v45593_v3 = vld [vmem:[#allocation153_spill] sm:$0xff] }
 0x428   :  { %38178 = vmatpush3.msra.mxu0 %v45590_v4  ;;  %38172 = vmatprep.mubr.msk.f32.mxu1 %vm97_vm0, %v43017_v10  ;;  %v32119_v49 = vadd.f32 %v32118_v45, %v32117_v53  ;;  %v37726_v7 = vpop.f32.mrf.mxu1  ;;  %v37733_v61 = vpop.f32.mrf.mxu0  ;;  %v32160_v5 = vadd.f32 %v32159_v39, %v32158_v44  ;;  %v43189_v21 = vadd.f32 %v42896_v9, %v31313_v25 }
 0x429   :  { %38179 = vmatprep.mubr.msk.f32.mxu0 %vm97_vm0, %v43017_v10  ;;  %38182 = vmatprep.subr.mxu1 %v45591_v62  ;;  %v32470_v30 = vand.u32 2147483647, %v31585_v34  ;;  %v31584_v41 = vadd.f32 %v31456_v20, %v43151_v2  ;;  %v31333_v8 = vmul.f32 2.0, %v37726_v7  ;;  %v31587_v29 = vadd.f32 %v37726_v7, %v31459_v47 }
 0x42a   :  { %38189 = vmatprep.subr.mxu0 %v45592_v35  ;;  %38173 = vmatmul.mubr.msk.f32.vlgmr.msra.gmra.mxu1 %vm97_vm0, %v43035_v18  ;;  %38679 = vpush %v32119_v49  ;;  %v31335_v17 = vmul.f32 2.0, %v37733_v61  ;;  %v20831_v57 = vpop.f32.mrf.mxu1  ;;  %v43183_v6 = vpop.f32.mrf.mxu0  ;;  %v31312_v20 = vmul.f32 2.0, %v42952_v63 }
 0x42b   :  { %38180 = vmatmul.mubr.msk.f32.vlgmr.msra.gmra.mxu0 %vm97_vm0, %v43035_v18  ;;  %38183 = vmatpush3.msra.mxu1 %v45591_v62  ;;  %v32469_v53 = vand.u32 2147483647, %v31584_v41  ;;  %v31461_v11 = vadd.f32 %v37719_v40, %v31333_v8  ;;  %v31332_v22 = vmul.f32 2.0, %v20831_v57  ;;  %v31586_v14 = vadd.f32 %v31458_v24, %v20831_v57  ;;  %v45595_v62 = vld [vmem:[#allocation155_spill] sm:$0xff] }
 0x42c   :  { %38190 = vmatpush3.msra.mxu0 %v45592_v35  ;;  %32981 = vadd.xlane.f32.xlu1 %v43128_v36  ;;  %v31334_v52 = vmul.f32 2.0, %v43183_v6  ;;  %v31463_v59 = vadd.f32 %v37726_v7, %v31335_v17  ;;  %v32486_v39 = vsel %vm97_vm0, %v32470_v30, 0.0  ;;  %v32472_v45 = vand.u32 2147483647, %v31587_v29  ;;  %v45596_v30 = vld [vmem:[#allocation156_spill] sm:$0xff] }
 0x42d   :  { %38184 = vmatprep.subr.mxu1 %v45593_v3  ;;  %38191 = vmatprep.subr.mxu0 %v45594_v12  ;;  %v32485_v9 = vsel %vm97_vm0, %v32469_v53, 0.0  ;;  %v31589_v47 = vadd.f32 %v37733_v61, %v31461_v11  ;;  %v32471_v40 = vand.u32 2147483647, %v31586_v14  ;;  %v31460_v4 = vadd.f32 %v31332_v22, %v43151_v2  ;;  %v45597_v14 = vld [vmem:[#allocation157_spill] sm:$0xff] }
 0x42e   :  { %38185 = vmatpush3.msra.mxu1 %v45593_v3  ;;  %38192 = vmatpush3.msra.mxu0 %v45594_v12  ;;  %v32487_v36 = vadd.f32 %v32486_v39, %v32485_v9  ;;  %v37740_v44 = vpop.f32.mrf.mxu1  ;;  %v37747_v25 = vpop.f32.mrf.mxu0  ;;  %v31462_v34 = vadd.f32 %v31334_v52, %v20831_v57  ;;  %v43210_v2 = vadd.f32 %v32161_v48, %v32160_v5  ;;  %v32490_v57 = vsel %vm97_vm0, %v32472_v45, 0.0  ;;  %v45598_v52 = vld [vmem:[#allocation158_spill] sm:$0xff] }
 0x42f   :  { %38186 = vmatprep.mubr.msk.f32.mxu1 %vm97_vm0, %v43017_v10  ;;  %38193 = vmatprep.mubr.msk.f32.mxu0 %vm97_vm0, %v43017_v10  ;;  %v31337_v49 = vmul.f32 2.0, %v37740_v44  ;;  %v43206_v7 = vadd.f32 %v37740_v44, %v31463_v59  ;;  %v31339_v24 = vmul.f32 2.0, %v37747_v25  ;;  %v43213_v41 = vadd.f32 %v42936_v26, %v31315_v28 }
 0x430   :  { %38196 = vmatprep.subr.mxu1 %v45595_v62  ;;  %38203 = vmatprep.subr.mxu0 %v45596_v30  ;;  %v32488_v8 = vsel %vm97_vm0, %v32471_v40, 0.0  ;;  %v31588_v29 = vadd.f32 %v31460_v4, %v43183_v6  ;;  %v20981_v35 = vpop.f32.mrf.mxu1  ;;  %v43217_v17 = vpop.f32.mrf.mxu0  ;;  %v32474_v48 = vand.u32 2147483647, %v31589_v47  ;;  %v43232_v59 = vsel %vm97_vm0, %v32137_v54, 0.0 }
 0x431   :  { %38187 = vmatmul.mubr.msk.f32.vlgmr.msra.gmra.mxu1 %vm97_vm0, %v43035_v18  ;;  %38194 = vmatmul.mubr.msk.f32.vlgmr.msra.gmra.mxu0 %vm97_vm0, %v43035_v18  ;;  %v32489_v5 = vadd.f32 %v32488_v8, %v32487_v36  ;;  %v31465_v53 = vadd.f32 %v37733_v61, %v31337_v49  ;;  %v31336_v28 = vmul.f32 2.0, %v20981_v35  ;;  %v31590_v11 = vadd.f32 %v31462_v34, %v20981_v35  ;;  %v45599_v34 = vld [vmem:[#allocation159_spill] sm:$0xff]  ;;  %v45600_v49 = vld [vmem:[#allocation160_spill] sm:$0xff] }
 0x432   :  { %38197 = vmatpush3.msra.mxu1 %v45595_v62  ;;  %38204 = vmatpush3.msra.mxu0 %v45596_v30  ;;  %v32473_v26 = vand.u32 2147483647, %v31588_v29  ;;  %v31338_v22 = vmul.f32 2.0, %v43217_v17  ;;  %v31467_v12 = vadd.f32 %v37740_v44, %v31339_v24  ;;  %v31440_v42 = vadd.f32 %v31312_v20, %v42911_v15  ;;  %v45601_v20 = vld [vmem:[#allocation298_spill] sm:$0xff] }
 0x433   :  { %38198 = vmatprep.subr.mxu1 %v45597_v14  ;;  %38205 = vmatprep.subr.mxu0 %v45598_v52  ;;  %v32491_v3 = vadd.f32 %v32490_v57, %v32489_v5  ;;  %v43234_v61 = vadd.f32 %v37747_v25, %v31465_v53  ;;  %v32475_v9 = vand.u32 2147483647, %v31590_v11  ;;  %v31464_v45 = vadd.f32 %v31336_v28, %v43183_v6  ;;  %v45602_v28 = vld [vmem:[#allocation161_spill] sm:$0xff]  ;;  %v45603_v11 = vld [vmem:[#allocation162_spill] sm:$0xff] }
 0x434   :  { %38199 = vmatpush3.msra.mxu1 %v45597_v14  ;;  %38206 = vmatpush3.msra.mxu0 %v45598_v52  ;;  %v32492_v39 = vsel %vm97_vm0, %v32473_v26, 0.0  ;;  %v37754_v47 = vpop.f32.mrf.mxu1  ;;  %v37761_v36 = vpop.f32.mrf.mxu0  ;;  %v31466_v40 = vadd.f32 %v31338_v22, %v20981_v35  ;;  %v32494_v6 = vsel %vm97_vm0, %v32474_v48, 0.0  ;;  %v32476_v24 = vand.u32 2147483647, %v43206_v7 }
 0x435   :  { %38200 = vmatprep.mubr.msk.f32.mxu1 %vm97_vm0, %v43017_v10  ;;  %38207 = vmatprep.mubr.msk.f32.mxu0 %vm97_vm0, %v43017_v10  ;;  %v32493_v54 = vadd.f32 %v32492_v39, %v32491_v3  ;;  %v31341_v4 = vmul.f32 2.0, %v37754_v47  ;;  %v43245_v44 = vadd.f32 %v37754_v47, %v31467_v12  ;;  %v31592_v62 = vadd.f32 %v31464_v45, %v43217_v17 }
 0x436   :  { %38210 = vmatprep.subr.mxu1 %v45599_v34  ;;  %38217 = vmatprep.subr.mxu0 %v45600_v49  ;;  %v31343_v30 = vmul.f32 2.0, %v37761_v36  ;;  %v21131_v8 = vpop.f32.mrf.mxu1  ;;  %v21206_v29 = vpop.f32.mrf.mxu0  ;;  %v31569_v15 = vadd.f32 %v42938_v46, %v43189_v21  ;;  %v31314_v35 = vmul.f32 2.0, %v45601_v20  ;;  %v32496_v7 = vsel %vm97_vm0, %v32475_v9, 0.0 }
 0x437   :  { %38201 = vmatmul.mubr.msk.f32.vlgmr.msra.gmra.mxu1 %vm97_vm0, %v43035_v18  ;;  %38208 = vmatmul.mubr.msk.f32.vlgmr.msra.gmra.mxu0 %vm97_vm0, %v43035_v18  ;;  %v32495_v57 = vadd.f32 %v32494_v6, %v32493_v54  ;;  %v31469_v48 = vadd.f32 %v37747_v25, %v31341_v4  ;;  %v32477_v5 = vand.u32 2147483647, %v31592_v62  ;;  %v31340_v53 = vmul.f32 2.0, %v21131_v8  ;;  %v45604_v54 = vld [vmem:[#allocation163_spill] sm:$0xff] }
 0x438   :  { %38211 = vmatpush3.msra.mxu1 %v45599_v34  ;;  %38218 = vmatpush3.msra.mxu0 %v45600_v49  ;;  %v31594_v26 = vadd.f32 %v31466_v40, %v21131_v8  ;;  %v31342_v21 = vmul.f32 2.0, %v21206_v29  ;;  %v31471_v52 = vadd.f32 %v37754_v47, %v31343_v30  ;;  %v43269_v25 = vadd.f32 %v31440_v42, %v45601_v20 }
 0x439   :  { %38212 = vmatprep.subr.mxu1 %v45602_v28  ;;  %38219 = vmatprep.subr.mxu0 %v45603_v11  ;;  %v32497_v22 = vadd.f32 %v32496_v7, %v32495_v57  ;;  %v43264_v14 = vadd.f32 %v37761_v36, %v31469_v48  ;;  %v32498_v3 = vsel %vm97_vm0, %v32476_v24, 0.0  ;;  %v32478_v12 = vand.u32 2147483647, %v43234_v61  ;;  %v45605_v61 = vld [vmem:[#allocation164_spill] sm:$0xff]  ;;  %v45607_v7 = vld [vmem:[#allocation166_spill] sm:$0xff] }
 0x43a   :  { %38213 = vmatpush3.msra.mxu1 %v45602_v28  ;;  %38220 = vmatpush3.msra.mxu0 %v45603_v11  ;;  %v31468_v39 = vadd.f32 %v31340_v53, %v43217_v17  ;;  %v37768_v9 = vpop.f32.mrf.mxu1  ;;  %v37775_v45 = vpop.f32.mrf.mxu0  ;;  %v32296_v47 = vand.u32 2147483647, %v31569_v15  ;;  %v43280_v36 = vadd.f32 %v42976_v33, %v43213_v41  ;;  %v31317_v17 = vmul.f32 2.0, %v42976_v33 }
 0x43b   :  { %38214 = vmatprep.mubr.msk.f32.mxu1 %vm97_vm0, %v43017_v10  ;;  %38221 = vmatprep.mubr.msk.f32.mxu0 %vm97_vm0, %v43017_v10  ;;  %v32499_v40 = vadd.f32 %v32498_v3, %v32497_v22  ;;  %v43282_v42 = vadd.f32 %v37768_v9, %v31471_v52  ;;  %v32500_v4 = vsel %vm97_vm0, %v32477_v5, 0.0  ;;  %v32479_v34 = vand.u32 2147483647, %v31594_v26 }
 0x43c   :  { %38224 = vmatprep.subr.mxu1 %v45604_v54  ;;  %38231 = vmatprep.subr.mxu0 %v45605_v61  ;;  %v31596_v49 = vadd.f32 %v31468_v39, %v21206_v29  ;;  %v21281_v6 = vpop.f32.mrf.mxu1  ;;  %v21356_v24 = vpop.f32.mrf.mxu0  ;;  %v43295_v41 = vsel %vm97_vm0, %v32136_v19, 0.0  ;;  %v31442_v62 = vadd.f32 %v31314_v35, %v42952_v63  ;;  %v31470_v15 = vadd.f32 %v31342_v21, %v21131_v8  ;;  %v45606_v19 = vld [vmem:[#allocation165_spill] sm:$0xff] }
 0x43d   :  { %38215 = vmatmul.mubr.msk.f32.vlgmr.msra.gmra.mxu1 %vm97_vm0, %v43035_v18  ;;  %38222 = vmatmul.mubr.msk.f32.vlgmr.msra.gmra.mxu0 %vm97_vm0, %v43035_v18  ;;  %v32501_v30 = vadd.f32 %v32500_v4, %v32499_v40  ;;  %v31319_v29 = vmul.f32 2.0, %v42978_v27  ;;  %v43303_v57 = vadd.f32 %v43170_v60, %v43210_v2  ;;  %v32502_v48 = vsel %vm97_vm0, %v32478_v12, 0.0 }
 0x43e   :  { %38225 = vmatpush3.msra.mxu1 %v45604_v54  ;;  %38232 = vmatpush3.msra.mxu0 %v45605_v61  ;;  %v32480_v56 = vand.u32 2147483647, %v43245_v44  ;;  %v43310_v63 = vsel %vm97_vm0, %v32296_v47, 0.0  ;;  %v32295_v8 = vand.u32 2147483647, %v43269_v25  ;;  %v31445_v60 = vadd.f32 %v42938_v46, %v31317_v17  ;;  %v45608_v25 = vld [vmem:[#allocation167_spill] sm:$0xff] }
 0x43f   :  { %38226 = vmatprep.subr.mxu1 %v45606_v19  ;;  %38233 = vmatprep.subr.mxu0 %v45607_v7  ;;  %v32298_v35 = vand.u32 2147483647, %v43280_v36  ;;  %v32503_v5 = vadd.f32 %v32502_v48, %v32501_v30  ;;  %v43318_v2 = vmul.f32 2.0, %v42990_v37  ;;  %v32504_v44 = vsel %vm97_vm0, %v32479_v34, 0.0  ;;  %v45609_v46 = vld [vmem:[#allocation168_spill] sm:$0xff] }
 0x440   :  { %38227 = vmatpush3.msra.mxu1 %v45606_v19  ;;  %38234 = vmatpush3.msra.mxu0 %v45607_v7  ;;  %v32481_v53 = vand.u32 2147483647, %v31596_v49  ;;  %v37782_v26 = vpop.f32.mrf.mxu1  ;;  %v37789_v28 = vpop.f32.mrf.mxu0  ;;  %v31598_v22 = vadd.f32 %v31470_v15, %v21281_v6  ;;  %v43328_v3 = vadd.f32 %v31442_v62, %v42990_v37  ;;  %v43331_v12 = vmul.f32 2.0, %v42992_v0  ;;  %v45610_v6 = vld [vmem:[#allocation169_spill] sm:$0xff]  ;;  %v45611_v62 = vld [vmem:[#allocation170_spill] sm:$0xff] }
 0x441   :  { %38228 = vmatprep.mubr.msk.f32.mxu1 %vm97_vm0, %v43017_v10  ;;  %38235 = vmatprep.mubr.msk.f32.mxu0 %vm97_vm0, %v43017_v10  ;;  %v32505_v11 = vadd.f32 %v32504_v44, %v32503_v5  ;;  %v31345_v21 = vmul.f32 2.0, %v37782_v26  ;;  %v31347_v52 = vmul.f32 2.0, %v37789_v28  ;;  %v32506_v39 = vsel %vm97_vm0, %v32480_v56, 0.0 }
 0x442   :  { %38238 = vmatprep.subr.mxu1 %v45608_v25  ;;  %38245 = vmatprep.subr.mxu0 %v45609_v46  ;;  %v32482_v9 = vand.u32 2147483647, %v43264_v14  ;;  %v21431_v47 = vpop.f32.mrf.mxu1  ;;  %v43335_v36 = vpop.f32.mrf.mxu0  ;;  %v43345_v14 = vsel %vm97_vm0, %v32295_v8, 0.0  ;;  %v43348_v4 = vadd.f32 %v42976_v33, %v31319_v29  ;;  %v32508_v34 = vsel %vm97_vm0, %v32481_v53, 0.0  ;;  %v45612_v53 = vld [vmem:[#allocation171_spill] sm:$0xff] }
 0x443   :  { %38229 = vmatmul.mubr.msk.f32.vlgmr.msra.gmra.mxu1 %vm97_vm0, %v43035_v18  ;;  %38236 = vmatmul.mubr.msk.f32.vlgmr.msra.gmra.mxu0 %vm97_vm0, %v43035_v18  ;;  %v32507_v40 = vadd.f32 %v32506_v39, %v32505_v11  ;;  %v31473_v54 = vadd.f32 %v37775_v45, %v31345_v21  ;;  %v31344_v61 = vmul.f32 2.0, %v21431_v47  ;;  %v31346_v17 = vmul.f32 2.0, %v43335_v36 }
 0x444   :  { %38239 = vmatpush3.msra.mxu1 %v45608_v25  ;;  %38246 = vmatpush3.msra.mxu0 %v45609_v46  ;;  %v31475_v49 = vadd.f32 %v37782_v26, %v31347_v52  ;;  %v32483_v30 = vand.u32 2147483647, %v31598_v22  ;;  %v43356_v56 = vsel %vm97_vm0, %v32298_v35, 0.0  ;;  %v43359_v33 = vadd.f32 %v42978_v27, %v31445_v60  ;;  %v45613_v60 = vld [vmem:[#allocation172_spill] sm:$0xff] }
 0x445   :  { %38240 = vmatprep.subr.mxu1 %v45610_v6  ;;  %38247 = vmatprep.subr.mxu0 %v45611_v62  ;;  %v32509_v45 = vadd.f32 %v32508_v34, %v32507_v40  ;;  %v31601_v15 = vadd.f32 %v37789_v28, %v31473_v54  ;;  %v31472_v48 = vadd.f32 %v31344_v61, %v21356_v24  ;;  %v32510_v29 = vsel %vm97_vm0, %v32482_v9, 0.0  ;;  %v45614_v54 = vld [vmem:[#allocation173_spill] sm:$0xff] }
 0x446   :  { %38241 = vmatpush3.msra.mxu1 %v45610_v6  ;;  %38248 = vmatpush3.msra.mxu0 %v45611_v62  ;;  %v37796_v19 = vpop.f32.mrf.mxu1  ;;  %v37803_v7 = vpop.f32.mrf.mxu0  ;;  %v31474_v8 = vadd.f32 %v31346_v17, %v21431_v47  ;;  %v43371_v26 = vadd.f32 %v43295_v41, %v43303_v57  ;;  %v32484_v11 = vand.u32 2147483647, %v43282_v42  ;;  %v32512_v46 = vsel %vm97_vm0, %v32483_v30, 0.0  ;;  %v45615_v6 = vld [vmem:[#allocation174_spill] sm:$0xff] }
 0x447   :  { %38242 = vmatprep.mubr.msk.f32.mxu1 %vm97_vm0, %v43017_v10  ;;  %38249 = vmatprep.mubr.msk.f32.mxu0 %vm97_vm0, %v43017_v10  ;;  %v32644_v24 = vand.u32 2147483647, %v31601_v15  ;;  %v31600_v5 = vadd.f32 %v31472_v48, %v43335_v36  ;;  %v31349_v44 = vmul.f32 2.0, %v37796_v19  ;;  %v31603_v35 = vadd.f32 %v37796_v19, %v31475_v49 }
 0x448   :  { %38252 = vmatprep.subr.mxu1 %v45612_v53  ;;  %38259 = vmatprep.subr.mxu0 %v45613_v60  ;;  %v31351_v22 = vmul.f32 2.0, %v37803_v7  ;;  %v21581_v21 = vpop.f32.mrf.mxu1  ;;  %v43374_v52 = vpop.f32.mrf.mxu0  ;;  %v32511_v25 = vadd.f32 %v32510_v29, %v32509_v45 }
 0x449   :  { %38243 = vmatmul.mubr.msk.f32.vlgmr.msra.gmra.mxu1 %vm97_vm0, %v43035_v18  ;;  %38250 = vmatmul.mubr.msk.f32.vlgmr.msra.gmra.mxu0 %vm97_vm0, %v43035_v18  ;;  %v32660_v39 = vsel %vm97_vm0, %v32644_v24, 0.0  ;;  %v32643_v9 = vand.u32 2147483647, %v31600_v5  ;;  %v31477_v41 = vadd.f32 %v37789_v28, %v31349_v44  ;;  %v31348_v42 = vmul.f32 2.0, %v21581_v21  ;;  %v45616_v24 = vld [vmem:[#allocation175_spill] sm:$0xff] }
 0x44a   :  { %38253 = vmatpush3.msra.mxu1 %v45612_v53  ;;  %38260 = vmatpush3.msra.mxu0 %v45613_v60  ;;  %v31602_v57 = vadd.f32 %v31474_v8, %v21581_v21  ;;  %v31350_v47 = vmul.f32 2.0, %v43374_v52  ;;  %v31479_v40 = vadd.f32 %v37796_v19, %v31351_v22  ;;  %v32646_v17 = vand.u32 2147483647, %v31603_v35  ;;  %v45617_v22 = vld [vmem:[#allocation176_spill] sm:$0xff] }
 0x44b   :  { %33155 = vadd.xlane.f32.xlu0 %v43130_v50  ;;  %38254 = vmatprep.subr.mxu1 %v45614_v54  ;;  %v32659_v61 = vsel %vm97_vm0, %v32643_v9, 0.0  ;;  %v31605_v34 = vadd.f32 %v37803_v7, %v31477_v41  ;;  %v32513_v49 = vadd.f32 %v32512_v46, %v32511_v25  ;;  %v31476_v45 = vadd.f32 %v31348_v42, %v43335_v36  ;;  %v45618_v41 = vld [vmem:[#allocation177_spill] sm:$0xff] }
 0x44c   :  { %38261 = vmatprep.subr.mxu0 %v45615_v6  ;;  %38255 = vmatpush3.msra.mxu1 %v45614_v54  ;;  %v32661_v28 = vadd.f32 %v32660_v39, %v32659_v61  ;;  %v32645_v62 = vand.u32 2147483647, %v31602_v57  ;;  %v37810_v30 = vpop.f32.mrf.mxu1  ;;  %v37817_v15 = vpop.f32.mrf.mxu0  ;;  %v31478_v48 = vadd.f32 %v31350_v47, %v21581_v21  ;;  %v32514_v8 = vsel %vm97_vm0, %v32484_v11, 0.0 }
 0x44d   :  { %38262 = vmatpush3.msra.mxu0 %v45615_v6  ;;  %38256 = vmatprep.mubr.msk.f32.mxu1 %vm97_vm0, %v43017_v10  ;;  %v31353_v50 = vmul.f32 2.0, %v37810_v30  ;;  %v43394_v29 = vadd.f32 %v37810_v30, %v31479_v40  ;;  %v31355_v19 = vmul.f32 2.0, %v37817_v15  ;;  %v43402_v36 = vadd.f32 %v43310_v63, %v43345_v14  ;;  %v45619_v40 = vld [vmem:[#allocation178_spill] sm:$0xff] }
 0x44e   :  { %38263 = vmatprep.mubr.msk.f32.mxu0 %vm97_vm0, %v43017_v10  ;;  %38266 = vmatprep.subr.mxu1 %v45616_v24  ;;  %v32662_v5 = vsel %vm97_vm0, %v32645_v62, 0.0  ;;  %v31604_v44 = vadd.f32 %v31476_v45, %v43374_v52  ;;  %v21731_v35 = vpop.f32.mrf.mxu1  ;;  %v43406_v53 = vpop.f32.mrf.mxu0  ;;  %v43408_v60 = vadd.f32 %v32514_v8, %v32513_v49  ;;  %v32664_v11 = vsel %vm97_vm0, %v32646_v17, 0.0 }
 0x44f   :  { %38273 = vmatprep.subr.mxu0 %v45617_v22  ;;  %38257 = vmatmul.mubr.msk.f32.vlgmr.msra.gmra.mxu1 %vm97_vm0, %v43035_v18  ;;  %v32648_v21 = vand.u32 2147483647, %v31605_v34  ;;  %v32663_v25 = vadd.f32 %v32662_v5, %v32661_v28  ;;  %v31481_v63 = vadd.f32 %v37803_v7, %v31353_v50  ;;  %v31352_v46 = vmul.f32 2.0, %v21731_v35 }
 0x450   :  { %38264 = vmatmul.mubr.msk.f32.vlgmr.msra.gmra.mxu0 %vm97_vm0, %v43035_v18  ;;  %38267 = vmatpush3.msra.mxu1 %v45616_v24  ;;  %v32647_v14 = vand.u32 2147483647, %v31604_v44  ;;  %v31606_v39 = vadd.f32 %v31478_v48, %v21731_v35  ;;  %v31354_v9 = vmul.f32 2.0, %v43406_v53  ;;  %v32297_v42 = vand.u32 2147483647, %v43328_v3  ;;  %v45620_v48 = vld [vmem:[#allocation179_spill] sm:$0xff] }
 0x451   :  { %38274 = vmatpush3.msra.mxu0 %v45617_v22  ;;  %38268 = vmatprep.subr.mxu1 %v45618_v41  ;;  %v32665_v57 = vadd.f32 %v32664_v11, %v32663_v25  ;;  %v43421_v47 = vadd.f32 %v37817_v15, %v31481_v63  ;;  %v31483_v7 = vadd.f32 %v37810_v30, %v31355_v19  ;;  %v32650_v50 = vand.u32 2147483647, %v43394_v29  ;;  %v45621_v44 = vld [vmem:[#allocation180_spill] sm:$0xff]  ;;  %v45622_v63 = vld [vmem:[#allocation181_spill] sm:$0xff] }
 0x452   :  { %38275 = vmatprep.subr.mxu0 %v45619_v40  ;;  %38269 = vmatpush3.msra.mxu1 %v45618_v41  ;;  %v32666_v54 = vsel %vm97_vm0, %v32647_v14, 0.0  ;;  %v32649_v61 = vand.u32 2147483647, %v31606_v39  ;;  %v31480_v17 = vadd.f32 %v31352_v46, %v43374_v52  ;;  %v37824_v34 = vpop.f32.mrf.mxu1  ;;  %v37831_v49 = vpop.f32.mrf.mxu0  ;;  %v31482_v6 = vadd.f32 %v31354_v9, %v21731_v35 }
 0x453   :  { %38276 = vmatpush3.msra.mxu0 %v45619_v40  ;;  %38270 = vmatprep.mubr.msk.f32.mxu1 %vm97_vm0, %v43017_v10  ;;  %v31444_v28 = vadd.f32 %v43318_v2, %v45601_v20  ;;  %v32667_v62 = vadd.f32 %v32666_v54, %v32665_v57  ;;  %v31357_v45 = vmul.f32 2.0, %v37824_v34  ;;  %v43432_v30 = vadd.f32 %v37824_v34, %v31483_v7 }
 0x454   :  { %38277 = vmatprep.mubr.msk.f32.mxu0 %vm97_vm0, %v43017_v10  ;;  %38280 = vmatprep.subr.mxu1 %v45620_v48  ;;  %v32668_v52 = vsel %vm97_vm0, %v32648_v21, 0.0  ;;  %v31608_v19 = vadd.f32 %v31480_v17, %v43406_v53  ;;  %v31359_v8 = vmul.f32 2.0, %v37831_v49  ;;  %v21881_v24 = vpop.f32.mrf.mxu1  ;;  %v21956_v5 = vpop.f32.mrf.mxu0  ;;  %v32300_v20 = vand.u32 2147483647, %v43359_v33 }
 0x455   :  { %38287 = vmatprep.subr.mxu0 %v45621_v44  ;;  %38271 = vmatmul.mubr.msk.f32.vlgmr.msra.gmra.mxu1 %vm97_vm0, %v43035_v18  ;;  %v31446_v2 = vadd.f32 %v43331_v12, %v42990_v37  ;;  %v32669_v35 = vadd.f32 %v32668_v52, %v32667_v62  ;;  %v31485_v22 = vadd.f32 %v37817_v15, %v31357_v45  ;;  %v32670_v29 = vsel %vm97_vm0, %v32649_v61, 0.0  ;;  %v45623_v15 = vld [vmem:[#allocation182_spill] sm:$0xff] }
 0x456   :  { %38278 = vmatmul.mubr.msk.f32.vlgmr.msra.gmra.mxu0 %vm97_vm0, %v43035_v18  ;;  %38281 = vmatpush3.msra.mxu1 %v45620_v48  ;;  %v32651_v11 = vand.u32 2147483647, %v31608_v19  ;;  %v31356_v21 = vmul.f32 2.0, %v21881_v24  ;;  %v31610_v25 = vadd.f32 %v31482_v6, %v21881_v24  ;;  %v31358_v37 = vmul.f32 2.0, %v21956_v5 }
 0x457   :  { %38288 = vmatpush3.msra.mxu0 %v45621_v44  ;;  %38282 = vmatprep.subr.mxu1 %v45622_v63  ;;  %v32671_v33 = vadd.f32 %v32670_v29, %v32669_v35  ;;  %v43452_v14 = vadd.f32 %v37831_v49, %v31485_v22  ;;  %v31487_v12 = vadd.f32 %v37824_v34, %v31359_v8  ;;  %v32672_v39 = vsel %vm97_vm0, %v32650_v50, 0.0  ;;  %v43511_v22 = vld [vmem:[#allocation9] sm:$0xff] }
 0x458   :  { %38289 = vmatprep.subr.mxu0 %v45623_v15  ;;  %38283 = vmatpush3.msra.mxu1 %v45622_v63  ;;  %v43458_v46 = vadd.f32 %v43013_v32, %v43348_v4  ;;  %v32652_v9 = vand.u32 2147483647, %v43421_v47  ;;  %v31484_v41 = vadd.f32 %v31356_v21, %v43406_v53  ;;  %v37838_v57 = vpop.f32.mrf.mxu1  ;;  %v43467_v7 = vadd.f32 %v31444_v28, %v42992_v0  ;;  %v45624_v47 = vld [vmem:[#allocation183_spill] sm:$0xff]  ;;  %v45625_v28 = vld [vmem:[#allocation184_spill] sm:$0xff] }
 0x459   :  { %38290 = vmatpush3.msra.mxu0 %v45623_v15  ;;  %38284 = vmatprep.mubr.msk.f32.mxu1 %vm97_vm0, %v43017_v10  ;;  %v31321_v40 = vmul.f32 2.0, %v43013_v32  ;;  %v32673_v54 = vadd.f32 %v32672_v39, %v32671_v33  ;;  %v43470_v4 = vadd.f32 %v37838_v57, %v31487_v12  ;;  %v37845_v61 = vpop.f32.mrf.mxu0  ;;  %v43476_v53 = vmul.f32 2.0, %v43015_v23  ;;  %v45629_v39 = vld [vmem:[#allocation188_spill] sm:$0xff] }
 0x45a   :  { %38291 = vmatprep.mubr.msk.f32.mxu0 %vm97_vm0, %v43017_v10  ;;  %38294 = vmatprep.subr.mxu1 %v45624_v47  ;;  %v32674_v17 = vsel %vm97_vm0, %v32651_v11, 0.0  ;;  %v32653_v34 = vand.u32 2147483647, %v31610_v25  ;;  %v31612_v49 = vadd.f32 %v31484_v41, %v21956_v5  ;;  %v22031_v6 = vpop.f32.mrf.mxu1  ;;  %v32314_v62 = vsel %vm97_vm0, %v32297_v42, 0.0  ;;  %v45627_v5 = vld [vmem:[#allocation186_spill] sm:$0xff] }
 0x45b   :  { %38301 = vmatprep.subr.mxu0 %v45625_v28  ;;  %38285 = vmatmul.mubr.msk.f32.vlgmr.msra.gmra.mxu1 %vm97_vm0, %v43035_v18  ;;  %v43487_v10 = vadd.f32 %v43232_v59, %v43371_v26  ;;  %v32675_v45 = vadd.f32 %v32674_v17, %v32673_v54  ;;  %v31486_v48 = vadd.f32 %v31358_v37, %v21881_v24  ;;  %v22106_v52 = vpop.f32.mrf.mxu0  ;;  %v43493_v50 = vsel %vm97_vm0, %v32300_v20, 0.0  ;;  %v45626_v59 = vld [vmem:[#allocation185_spill] sm:$0xff]  ;;  %s38680_s2 = spop %38679 }
 0x45c   :  { %38292 = vmatmul.mubr.msk.f32.vlgmr.msra.gmra.mxu0 %vm97_vm0, %v43035_v18  ;;  %38295 = vmatpush3.msra.mxu1 %v45624_v47  ;;  %v32315_v19 = vadd.f32 %v32314_v62, %v43402_v36  ;;  %v32676_v3 = vsel %vm97_vm0, %v32652_v9, 0.0  ;;  %v32654_v42 = vand.u32 2147483647, %v43432_v30  ;;  %v32299_v26 = vand.u32 2147483647, %v43467_v7  ;;  %v43527_v9 = vld [vmem:[#allocation9 + $0x8] sm:$0xff] }
 0x45d   :  { %38302 = vmatpush3.msra.mxu0 %v45625_v28  ;;  %38296 = vmatprep.subr.mxu1 %v45626_v59  ;;  %v32302_v8 = vand.u32 2147483647, %v43458_v46  ;;  %v31449_v18 = vadd.f32 %v42978_v27, %v31321_v40  ;;  %v32677_v24 = vadd.f32 %v32676_v3, %v32675_v45  ;;  %v31320_v36 = vmul.f32 2.0, %v43031_v58  ;;  %v45631_v62 = vld [vmem:[#allocation190_spill] sm:$0xff] }
 0x45e   :  { %38303 = vmatprep.subr.mxu0 %v45627_v5  ;;  %38297 = vmatpush3.msra.mxu1 %v45626_v59  ;;  %v43507_v44 = vadd.f32 %v31446_v2, %v43031_v58  ;;  %v32678_v30 = vsel %vm97_vm0, %v32653_v34, 0.0  ;;  %v32655_v20 = vand.u32 2147483647, %v31612_v49  ;;  %v37852_v35 = vpop.f32.mrf.mxu1  ;;  %v43516_v27 = vmul.f32 2.0, %v43033_v51  ;;  %v45628_v2 = vld [vmem:[#allocation187_spill] sm:$0xff]  ;;  %v45630_v34 = vld [vmem:[#allocation189_spill] sm:$0xff] }
 0x45f   :  { %38304 = vmatpush3.msra.mxu0 %v45627_v5  ;;  %38298 = vmatprep.mubr.msk.f32.mxu1 %vm97_vm0, %v43511_v22  ;;  %v32679_v29 = vadd.f32 %v32678_v30, %v32677_v24  ;;  %v31614_v11 = vadd.f32 %v31486_v48, %v22031_v6  ;;  %v31361_v21 = vmul.f32 2.0, %v37852_v35  ;;  %v37859_v25 = vpop.f32.mrf.mxu0  ;;  %v43522_v63 = vadd.f32 %v43356_v56, %v32315_v19 }
 0x460   :  { %38305 = vmatprep.mubr.msk.f32.mxu0 %vm97_vm0, %v43511_v22  ;;  %38308 = vmatprep.subr.mxu1 %v45628_v2  ;;  %v32680_v33 = vsel %vm97_vm0, %v32654_v42, 0.0  ;;  %v32656_v37 = vand.u32 2147483647, %v43452_v14  ;;  %v31363_v12 = vmul.f32 2.0, %v37859_v25  ;;  %v22181_v15 = vpop.f32.mrf.mxu1  ;;  %v43532_v41 = vadd.f32 %v43015_v23, %v31449_v18 }
 0x461   :  { %38315 = vmatprep.subr.mxu0 %v45629_v39  ;;  %38299 = vmatmul.mubr.msk.f32.vlgmr.msra.gmra.mxu1 %vm97_vm0, %v43527_v9  ;;  %v32681_v57 = vadd.f32 %v32680_v33, %v32679_v29  ;;  %v31489_v7 = vadd.f32 %v37845_v61, %v31361_v21  ;;  %v31360_v56 = vmul.f32 2.0, %v22181_v15  ;;  %v22256_v40 = vpop.f32.mrf.mxu0  ;;  %v32682_v14 = vsel %vm97_vm0, %v32655_v20, 0.0 }
 0x462   :  { %38306 = vmatmul.mubr.msk.f32.vlgmr.msra.gmra.mxu0 %vm97_vm0, %v43527_v9  ;;  %38309 = vmatpush3.msra.mxu1 %v45628_v2  ;;  %v32658_v54 = vand.u32 2147483647, %v43470_v4  ;;  %v31362_v47 = vmul.f32 2.0, %v22256_v40  ;;  %v31491_v17 = vadd.f32 %v37852_v35, %v31363_v12  ;;  %v32657_v6 = vand.u32 2147483647, %v31614_v11  ;;  %v45633_v35 = vld [vmem:[#allocation192_spill] sm:$0xff] }
 0x463   :  { %38316 = vmatpush3.msra.mxu0 %v45629_v39  ;;  %38310 = vmatprep.subr.mxu1 %v45630_v34  ;;  %v32683_v49 = vadd.f32 %v32682_v14, %v32681_v57  ;;  %v31617_v61 = vadd.f32 %v37859_v25, %v31489_v7  ;;  %v31488_v28 = vadd.f32 %v31360_v56, %v22106_v52  ;;  %v32318_v45 = vsel %vm97_vm0, %v32299_v26, 0.0  ;;  %v45632_v26 = vld [vmem:[#allocation191_spill] sm:$0xff]  ;;  %v45635_v56 = vld [vmem:[#allocation194_spill] sm:$0xff] }
 0x464   :  { %38317 = vmatprep.subr.mxu0 %v45631_v62  ;;  %38311 = vmatpush3.msra.mxu1 %v45630_v34  ;;  %v43546_v48 = vadd.f32 %v43013_v32, %v43476_v53  ;;  %v32684_v4 = vsel %vm97_vm0, %v32656_v37, 0.0  ;;  %v37866_v19 = vpop.f32.mrf.mxu1  ;;  %v31490_v3 = vadd.f32 %v31362_v47, %v22181_v15  ;;  %v43556_v32 = vadd.f32 %v31320_v36, %v42992_v0 }
 0x465   :  { %38318 = vmatpush3.msra.mxu0 %v45631_v62  ;;  %38312 = vmatprep.mubr.msk.f32.mxu1 %vm97_vm0, %v43511_v22  ;;  %v32818_v52 = vand.u32 2147483647, %v31617_v61  ;;  %v31616_v42 = vadd.f32 %v31488_v28, %v22256_v40  ;;  %v31365_v59 = vmul.f32 2.0, %v37866_v19  ;;  %v31619_v18 = vadd.f32 %v37866_v19, %v31491_v17  ;;  %v37873_v24 = vpop.f32.mrf.mxu0 }
 0x466   :  { %38319 = vmatprep.mubr.msk.f32.mxu0 %vm97_vm0, %v43511_v22  ;;  %38322 = vmatprep.subr.mxu1 %v45632_v26  ;;  %v31367_v53 = vmul.f32 2.0, %v37873_v24  ;;  %v22331_v5 = vpop.f32.mrf.mxu1  ;;  %v32685_v30 = vadd.f32 %v32684_v4, %v32683_v49  ;;  %v32688_v20 = vsel %vm97_vm0, %v32658_v54, 0.0  ;;  %v32686_v29 = vsel %vm97_vm0, %v32657_v6, 0.0 }
 0x467   :  { %38329 = vmatprep.subr.mxu0 %v45633_v35  ;;  %38313 = vmatmul.mubr.msk.f32.vlgmr.msra.gmra.mxu1 %vm97_vm0, %v43527_v9  ;;  %v32834_v11 = vsel %vm97_vm0, %v32818_v52, 0.0  ;;  %v32817_v21 = vand.u32 2147483647, %v31616_v42  ;;  %v31493_v2 = vadd.f32 %v37859_v25, %v31365_v59  ;;  %v22406_v33 = vpop.f32.mrf.mxu0  ;;  %v31364_v0 = vmul.f32 2.0, %v22331_v5  ;;  %v45634_v25 = vld [vmem:[#allocation193_spill] sm:$0xff] }
 0x468   :  { %38320 = vmatmul.mubr.msk.f32.vlgmr.msra.gmra.mxu0 %vm97_vm0, %v43527_v9  ;;  %38323 = vmatpush3.msra.mxu1 %v45632_v26  ;;  %v31618_v36 = vadd.f32 %v31490_v3, %v22331_v5  ;;  %v31366_v37 = vmul.f32 2.0, %v22406_v33  ;;  %v31495_v12 = vadd.f32 %v37866_v19, %v31367_v53  ;;  %v32820_v39 = vand.u32 2147483647, %v31619_v18  ;;  %v45637_v3 = vld [vmem:[#allocation196_spill] sm:$0xff] }
 0x469   :  { %38330 = vmatpush3.msra.mxu0 %v45633_v35  ;;  %33329 = vadd.xlane.f32.xlu1 %v43142_v55  ;;  %v32833_v15 = vsel %vm97_vm0, %v32817_v21, 0.0  ;;  %v31621_v57 = vadd.f32 %v37873_v24, %v31493_v2  ;;  %v32687_v7 = vadd.f32 %v32686_v29, %v32685_v30  ;;  %v31492_v47 = vadd.f32 %v31364_v0, %v22256_v40  ;;  %v45638_v29 = vld [vmem:[#allocation197_spill] sm:$0xff] }
 0x46a   :  { %38324 = vmatprep.subr.mxu1 %v45634_v25  ;;  %38331 = vmatprep.subr.mxu0 %v45635_v56  ;;  %v32835_v14 = vadd.f32 %v32834_v11, %v32833_v15  ;;  %v32819_v54 = vand.u32 2147483647, %v31618_v36  ;;  %v37880_v17 = vpop.f32.mrf.mxu1  ;;  %v31494_v34 = vadd.f32 %v31366_v37, %v22331_v5  ;;  %v43576_v55 = vadd.f32 %v43516_v27, %v43031_v58  ;;  %v45636_v27 = vld [vmem:[#allocation195_spill] sm:$0xff]  ;;  %v45639_v11 = vld [vmem:[#allocation198_spill] sm:$0xff] }
 0x46b   :  { %38325 = vmatpush3.msra.mxu1 %v45634_v25  ;;  %38332 = vmatpush3.msra.mxu0 %v45635_v56  ;;  %v31369_v49 = vmul.f32 2.0, %v37880_v17  ;;  %v43578_v6 = vadd.f32 %v37880_v17, %v31495_v12  ;;  %v37887_v61 = vpop.f32.mrf.mxu0  ;;  %v43580_v28 = vadd.f32 %v32688_v20, %v32687_v7  ;;  %v32319_v40 = vadd.f32 %v32318_v45, %v43522_v63 }
 0x46c   :  { %38326 = vmatprep.mubr.msk.f32.mxu1 %vm97_vm0, %v43511_v22  ;;  %38333 = vmatprep.mubr.msk.f32.mxu0 %vm97_vm0, %v43511_v22  ;;  %v32836_v62 = vsel %vm97_vm0, %v32819_v54, 0.0  ;;  %v31620_v4 = vadd.f32 %v31492_v47, %v22406_v33  ;;  %v31371_v19 = vmul.f32 2.0, %v37887_v61  ;;  %v22481_v58 = vpop.f32.mrf.mxu1  ;;  %v32838_v52 = vsel %vm97_vm0, %v32820_v39, 0.0  ;;  %v45640_v54 = vld [vmem:[#allocation199_spill] sm:$0xff]  ;;  %v45641_v47 = vld [vmem:[#allocation200_spill] sm:$0xff] }
 0x46d   :  { %38336 = vmatprep.subr.mxu1 %v45636_v27  ;;  %38343 = vmatprep.subr.mxu0 %v45637_v3  ;;  %v32822_v42 = vand.u32 2147483647, %v31621_v57  ;;  %v32837_v59 = vadd.f32 %v32836_v62, %v32835_v14  ;;  %v31497_v18 = vadd.f32 %v37873_v24, %v31369_v49  ;;  %v22556_v26 = vpop.f32.mrf.mxu0  ;;  %v31368_v45 = vmul.f32 2.0, %v22481_v58 }
 0x46e   :  { %38327 = vmatmul.mubr.msk.f32.vlgmr.msra.gmra.mxu1 %vm97_vm0, %v43527_v9  ;;  %38334 = vmatmul.mubr.msk.f32.vlgmr.msra.gmra.mxu0 %vm97_vm0, %v43527_v9  ;;  %v32821_v63 = vand.u32 2147483647, %v31620_v4  ;;  %v31622_v53 = vadd.f32 %v31494_v34, %v22481_v58  ;;  %v31370_v5 = vmul.f32 2.0, %v22556_v26  ;;  %v32301_v30 = vand.u32 2147483647, %v43507_v44 }
 0x46f   :  { %38337 = vmatpush3.msra.mxu1 %v45636_v27  ;;  %38344 = vmatpush3.msra.mxu0 %v45637_v3  ;;  %v32839_v20 = vadd.f32 %v32838_v52, %v32837_v59  ;;  %v43598_v35 = vadd.f32 %v37887_v61, %v31497_v18  ;;  %v31499_v24 = vadd.f32 %v37880_v17, %v31371_v19  ;;  %v32304_v44 = vand.u32 2147483647, %v43532_v41  ;;  %v45642_v52 = vld [vmem:[#allocation201_spill] sm:$0xff] }
 0x470   :  { %38338 = vmatprep.subr.mxu1 %v45638_v29  ;;  %38345 = vmatprep.subr.mxu0 %v45639_v11  ;;  %v32840_v21 = vsel %vm97_vm0, %v32821_v63, 0.0  ;;  %v32823_v2 = vand.u32 2147483647, %v31622_v53  ;;  %v31496_v0 = vadd.f32 %v31368_v45, %v22406_v33  ;;  %v37894_v36 = vpop.f32.mrf.mxu1  ;;  %v31498_v37 = vadd.f32 %v31370_v5, %v22481_v58 }
 0x471   :  { %38339 = vmatpush3.msra.mxu1 %v45638_v29  ;;  %38346 = vmatpush3.msra.mxu0 %v45639_v11  ;;  %v32841_v12 = vadd.f32 %v32840_v21, %v32839_v20  ;;  %v31373_v15 = vmul.f32 2.0, %v37894_v36  ;;  %v43606_v39 = vadd.f32 %v37894_v36, %v31499_v24  ;;  %v37901_v57 = vpop.f32.mrf.mxu0  ;;  %v32842_v33 = vsel %vm97_vm0, %v32822_v42, 0.0  ;;  %v45643_v42 = vld [vmem:[#allocation202_spill] sm:$0xff] }
 0x472   :  { %38340 = vmatprep.mubr.msk.f32.mxu1 %vm97_vm0, %v43511_v22  ;;  %38347 = vmatprep.mubr.msk.f32.mxu0 %vm97_vm0, %v43511_v22  ;;  %v32824_v7 = vand.u32 2147483647, %v43578_v6  ;;  %v31624_v25 = vadd.f32 %v31496_v0, %v22556_v26  ;;  %v31375_v56 = vmul.f32 2.0, %v37901_v57  ;;  %v22631_v14 = vpop.f32.mrf.mxu1  ;;  %v32321_v17 = vadd.f32 %v43493_v50, %v32319_v40  ;;  %v45645_v0 = vld [vmem:[#allocation204_spill] sm:$0xff] }
 0x473   :  { %38350 = vmatprep.subr.mxu1 %v45640_v54  ;;  %38357 = vmatprep.subr.mxu0 %v45641_v47  ;;  %v32843_v34 = vadd.f32 %v32842_v33, %v32841_v12  ;;  %v32844_v49 = vsel %vm97_vm0, %v32823_v2, 0.0  ;;  %v31501_v62 = vadd.f32 %v37887_v61, %v31373_v15  ;;  %v22706_v4 = vpop.f32.mrf.mxu0  ;;  %v31626_v19 = vadd.f32 %v31498_v37, %v22631_v14  ;;  %v45644_v2 = vld [vmem:[#allocation203_spill] sm:$0xff] }
 0x474   :  { %38341 = vmatmul.mubr.msk.f32.vlgmr.msra.gmra.mxu1 %vm97_vm0, %v43527_v9  ;;  %38348 = vmatmul.mubr.msk.f32.vlgmr.msra.gmra.mxu0 %vm97_vm0, %v43527_v9  ;;  %v32825_v6 = vand.u32 2147483647, %v31624_v25  ;;  %v31372_v58 = vmul.f32 2.0, %v22631_v14  ;;  %v31374_v27 = vmul.f32 2.0, %v22706_v4  ;;  %v31325_v50 = vmul.f32 2.0, %v43060_v43 }
 0x475   :  { %38351 = vmatpush3.msra.mxu1 %v45640_v54  ;;  %38358 = vmatpush3.msra.mxu0 %v45641_v47  ;;  %v32845_v40 = vadd.f32 %v32844_v49, %v32843_v34  ;;  %v43625_v3 = vadd.f32 %v37901_v57, %v31501_v62  ;;  %v31503_v61 = vadd.f32 %v37894_v36, %v31375_v56  ;;  %v32846_v59 = vsel %vm97_vm0, %v32824_v7, 0.0  ;;  %v45646_v54 = vld [vmem:[#allocation205_spill] sm:$0xff]  ;;  %v45647_v47 = vld [vmem:[#allocation206_spill] sm:$0xff] }
 0x476   :  { %38352 = vmatprep.subr.mxu1 %v45642_v52  ;;  %38359 = vmatprep.subr.mxu0 %v45643_v42  ;;  %v32826_v18 = vand.u32 2147483647, %v43598_v35  ;;  %v31500_v63 = vadd.f32 %v31372_v58, %v22556_v26  ;;  %v31502_v45 = vadd.f32 %v31374_v27, %v22631_v14  ;;  %v32322_v53 = vsel %vm97_vm0, %v32301_v30, 0.0 }
 0x477   :  { %v31576_v5 = vadd.f32 %v43556_v32, %v43033_v51  ;;  %38353 = vmatpush3.msra.mxu1 %v45642_v52  ;;  %38360 = vmatpush3.msra.mxu0 %v45643_v42  ;;  %v43638_v20 = vadd.f32 %v43060_v43, %v43546_v48  ;;  %v32847_v24 = vadd.f32 %v32846_v59, %v32845_v40  ;;  %v37908_v29 = vpop.f32.mrf.mxu1  ;;  %v37915_v11 = vpop.f32.mrf.mxu0  ;;  %v32848_v26 = vsel %vm97_vm0, %v32825_v6, 0.0  ;;  %v45649_v40 = vld [vmem:[#allocation208_spill] sm:$0xff] }
 0x478   :  { %38354 = vmatprep.mubr.msk.f32.mxu1 %vm97_vm0, %v43511_v22  ;;  %38361 = vmatprep.mubr.msk.f32.mxu0 %vm97_vm0, %v43511_v22  ;;  %v32827_v32 = vand.u32 2147483647, %v31626_v19  ;;  %v31628_v30 = vadd.f32 %v31500_v63, %v22706_v4  ;;  %v43645_v35 = vadd.f32 %v37908_v29, %v31503_v61  ;;  %v32324_v48 = vsel %vm97_vm0, %v32302_v8, 0.0 }
 0x479   :  { %v32323_v21 = vadd.f32 %v32322_v53, %v32321_v17  ;;  %38364 = vmatprep.subr.mxu1 %v45644_v2  ;;  %38371 = vmatprep.subr.mxu0 %v45645_v0  ;;  %v31453_v36 = vadd.f32 %v43015_v23, %v31325_v50  ;;  %v32849_v37 = vadd.f32 %v32848_v26, %v32847_v24  ;;  %v22781_v12 = vpop.f32.mrf.mxu1  ;;  %v22856_v15 = vpop.f32.mrf.mxu0  ;;  %v31327_v57 = vmul.f32 2.0, %v43062_v16  ;;  %v45648_v50 = vld [vmem:[#allocation207_spill] sm:$0xff] }
 0x47a   :  { %38355 = vmatmul.mubr.msk.f32.vlgmr.msra.gmra.mxu1 %vm97_vm0, %v43527_v9  ;;  %38362 = vmatmul.mubr.msk.f32.vlgmr.msra.gmra.mxu0 %vm97_vm0, %v43527_v9  ;;  %v32850_v46 = vsel %vm97_vm0, %v32826_v18, 0.0  ;;  %v32828_v8 = vand.u32 2147483647, %v43606_v39  ;;  %v31630_v33 = vadd.f32 %v31502_v45, %v22781_v12  ;;  %v43663_v23 = vsel %vm97_vm0, %v32304_v44, 0.0 }
 0x47b   :  { %v32303_v7 = vand.u32 2147483647, %v31576_v5  ;;  %38365 = vmatpush3.msra.mxu1 %v45644_v2  ;;  %38372 = vmatpush3.msra.mxu0 %v45645_v0  ;;  %v32829_v25 = vand.u32 2147483647, %v31628_v30  ;;  %v32851_v56 = vadd.f32 %v32850_v46, %v32849_v37  ;;  %v32306_v14 = vand.u32 2147483647, %v43638_v20 }
 0x47c   :  { %38366 = vmatprep.subr.mxu1 %v45646_v54  ;;  %38373 = vmatprep.subr.mxu0 %v45647_v47  ;;  %v31324_v39 = vmul.f32 2.0, %v43075_v13  ;;  %v43673_v41 = vadd.f32 %v43576_v55, %v43075_v13  ;;  %v32852_v44 = vsel %vm97_vm0, %v32827_v32, 0.0  ;;  %v32325_v17 = vadd.f32 %v32324_v48, %v32323_v21  ;;  %v45650_v32 = vld [vmem:[#allocation209_spill] sm:$0xff]  ;;  %v45651_v30 = vld [vmem:[#allocation210_spill] sm:$0xff] }
 0x47d   :  { %v43677_v34 = vadd.f32 %v43062_v16, %v31453_v36  ;;  %v31326_v49 = vmul.f32 2.0, %v43077_v1  ;;  %38367 = vmatpush3.msra.mxu1 %v45646_v54  ;;  %38374 = vmatpush3.msra.mxu0 %v45647_v47  ;;  %v32853_v62 = vadd.f32 %v32852_v44, %v32851_v56  ;;  %v37922_v4 = vpop.f32.mrf.mxu1  ;;  %v37929_v6 = vpop.f32.mrf.mxu0  ;;  %v32854_v55 = vsel %vm97_vm0, %v32828_v8, 0.0 }
 0x47e   :  { %38368 = vmatprep.mubr.msk.f32.mxu1 %vm97_vm0, %v43511_v22  ;;  %38375 = vmatprep.mubr.msk.f32.mxu0 %vm97_vm0, %v43511_v22  ;;  %v32830_v16 = vand.u32 2147483647, %v43625_v3  ;;  %v31377_v19 = vmul.f32 2.0, %v37922_v4  ;;  %v31379_v58 = vmul.f32 2.0, %v37929_v6  ;;  %v32326_v27 = vsel %vm97_vm0, %v32303_v7, 0.0  ;;  %v45652_v7 = vld [vmem:[#allocation211_spill] sm:$0xff] }
 0x47f   :  { %38378 = vmatprep.subr.mxu1 %v45648_v50  ;;  %38385 = vmatprep.subr.mxu0 %v45649_v40  ;;  %v32855_v61 = vadd.f32 %v32854_v55, %v32853_v62  ;;  %v32856_v52 = vsel %vm97_vm0, %v32829_v25, 0.0  ;;  %v32831_v42 = vand.u32 2147483647, %v31630_v33  ;;  %v22931_v59 = vpop.f32.mrf.mxu1  ;;  %v43692_v18 = vpop.f32.mrf.mxu0  ;;  %v32327_v5 = vadd.f32 %v32326_v27, %v32325_v17  ;;  %v45653_v25 = vld [vmem:[#allocation212_spill] sm:$0xff]  ;;  %v45654_v55 = vld [vmem:[#allocation213_spill] sm:$0xff] }
 0x480   :  { %38369 = vmatmul.mubr.msk.f32.vlgmr.msra.gmra.mxu1 %vm97_vm0, %v43527_v9  ;;  %38376 = vmatmul.mubr.msk.f32.vlgmr.msra.gmra.mxu0 %vm97_vm0, %v43527_v9  ;;  %v31505_v3 = vadd.f32 %v37915_v11, %v31377_v19  ;;  %v31376_v63 = vmul.f32 2.0, %v22931_v59  ;;  %v31378_v45 = vmul.f32 2.0, %v43692_v18  ;;  %v31507_v53 = vadd.f32 %v37922_v4, %v31379_v58 }
 0x481   :  { %v32305_v24 = vand.u32 2147483647, %v43673_v41  ;;  %v43701_v29 = vadd.f32 %v43060_v43, %v31327_v57  ;;  %38379 = vmatpush3.msra.mxu1 %v45648_v50  ;;  %38386 = vmatpush3.msra.mxu0 %v45649_v40  ;;  %v32857_v26 = vadd.f32 %v32856_v52, %v32855_v61  ;;  %v32858_v11 = vsel %vm97_vm0, %v32830_v16, 0.0  ;;  %v45655_v16 = vld [vmem:[#allocation214_spill] sm:$0xff] }
 0x482   :  { %38380 = vmatprep.subr.mxu1 %v45650_v32  ;;  %38387 = vmatprep.subr.mxu0 %v45651_v30  ;;  %v32832_v48 = vand.u32 2147483647, %v43645_v35  ;;  %v31633_v21 = vadd.f32 %v37929_v6, %v31505_v3  ;;  %v31504_v2 = vadd.f32 %v31376_v63, %v22856_v15  ;;  %v31452_v0 = vadd.f32 %v31324_v39, %v43033_v51 }
 0x483   :  { %38381 = vmatpush3.msra.mxu1 %v45650_v32  ;;  %38388 = vmatpush3.msra.mxu0 %v45651_v30  ;;  %v32860_v43 = vsel %vm97_vm0, %v32831_v42, 0.0  ;;  %v37936_v36 = vpop.f32.mrf.mxu1  ;;  %v37943_v37 = vpop.f32.mrf.mxu0  ;;  %v31506_v12 = vadd.f32 %v31378_v45, %v22931_v59  ;;  %v32859_v57 = vadd.f32 %v32858_v11, %v32857_v26  ;;  %v32329_v8 = vadd.f32 %v43663_v23, %v32327_v5  ;;  %v45657_v11 = vld [vmem:[#allocation216_spill] sm:$0xff] }
 0x484   :  { %38382 = vmatprep.mubr.msk.f32.mxu1 %vm97_vm0, %v43511_v22  ;;  %38389 = vmatprep.mubr.msk.f32.mxu0 %vm97_vm0, %v43511_v22  ;;  %v32992_v35 = vand.u32 2147483647, %v31633_v21  ;;  %v31632_v15 = vadd.f32 %v31504_v2, %v43692_v18  ;;  %v31381_v51 = vmul.f32 2.0, %v37936_v36  ;;  %v31635_v46 = vadd.f32 %v37936_v36, %v31507_v53 }
 0x485   :  { %v43720_v33 = vadd.f32 %v31326_v49, %v43075_v13  ;;  %38392 = vmatprep.subr.mxu1 %v45652_v7  ;;  %38399 = vmatprep.subr.mxu0 %v45653_v25  ;;  %v31383_v56 = vmul.f32 2.0, %v37943_v37  ;;  %v23081_v54 = vpop.f32.mrf.mxu1  ;;  %v43724_v47 = vpop.f32.mrf.mxu0  ;;  %v32861_v39 = vadd.f32 %v32860_v43, %v32859_v57  ;;  %v32862_v44 = vsel %vm97_vm0, %v32832_v48, 0.0 }
 0x486   :  { %38383 = vmatmul.mubr.msk.f32.vlgmr.msra.gmra.mxu1 %vm97_vm0, %v43527_v9  ;;  %38390 = vmatmul.mubr.msk.f32.vlgmr.msra.gmra.mxu0 %vm97_vm0, %v43527_v9  ;;  %v33008_v23 = vsel %vm97_vm0, %v32992_v35, 0.0  ;;  %v32991_v41 = vand.u32 2147483647, %v31632_v15  ;;  %v31509_v13 = vadd.f32 %v37929_v6, %v31381_v51  ;;  %v31380_v17 = vmul.f32 2.0, %v23081_v54  ;;  %v45658_v35 = vld [vmem:[#allocation217_spill] sm:$0xff] }
 0x487   :  { %38393 = vmatpush3.msra.mxu1 %v45652_v7  ;;  %38400 = vmatpush3.msra.mxu0 %v45653_v25  ;;  %v31634_v49 = vadd.f32 %v31506_v12, %v23081_v54  ;;  %v31382_v62 = vmul.f32 2.0, %v43724_v47  ;;  %v31511_v4 = vadd.f32 %v37936_v36, %v31383_v56  ;;  %v32994_v58 = vand.u32 2147483647, %v31635_v46  ;;  %v45659_v46 = vld [vmem:[#allocation218_spill] sm:$0xff] }
 0x488   :  { %38394 = vmatprep.subr.mxu1 %v45654_v55  ;;  %38401 = vmatprep.subr.mxu0 %v45655_v16  ;;  %v33007_v19 = vsel %vm97_vm0, %v32991_v41, 0.0  ;;  %v31637_v27 = vadd.f32 %v37943_v37, %v31509_v13  ;;  %v43738_v6 = vadd.f32 %v32862_v44, %v32861_v39  ;;  %v31508_v61 = vadd.f32 %v31380_v17, %v43692_v18  ;;  %v45656_v18 = vld [vmem:[#allocation215_spill] sm:$0xff] }
 0x489   :  { %38395 = vmatpush3.msra.mxu1 %v45654_v55  ;;  %38402 = vmatpush3.msra.mxu0 %v45655_v16  ;;  %v33009_v50 = vadd.f32 %v33008_v23, %v33007_v19  ;;  %v32993_v40 = vand.u32 2147483647, %v31634_v49  ;;  %v37950_v52 = vpop.f32.mrf.mxu1  ;;  %v37957_v42 = vpop.f32.mrf.mxu0  ;;  %v31510_v59 = vadd.f32 %v31382_v62, %v23081_v54  ;;  %v32330_v3 = vsel %vm97_vm0, %v32305_v24, 0.0  ;;  %v45660_v13 = vld [vmem:[#allocation219_spill] sm:$0xff]  ;;  %v45661_v16 = vld [vmem:[#allocation220_spill] sm:$0xff] }
 0x48a   :  { %32169 = vadd.xlane.f32.xlu0 %v43487_v10  ;;  %38396 = vmatprep.mubr.msk.f32.mxu1 %vm97_vm0, %v43511_v22  ;;  %v31385_v63 = vmul.f32 2.0, %v37950_v52  ;;  %v43747_v45 = vadd.f32 %v37950_v52, %v31511_v4  ;;  %v31387_v53 = vmul.f32 2.0, %v37957_v42  ;;  %v32331_v5 = vadd.f32 %v32330_v3, %v32329_v8 }
 0x48b   :  { %v43750_v26 = vadd.f32 %v31452_v0, %v43077_v1  ;;  %38403 = vmatprep.mubr.msk.f32.mxu0 %vm97_vm0, %v43511_v22  ;;  %38406 = vmatprep.subr.mxu1 %v45656_v18  ;;  %v33010_v24 = vsel %vm97_vm0, %v32993_v40, 0.0  ;;  %v31636_v10 = vadd.f32 %v31508_v61, %v43724_v47  ;;  %v23231_v32 = vpop.f32.mrf.mxu1  ;;  %v23306_v30 = vpop.f32.mrf.mxu0  ;;  %v33012_v48 = vsel %vm97_vm0, %v32994_v58, 0.0 }
 0x48c   :  { %38413 = vmatprep.subr.mxu0 %v45657_v11  ;;  %38397 = vmatmul.mubr.msk.f32.vlgmr.msra.gmra.mxu1 %vm97_vm0, %v43527_v9  ;;  %v32996_v1 = vand.u32 2147483647, %v31637_v27  ;;  %v33011_v21 = vadd.f32 %v33010_v24, %v33009_v50  ;;  %v31513_v2 = vadd.f32 %v37943_v37, %v31385_v63  ;;  %v31384_v43 = vmul.f32 2.0, %v23231_v32 }
 0x48d   :  { %38404 = vmatmul.mubr.msk.f32.vlgmr.msra.gmra.mxu0 %vm97_vm0, %v43527_v9  ;;  %38407 = vmatpush3.msra.mxu1 %v45656_v18  ;;  %v32995_v0 = vand.u32 2147483647, %v31636_v10  ;;  %v31638_v36 = vadd.f32 %v31510_v59, %v23231_v32  ;;  %v31386_v12 = vmul.f32 2.0, %v23306_v30  ;;  %v32332_v57 = vsel %vm97_vm0, %v32306_v14, 0.0  ;;  %v45662_v59 = vld [vmem:[#allocation221_spill] sm:$0xff] }
 0x48e   :  { %38414 = vmatpush3.msra.mxu0 %v45657_v11  ;;  %38408 = vmatprep.subr.mxu1 %v45658_v35  ;;  %v33013_v15 = vadd.f32 %v33012_v48, %v33011_v21  ;;  %v43769_v51 = vadd.f32 %v37957_v42, %v31513_v2  ;;  %v31515_v37 = vadd.f32 %v37950_v52, %v31387_v53  ;;  %v32307_v54 = vand.u32 2147483647, %v43750_v26  ;;  %v45663_v53 = vld [vmem:[#allocation222_spill] sm:$0xff] }
 0x48f   :  { %38415 = vmatprep.subr.mxu0 %v45659_v46  ;;  %38409 = vmatpush3.msra.mxu1 %v45658_v35  ;;  %v33014_v8 = vsel %vm97_vm0, %v32995_v0, 0.0  ;;  %v32997_v7 = vand.u32 2147483647, %v31638_v36  ;;  %v31512_v25 = vadd.f32 %v31384_v43, %v43724_v47  ;;  %v37964_v20 = vpop.f32.mrf.mxu1  ;;  %v37971_v56 = vpop.f32.mrf.mxu0  ;;  %v31514_v14 = vadd.f32 %v31386_v12, %v23231_v32  ;;  %v45665_v43 = vld [vmem:[#allocation224_spill] sm:$0xff] }
 0x490   :  { %38416 = vmatpush3.msra.mxu0 %v45659_v46  ;;  %38410 = vmatprep.mubr.msk.f32.mxu1 %vm97_vm0, %v43511_v22  ;;  %v33015_v39 = vadd.f32 %v33014_v8, %v33013_v15  ;;  %v31389_v23 = vmul.f32 2.0, %v37964_v20  ;;  %v43779_v41 = vadd.f32 %v37964_v20, %v31515_v37  ;;  %v33016_v47 = vsel %vm97_vm0, %v32996_v1, 0.0  ;;  %v45666_v37 = vld [vmem:[#allocation225_spill] sm:$0xff] }
 0x491   :  { %38417 = vmatprep.mubr.msk.f32.mxu0 %vm97_vm0, %v43511_v22  ;;  %38420 = vmatprep.subr.mxu1 %v45660_v13  ;;  %v32998_v44 = vand.u32 2147483647, %v43747_v45  ;;  %v31640_v17 = vadd.f32 %v31512_v25, %v23306_v30  ;;  %v31391_v49 = vmul.f32 2.0, %v37971_v56  ;;  %v23381_v62 = vpop.f32.mrf.mxu1  ;;  %v23456_v4 = vpop.f32.mrf.mxu0  ;;  %v32333_v55 = vadd.f32 %v32332_v57, %v32331_v5  ;;  %v45667_v25 = vld [vmem:[#allocation226_spill] sm:$0xff] }
 0x492   :  { %38427 = vmatprep.subr.mxu0 %v45661_v16  ;;  %38411 = vmatmul.mubr.msk.f32.vlgmr.msra.gmra.mxu1 %vm97_vm0, %v43527_v9  ;;  %v33017_v19 = vadd.f32 %v33016_v47, %v33015_v39  ;;  %v33018_v58 = vsel %vm97_vm0, %v32997_v7, 0.0  ;;  %v31517_v27 = vadd.f32 %v37957_v42, %v31389_v23  ;;  %v31388_v40 = vmul.f32 2.0, %v23381_v62  ;;  %v45668_v39 = vld [vmem:[#allocation227_spill] sm:$0xff] }
 0x493   :  { %38418 = vmatmul.mubr.msk.f32.vlgmr.msra.gmra.mxu0 %vm97_vm0, %v43527_v9  ;;  %38421 = vmatpush3.msra.mxu1 %v45660_v13  ;;  %v32999_v50 = vand.u32 2147483647, %v31640_v17  ;;  %v31642_v61 = vadd.f32 %v31514_v14, %v23381_v62  ;;  %v31390_v52 = vmul.f32 2.0, %v23456_v4  ;;  %v31519_v45 = vadd.f32 %v37964_v20, %v31391_v49  ;;  %v45669_v13 = vld [vmem:[#allocation228_spill] sm:$0xff] }
 0x494   :  { %38428 = vmatpush3.msra.mxu0 %v45661_v16  ;;  %38422 = vmatprep.subr.mxu1 %v45662_v59  ;;  %v33019_v3 = vadd.f32 %v33018_v58, %v33017_v19  ;;  %v43795_v63 = vadd.f32 %v37971_v56, %v31517_v27  ;;  %v33020_v42 = vsel %vm97_vm0, %v32998_v44, 0.0  ;;  %v33000_v5 = vand.u32 2147483647, %v43769_v51  ;;  %v45671_v58 = vld [vmem:[#allocation230_spill] sm:$0xff] }
 0x495   :  { %38429 = vmatprep.subr.mxu0 %v45663_v53  ;;  %38423 = vmatpush3.msra.mxu1 %v45662_v59  ;;  %v31516_v26 = vadd.f32 %v31388_v40, %v23306_v30  ;;  %v37978_v18 = vpop.f32.mrf.mxu1  ;;  %v31518_v24 = vadd.f32 %v31390_v52, %v23381_v62  ;;  %v32308_v10 = vand.u32 2147483647, %v43677_v34  ;;  %v31582_v32 = vadd.f32 %v43720_v33, %v43113_v38  ;;  %v45664_v30 = vld [vmem:[#allocation223_spill] sm:$0xff] }
 0x496   :  { %38430 = vmatpush3.msra.mxu0 %v45663_v53  ;;  %38424 = vmatprep.mubr.msk.f32.mxu1 %vm97_vm0, %v43511_v22  ;;  %v33021_v11 = vadd.f32 %v33020_v42, %v33019_v3  ;;  %v43807_v48 = vadd.f32 %v37978_v18, %v31519_v45  ;;  %v43809_v1 = vpop.f32.mrf.mxu0  ;;  %v32334_v21 = vsel %vm97_vm0, %v32307_v54, 0.0  ;;  %v33022_v34 = vsel %vm97_vm0, %v32999_v50, 0.0  ;;  %v45672_v52 = vld [vmem:[#allocation231_spill] sm:$0xff]  ;;  %v45673_v53 = vld [vmem:[#allocation232_spill] sm:$0xff]  ;;  %v45674_v18 = vld [vmem:[#allocation233_spill] sm:$0xff] }
 0x497   :  { %38431 = vmatprep.mubr.msk.f32.mxu0 %vm97_vm0, %v43511_v22  ;;  %38434 = vmatprep.subr.mxu1 %v45664_v30  ;;  %v33001_v38 = vand.u32 2147483647, %v31642_v61  ;;  %v31644_v33 = vadd.f32 %v31516_v26, %v23456_v4  ;;  %v23531_v2 = vpop.f32.mrf.mxu1  ;;  %v32335_v0 = vadd.f32 %v32334_v21, %v32333_v55  ;;  %v33024_v57 = vsel %vm97_vm0, %v33000_v5, 0.0  ;;  %v45670_v55 = vld [vmem:[#allocation229_spill] sm:$0xff] }
 0x498   :  { %38441 = vmatprep.subr.mxu0 %v45665_v43  ;;  %38425 = vmatmul.mubr.msk.f32.vlgmr.msra.gmra.mxu1 %vm97_vm0, %v43527_v9  ;;  %v33023_v36 = vadd.f32 %v33022_v34, %v33021_v11  ;;  %v43819_v12 = vpop.f32.mrf.mxu0  ;;  %v33002_v35 = vand.u32 2147483647, %v43779_v41  ;;  %v31646_v15 = vadd.f32 %v31518_v24, %v23531_v2  ;;  %v31583_v51 = vadd.f32 %v43100_v31, %v43701_v29  ;;  %v45677_v2 = vld [vmem:[#allocation236_spill] sm:$0xff] }
 0x499   :  { %38432 = vmatmul.mubr.msk.f32.vlgmr.msra.gmra.mxu0 %vm97_vm0, %v43527_v9  ;;  %38435 = vmatpush3.msra.mxu1 %v45664_v30  ;;  %v32336_v8 = vsel %vm97_vm0, %v32308_v10, 0.0  ;;  %v32309_v7 = vand.u32 2147483647, %v31582_v32  ;;  %v33026_v20 = vsel %vm97_vm0, %v33001_v38, 0.0  ;;  %v33003_v56 = vand.u32 2147483647, %v31644_v33 }
 0x49a   :  { %38442 = vmatpush3.msra.mxu0 %v45665_v43  ;;  %38436 = vmatprep.subr.mxu1 %v45666_v37  ;;  %v33025_v46 = vadd.f32 %v33024_v57, %v33023_v36  ;;  %v32337_v31 = vadd.f32 %v32336_v8, %v32335_v0  ;;  %v33028_v23 = vsel %vm97_vm0, %v33002_v35, 0.0  ;;  %v33004_v47 = vand.u32 2147483647, %v43795_v63  ;;  %v45675_v10 = vld [vmem:[#allocation234_spill] sm:$0xff]  ;;  %v45676_v33 = vld [vmem:[#allocation235_spill] sm:$0xff]  ;;  %v45678_v57 = vld [vmem:[#allocation237_spill] sm:$0xff] }
 0x49b   :  { %38443 = vmatprep.subr.mxu0 %v45667_v25  ;;  %38437 = vmatpush3.msra.mxu1 %v45666_v37  ;;  %v43834_v14 = vpop.f32.mrf.mxu1  ;;  %v32310_v49 = vand.u32 2147483647, %v31583_v51  ;;  %v32338_v62 = vsel %vm97_vm0, %v32309_v7, 0.0  ;;  %v33030_v4 = vsel %vm97_vm0, %v33003_v56, 0.0  ;;  %v33005_v27 = vand.u32 2147483647, %v31646_v15 }
 0x49c   :  { %38444 = vmatpush3.msra.mxu0 %v45667_v25  ;;  %38438 = vmatprep.mubr.msk.f32.mxu1 %vm97_vm0, %v43511_v22  ;;  %v33027_v29 = vadd.f32 %v33026_v20, %v33025_v46  ;;  %v43839_v54 = vpop.f32.mrf.mxu0  ;;  %v32339_v16 = vadd.f32 %v32338_v62, %v32337_v31  ;;  %v33032_v40 = vsel %vm97_vm0, %v33004_v47, 0.0  ;;  %v33006_v3 = vand.u32 2147483647, %v43807_v48  ;;  %v45679_v35 = vld [vmem:[#allocation238_spill] sm:$0xff]  ;;  %v45680_v8 = vld [vmem:[#allocation239_spill] sm:$0xff] }
 0x49d   :  { %38445 = vmatprep.mubr.msk.f32.mxu0 %vm97_vm0, %v43511_v22  ;;  %38448 = vmatprep.subr.mxu1 %v45668_v39  ;;  %v43845_v41 = vpop.f32.mrf.mxu1  ;;  %v32340_v59 = vsel %vm97_vm0, %v32310_v49, 0.0  ;;  %v33034_v26 = vsel %vm97_vm0, %v33005_v27, 0.0  ;;  %v31393_v34 = vmul.f32 2.0, %v43834_v14 }
 0x49e   :  { %38455 = vmatprep.subr.mxu0 %v45669_v13  ;;  %38439 = vmatmul.mubr.msk.f32.vlgmr.msra.gmra.mxu1 %vm97_vm0, %v43527_v9  ;;  %v33029_v44 = vadd.f32 %v33028_v23, %v33027_v29  ;;  %v43851_v17 = vpop.f32.mrf.mxu0  ;;  %v32341_v42 = vadd.f32 %v32340_v59, %v32339_v16  ;;  %v31392_v32 = vmul.f32 2.0, %v43845_v41  ;;  %v33036_v48 = vsel %vm97_vm0, %v33006_v3, 0.0  ;;  %v45683_v23 = vld [vmem:[#allocation242_spill] sm:$0xff]  ;;  %v45685_v16 = vld [vmem:[#allocation244_spill] sm:$0xff]  ;;  %v45686_v3 = vld [vmem:[#allocation245_spill] sm:$0xff] }
 0x49f   :  { %38446 = vmatmul.mubr.msk.f32.vlgmr.msra.gmra.mxu0 %vm97_vm0, %v43527_v9  ;;  %38449 = vmatpush3.msra.mxu1 %v45668_v39  ;;  %v31394_v36 = vmul.f32 2.0, %v43851_v17  ;;  %v31521_v15 = vadd.f32 %v43809_v1, %v31393_v34  ;;  %v45681_v1 = vld [vmem:[#allocation240_spill] sm:$0xff]  ;;  %v45682_v39 = vld [vmem:[#allocation241_spill] sm:$0xff] }
 0x4a0   :  { %38456 = vmatpush3.msra.mxu0 %v45669_v13  ;;  %38450 = vmatprep.subr.mxu1 %v45670_v55  ;;  %v33031_v19 = vadd.f32 %v33030_v4, %v33029_v44  ;;  %v31520_v43 = vadd.f32 %v31392_v32, %v43819_v12  ;;  %v31395_v12 = vmul.f32 2.0, %v43839_v54  ;;  %v45689_v34 = vld [vmem:[#allocation248_spill] sm:$0xff] }
 0x4a1   :  { %38457 = vmatprep.subr.mxu0 %v45671_v58  ;;  %38451 = vmatpush3.msra.mxu1 %v45670_v55  ;;  %v43862_v50 = vpop.f32.mrf.mxu1  ;;  %v31522_v25 = vadd.f32 %v31394_v36, %v43845_v41  ;;  %v31649_v31 = vadd.f32 %v43839_v54, %v31521_v15  ;;  %v45684_v55 = vld [vmem:[#allocation243_spill] sm:$0xff]  ;;  %v44002_v15 = vld [vmem:[#allocation9 + $0x8] sm:$0xff] }
 0x4a2   :  { %38458 = vmatpush3.msra.mxu0 %v45671_v58  ;;  %38452 = vmatprep.mubr.msk.f32.mxu1 %vm97_vm0, %v43511_v22  ;;  %v43868_v61 = vpop.f32.mrf.mxu0  ;;  %v33033_v45 = vadd.f32 %v33032_v40, %v33031_v19  ;;  %v31648_v46 = vadd.f32 %v31520_v43, %v43851_v17  ;;  %v31397_v7 = vmul.f32 2.0, %v43862_v50  ;;  %v31523_v29 = vadd.f32 %v43834_v14, %v31395_v12 }
 0x4a3   :  { %38459 = vmatprep.mubr.msk.f32.mxu0 %vm97_vm0, %v43511_v22  ;;  %38462 = vmatprep.subr.mxu1 %v45672_v52  ;;  %v43875_v63 = vpop.f32.mrf.mxu1  ;;  %v31399_v13 = vmul.f32 2.0, %v43868_v61  ;;  %v33166_v4 = vand.u32 2147483647, %v31649_v31 }
 0x4a4   :  { %38469 = vmatprep.subr.mxu0 %v45673_v53  ;;  %38453 = vmatmul.mubr.msk.f32.vlgmr.msra.gmra.mxu1 %vm97_vm0, %v43527_v9  ;;  %v43880_v5 = vpop.f32.mrf.mxu0  ;;  %v33035_v24 = vadd.f32 %v33034_v26, %v33033_v45  ;;  %v33165_v41 = vand.u32 2147483647, %v31648_v46  ;;  %v31525_v47 = vadd.f32 %v43839_v54, %v31397_v7  ;;  %v31396_v44 = vmul.f32 2.0, %v43875_v63  ;;  %v45687_v45 = vld [vmem:[#allocation246_spill] sm:$0xff] }
 0x4a5   :  { %38460 = vmatmul.mubr.msk.f32.vlgmr.msra.gmra.mxu0 %vm97_vm0, %v43527_v9  ;;  %38463 = vmatpush3.msra.mxu1 %v45672_v52  ;;  %v31650_v49 = vadd.f32 %v31522_v25, %v43875_v63  ;;  %v31651_v54 = vadd.f32 %v43862_v50, %v31523_v29  ;;  %v31527_v59 = vadd.f32 %v43862_v50, %v31399_v13  ;;  %v31398_v26 = vmul.f32 2.0, %v43880_v5 }
 0x4a6   :  { %38470 = vmatpush3.msra.mxu0 %v45673_v53  ;;  %38464 = vmatprep.subr.mxu1 %v45674_v18  ;;  %v43897_v30 = vadd.f32 %v33036_v48, %v33035_v24  ;;  %v33181_v27 = vsel %vm97_vm0, %v33165_v41, 0.0  ;;  %v31524_v52 = vadd.f32 %v31396_v44, %v43851_v17  ;;  %v33182_v53 = vsel %vm97_vm0, %v33166_v4, 0.0  ;;  %v45688_v48 = vld [vmem:[#allocation247_spill] sm:$0xff] }
 0x4a7   :  { %38471 = vmatprep.subr.mxu0 %v45675_v10  ;;  %38465 = vmatpush3.msra.mxu1 %v45674_v18  ;;  %v43891_v11 = vpop.f32.mrf.mxu1  ;;  %v33167_v40 = vand.u32 2147483647, %v31650_v49  ;;  %v31526_v29 = vadd.f32 %v31398_v26, %v43875_v63 }
 0x4a8   :  { %38472 = vmatpush3.msra.mxu0 %v45675_v10  ;;  %32342 = vadd.xlane.f32.xlu0 %v32341_v42  ;;  %v43895_v21 = vpop.f32.mrf.mxu0  ;;  %v33168_v42 = vand.u32 2147483647, %v31651_v54  ;;  %v31401_v18 = vmul.f32 2.0, %v43891_v11  ;;  %v43985_v10 = vld [vmem:[#allocation9] sm:$0xff]  ;;  %v43995_v43 = vadd.f32 %v31524_v52, %v43880_v5  ;;  %v43998_v36 = vadd.f32 %v43891_v11, %v31527_v59 }
 0x4a9   :  { %38466 = vmatprep.mubr.msk.f32.mxu1 %vm97_vm0, %v43511_v22  ;;  %38473 = vmatprep.mubr.msk.f32.mxu0 %vm97_vm0, %v43511_v22  ;;  %v43904_v38 = vpop.f32.mrf.mxu1  ;;  %v31403_v41 = vmul.f32 2.0, %v43895_v21 }
 0x4aa   :  { %38476 = vmatprep.subr.mxu1 %v45676_v33  ;;  %38483 = vmatprep.subr.mxu0 %v45677_v2  ;;  %v43908_v0 = vpop.f32.mrf.mxu0  ;;  %v33186_v7 = vsel %vm97_vm0, %v33168_v42, 0.0  ;;  %v31529_v31 = vadd.f32 %v43868_v61, %v31401_v18  ;;  %v33172_v63 = vand.u32 2147483647, %v43998_v36  ;;  %v44033_v59 = vadd.f32 %v31526_v29, %v43904_v38 }
 0x4ab   :  { %38467 = vmatmul.mubr.msk.f32.vlgmr.msra.gmra.mxu1 %vm97_vm0, %v43527_v9  ;;  %38474 = vmatmul.mubr.msk.f32.vlgmr.msra.gmra.mxu0 %vm97_vm0, %v43527_v9  ;;  %v44048_v26 = vadd.f32 %v43891_v11, %v31403_v41  ;;  %v45696_v41 = vld [vmem:[#allocation255_spill] sm:$0xff] }
 0x4ac   :  { %38477 = vmatpush3.msra.mxu1 %v45676_v33  ;;  %38484 = vmatpush3.msra.mxu0 %v45677_v2  ;;  %v33184_v2 = vsel %vm97_vm0, %v33167_v40, 0.0  ;;  %v45693_v40 = vld [vmem:[#allocation252_spill] sm:$0xff]  ;;  %v44045_v42 = vadd.f32 %v43895_v21, %v31529_v31 }
 0x4ad   :  { %38478 = vmatprep.subr.mxu1 %v45678_v57  ;;  %38485 = vmatprep.subr.mxu0 %v45679_v35  ;;  %v43921_v51 = vpop.f32.mrf.mxu1 }
 0x4ae   :  { %38479 = vmatpush3.msra.mxu1 %v45678_v57  ;;  %38486 = vmatpush3.msra.mxu0 %v45679_v35  ;;  %v43926_v37 = vpop.f32.mrf.mxu0  ;;  %v44102_v36 = vadd.f32 %v43921_v51, %v44048_v26  ;;  %v45701_v26 = vld [vmem:[#allocation260_spill] sm:$0xff] }
 0x4af   :  { %38480 = vmatprep.mubr.msk.f32.mxu1 %vm97_vm0, %v43511_v22  ;;  %38487 = vmatprep.mubr.msk.f32.mxu0 %vm97_vm0, %v43511_v22  ;;  %v43937_v20 = vpop.f32.mrf.mxu1 }
 0x4b0   :  { %38490 = vmatprep.subr.mxu1 %v45680_v8  ;;  %38497 = vmatprep.subr.mxu0 %v45681_v1  ;;  %v43939_v56 = vpop.f32.mrf.mxu0 }
 0x4b1   :  { %38481 = vmatmul.mubr.msk.f32.vlgmr.msra.gmra.mxu1 %vm97_vm0, %v43527_v9  ;;  %38488 = vmatmul.mubr.msk.f32.vlgmr.msra.gmra.mxu0 %vm97_vm0, %v43527_v9 }
 0x4b2   :  { %38491 = vmatpush3.msra.mxu1 %v45680_v8  ;;  %38498 = vmatpush3.msra.mxu0 %v45681_v1 }
 0x4b3   :  { %38492 = vmatprep.subr.mxu1 %v45682_v39  ;;  %38499 = vmatprep.subr.mxu0 %v45683_v23 }
 0x4b4   :  { %38493 = vmatpush3.msra.mxu1 %v45682_v39  ;;  %38500 = vmatpush3.msra.mxu0 %v45683_v23  ;;  %v43957_v62 = vpop.f32.mrf.mxu1  ;;  %v38055_v14 = vpop.f32.mrf.mxu0  ;;  %v45690_v39 = vld [vmem:[#allocation249_spill] sm:$0xff]  ;;  %v45691_v23 = vld [vmem:[#allocation250_spill] sm:$0xff] }
 0x4b5   :  { %38494 = vmatprep.mubr.msk.f32.mxu1 %vm97_vm0, %v43511_v22  ;;  %38501 = vmatprep.mubr.msk.f32.mxu0 %vm97_vm0, %v43511_v22  ;;  %v31653_v22 = vadd.f32 %v43868_v61, %v31525_v47  ;;  %v33169_v61 = vand.u32 2147483647, %v43995_v43 }
 0x4b6   :  { %38504 = vmatprep.subr.mxu1 %v45684_v55  ;;  %38511 = vmatprep.subr.mxu0 %v45685_v16  ;;  %v43966_v19 = vpop.f32.mrf.mxu1  ;;  %v24356_v58 = vpop.f32.mrf.mxu0 }
 0x4b7   :  { %38495 = vmatmul.mubr.msk.f32.vlgmr.msra.gmra.mxu1 %vm97_vm0, %v43527_v9  ;;  %38502 = vmatmul.mubr.msk.f32.vlgmr.msra.gmra.mxu0 %vm97_vm0, %v43527_v9  ;;  %v33183_v9 = vadd.f32 %v33182_v53, %v33181_v27  ;;  %v33170_v33 = vand.u32 2147483647, %v31653_v22  ;;  %v45692_v22 = vld [vmem:[#allocation251_spill] sm:$0xff]  ;;  %v33188_v31 = vsel %vm97_vm0, %v33169_v61, 0.0  ;;  %v45697_v61 = vld [vmem:[#allocation256_spill] sm:$0xff] }
 0x4b8   :  { %38505 = vmatpush3.msra.mxu1 %v45684_v55  ;;  %38512 = vmatpush3.msra.mxu0 %v45685_v16 }
 0x4b9   :  { %38506 = vmatprep.subr.mxu1 %v45686_v3  ;;  %38513 = vmatprep.subr.mxu0 %v45687_v45  ;;  %v33185_v25 = vadd.f32 %v33184_v2, %v33183_v9  ;;  %v44020_v49 = vsel %vm97_vm0, %v33170_v33, 0.0  ;;  %v45694_v33 = vld [vmem:[#allocation253_spill] sm:$0xff]  ;;  %v45695_v2 = vld [vmem:[#allocation254_spill] sm:$0xff] }
 0x4ba   :  { %38507 = vmatpush3.msra.mxu1 %v45686_v3  ;;  %38514 = vmatpush3.msra.mxu0 %v45687_v45  ;;  %v38062_v24 = vpop.f32.mrf.mxu1  ;;  %v38069_v17 = vpop.f32.mrf.mxu0  ;;  %v44036_v3 = vmul.f32 2.0, %v43908_v0 }
 0x4bb   :  { %38508 = vmatprep.mubr.msk.f32.mxu1 %vm97_vm0, %v43985_v10  ;;  %38515 = vmatprep.mubr.msk.f32.mxu0 %vm97_vm0, %v43985_v10  ;;  %v31409_v50 = vmul.f32 2.0, %v38062_v24  ;;  %v31411_v32 = vmul.f32 2.0, %v38069_v17  ;;  %v33187_v52 = vadd.f32 %v33186_v7, %v33185_v25 }
 0x4bc   :  { %38518 = vmatprep.subr.mxu1 %v45688_v48  ;;  %38525 = vmatprep.subr.mxu0 %v45689_v34  ;;  %v24431_v57 = vpop.f32.mrf.mxu1  ;;  %v44000_v35 = vpop.f32.mrf.mxu0 }
 0x4bd   :  { %38509 = vmatmul.mubr.msk.f32.vlgmr.msra.gmra.mxu1 %vm97_vm0, %v44002_v15  ;;  %38516 = vmatmul.mubr.msk.f32.vlgmr.msra.gmra.mxu0 %vm97_vm0, %v44002_v15  ;;  %v31537_v12 = vadd.f32 %v38055_v14, %v31409_v50  ;;  %v31408_v46 = vmul.f32 2.0, %v24431_v57  ;;  %v31410_v8 = vmul.f32 2.0, %v44000_v35  ;;  %v31539_v1 = vadd.f32 %v38062_v24, %v31411_v32 }
 0x4be   :  { %38519 = vmatpush3.msra.mxu1 %v45688_v48  ;;  %38526 = vmatpush3.msra.mxu0 %v45689_v34  ;;  %v31400_v14 = vmul.f32 2.0, %v43904_v38 }
 0x4bf   :  { %38520 = vmatprep.subr.mxu1 %v45690_v39  ;;  %38527 = vmatprep.subr.mxu0 %v45691_v23  ;;  %v31665_v13 = vadd.f32 %v38069_v17, %v31537_v12  ;;  %v31536_v47 = vadd.f32 %v31408_v46, %v24356_v58  ;;  %v31538_v44 = vadd.f32 %v31410_v8, %v24431_v57 }
 0x4c0   :  { %38521 = vmatpush3.msra.mxu1 %v45690_v39  ;;  %38528 = vmatpush3.msra.mxu0 %v45691_v23  ;;  %v38076_v4 = vpop.f32.mrf.mxu1  ;;  %v38083_v55 = vpop.f32.mrf.mxu0 }
 0x4c1   :  { %38522 = vmatprep.mubr.msk.f32.mxu1 %vm97_vm0, %v43985_v10  ;;  %38529 = vmatprep.mubr.msk.f32.mxu0 %vm97_vm0, %v43985_v10  ;;  %v33340_v16 = vand.u32 2147483647, %v31665_v13  ;;  %v31664_v54 = vadd.f32 %v31536_v47, %v44000_v35  ;;  %v31413_v58 = vmul.f32 2.0, %v38076_v4  ;;  %v31667_v27 = vadd.f32 %v38076_v4, %v31539_v1 }
 0x4c2   :  { %38532 = vmatprep.subr.mxu1 %v45692_v22  ;;  %38539 = vmatprep.subr.mxu0 %v45693_v40  ;;  %v31415_v45 = vmul.f32 2.0, %v38083_v55  ;;  %v24581_v53 = vpop.f32.mrf.mxu1  ;;  %v44038_v9 = vpop.f32.mrf.mxu0  ;;  %v31528_v13 = vadd.f32 %v31400_v14, %v43880_v5 }
 0x4c3   :  { %38523 = vmatmul.mubr.msk.f32.vlgmr.msra.gmra.mxu1 %vm97_vm0, %v44002_v15  ;;  %38530 = vmatmul.mubr.msk.f32.vlgmr.msra.gmra.mxu0 %vm97_vm0, %v44002_v15  ;;  %v33339_v18 = vand.u32 2147483647, %v31664_v54  ;;  %v31541_v24 = vadd.f32 %v38069_v17, %v31413_v58  ;;  %v31412_v50 = vmul.f32 2.0, %v24581_v53  ;;  %v31666_v32 = vadd.f32 %v31538_v44, %v24581_v53 }
 0x4c4   :  { %38533 = vmatpush3.msra.mxu1 %v45692_v22  ;;  %38540 = vmatpush3.msra.mxu0 %v45693_v40  ;;  %v31414_v48 = vmul.f32 2.0, %v44038_v9  ;;  %v31543_v34 = vadd.f32 %v38076_v4, %v31415_v45  ;;  %v33356_v43 = vsel %vm97_vm0, %v33340_v16, 0.0  ;;  %v33342_v57 = vand.u32 2147483647, %v31667_v27 }
 0x4c5   :  { %38534 = vmatprep.subr.mxu1 %v45694_v33  ;;  %38541 = vmatprep.subr.mxu0 %v45695_v2  ;;  %v33355_v11 = vsel %vm97_vm0, %v33339_v18, 0.0  ;;  %v31669_v12 = vadd.f32 %v38083_v55, %v31541_v24  ;;  %v33341_v46 = vand.u32 2147483647, %v31666_v32  ;;  %v31540_v8 = vadd.f32 %v31412_v50, %v44000_v35  ;;  %v45699_v24 = vld [vmem:[#allocation258_spill] sm:$0xff] }
 0x4c6   :  { %38535 = vmatpush3.msra.mxu1 %v45694_v33  ;;  %38542 = vmatpush3.msra.mxu0 %v45695_v2  ;;  %v33357_v17 = vadd.f32 %v33356_v43, %v33355_v11  ;;  %v38090_v1 = vpop.f32.mrf.mxu1  ;;  %v38097_v7 = vpop.f32.mrf.mxu0  ;;  %v31542_v25 = vadd.f32 %v31414_v48, %v24581_v53  ;;  %v44069_v35 = vadd.f32 %v33188_v31, %v33187_v52  ;;  %v33360_v16 = vsel %vm97_vm0, %v33342_v57, 0.0  ;;  %v45698_v52 = vld [vmem:[#allocation257_spill] sm:$0xff] }
 0x4c7   :  { %32516 = vadd.xlane.f32.xlu1 %v43408_v60  ;;  %38536 = vmatprep.mubr.msk.f32.mxu1 %vm97_vm0, %v43985_v10  ;;  %v31417_v29 = vmul.f32 2.0, %v38090_v1  ;;  %v44064_v39 = vadd.f32 %v38090_v1, %v31543_v34  ;;  %v31419_v23 = vmul.f32 2.0, %v38097_v7  ;;  %v33358_v60 = vsel %vm97_vm0, %v33341_v46, 0.0 }
 0x4c8   :  { %38543 = vmatprep.mubr.msk.f32.mxu0 %vm97_vm0, %v43985_v10  ;;  %38546 = vmatprep.subr.mxu1 %v45696_v41  ;;  %v31668_v47 = vadd.f32 %v31540_v8, %v44038_v9  ;;  %v24731_v44 = vpop.f32.mrf.mxu1  ;;  %v44074_v4 = vpop.f32.mrf.mxu0  ;;  %v33344_v54 = vand.u32 2147483647, %v31669_v12  ;;  %v33359_v58 = vadd.f32 %v33358_v60, %v33357_v17  ;;  %v44089_v45 = vsel %vm97_vm0, %v33172_v63, 0.0 }
 0x4c9   :  { %38553 = vmatprep.subr.mxu0 %v45697_v61  ;;  %38537 = vmatmul.mubr.msk.f32.vlgmr.msra.gmra.mxu1 %vm97_vm0, %v44002_v15  ;;  %v31545_v27 = vadd.f32 %v38083_v55, %v31417_v29  ;;  %v31416_v14 = vmul.f32 2.0, %v24731_v44  ;;  %v31670_v22 = vadd.f32 %v31542_v25, %v24731_v44  ;;  %v31418_v40 = vmul.f32 2.0, %v44074_v4 }
 0x4ca   :  { %38544 = vmatmul.mubr.msk.f32.vlgmr.msra.gmra.mxu0 %vm97_vm0, %v44002_v15  ;;  %38547 = vmatpush3.msra.mxu1 %v45696_v41  ;;  %v33343_v5 = vand.u32 2147483647, %v31668_v47  ;;  %v33361_v55 = vadd.f32 %v33360_v16, %v33359_v58  ;;  %v31547_v18 = vadd.f32 %v38090_v1, %v31419_v23  ;;  %v33364_v57 = vsel %vm97_vm0, %v33344_v54, 0.0 }
 0x4cb   :  { %38554 = vmatpush3.msra.mxu0 %v45697_v61  ;;  %38548 = vmatprep.subr.mxu1 %v45698_v52  ;;  %v44091_v53 = vadd.f32 %v38097_v7, %v31545_v27  ;;  %v33345_v32 = vand.u32 2147483647, %v31670_v22  ;;  %v31544_v48 = vadd.f32 %v31416_v14, %v44038_v9  ;;  %v31546_v2 = vadd.f32 %v31418_v40, %v24731_v44  ;;  %v45700_v9 = vld [vmem:[#allocation259_spill] sm:$0xff]  ;;  %v45702_v44 = vld [vmem:[#allocation261_spill] sm:$0xff] }
 0x4cc   :  { %38555 = vmatprep.subr.mxu0 %v45699_v24  ;;  %38549 = vmatpush3.msra.mxu1 %v45698_v52  ;;  %v33362_v50 = vsel %vm97_vm0, %v33343_v5, 0.0  ;;  %v38104_v34 = vpop.f32.mrf.mxu1  ;;  %v38111_v33 = vpop.f32.mrf.mxu0  ;;  %v33346_v12 = vand.u32 2147483647, %v44064_v39  ;;  %v44116_v25 = vadd.f32 %v31528_v13, %v43908_v0  ;;  %v33171_v13 = vand.u32 2147483647, %v44033_v59 }
 0x4cd   :  { %38556 = vmatpush3.msra.mxu0 %v45699_v24  ;;  %38550 = vmatprep.mubr.msk.f32.mxu1 %vm97_vm0, %v43985_v10  ;;  %v33363_v63 = vadd.f32 %v33362_v50, %v33361_v55  ;;  %v31421_v43 = vmul.f32 2.0, %v38104_v34  ;;  %v44104_v11 = vadd.f32 %v38104_v34, %v31547_v18  ;;  %v31672_v17 = vadd.f32 %v31544_v48, %v44074_v4 }
 0x4ce   :  { %38557 = vmatprep.mubr.msk.f32.mxu0 %vm97_vm0, %v43985_v10  ;;  %38560 = vmatprep.subr.mxu1 %v45700_v9  ;;  %v31423_v46 = vmul.f32 2.0, %v38111_v33  ;;  %v24881_v8 = vpop.f32.mrf.mxu1  ;;  %v24956_v1 = vpop.f32.mrf.mxu0  ;;  %v33366_v29 = vsel %vm97_vm0, %v33345_v32, 0.0  ;;  %v33368_v58 = vsel %vm97_vm0, %v33346_v12, 0.0  ;;  %v33348_v27 = vand.u32 2147483647, %v44091_v53  ;;  %v45706_v12 = vld [vmem:[#allocation265_spill] sm:$0xff] }
 0x4cf   :  { %38567 = vmatprep.subr.mxu0 %v45701_v26  ;;  %38551 = vmatmul.mubr.msk.f32.vlgmr.msra.gmra.mxu1 %vm97_vm0, %v44002_v15  ;;  %v33365_v31 = vadd.f32 %v33364_v57, %v33363_v63  ;;  %v31549_v23 = vadd.f32 %v38097_v7, %v31421_v43  ;;  %v33347_v39 = vand.u32 2147483647, %v31672_v17  ;;  %v31420_v41 = vmul.f32 2.0, %v24881_v8  ;;  %v45703_v7 = vld [vmem:[#allocation262_spill] sm:$0xff] }
 0x4d0   :  { %38558 = vmatmul.mubr.msk.f32.vlgmr.msra.gmra.mxu0 %vm97_vm0, %v44002_v15  ;;  %38561 = vmatpush3.msra.mxu1 %v45700_v9  ;;  %v31674_v60 = vadd.f32 %v31546_v2, %v24881_v8  ;;  %v31422_v47 = vmul.f32 2.0, %v24956_v1  ;;  %v31551_v54 = vadd.f32 %v38104_v34, %v31423_v46  ;;  %v33174_v59 = vand.u32 2147483647, %v44045_v42  ;;  %v45705_v42 = vld [vmem:[#allocation264_spill] sm:$0xff] }
 0x4d1   :  { %38568 = vmatpush3.msra.mxu0 %v45701_v26  ;;  %38562 = vmatprep.subr.mxu1 %v45702_v44  ;;  %v33367_v61 = vadd.f32 %v33366_v29, %v33365_v31  ;;  %v44125_v16 = vadd.f32 %v38111_v33, %v31549_v23  ;;  %v31548_v5 = vadd.f32 %v31420_v41, %v44074_v4  ;;  %v45704_v4 = vld [vmem:[#allocation263_spill] sm:$0xff]  ;;  %v31405_v53 = vmul.f32 2.0, %v43921_v51 }
 0x4d2   :  { %38569 = vmatprep.subr.mxu0 %v45703_v7  ;;  %38563 = vmatpush3.msra.mxu1 %v45702_v44  ;;  %v38118_v14 = vpop.f32.mrf.mxu1  ;;  %v31550_v22 = vadd.f32 %v31422_v47, %v24881_v8  ;;  %v33191_v40 = vadd.f32 %v44020_v49, %v44069_v35  ;;  %v33370_v24 = vsel %vm97_vm0, %v33347_v39, 0.0  ;;  %v33349_v50 = vand.u32 2147483647, %v31674_v60  ;;  %v45707_v8 = vld [vmem:[#allocation266_spill] sm:$0xff]  ;;  %v45708_v60 = vld [vmem:[#allocation267_spill] sm:$0xff] }
 0x4d3   :  { %38570 = vmatpush3.msra.mxu0 %v45703_v7  ;;  %38564 = vmatprep.mubr.msk.f32.mxu1 %vm97_vm0, %v43985_v10  ;;  %v33369_v52 = vadd.f32 %v33368_v58, %v33367_v61  ;;  %v44138_v55 = vadd.f32 %v38118_v14, %v31551_v54  ;;  %v38125_v18 = vpop.f32.mrf.mxu0  ;;  %v31676_v32 = vadd.f32 %v31548_v5, %v24956_v1  ;;  %v33192_v49 = vsel %vm97_vm0, %v33171_v13, 0.0  ;;  %v45709_v7 = vld [vmem:[#allocation268_spill] sm:$0xff] }
 0x4d4   :  { %38571 = vmatprep.mubr.msk.f32.mxu0 %vm97_vm0, %v43985_v10  ;;  %38574 = vmatprep.subr.mxu1 %v45704_v4  ;;  %v25031_v48 = vpop.f32.mrf.mxu1  ;;  %v44150_v35 = vmul.f32 2.0, %v43926_v37  ;;  %v31530_v34 = vadd.f32 %v44036_v3, %v43904_v38  ;;  %v33173_v63 = vand.u32 2147483647, %v44116_v25  ;;  %v33372_v43 = vsel %vm97_vm0, %v33348_v27, 0.0 }
 0x4d5   :  { %38581 = vmatprep.subr.mxu0 %v45705_v42  ;;  %38565 = vmatmul.mubr.msk.f32.vlgmr.msra.gmra.mxu1 %vm97_vm0, %v44002_v15  ;;  %v33371_v33 = vadd.f32 %v33370_v24, %v33369_v52  ;;  %v25106_v2 = vpop.f32.mrf.mxu0  ;;  %v33350_v9 = vand.u32 2147483647, %v44104_v11  ;;  %v44160_v57 = vadd.f32 %v31550_v22, %v25031_v48  ;;  %v44165_v38 = vsel %vm97_vm0, %v33174_v59, 0.0 }
 0x4d6   :  { %38572 = vmatmul.mubr.msk.f32.vlgmr.msra.gmra.mxu0 %vm97_vm0, %v44002_v15  ;;  %38575 = vmatpush3.msra.mxu1 %v45704_v4  ;;  %v33193_v3 = vadd.f32 %v33192_v49, %v33191_v40  ;;  %v33176_v17 = vand.u32 2147483647, %v44102_v36  ;;  %v44171_v1 = vadd.f32 %v43895_v21, %v31405_v53  ;;  %v31404_v11 = vmul.f32 2.0, %v43937_v20  ;;  %v45710_v4 = vld [vmem:[#allocation269_spill] sm:$0xff] }
 0x4d7   :  { %38582 = vmatpush3.msra.mxu0 %v45705_v42  ;;  %38576 = vmatprep.subr.mxu1 %v45706_v12  ;;  %v33373_v46 = vadd.f32 %v33372_v43, %v33371_v33  ;;  %v33374_v26 = vsel %vm97_vm0, %v33349_v50, 0.0  ;;  %v33351_v25 = vand.u32 2147483647, %v31676_v32  ;;  %v44179_v29 = vadd.f32 %v31530_v34, %v43937_v20  ;;  %v45711_v50 = vld [vmem:[#allocation270_spill] sm:$0xff] }
 0x4d8   :  { %38583 = vmatprep.subr.mxu0 %v45707_v8  ;;  %38577 = vmatpush3.msra.mxu1 %v45706_v12  ;;  %v38132_v31 = vpop.f32.mrf.mxu1  ;;  %v44182_v23 = vmul.f32 2.0, %v43939_v56  ;;  %v33196_v47 = vsel %vm97_vm0, %v33173_v63, 0.0  ;;  %v33376_v44 = vsel %vm97_vm0, %v33350_v9, 0.0  ;;  %v33352_v13 = vand.u32 2147483647, %v44125_v16  ;;  %v45712_v9 = vld [vmem:[#allocation271_spill] sm:$0xff] }
 0x4d9   :  { %38584 = vmatpush3.msra.mxu0 %v45707_v8  ;;  %38578 = vmatprep.mubr.msk.f32.mxu1 %vm97_vm0, %v43985_v10  ;;  %v33375_v39 = vadd.f32 %v33374_v26, %v33373_v46  ;;  %v31681_v21 = vmul.f32 2.0, %v38132_v31  ;;  %v38139_v41 = vpop.f32.mrf.mxu0  ;;  %v33195_v58 = vadd.f32 %v44089_v45, %v33193_v3  ;;  %v33378_v16 = vsel %vm97_vm0, %v33351_v25, 0.0  ;;  %v45713_v8 = vld [vmem:[#allocation272_spill] sm:$0xff] }
 0x4da   :  { %38585 = vmatprep.mubr.msk.f32.mxu0 %vm97_vm0, %v43985_v10  ;;  %38588 = vmatprep.subr.mxu1 %v45708_v60  ;;  %v31683_v61 = vmul.f32 2.0, %v38139_v41  ;;  %v25181_v54 = vpop.f32.mrf.mxu1  ;;  %v33354_v59 = vand.u32 2147483647, %v44138_v55  ;;  %v33175_v32 = vand.u32 2147483647, %v44179_v29  ;;  %v44206_v48 = vadd.f32 %v31404_v11, %v43908_v0 }
 0x4db   :  { %38595 = vmatprep.subr.mxu0 %v45709_v7  ;;  %38579 = vmatmul.mubr.msk.f32.vlgmr.msra.gmra.mxu1 %vm97_vm0, %v44002_v15  ;;  %v33377_v27 = vadd.f32 %v33376_v44, %v33375_v39  ;;  %v31809_v5 = vadd.f32 %v38125_v18, %v31681_v21  ;;  %v31680_v14 = vmul.f32 2.0, %v25181_v54  ;;  %v25256_v22 = vpop.f32.mrf.mxu0  ;;  %v33353_v18 = vand.u32 2147483647, %v44160_v57  ;;  %v45714_v44 = vld [vmem:[#allocation273_spill] sm:$0xff] }
 0x4dc   :  { %38586 = vmatmul.mubr.msk.f32.vlgmr.msra.gmra.mxu0 %vm97_vm0, %v44002_v15  ;;  %38589 = vmatpush3.msra.mxu1 %v45708_v60  ;;  %v31682_v40 = vmul.f32 2.0, %v25256_v22  ;;  %v31811_v52 = vadd.f32 %v38132_v31, %v31683_v61  ;;  %v33380_v55 = vsel %vm97_vm0, %v33352_v13, 0.0  ;;  %v33197_v0 = vadd.f32 %v33196_v47, %v33195_v58 }
 0x4dd   :  { %38596 = vmatpush3.msra.mxu0 %v45709_v7  ;;  %38590 = vmatprep.subr.mxu1 %v45710_v4  ;;  %v33379_v45 = vadd.f32 %v33378_v16, %v33377_v27  ;;  %v31937_v53 = vadd.f32 %v38139_v41, %v31809_v5  ;;  %v31808_v24 = vadd.f32 %v31680_v14, %v25106_v2  ;;  %v33384_v46 = vsel %vm97_vm0, %v33354_v59, 0.0 }
 0x4de   :  { %38597 = vmatprep.subr.mxu0 %v45711_v50  ;;  %38591 = vmatpush3.msra.mxu1 %v45710_v4  ;;  %v38146_v42 = vpop.f32.mrf.mxu1  ;;  %v31810_v49 = vadd.f32 %v31682_v40, %v25181_v54  ;;  %v33382_v11 = vsel %vm97_vm0, %v33353_v18, 0.0  ;;  %v33199_v59 = vadd.f32 %v44165_v38, %v33197_v0  ;;  %v33200_v40 = vsel %vm97_vm0, %v33175_v32, 0.0 }
 0x4df   :  { %38598 = vmatpush3.msra.mxu0 %v45711_v50  ;;  %38592 = vmatprep.mubr.msk.f32.mxu1 %vm97_vm0, %v43985_v10  ;;  %v32180_v34 = vand.u32 2147483647, %v31937_v53  ;;  %v31936_v33 = vadd.f32 %v31808_v24, %v25256_v22  ;;  %v31685_v2 = vmul.f32 2.0, %v38146_v42  ;;  %v31939_v63 = vadd.f32 %v38146_v42, %v31811_v52  ;;  %v38153_v43 = vpop.f32.mrf.mxu0  ;;  %v45716_v24 = vld [vmem:[#allocation275_spill] sm:$0xff]  ;;  %v45717_v50 = vld [vmem:[#allocation276_spill] sm:$0xff] }
 0x4e0   :  { %38599 = vmatprep.mubr.msk.f32.mxu0 %vm97_vm0, %v43985_v10  ;;  %38602 = vmatprep.subr.mxu1 %v45712_v9  ;;  %v31687_v57 = vmul.f32 2.0, %v38153_v43  ;;  %v25331_v12 = vpop.f32.mrf.mxu1  ;;  %v33381_v3 = vadd.f32 %v33380_v55, %v33379_v45  ;;  %v33202_v0 = vsel %vm97_vm0, %v33176_v17, 0.0  ;;  %v44266_v36 = vadd.f32 %v43926_v37, %v44171_v1  ;;  %v45720_v37 = vld [vmem:[#allocation279_spill] sm:$0xff]  ;;  %v45721_v1 = vld [vmem:[#allocation280_spill] sm:$0xff] }
 0x4e1   :  { %38609 = vmatprep.subr.mxu0 %v45713_v8  ;;  %38593 = vmatmul.mubr.msk.f32.vlgmr.msra.gmra.mxu1 %vm97_vm0, %v44002_v15  ;;  %v32196_v26 = vsel %vm97_vm0, %v32180_v34, 0.0  ;;  %v32179_v25 = vand.u32 2147483647, %v31936_v33  ;;  %v31813_v31 = vadd.f32 %v38139_v41, %v31685_v2  ;;  %v25406_v29 = vpop.f32.mrf.mxu0  ;;  %v32182_v39 = vand.u32 2147483647, %v31939_v63  ;;  %v45715_v41 = vld [vmem:[#allocation274_spill] sm:$0xff] }
 0x4e2   :  { %38600 = vmatmul.mubr.msk.f32.vlgmr.msra.gmra.mxu0 %vm97_vm0, %v44002_v15  ;;  %38603 = vmatpush3.msra.mxu1 %v45712_v9  ;;  %v31684_v21 = vmul.f32 2.0, %v25331_v12  ;;  %v31938_v60 = vadd.f32 %v31810_v49, %v25331_v12  ;;  %v31686_v47 = vmul.f32 2.0, %v25406_v29  ;;  %v31815_v54 = vadd.f32 %v38146_v42, %v31687_v57 }
 0x4e3   :  { %38610 = vmatpush3.msra.mxu0 %v45713_v8  ;;  %38604 = vmatprep.subr.mxu1 %v45714_v44  ;;  %v32195_v13 = vsel %vm97_vm0, %v32179_v25, 0.0  ;;  %v31941_v61 = vadd.f32 %v38153_v43, %v31813_v31  ;;  %v33383_v7 = vadd.f32 %v33382_v11, %v33381_v3  ;;  %v31660_v57 = vadd.f32 %v44206_v48, %v43939_v56  ;;  %v45718_v3 = vld [vmem:[#allocation277_spill] sm:$0xff] }
 0x4e4   :  { %38611 = vmatprep.subr.mxu0 %v45715_v41  ;;  %38605 = vmatpush3.msra.mxu1 %v45714_v44  ;;  %v32197_v58 = vadd.f32 %v32196_v26, %v32195_v13  ;;  %v32181_v27 = vand.u32 2147483647, %v31938_v60  ;;  %v31812_v5 = vadd.f32 %v31684_v21, %v25256_v22  ;;  %v38160_v14 = vpop.f32.mrf.mxu1  ;;  %v31814_v16 = vadd.f32 %v31686_v47, %v25331_v12 }
 0x4e5   :  { %38612 = vmatpush3.msra.mxu0 %v45715_v41  ;;  %32690 = vadd.xlane.f32.xlu0 %v43580_v28  ;;  %v31689_v52 = vmul.f32 2.0, %v38160_v14  ;;  %v44233_v4 = vpop.f32.mrf.mxu0  ;;  %v44235_v45 = vadd.f32 %v33384_v46, %v33383_v7  ;;  %v32200_v22 = vsel %vm97_vm0, %v32182_v39, 0.0  ;;  %v32184_v18 = vand.u32 2147483647, %v31941_v61  ;;  %v45719_v46 = vld [vmem:[#allocation278_spill] sm:$0xff] }
 0x4e6   :  { %38606 = vmatprep.mubr.msk.f32.mxu1 %vm97_vm0, %v43985_v10  ;;  %38613 = vmatprep.mubr.msk.f32.mxu0 %vm97_vm0, %v43985_v10  ;;  %v32198_v28 = vsel %vm97_vm0, %v32181_v27, 0.0  ;;  %v31940_v53 = vadd.f32 %v31812_v5, %v25406_v29  ;;  %v25481_v38 = vpop.f32.mrf.mxu1  ;;  %v31943_v55 = vadd.f32 %v38160_v14, %v31815_v54  ;;  %v31691_v42 = vmul.f32 2.0, %v44233_v4 }
 0x4e7   :  { %38616 = vmatprep.subr.mxu1 %v45716_v24  ;;  %38623 = vmatprep.subr.mxu0 %v45717_v50  ;;  %v32199_v32 = vadd.f32 %v32198_v28, %v32197_v58  ;;  %v31817_v49 = vadd.f32 %v38153_v43, %v31689_v52  ;;  %v25556_v34 = vpop.f32.mrf.mxu0  ;;  %v31688_v2 = vmul.f32 2.0, %v25481_v38  ;;  %v31942_v63 = vadd.f32 %v31814_v16, %v25481_v38  ;;  %v45723_v52 = vld [vmem:[#allocation282_spill] sm:$0xff] }
 0x4e8   :  { %38607 = vmatmul.mubr.msk.f32.vlgmr.msra.gmra.mxu1 %vm97_vm0, %v44002_v15  ;;  %38614 = vmatmul.mubr.msk.f32.vlgmr.msra.gmra.mxu0 %vm97_vm0, %v44002_v15  ;;  %v32183_v33 = vand.u32 2147483647, %v31940_v53  ;;  %v31690_v9 = vmul.f32 2.0, %v25556_v34  ;;  %v33201_v43 = vadd.f32 %v33200_v40, %v33199_v59  ;;  %v32186_v17 = vand.u32 2147483647, %v31943_v55  ;;  %v45722_v40 = vld [vmem:[#allocation281_spill] sm:$0xff] }
 0x4e9   :  { %38617 = vmatpush3.msra.mxu1 %v45716_v24  ;;  %38624 = vmatpush3.msra.mxu0 %v45717_v50  ;;  %v32201_v12 = vadd.f32 %v32200_v22, %v32199_v32  ;;  %v32185_v11 = vand.u32 2147483647, %v31942_v63  ;;  %v31816_v26 = vadd.f32 %v31688_v2, %v25406_v29  ;;  %v31819_v48 = vadd.f32 %v38160_v14, %v31691_v42  ;;  %v45724_v2 = vld [vmem:[#allocation283_spill] sm:$0xff] }
 0x4ea   :  { %38618 = vmatprep.subr.mxu1 %v45718_v3  ;;  %38625 = vmatprep.subr.mxu0 %v45719_v46  ;;  %v32202_v8 = vsel %vm97_vm0, %v32183_v33, 0.0  ;;  %v44260_v25 = vpop.f32.mrf.mxu1  ;;  %v31818_v31 = vadd.f32 %v31690_v9, %v25481_v38  ;;  %v32204_v29 = vsel %vm97_vm0, %v32184_v18, 0.0  ;;  %v31945_v21 = vadd.f32 %v44233_v4, %v31817_v49 }
 0x4eb   :  { %38619 = vmatpush3.msra.mxu1 %v45718_v3  ;;  %38626 = vmatpush3.msra.mxu0 %v45719_v46  ;;  %v32203_v56 = vadd.f32 %v32202_v8, %v32201_v12  ;;  %v38181_v39 = vpop.f32.mrf.mxu0  ;;  %v31944_v60 = vadd.f32 %v31816_v26, %v25556_v34  ;;  %v31693_v47 = vmul.f32 2.0, %v44260_v25  ;;  %v33177_v13 = vand.u32 2147483647, %v31660_v57 }
 0x4ec   :  { %38620 = vmatprep.mubr.msk.f32.mxu1 %vm97_vm0, %v43985_v10  ;;  %38627 = vmatprep.mubr.msk.f32.mxu0 %vm97_vm0, %v43985_v10  ;;  %v25631_v44 = vpop.f32.mrf.mxu1  ;;  %v33203_v61 = vadd.f32 %v33202_v0, %v33201_v43  ;;  %v31534_v54 = vadd.f32 %v44182_v23, %v43937_v20  ;;  %v32206_v58 = vsel %vm97_vm0, %v32185_v11, 0.0  ;;  %v32208_v16 = vsel %vm97_vm0, %v32186_v17, 0.0 }
 0x4ed   :  { %38630 = vmatprep.subr.mxu1 %v45720_v37  ;;  %38637 = vmatprep.subr.mxu0 %v45721_v1  ;;  %v32205_v7 = vadd.f32 %v32204_v29, %v32203_v56  ;;  %v25706_v41 = vpop.f32.mrf.mxu0  ;;  %v32187_v27 = vand.u32 2147483647, %v31944_v60  ;;  %v31692_v5 = vmul.f32 2.0, %v25631_v44  ;;  %v31946_v14 = vadd.f32 %v31818_v31, %v25631_v44  ;;  %v45726_v31 = vld [vmem:[#allocation285_spill] sm:$0xff] }
 0x4ee   :  { %38621 = vmatmul.mubr.msk.f32.vlgmr.msra.gmra.mxu1 %vm97_vm0, %v44002_v15  ;;  %38628 = vmatmul.mubr.msk.f32.vlgmr.msra.gmra.mxu0 %vm97_vm0, %v44002_v15  ;;  %v31947_v23 = vadd.f32 %v44260_v25, %v31819_v48  ;;  %v31694_v59 = vmul.f32 2.0, %v25706_v41  ;;  %v32188_v22 = vand.u32 2147483647, %v31945_v21  ;;  %v31695_v18 = vmul.f32 2.0, %v38181_v39 }
 0x4ef   :  { %38631 = vmatpush3.msra.mxu1 %v45720_v37  ;;  %38638 = vmatpush3.msra.mxu0 %v45721_v1  ;;  %v32207_v20 = vadd.f32 %v32206_v58, %v32205_v7  ;;  %v31821_v28 = vadd.f32 %v44233_v4, %v31693_v47  ;;  %v31820_v53 = vadd.f32 %v31692_v5, %v25556_v34  ;;  %v33178_v38 = vand.u32 2147483647, %v44266_v36  ;;  %v45727_v36 = vld [vmem:[#allocation286_spill] sm:$0xff]  ;;  %v45728_v1 = vld [vmem:[#allocation287_spill] sm:$0xff] }
 0x4f0   :  { %38632 = vmatprep.subr.mxu1 %v45722_v40  ;;  %38639 = vmatprep.subr.mxu0 %v45723_v52  ;;  %v31535_v24 = vadd.f32 %v43921_v51, %v44150_v35  ;;  %v31662_v50 = vadd.f32 %v31534_v54, %v43966_v19  ;;  %v33204_v4 = vsel %vm97_vm0, %v33177_v13, 0.0  ;;  %v32210_v49 = vsel %vm97_vm0, %v32187_v27, 0.0  ;;  %v45725_v51 = vld [vmem:[#allocation284_spill] sm:$0xff] }
 0x4f1   :  { %38633 = vmatpush3.msra.mxu1 %v45722_v40  ;;  %38640 = vmatpush3.msra.mxu0 %v45723_v52  ;;  %v32209_v32 = vadd.f32 %v32208_v16, %v32207_v20  ;;  %v38188_v55 = vpop.f32.mrf.mxu1  ;;  %v38195_v42 = vpop.f32.mrf.mxu0  ;;  %v32189_v34 = vand.u32 2147483647, %v31946_v14  ;;  %v31948_v33 = vadd.f32 %v31820_v53, %v25706_v41  ;;  %v33205_v19 = vadd.f32 %v33204_v4, %v33203_v61  ;;  %v45729_v13 = vld [vmem:[#allocation288_spill] sm:$0xff]  ;;  %v45730_v52 = vld [vmem:[#allocation289_spill] sm:$0xff]  ;;  %v45732_v4 = vld [vmem:[#allocation291_spill] sm:$0xff] }
 0x4f2   :  { %38634 = vmatprep.mubr.msk.f32.mxu1 %vm97_vm0, %v43985_v10  ;;  %38641 = vmatprep.mubr.msk.f32.mxu0 %vm97_vm0, %v43985_v10  ;;  %v32190_v63 = vand.u32 2147483647, %v31947_v23  ;;  %v31822_v0 = vadd.f32 %v31694_v59, %v25631_v44  ;;  %v32212_v57 = vsel %vm97_vm0, %v32188_v22, 0.0  ;;  %v31949_v12 = vadd.f32 %v38181_v39, %v31821_v28  ;;  %v45731_v22 = vld [vmem:[#allocation290_spill] sm:$0xff] }
 0x4f3   :  { %38644 = vmatprep.subr.mxu1 %v45724_v2  ;;  %38651 = vmatprep.subr.mxu0 %v45725_v51  ;;  %v32211_v35 = vadd.f32 %v32210_v49, %v32209_v32  ;;  %v25781_v9 = vpop.f32.mrf.mxu1  ;;  %v25856_v43 = vpop.f32.mrf.mxu0  ;;  %v31823_v3 = vadd.f32 %v44260_v25, %v31695_v18  ;;  %v31663_v46 = vadd.f32 %v43957_v62, %v31535_v24  ;;  %v33179_v8 = vand.u32 2147483647, %v31662_v50 }
 0x4f4   :  { %38635 = vmatmul.mubr.msk.f32.vlgmr.msra.gmra.mxu1 %vm97_vm0, %v44002_v15  ;;  %38642 = vmatmul.mubr.msk.f32.vlgmr.msra.gmra.mxu0 %vm97_vm0, %v44002_v15  ;;  %v32191_v26 = vand.u32 2147483647, %v31948_v33  ;;  %v33206_v56 = vsel %vm97_vm0, %v33178_v38, 0.0  ;;  %v32214_v17 = vsel %vm97_vm0, %v32189_v34, 0.0  ;;  %v32216_v48 = vsel %vm97_vm0, %v32190_v63, 0.0 }
 0x4f5   :  { %38645 = vmatpush3.msra.mxu1 %v45724_v2  ;;  %38652 = vmatpush3.msra.mxu0 %v45725_v51  ;;  %v32213_v11 = vadd.f32 %v32212_v57, %v32211_v35  ;;  %v33207_v25 = vadd.f32 %v33206_v56, %v33205_v19  ;;  %v31950_v62 = vadd.f32 %v31822_v0, %v25781_v9  ;;  %v32192_v60 = vand.u32 2147483647, %v31949_v12 }
 0x4f6   :  { %38646 = vmatprep.subr.mxu1 %v45726_v31  ;;  %38653 = vmatprep.subr.mxu0 %v45727_v36  ;;  %v31951_v47 = vadd.f32 %v38188_v55, %v31823_v3  ;;  %v33180_v61 = vand.u32 2147483647, %v31663_v46  ;;  %v33208_v54 = vsel %vm97_vm0, %v33179_v8, 0.0  ;;  %v32218_v41 = vsel %vm97_vm0, %v32191_v26, 0.0  ;;  %v45733_v3 = vld [vmem:[#allocation292_spill] sm:$0xff] }
 0x4f7   :  { %38647 = vmatpush3.msra.mxu1 %v45726_v31  ;;  %38654 = vmatpush3.msra.mxu0 %v45727_v36  ;;  %v32215_v39 = vadd.f32 %v32214_v17, %v32213_v11  ;;  %v38202_v29 = vpop.f32.mrf.mxu1  ;;  %v38209_v21 = vpop.f32.mrf.mxu0  ;;  %v33209_v23 = vadd.f32 %v33208_v54, %v33207_v25  ;;  %v32193_v40 = vand.u32 2147483647, %v31950_v62  ;;  %v32220_v18 = vsel %vm97_vm0, %v32192_v60, 0.0 }
 0x4f8   :  { %38648 = vmatprep.mubr.msk.f32.mxu1 %vm97_vm0, %v43985_v10  ;;  %38655 = vmatprep.mubr.msk.f32.mxu0 %vm97_vm0, %v43985_v10  ;;  %v31697_v44 = vmul.f32 2.0, %v38202_v29  ;;  %v31699_v37 = vmul.f32 2.0, %v38209_v21  ;;  %v32194_v28 = vand.u32 2147483647, %v31951_v47  ;;  %v33210_v24 = vsel %vm97_vm0, %v33180_v61, 0.0 }
 0x4f9   :  { %38658 = vmatprep.subr.mxu1 %v45728_v1  ;;  %38665 = vmatprep.subr.mxu0 %v45729_v13  ;;  %v32217_v7 = vadd.f32 %v32216_v48, %v32215_v39  ;;  %v25931_v58 = vpop.f32.mrf.mxu1  ;;  %v26006_v27 = vpop.f32.mrf.mxu0  ;;  %v33211_v51 = vadd.f32 %v33210_v24, %v33209_v23  ;;  %v32222_v19 = vsel %vm97_vm0, %v32193_v40, 0.0 }
 0x4fa   :  { %38649 = vmatmul.mubr.msk.f32.vlgmr.msra.gmra.mxu1 %vm97_vm0, %v44002_v15  ;;  %38656 = vmatmul.mubr.msk.f32.vlgmr.msra.gmra.mxu0 %vm97_vm0, %v44002_v15  ;;  %v31825_v5 = vadd.f32 %v38195_v42, %v31697_v44  ;;  %v31696_v14 = vmul.f32 2.0, %v25931_v58  ;;  %v31698_v16 = vmul.f32 2.0, %v26006_v27  ;;  %v31827_v20 = vadd.f32 %v38202_v29, %v31699_v37 }
 0x4fb   :  { %38659 = vmatpush3.msra.mxu1 %v45728_v1  ;;  %38666 = vmatpush3.msra.mxu0 %v45729_v13  ;;  %v32219_v59 = vadd.f32 %v32218_v41, %v32217_v7  ;;  %v32224_v12 = vsel %vm97_vm0, %v32194_v28, 0.0 }
 0x4fc   :  { %38660 = vmatprep.subr.mxu1 %v45730_v52  ;;  %38667 = vmatprep.subr.mxu0 %v45731_v22  ;;  %v31953_v53 = vadd.f32 %v38209_v21, %v31825_v5  ;;  %v31824_v38 = vadd.f32 %v31696_v14, %v25856_v43  ;;  %v31826_v55 = vadd.f32 %v31698_v16, %v25931_v58 }
 0x4fd   :  { %38661 = vmatpush3.msra.mxu1 %v45730_v52  ;;  %38668 = vmatpush3.msra.mxu0 %v45731_v22  ;;  %v38216_v50 = vpop.f32.mrf.mxu1  ;;  %v38223_v32 = vpop.f32.mrf.mxu0  ;;  %v32221_v42 = vadd.f32 %v32220_v18, %v32219_v59 }
 0x4fe   :  { %38662 = vmatprep.mubr.msk.f32.mxu1 %vm97_vm0, %v43985_v10  ;;  %38672 = vmatprep.subr.mxu1 %v45732_v4  ;;  %v32353_v49 = vand.u32 2147483647, %v31953_v53  ;;  %v31952_v34 = vadd.f32 %v31824_v38, %v26006_v27  ;;  %v31701_v33 = vmul.f32 2.0, %v38216_v50  ;;  %v31955_v2 = vadd.f32 %v38216_v50, %v31827_v20 }
 0x4ff   :  { %38663 = vmatmul.mubr.msk.f32.vlgmr.msra.gmra.mxu1 %vm97_vm0, %v44002_v15  ;;  %32864 = vadd.xlane.f32.xlu1 %v43738_v6  ;;  %v31703_v35 = vmul.f32 2.0, %v38223_v32  ;;  %v26081_v63 = vpop.f32.mrf.mxu1  ;;  %v26156_v9 = vpop.f32.mrf.mxu0  ;;  %v32223_v57 = vadd.f32 %v32222_v19, %v32221_v42 }
 0x500   :  { %38673 = vmatpush3.msra.mxu1 %v45732_v4  ;;  %38669 = vmatprep.mubr.msk.f32.mxu0 %vm97_vm0, %v43985_v10  ;;  %v32352_v0 = vand.u32 2147483647, %v31952_v34  ;;  %v31829_v43 = vadd.f32 %v38209_v21, %v31701_v33  ;;  %v32355_v6 = vand.u32 2147483647, %v31955_v2  ;;  %v31700_v46 = vmul.f32 2.0, %v26081_v63 }
 0x501   :  { %38674 = vmatprep.subr.mxu1 %v45733_v3  ;;  %38670 = vmatmul.mubr.msk.f32.vlgmr.msra.gmra.mxu0 %vm97_vm0, %v44002_v15  ;;  %v31954_v8 = vadd.f32 %v31826_v55, %v26081_v63  ;;  %v31702_v11 = vmul.f32 2.0, %v26156_v9  ;;  %v32369_v26 = vsel %vm97_vm0, %v32353_v49, 0.0  ;;  %v31831_v56 = vadd.f32 %v38216_v50, %v31703_v35 }
 0x502   :  { %38675 = vmatpush3.msra.mxu1 %v45733_v3  ;;  %38676 = vmatprep.mubr.msk.f32.mxu1 %vm97_vm0, %v43985_v10  ;;  %v32368_v31 = vsel %vm97_vm0, %v32352_v0, 0.0  ;;  %v31957_v36 = vadd.f32 %v38223_v32, %v31829_v43  ;;  %v31828_v48 = vadd.f32 %v31700_v46, %v26006_v27  ;;  %v32225_v10 = vadd.f32 %v32224_v12, %v32223_v57 }
 0x503   :  { %38677 = vmatmul.mubr.msk.f32.vlgmr.msra.gmra.mxu1 %vm97_vm0, %v44002_v15  ;;  %33038 = vadd.xlane.f32.xlu0 %v43897_v30  ;;  %v32370_v17 = vadd.f32 %v32369_v26, %v32368_v31  ;;  %v32354_v25 = vand.u32 2147483647, %v31954_v8  ;;  %v38230_v39 = vpop.f32.mrf.mxu1  ;;  %v38237_v62 = vpop.f32.mrf.mxu0  ;;  %v31830_v29 = vadd.f32 %v31702_v11, %v26081_v63  ;;  %v32373_v60 = vsel %vm97_vm0, %v32355_v6, 0.0 }
 0x504   :  { %33212 = vadd.xlane.f32.xlu1 %v33211_v51  ;;  %v31705_v21 = vmul.f32 2.0, %v38230_v39  ;;  %v32357_v47 = vand.u32 2147483647, %v31957_v36  ;;  %v31956_v37 = vadd.f32 %v31828_v48, %v26156_v9  ;;  %v44365_v15 = vpop.xlane.xlu0 %32459  ;;  %v31959_v61 = vadd.f32 %v38230_v39, %v31831_v56 }
 0x505   :  { %v32371_v44 = vsel %vm97_vm0, %v32354_v25, 0.0  ;;  %v26231_v1 = vpop.f32.mrf.mxu1  ;;  %v26306_v13 = vpop.f32.mrf.mxu0  ;;  %v31707_v54 = vmul.f32 2.0, %v38237_v62 }
 0x506   :  { %v32372_v30 = vadd.f32 %v32371_v44, %v32370_v17  ;;  %v31833_v7 = vadd.f32 %v38223_v32, %v31705_v21  ;;  %v32356_v41 = vand.u32 2147483647, %v31956_v37  ;;  %v31704_v58 = vmul.f32 2.0, %v26231_v1 }
 0x507   :  { %v31958_v27 = vadd.f32 %v31830_v29, %v26231_v1  ;;  %v31706_v5 = vmul.f32 2.0, %v26306_v13  ;;  %v32359_v28 = vand.u32 2147483647, %v31959_v61  ;;  %v32377_v38 = vsel %vm97_vm0, %v32357_v47, 0.0 }
 0x508   :  { %v32374_v14 = vadd.f32 %v32373_v60, %v32372_v30  ;;  %32226 = vadd.xlane.f32.xlu1 %v32225_v10  ;;  %v32375_v16 = vsel %vm97_vm0, %v32356_v41, 0.0  ;;  %v31832_v23 = vadd.f32 %v31704_v58, %v26156_v9  ;;  %v44368_v22 = vpop.xlane.xlu0 %32807  ;;  %v31961_v53 = vadd.f32 %v38237_v62, %v31833_v7 }
 0x509   :  { %v32358_v20 = vand.u32 2147483647, %v31958_v27  ;;  %v38244_v59 = vpop.f32.mrf.mxu1  ;;  %v38251_v40 = vpop.f32.mrf.mxu0  ;;  %v31834_v52 = vadd.f32 %v31706_v5, %v26231_v1  ;;  %v31835_v32 = vadd.f32 %v38230_v39, %v31707_v54  ;;  %v32381_v19 = vsel %vm97_vm0, %v32359_v28, 0.0 }
 0x50a   :  { %v32376_v18 = vadd.f32 %v32375_v16, %v32374_v14  ;;  %v31960_v24 = vadd.f32 %v31832_v23, %v26306_v13  ;;  %v31709_v50 = vmul.f32 2.0, %v38244_v59  ;;  %v32361_v35 = vand.u32 2147483647, %v31961_v53 }
 0x50b   :  { %v26381_v55 = vpop.f32.mrf.mxu1  ;;  %v26456_v42 = vpop.f32.mrf.mxu0  ;;  %v32379_v49 = vsel %vm97_vm0, %v32358_v20, 0.0  ;;  %v31963_v0 = vadd.f32 %v38244_v59, %v31835_v32  ;;  %v31711_v43 = vmul.f32 2.0, %v38251_v40 }
 0x50c   :  { %v32378_v4 = vadd.f32 %v32377_v38, %v32376_v18  ;;  %v32360_v34 = vand.u32 2147483647, %v31960_v24  ;;  %v31708_v33 = vmul.f32 2.0, %v26381_v55  ;;  %v31962_v2 = vadd.f32 %v31834_v52, %v26381_v55  ;;  %v44373_v9 = vpop.xlane.xlu0 %33155 }
 0x50d   :  { %v31710_v51 = vmul.f32 2.0, %v26456_v42  ;;  %v31837_v57 = vadd.f32 %v38237_v62, %v31709_v50  ;;  %v32385_v48 = vsel %vm97_vm0, %v32361_v35, 0.0  ;;  %v32363_v39 = vand.u32 2147483647, %v31963_v0 }
 0x50e   :  { %v32380_v63 = vadd.f32 %v32379_v49, %v32378_v4  ;;  %v31836_v12 = vadd.f32 %v31708_v33, %v26306_v13  ;;  %v32383_v8 = vsel %vm97_vm0, %v32360_v34, 0.0  ;;  %v32362_v11 = vand.u32 2147483647, %v31962_v2 }
 0x50f   :  { %v38258_v3 = vpop.f32.mrf.mxu1  ;;  %v31838_v36 = vadd.f32 %v31710_v51, %v26381_v55  ;;  %v31965_v29 = vadd.f32 %v38251_v40, %v31837_v57  ;;  %v31839_v21 = vadd.f32 %v38244_v59, %v31711_v43  ;;  %v32389_v54 = vsel %vm97_vm0, %v32363_v39, 0.0 }
 0x510   :  { %v32382_v6 = vadd.f32 %v32381_v19, %v32380_v63  ;;  %v38265_v46 = vpop.f32.mrf.mxu0  ;;  %v31964_v26 = vadd.f32 %v31836_v12, %v26456_v42  ;;  %v32387_v60 = vsel %vm97_vm0, %v32362_v11, 0.0 }
 0x511   :  { %v26531_v31 = vpop.f32.mrf.mxu1  ;;  %v32365_v7 = vand.u32 2147483647, %v31965_v29  ;;  %v31967_v41 = vadd.f32 %v38258_v3, %v31839_v21 }
 0x512   :  { %v32384_v56 = vadd.f32 %v32383_v8, %v32382_v6  ;;  %v26606_v17 = vpop.f32.mrf.mxu0  ;;  %v32364_v47 = vand.u32 2147483647, %v31964_v26  ;;  %v31966_v44 = vadd.f32 %v31838_v36, %v26531_v31 }
 0x513   :  { %v32170_v25 = vpop.xlane.xlu0 %32169  ;;  %v32393_v50 = vsel %vm97_vm0, %v32365_v7, 0.0  ;;  %v32367_v32 = vand.u32 2147483647, %v31967_v41 }
 0x514   :  { %v32171_v10 = vrot.slane %v32170_v25, 4  ;;  %v32386_v62 = vadd.f32 %v32385_v48, %v32384_v56  ;;  %v32391_v59 = vsel %vm97_vm0, %v32364_v47, 0.0  ;;  %v32366_v40 = vand.u32 2147483647, %v31966_v44 }
 0x515   :  { %v38272_v37 = vpop.f32.mrf.mxu1  ;;  %v32397_v47 = vsel %vm97_vm0, %v32367_v32, 0.0 }
 0x516   :  { %v32172_v1 = vadd.f32 %v32171_v10, %v32170_v25  ;;  %v32388_v13 = vadd.f32 %v32387_v60, %v32386_v62  ;;  %v31713_v30 = vmul.f32 2.0, %v38272_v37  ;;  %v38279_v61 = vpop.f32.mrf.mxu0  ;;  %v32395_v51 = vsel %vm97_vm0, %v32366_v40, 0.0 }
 0x517   :  { %v31715_v58 = vmul.f32 2.0, %v38279_v61  ;;  %v26681_v27 = vpop.f32.mrf.mxu1 }
 0x518   :  { %v32173_v5 = vrot.slane %v32172_v1, 2  ;;  %v32390_v14 = vadd.f32 %v32389_v54, %v32388_v13  ;;  %v31841_v16 = vadd.f32 %v38265_v46, %v31713_v30  ;;  %v31712_v20 = vmul.f32 2.0, %v26681_v27  ;;  %v26756_v23 = vpop.f32.mrf.mxu0 }
 0x519   :  { %v31714_v52 = vmul.f32 2.0, %v26756_v23  ;;  %v31843_v18 = vadd.f32 %v38272_v37, %v31715_v58 }
 0x51a   :  { %v32174_v28 = vadd.f32 %v32173_v5, %v32172_v1  ;;  %v32392_v53 = vadd.f32 %v32391_v59, %v32390_v14  ;;  %v31969_v38 = vadd.f32 %v38279_v61, %v31841_v16  ;;  %v31840_v24 = vadd.f32 %v31712_v20, %v26606_v17 }
 0x51b   :  { %v38286_v55 = vpop.f32.mrf.mxu1  ;;  %v31842_v42 = vadd.f32 %v31714_v52, %v26681_v27 }
 0x51c   :  { %v32175_v4 = vrot.slane %v32174_v28, 1  ;;  %v32527_v49 = vand.u32 2147483647, %v31969_v38  ;;  %v31968_v34 = vadd.f32 %v31840_v24, %v26756_v23  ;;  %v31717_v33 = vmul.f32 2.0, %v38286_v55  ;;  %v38293_v2 = vpop.f32.mrf.mxu0 }
 0x51d   :  { %v31971_v19 = vadd.f32 %v38286_v55, %v31843_v18  ;;  %v31719_v35 = vmul.f32 2.0, %v38293_v2  ;;  %v26831_v63 = vpop.f32.mrf.mxu1  ;;  %v32394_v0 = vadd.f32 %v32393_v50, %v32392_v53 }
 0x51e   :  { %v32176_v43 = vadd.f32 %v32175_v4, %v32174_v28  ;;  %v32543_v57 = vsel %vm97_vm0, %v32527_v49, 0.0  ;;  %v32526_v12 = vand.u32 2147483647, %v31968_v34  ;;  %v31845_v3 = vadd.f32 %v38279_v61, %v31717_v33  ;;  %v26906_v6 = vpop.f32.mrf.mxu0 }
 0x51f   :  { %v32529_v46 = vand.u32 2147483647, %v31971_v19  ;;  %v31716_v8 = vmul.f32 2.0, %v26831_v63  ;;  %v31970_v11 = vadd.f32 %v31842_v42, %v26831_v63  ;;  %v31718_v26 = vmul.f32 2.0, %v26906_v6 }
 0x520   :  { %38681 = vpush %v32176_v43  ;;  %v32542_v31 = vsel %vm97_vm0, %v32526_v12, 0.0  ;;  %v31973_v36 = vadd.f32 %v38293_v2, %v31845_v3  ;;  %v31847_v56 = vadd.f32 %v38286_v55, %v31719_v35  ;;  %v32396_v17 = vadd.f32 %v32395_v51, %v32394_v0 }
 0x521   :  { %v32544_v25 = vadd.f32 %v32543_v57, %v32542_v31  ;;  %v32528_v48 = vand.u32 2147483647, %v31970_v11  ;;  %v31844_v39 = vadd.f32 %v31716_v8, %v26756_v23  ;;  %v38300_v29 = vpop.f32.mrf.mxu1  ;;  %v32547_v21 = vsel %vm97_vm0, %v32529_v46, 0.0 }
 0x522   :  { %v31721_v10 = vmul.f32 2.0, %v38300_v29  ;;  %v38307_v62 = vpop.f32.mrf.mxu0  ;;  %v31846_v60 = vadd.f32 %v31718_v26, %v26831_v63  ;;  %v32531_v44 = vand.u32 2147483647, %v31973_v36  ;;  %v32398_v30 = vadd.f32 %v32397_v47, %v32396_v17 }
 0x523   :  { %v32545_v37 = vsel %vm97_vm0, %v32528_v48, 0.0  ;;  %v31972_v1 = vadd.f32 %v31844_v39, %v26906_v6  ;;  %v26981_v13 = vpop.f32.mrf.mxu1  ;;  %v31975_v54 = vadd.f32 %v38300_v29, %v31847_v56  ;;  %v31723_v7 = vmul.f32 2.0, %v38307_v62 }
 0x524   :  { %v32546_v61 = vadd.f32 %v32545_v37, %v32544_v25  ;;  %v31849_v41 = vadd.f32 %v38293_v2, %v31721_v10  ;;  %v27056_v58 = vpop.f32.mrf.mxu0  ;;  %v31720_v5 = vmul.f32 2.0, %v26981_v13  ;;  %v31974_v14 = vadd.f32 %v31846_v60, %v26981_v13  ;;  %32399 = vadd.xlane.f32.xlu1 %v32398_v30 }
 0x525   :  { %v32530_v27 = vand.u32 2147483647, %v31972_v1  ;;  %v31722_v16 = vmul.f32 2.0, %v27056_v58  ;;  %v32533_v53 = vand.u32 2147483647, %v31975_v54  ;;  %v31851_v38 = vadd.f32 %v38300_v29, %v31723_v7 }
 0x526   :  { %v32548_v20 = vadd.f32 %v32547_v21, %v32546_v61  ;;  %v32532_v59 = vand.u32 2147483647, %v31974_v14  ;;  %v31848_v40 = vadd.f32 %v31720_v5, %v26906_v6  ;;  %v32551_v50 = vsel %vm97_vm0, %v32531_v44, 0.0 }
 0x527   :  { %v32549_v23 = vsel %vm97_vm0, %v32530_v27, 0.0  ;;  %v38314_v52 = vpop.f32.mrf.mxu1  ;;  %v31850_v18 = vadd.f32 %v31722_v16, %v26981_v13  ;;  %v31977_v32 = vadd.f32 %v38307_v62, %v31849_v41  ;;  %v32555_v63 = vsel %vm97_vm0, %v32533_v53, 0.0 }
 0x528   :  { %v32550_v28 = vadd.f32 %v32549_v23, %v32548_v20  ;;  %v38321_v24 = vpop.f32.mrf.mxu0  ;;  %v31976_v55 = vadd.f32 %v31848_v40, %v27056_v58  ;;  %v31725_v42 = vmul.f32 2.0, %v38314_v52  ;;  %v32553_v34 = vsel %vm97_vm0, %v32532_v59, 0.0 }
 0x529   :  { %v27131_v4 = vpop.f32.mrf.mxu1  ;;  %v31979_v43 = vadd.f32 %v38314_v52, %v31851_v38  ;;  %v32535_v57 = vand.u32 2147483647, %v31977_v32  ;;  %v31727_v12 = vmul.f32 2.0, %v38321_v24 }
 0x52a   :  { %v32552_v49 = vadd.f32 %v32551_v50, %v32550_v28  ;;  %v27206_v33 = vpop.f32.mrf.mxu0  ;;  %v32534_v2 = vand.u32 2147483647, %v31976_v55  ;;  %v31724_v51 = vmul.f32 2.0, %v27131_v4  ;;  %v31978_v19 = vadd.f32 %v31850_v18, %v27131_v4 }
 0x52b   :  { %v31726_v35 = vmul.f32 2.0, %v27206_v33  ;;  %v31853_v3 = vadd.f32 %v38307_v62, %v31725_v42  ;;  %v32537_v25 = vand.u32 2147483647, %v31979_v43  ;;  %v32559_v29 = vsel %vm97_vm0, %v32535_v57, 0.0 }
 0x52c   :  { %v32554_v0 = vadd.f32 %v32553_v34, %v32552_v49  ;;  %v31852_v6 = vadd.f32 %v31724_v51, %v27056_v58  ;;  %v32557_v31 = vsel %vm97_vm0, %v32534_v2, 0.0  ;;  %v32536_v36 = vand.u32 2147483647, %v31978_v19 }
 0x52d   :  { %v31854_v26 = vadd.f32 %v31726_v35, %v27131_v4  ;;  %v31981_v21 = vadd.f32 %v38321_v24, %v31853_v3  ;;  %v31855_v10 = vadd.f32 %v38314_v52, %v31727_v12  ;;  %v32563_v37 = vsel %vm97_vm0, %v32537_v25, 0.0 }
 0x52e   :  { %v32556_v46 = vadd.f32 %v32555_v63, %v32554_v0  ;;  %v38328_v8 = vpop.f32.mrf.mxu1  ;;  %v38335_v11 = vpop.f32.mrf.mxu0  ;;  %v31980_v56 = vadd.f32 %v31852_v6, %v27206_v33  ;;  %v32561_v44 = vsel %vm97_vm0, %v32536_v36, 0.0 }
 0x52f   :  { %v32539_v61 = vand.u32 2147483647, %v31981_v21  ;;  %v31983_v54 = vadd.f32 %v38328_v8, %v31855_v10 }
 0x530   :  { %v32558_v17 = vadd.f32 %v32557_v31, %v32556_v46  ;;  %v27281_v48 = vpop.f32.mrf.mxu1  ;;  %v27356_v39 = vpop.f32.mrf.mxu0  ;;  %v32538_v47 = vand.u32 2147483647, %v31980_v56 }
 0x531   :  { %v31982_v62 = vadd.f32 %v31854_v26, %v27281_v48  ;;  %v32567_v18 = vsel %vm97_vm0, %v32539_v61, 0.0  ;;  %v32541_v28 = vand.u32 2147483647, %v31983_v54 }
 0x532   :  { %v32560_v60 = vadd.f32 %v32559_v29, %v32558_v17  ;;  %v32565_v27 = vsel %vm97_vm0, %v32538_v47, 0.0 }
 0x533   :  { %v32540_v5 = vand.u32 2147483647, %v31982_v62  ;;  %v32571_v57 = vsel %vm97_vm0, %v32541_v28, 0.0 }
 0x534   :  { %v32562_v1 = vadd.f32 %v32561_v44, %v32560_v60  ;;  %v38342_v13 = vpop.f32.mrf.mxu1  ;;  %v38349_v30 = vpop.f32.mrf.mxu0 }
 0x535   :  { %v31729_v7 = vmul.f32 2.0, %v38342_v13  ;;  %v31731_v41 = vmul.f32 2.0, %v38349_v30  ;;  %v32569_v24 = vsel %vm97_vm0, %v32540_v5, 0.0 }
 0x536   :  { %v32564_v58 = vadd.f32 %v32563_v37, %v32562_v1  ;;  %v27431_v14 = vpop.f32.mrf.mxu1  ;;  %v27506_v16 = vpop.f32.mrf.mxu0 }
 0x537   :  { %v31857_v20 = vadd.f32 %v38335_v11, %v31729_v7  ;;  %v31728_v23 = vmul.f32 2.0, %v27431_v14  ;;  %v31730_v59 = vmul.f32 2.0, %v27506_v16  ;;  %v31859_v40 = vadd.f32 %v38342_v13, %v31731_v41 }
 0x538   :  { %v32566_v52 = vadd.f32 %v32565_v27, %v32564_v58 }
 0x539   :  { %v31985_v53 = vadd.f32 %v38349_v30, %v31857_v20  ;;  %v31856_v38 = vadd.f32 %v31728_v23, %v27356_v39  ;;  %v31858_v55 = vadd.f32 %v31730_v59, %v27431_v14 }
 0x53a   :  { %v38356_v50 = vpop.f32.mrf.mxu1  ;;  %v38363_v32 = vpop.f32.mrf.mxu0  ;;  %v32568_v42 = vadd.f32 %v32567_v18, %v32566_v52 }
 0x53b   :  { %v32701_v4 = vand.u32 2147483647, %v31985_v53  ;;  %v31984_v49 = vadd.f32 %v31856_v38, %v27506_v16  ;;  %v31733_v34 = vmul.f32 2.0, %v38356_v50  ;;  %v31987_v33 = vadd.f32 %v38356_v50, %v31859_v40 }
 0x53c   :  { %v31735_v2 = vmul.f32 2.0, %v38363_v32  ;;  %v27581_v51 = vpop.f32.mrf.mxu1  ;;  %v27656_v19 = vpop.f32.mrf.mxu0  ;;  %v32570_v35 = vadd.f32 %v32569_v24, %v32568_v42 }
 0x53d   :  { %v32717_v63 = vsel %vm97_vm0, %v32701_v4, 0.0  ;;  %v32700_v0 = vand.u32 2147483647, %v31984_v49  ;;  %v31861_v43 = vadd.f32 %v38349_v30, %v31733_v34  ;;  %v32703_v12 = vand.u32 2147483647, %v31987_v33 }
 0x53e   :  { %v31732_v3 = vmul.f32 2.0, %v27581_v51  ;;  %v31986_v6 = vadd.f32 %v31858_v55, %v27581_v51  ;;  %v31734_v46 = vmul.f32 2.0, %v27656_v19  ;;  %v31863_v26 = vadd.f32 %v38356_v50, %v31735_v2 }
 0x53f   :  { %v32716_v8 = vsel %vm97_vm0, %v32700_v0, 0.0  ;;  %v31989_v11 = vadd.f32 %v38363_v32, %v31861_v43  ;;  %v32572_v31 = vadd.f32 %v32571_v57, %v32570_v35  ;;  %v32721_v21 = vsel %vm97_vm0, %v32703_v12, 0.0 }
 0x540   :  { %v32718_v36 = vadd.f32 %v32717_v63, %v32716_v8  ;;  %v32702_v56 = vand.u32 2147483647, %v31986_v6  ;;  %v31860_v17 = vadd.f32 %v31732_v3, %v27506_v16  ;;  %v38370_v25 = vpop.f32.mrf.mxu1  ;;  %v38377_v48 = vpop.f32.mrf.mxu0  ;;  %v31862_v39 = vadd.f32 %v31734_v46, %v27581_v51 }
 0x541   :  { %v31737_v29 = vmul.f32 2.0, %v38370_v25  ;;  %32573 = vadd.xlane.f32.xlu0 %v32572_v31  ;;  %v32705_v10 = vand.u32 2147483647, %v31989_v11  ;;  %v31991_v1 = vadd.f32 %v38370_v25, %v31863_v26  ;;  %v31739_v13 = vmul.f32 2.0, %v38377_v48 }
 0x542   :  { %v32719_v60 = vsel %vm97_vm0, %v32702_v56, 0.0  ;;  %v31988_v47 = vadd.f32 %v31860_v17, %v27656_v19  ;;  %v27731_v62 = vpop.f32.mrf.mxu1  ;;  %v27806_v44 = vpop.f32.mrf.mxu0 }
 0x543   :  { %v32720_v37 = vadd.f32 %v32719_v60, %v32718_v36  ;;  %v31865_v30 = vadd.f32 %v38363_v32, %v31737_v29  ;;  %v31736_v54 = vmul.f32 2.0, %v27731_v62  ;;  %v31990_v7 = vadd.f32 %v31862_v39, %v27731_v62 }
 0x544   :  { %v32704_v61 = vand.u32 2147483647, %v31988_v47  ;;  %v31738_v41 = vmul.f32 2.0, %v27806_v44  ;;  %v32725_v59 = vsel %vm97_vm0, %v32705_v10, 0.0  ;;  %v32707_v52 = vand.u32 2147483647, %v31991_v1 }
 0x545   :  { %v32722_v58 = vadd.f32 %v32721_v21, %v32720_v37  ;;  %v32706_v5 = vand.u32 2147483647, %v31990_v7  ;;  %v31864_v14 = vadd.f32 %v31736_v54, %v27656_v19  ;;  %v31993_v18 = vadd.f32 %v38377_v48, %v31865_v30 }
 0x546   :  { %v32723_v27 = vsel %vm97_vm0, %v32704_v61, 0.0  ;;  %v38384_v16 = vpop.f32.mrf.mxu1  ;;  %v38391_v20 = vpop.f32.mrf.mxu0  ;;  %v31866_v23 = vadd.f32 %v31738_v41, %v27731_v62  ;;  %v31867_v38 = vadd.f32 %v38370_v25, %v31739_v13  ;;  %v32729_v33 = vsel %vm97_vm0, %v32707_v52, 0.0 }
 0x547   :  { %v32724_v40 = vadd.f32 %v32723_v27, %v32722_v58  ;;  %v31992_v28 = vadd.f32 %v31864_v14, %v27806_v44  ;;  %v31741_v53 = vmul.f32 2.0, %v38384_v16  ;;  %v32727_v55 = vsel %vm97_vm0, %v32706_v5, 0.0 }
 0x548   :  { %v27881_v24 = vpop.f32.mrf.mxu1  ;;  %v27956_v50 = vpop.f32.mrf.mxu0  ;;  %v31743_v4 = vmul.f32 2.0, %v38391_v20  ;;  %v32709_v19 = vand.u32 2147483647, %v31993_v18  ;;  %v31995_v35 = vadd.f32 %v38384_v16, %v31867_v38 }
 0x549   :  { %v32726_v32 = vadd.f32 %v32725_v59, %v32724_v40  ;;  %v32708_v42 = vand.u32 2147483647, %v31992_v28  ;;  %v31740_v49 = vmul.f32 2.0, %v27881_v24  ;;  %v31994_v34 = vadd.f32 %v31866_v23, %v27881_v24 }
 0x54a   :  { %v31742_v51 = vmul.f32 2.0, %v27956_v50  ;;  %v31869_v63 = vadd.f32 %v38377_v48, %v31741_v53  ;;  %v31871_v8 = vadd.f32 %v38384_v16, %v31743_v4  ;;  %v32733_v56 = vsel %vm97_vm0, %v32709_v19, 0.0 }
 0x54b   :  { %v32728_v2 = vadd.f32 %v32727_v55, %v32726_v32  ;;  %v31868_v0 = vadd.f32 %v31740_v49, %v27806_v44  ;;  %v32731_v3 = vsel %vm97_vm0, %v32708_v42, 0.0  ;;  %v32710_v6 = vand.u32 2147483647, %v31994_v34 }
 0x54c   :  { %v38398_v43 = vpop.f32.mrf.mxu1  ;;  %v31870_v31 = vadd.f32 %v31742_v51, %v27881_v24  ;;  %v32711_v17 = vand.u32 2147483647, %v31995_v35  ;;  %v31997_v25 = vadd.f32 %v38391_v20, %v31869_v63 }
 0x54d   :  { %v32730_v57 = vadd.f32 %v32729_v33, %v32728_v2  ;;  %v38405_v12 = vpop.f32.mrf.mxu0  ;;  %v31996_v46 = vadd.f32 %v31868_v0, %v27956_v50  ;;  %v32735_v48 = vsel %vm97_vm0, %v32710_v6, 0.0  ;;  %v31999_v21 = vadd.f32 %v38398_v43, %v31871_v8 }
 0x54e   :  { %v28031_v11 = vpop.f32.mrf.mxu1  ;;  %v32737_v37 = vsel %vm97_vm0, %v32711_v17, 0.0  ;;  %v32713_v1 = vand.u32 2147483647, %v31997_v25 }
 0x54f   :  { %v32732_v26 = vadd.f32 %v32731_v3, %v32730_v57  ;;  %v28106_v36 = vpop.f32.mrf.mxu0  ;;  %v32712_v29 = vand.u32 2147483647, %v31996_v46  ;;  %v31998_v47 = vadd.f32 %v31870_v31, %v28031_v11  ;;  %v32715_v27 = vand.u32 2147483647, %v31999_v21 }
 0x550   :  { %v32741_v40 = vsel %vm97_vm0, %v32713_v1, 0.0 }
 0x551   :  { %v32734_v39 = vadd.f32 %v32733_v56, %v32732_v26  ;;  %v32739_v58 = vsel %vm97_vm0, %v32712_v29, 0.0  ;;  %v32714_v20 = vand.u32 2147483647, %v31998_v47  ;;  %v32745_v4 = vsel %vm97_vm0, %v32715_v27, 0.0  ;;  %s38682_s4 = spop %38681 }
 0x552   :  { %v38412_v10 = vpop.f32.mrf.mxu1  ;;  %s32178_s17 = sadd.f32 %s38682_s4, %s38680_s2 }
 0x553   :  { %v32736_v60 = vadd.f32 %v32735_v48, %v32734_v39  ;;  %v31745_v62 = vmul.f32 2.0, %v38412_v10  ;;  %v38419_v44 = vpop.f32.mrf.mxu0  ;;  %v32743_v49 = vsel %vm97_vm0, %v32714_v20, 0.0 }
 0x554   :  { %v31747_v13 = vmul.f32 2.0, %v38419_v44  ;;  %v28181_v30 = vpop.f32.mrf.mxu1 }
 0x555   :  { %v32738_v61 = vadd.f32 %v32737_v37, %v32736_v60  ;;  %v31873_v54 = vadd.f32 %v38405_v12, %v31745_v62  ;;  %v31744_v7 = vmul.f32 2.0, %v28181_v30  ;;  %v28256_v41 = vpop.f32.mrf.mxu0 }
 0x556   :  { %v31746_v5 = vmul.f32 2.0, %v28256_v41  ;;  %v31875_v14 = vadd.f32 %v38412_v10, %v31747_v13 }
 0x557   :  { %v32740_v16 = vadd.f32 %v32739_v58, %v32738_v61  ;;  %v32001_v23 = vadd.f32 %v38419_v44, %v31873_v54  ;;  %v31872_v59 = vadd.f32 %v31744_v7, %v28106_v36 }
 0x558   :  { %v38426_v52 = vpop.f32.mrf.mxu1  ;;  %v31874_v18 = vadd.f32 %v31746_v5, %v28181_v30 }
 0x559   :  { %v32875_v28 = vand.u32 2147483647, %v32001_v23  ;;  %v32000_v53 = vadd.f32 %v31872_v59, %v28256_v41  ;;  %v31749_v38 = vmul.f32 2.0, %v38426_v52  ;;  %v32003_v24 = vadd.f32 %v38426_v52, %v31875_v14  ;;  %v38433_v50 = vpop.f32.mrf.mxu0 }
 0x55a   :  { %v31751_v32 = vmul.f32 2.0, %v38433_v50  ;;  %v28331_v55 = vpop.f32.mrf.mxu1  ;;  %v32742_v42 = vadd.f32 %v32741_v40, %v32740_v16 }
 0x55b   :  { %v32891_v34 = vsel %vm97_vm0, %v32875_v28, 0.0  ;;  %v32874_v33 = vand.u32 2147483647, %v32000_v53  ;;  %v31877_v2 = vadd.f32 %v38419_v44, %v31749_v38  ;;  %v28406_v51 = vpop.f32.mrf.mxu0  ;;  %v32877_v19 = vand.u32 2147483647, %v32003_v24 }
 0x55c   :  { %v31748_v35 = vmul.f32 2.0, %v28331_v55  ;;  %v32002_v63 = vadd.f32 %v31874_v18, %v28331_v55  ;;  %v31750_v0 = vmul.f32 2.0, %v28406_v51  ;;  %v31879_v12 = vadd.f32 %v38426_v52, %v31751_v32 }
 0x55d   :  { %v32890_v43 = vsel %vm97_vm0, %v32874_v33, 0.0  ;;  %v32005_v57 = vadd.f32 %v38433_v50, %v31877_v2  ;;  %v32744_v3 = vadd.f32 %v32743_v49, %v32742_v42  ;;  %v32895_v17 = vsel %vm97_vm0, %v32877_v19, 0.0 }
 0x55e   :  { %v32892_v6 = vadd.f32 %v32891_v34, %v32890_v43  ;;  %v32876_v46 = vand.u32 2147483647, %v32002_v63  ;;  %v31876_v8 = vadd.f32 %v31748_v35, %v28256_v41  ;;  %v38440_v11 = vpop.f32.mrf.mxu1  ;;  %v31878_v26 = vadd.f32 %v31750_v0, %v28331_v55 }
 0x55f   :  { %v31753_v31 = vmul.f32 2.0, %v38440_v11  ;;  %v38447_v36 = vpop.f32.mrf.mxu0  ;;  %v32746_v56 = vadd.f32 %v32745_v4, %v32744_v3  ;;  %v32879_v25 = vand.u32 2147483647, %v32005_v57  ;;  %v32007_v10 = vadd.f32 %v38440_v11, %v31879_v12 }
 0x560   :  { %v32893_v39 = vsel %vm97_vm0, %v32876_v46, 0.0  ;;  %v32004_v48 = vadd.f32 %v31876_v8, %v28406_v51  ;;  %v28481_v29 = vpop.f32.mrf.mxu1  ;;  %v31755_v60 = vmul.f32 2.0, %v38447_v36 }
 0x561   :  { %v32894_v21 = vadd.f32 %v32893_v39, %v32892_v6  ;;  %v31881_v47 = vadd.f32 %v38433_v50, %v31753_v31  ;;  %v28556_v62 = vpop.f32.mrf.mxu0  ;;  %32747 = vadd.xlane.f32.xlu1 %v32746_v56  ;;  %v31752_v37 = vmul.f32 2.0, %v28481_v29  ;;  %v32006_v1 = vadd.f32 %v31878_v26, %v28481_v29 }
 0x562   :  { %v32878_v44 = vand.u32 2147483647, %v32004_v48  ;;  %v31754_v13 = vmul.f32 2.0, %v28556_v62  ;;  %v32881_v5 = vand.u32 2147483647, %v32007_v10  ;;  %v31883_v14 = vadd.f32 %v38440_v11, %v31755_v60 }
 0x563   :  { %v32896_v30 = vadd.f32 %v32895_v17, %v32894_v21  ;;  %v32880_v54 = vand.u32 2147483647, %v32006_v1  ;;  %v31880_v7 = vadd.f32 %v31752_v37, %v28406_v51  ;;  %v32899_v20 = vsel %vm97_vm0, %v32879_v25, 0.0 }
 0x564   :  { %v32897_v61 = vsel %vm97_vm0, %v32878_v44, 0.0  ;;  %v38454_v41 = vpop.f32.mrf.mxu1  ;;  %v31882_v58 = vadd.f32 %v31754_v13, %v28481_v29  ;;  %v32009_v23 = vadd.f32 %v38447_v36, %v31881_v47  ;;  %v32903_v55 = vsel %vm97_vm0, %v32881_v5, 0.0 }
 0x565   :  { %v32898_v27 = vadd.f32 %v32897_v61, %v32896_v30  ;;  %v38461_v16 = vpop.f32.mrf.mxu0  ;;  %v32008_v59 = vadd.f32 %v31880_v7, %v28556_v62  ;;  %v31757_v40 = vmul.f32 2.0, %v38454_v41  ;;  %v32901_v28 = vsel %vm97_vm0, %v32880_v54, 0.0  ;;  %v44428_v30 = vpop.xlane.xlu1 %32285 }
 0x566   :  { %v28631_v52 = vpop.f32.mrf.mxu1  ;;  %v32011_v4 = vadd.f32 %v38454_v41, %v31883_v14  ;;  %v32883_v49 = vand.u32 2147483647, %v32009_v23  ;;  %v31759_v34 = vmul.f32 2.0, %v38461_v16 }
 0x567   :  { %v32900_v18 = vadd.f32 %v32899_v20, %v32898_v27  ;;  %v28706_v53 = vpop.f32.mrf.mxu0  ;;  %v32882_v38 = vand.u32 2147483647, %v32008_v59  ;;  %v31756_v24 = vmul.f32 2.0, %v28631_v52  ;;  %v32010_v50 = vadd.f32 %v31882_v58, %v28631_v52 }
 0x568   :  { %v31758_v32 = vmul.f32 2.0, %v28706_v53  ;;  %v31885_v33 = vadd.f32 %v38447_v36, %v31757_v40  ;;  %v32885_v3 = vand.u32 2147483647, %v32011_v4  ;;  %v32907_v8 = vsel %vm97_vm0, %v32883_v49, 0.0 }
 0x569   :  { %v32902_v42 = vadd.f32 %v32901_v28, %v32900_v18  ;;  %v31884_v2 = vadd.f32 %v31756_v24, %v28556_v62  ;;  %v32905_v0 = vsel %vm97_vm0, %v32882_v38, 0.0  ;;  %v32884_v43 = vand.u32 2147483647, %v32010_v50  ;;  %v44432_v18 = vpop.xlane.xlu1 %32633 }
 0x56a   :  { %v31886_v63 = vadd.f32 %v31758_v32, %v28631_v52  ;;  %v32013_v11 = vadd.f32 %v38461_v16, %v31885_v33  ;;  %v31887_v26 = vadd.f32 %v38454_v41, %v31759_v34  ;;  %v32911_v25 = vsel %vm97_vm0, %v32885_v3, 0.0 }
 0x56b   :  { %v32904_v51 = vadd.f32 %v32903_v55, %v32902_v42  ;;  %v38468_v19 = vpop.f32.mrf.mxu1  ;;  %v38475_v35 = vpop.f32.mrf.mxu0  ;;  %v32012_v57 = vadd.f32 %v31884_v2, %v28706_v53  ;;  %v32909_v17 = vsel %vm97_vm0, %v32884_v43, 0.0 }
 0x56c   :  { %v32887_v21 = vand.u32 2147483647, %v32013_v11  ;;  %v32015_v10 = vadd.f32 %v38468_v19, %v31887_v26 }
 0x56d   :  { %v32906_v12 = vadd.f32 %v32905_v0, %v32904_v51  ;;  %v28781_v6 = vpop.f32.mrf.mxu1  ;;  %v28856_v46 = vpop.f32.mrf.mxu0  ;;  %v32886_v56 = vand.u32 2147483647, %v32012_v57 }
 0x56e   :  { %v32014_v36 = vadd.f32 %v31886_v63, %v28781_v6  ;;  %v32915_v27 = vsel %vm97_vm0, %v32887_v21, 0.0  ;;  %v32889_v5 = vand.u32 2147483647, %v32015_v10  ;;  %v44436_v63 = vpop.xlane.xlu1 %32981 }
 0x56f   :  { %v32908_v31 = vadd.f32 %v32907_v8, %v32906_v12  ;;  %v32913_v44 = vsel %vm97_vm0, %v32886_v56, 0.0 }
 0x570   :  { %v32888_v37 = vand.u32 2147483647, %v32014_v36  ;;  %v32919_v33 = vsel %vm97_vm0, %v32889_v5, 0.0 }
 0x571   :  { %v32910_v39 = vadd.f32 %v32909_v17, %v32908_v31  ;;  %v38482_v48 = vpop.f32.mrf.mxu1  ;;  %v38489_v29 = vpop.f32.mrf.mxu0 }
 0x572   :  { %v31761_v60 = vmul.f32 2.0, %v38482_v48  ;;  %v31763_v47 = vmul.f32 2.0, %v38489_v29  ;;  %v32917_v20 = vsel %vm97_vm0, %v32888_v37, 0.0 }
 0x573   :  { %v32912_v62 = vadd.f32 %v32911_v25, %v32910_v39  ;;  %v28931_v1 = vpop.f32.mrf.mxu1  ;;  %v29006_v13 = vpop.f32.mrf.mxu0 }
 0x574   :  { %v31889_v61 = vadd.f32 %v38475_v35, %v31761_v60  ;;  %v31760_v54 = vmul.f32 2.0, %v28931_v1  ;;  %v31762_v7 = vmul.f32 2.0, %v29006_v13  ;;  %v31891_v41 = vadd.f32 %v38482_v48, %v31763_v47 }
 0x575   :  { %v32914_v58 = vadd.f32 %v32913_v44, %v32912_v62 }
 0x576   :  { %v32017_v14 = vadd.f32 %v38489_v29, %v31889_v61  ;;  %v31888_v16 = vadd.f32 %v31760_v54, %v28856_v46  ;;  %v31890_v40 = vadd.f32 %v31762_v7, %v28931_v1 }
 0x577   :  { %v38496_v23 = vpop.f32.mrf.mxu1  ;;  %v38503_v59 = vpop.f32.mrf.mxu0  ;;  %v32916_v52 = vadd.f32 %v32915_v27, %v32914_v58 }
 0x578   :  { %v33049_v28 = vand.u32 2147483647, %v32017_v14  ;;  %v32016_v53 = vadd.f32 %v31888_v16, %v29006_v13  ;;  %v31765_v38 = vmul.f32 2.0, %v38496_v23  ;;  %v32019_v24 = vadd.f32 %v38496_v23, %v31891_v41 }
 0x579   :  { %v31767_v50 = vmul.f32 2.0, %v38503_v59  ;;  %v29081_v32 = vpop.f32.mrf.mxu1  ;;  %v29156_v55 = vpop.f32.mrf.mxu0  ;;  %v32918_v42 = vadd.f32 %v32917_v20, %v32916_v52 }
 0x57a   :  { %v33065_v4 = vsel %vm97_vm0, %v33049_v28, 0.0  ;;  %v33048_v49 = vand.u32 2147483647, %v32016_v53  ;;  %v31893_v34 = vadd.f32 %v38489_v29, %v31765_v38  ;;  %v33051_v2 = vand.u32 2147483647, %v32019_v24  ;;  %v44441_v29 = vpop.xlane.xlu1 %33329 }
 0x57b   :  { %v31764_v51 = vmul.f32 2.0, %v29081_v32  ;;  %v32018_v19 = vadd.f32 %v31890_v40, %v29081_v32  ;;  %v31766_v35 = vmul.f32 2.0, %v29156_v55  ;;  %v31895_v57 = vadd.f32 %v38496_v23, %v31767_v50 }
 0x57c   :  { %v33064_v0 = vsel %vm97_vm0, %v33048_v49, 0.0  ;;  %v32021_v43 = vadd.f32 %v38503_v59, %v31893_v34  ;;  %v32920_v12 = vadd.f32 %v32919_v33, %v32918_v42  ;;  %v33069_v56 = vsel %vm97_vm0, %v33051_v2, 0.0 }
 0x57d   :  { %v33066_v3 = vadd.f32 %v33065_v4, %v33064_v0  ;;  %v33050_v6 = vand.u32 2147483647, %v32018_v19  ;;  %v31892_v46 = vadd.f32 %v31764_v51, %v29006_v13  ;;  %v38510_v8 = vpop.f32.mrf.mxu1  ;;  %v38517_v11 = vpop.f32.mrf.mxu0  ;;  %v31894_v26 = vadd.f32 %v31766_v35, %v29081_v32 }
 0x57e   :  { %v31769_v31 = vmul.f32 2.0, %v38510_v8  ;;  %32921 = vadd.xlane.f32.xlu0 %v32920_v12  ;;  %v33053_v36 = vand.u32 2147483647, %v32021_v43  ;;  %v32023_v10 = vadd.f32 %v38510_v8, %v31895_v57  ;;  %v31771_v60 = vmul.f32 2.0, %v38517_v11  ;;  %v44444_v5 = vpop.xlane.xlu1 %32516 }
 0x57f   :  { %v33067_v17 = vsel %vm97_vm0, %v33050_v6, 0.0  ;;  %v32020_v25 = vadd.f32 %v31892_v46, %v29156_v55  ;;  %v29231_v39 = vpop.f32.mrf.mxu1  ;;  %v29306_v48 = vpop.f32.mrf.mxu0 }
 0x580   :  { %v33068_v21 = vadd.f32 %v33067_v17, %v33066_v3  ;;  %v31897_v47 = vadd.f32 %v38503_v59, %v31769_v31  ;;  %v31768_v44 = vmul.f32 2.0, %v29231_v39  ;;  %v32022_v37 = vadd.f32 %v31894_v26, %v29231_v39 }
 0x581   :  { %v33052_v62 = vand.u32 2147483647, %v32020_v25  ;;  %v31770_v1 = vmul.f32 2.0, %v29306_v48  ;;  %v33073_v14 = vsel %vm97_vm0, %v33053_v36, 0.0  ;;  %v33055_v20 = vand.u32 2147483647, %v32023_v10 }
 0x582   :  { %v33070_v13 = vadd.f32 %v33069_v56, %v33068_v21  ;;  %v33054_v54 = vand.u32 2147483647, %v32022_v37  ;;  %v31896_v7 = vadd.f32 %v31768_v44, %v29156_v55  ;;  %v32025_v23 = vadd.f32 %v38517_v11, %v31897_v47 }
 0x583   :  { %v33071_v61 = vsel %vm97_vm0, %v33052_v62, 0.0  ;;  %v38524_v41 = vpop.f32.mrf.mxu1  ;;  %v38531_v58 = vpop.f32.mrf.mxu0  ;;  %v31898_v27 = vadd.f32 %v31770_v1, %v29231_v39  ;;  %v31899_v52 = vadd.f32 %v38510_v8, %v31771_v60  ;;  %v33077_v49 = vsel %vm97_vm0, %v33055_v20, 0.0 }
 0x584   :  { %v33072_v16 = vadd.f32 %v33071_v61, %v33070_v13  ;;  %v32024_v59 = vadd.f32 %v31896_v7, %v29306_v48  ;;  %v31773_v40 = vmul.f32 2.0, %v38524_v41  ;;  %v33075_v24 = vsel %vm97_vm0, %v33054_v54, 0.0 }
 0x585   :  { %v29381_v28 = vpop.f32.mrf.mxu1  ;;  %v29456_v53 = vpop.f32.mrf.mxu0  ;;  %v31775_v50 = vmul.f32 2.0, %v38531_v58  ;;  %v33057_v2 = vand.u32 2147483647, %v32025_v23  ;;  %v32027_v51 = vadd.f32 %v38524_v41, %v31899_v52  ;;  %v32287_v31 = vrot.slane %v44428_v30, 4 }
 0x586   :  { %v33074_v38 = vadd.f32 %v33073_v14, %v33072_v16  ;;  %v33056_v32 = vand.u32 2147483647, %v32024_v59  ;;  %v31772_v55 = vmul.f32 2.0, %v29381_v28  ;;  %v32026_v42 = vadd.f32 %v31898_v27, %v29381_v28 }
 0x587   :  { %v31774_v4 = vmul.f32 2.0, %v29456_v53  ;;  %v31901_v19 = vadd.f32 %v38517_v11, %v31773_v40  ;;  %v31903_v57 = vadd.f32 %v38524_v41, %v31775_v50  ;;  %v33081_v17 = vsel %vm97_vm0, %v33057_v2, 0.0 }
 0x588   :  { %v33076_v34 = vadd.f32 %v33075_v24, %v33074_v38  ;;  %v44449_v33 = vpop.xlane.xlu1 %32864  ;;  %v31900_v35 = vadd.f32 %v31772_v55, %v29306_v48  ;;  %v33079_v3 = vsel %vm97_vm0, %v33056_v32, 0.0  ;;  %v33058_v6 = vand.u32 2147483647, %v32026_v42  ;;  %v32343_v48 = vpop.xlane.xlu0 %32342 }
 0x589   :  { %v38538_v0 = vpop.f32.mrf.mxu1  ;;  %v31902_v26 = vadd.f32 %v31774_v4, %v29381_v28  ;;  %v33059_v25 = vand.u32 2147483647, %v32027_v51  ;;  %v32029_v39 = vadd.f32 %v38531_v58, %v31901_v19  ;;  %v44458_v37 = vadd.f32 %v32287_v31, %v44428_v30 }
 0x58a   :  { %v33078_v43 = vadd.f32 %v33077_v49, %v33076_v34  ;;  %v38545_v12 = vpop.f32.mrf.mxu0  ;;  %v32028_v46 = vadd.f32 %v31900_v35, %v29456_v53  ;;  %v32031_v10 = vadd.f32 %v38538_v0, %v31903_v57  ;;  %v33083_v60 = vsel %vm97_vm0, %v33058_v6, 0.0 }
 0x58b   :  { %v29531_v8 = vpop.f32.mrf.mxu1  ;;  %v32344_v54 = vrot.slane %v32343_v48, 4  ;;  %v33085_v7 = vsel %vm97_vm0, %v33059_v25, 0.0  ;;  %v33061_v41 = vand.u32 2147483647, %v32029_v39  ;;  %v32289_v55 = vrot.slane %v44458_v37, 2 }
 0x58c   :  { %v33080_v56 = vadd.f32 %v33079_v3, %v33078_v43  ;;  %v29606_v36 = vpop.f32.mrf.mxu0  ;;  %v33060_v47 = vand.u32 2147483647, %v32028_v46  ;;  %v32030_v62 = vadd.f32 %v31902_v26, %v29531_v8  ;;  %v33063_v20 = vand.u32 2147483647, %v32031_v10 }
 0x58d   :  { %v44454_v11 = vpop.xlane.xlu1 %33212  ;;  %v44463_v42 = vadd.f32 %v32344_v54, %v32343_v48  ;;  %v33089_v4 = vsel %vm97_vm0, %v33061_v41, 0.0 }
 0x58e   :  { %v33082_v21 = vadd.f32 %v33081_v17, %v33080_v56  ;;  %v33087_v52 = vsel %vm97_vm0, %v33060_v47, 0.0  ;;  %v33062_v28 = vand.u32 2147483647, %v32030_v62  ;;  %v33093_v6 = vsel %vm97_vm0, %v33063_v20, 0.0 }
 0x58f   :  { %v38552_v44 = vpop.f32.mrf.mxu1  ;;  %v32346_v54 = vrot.slane %v44463_v42, 2 }
 0x590   :  { %v33084_v1 = vadd.f32 %v33083_v60, %v33082_v21  ;;  %v31777_v13 = vmul.f32 2.0, %v38552_v44  ;;  %v38559_v61 = vpop.f32.mrf.mxu0  ;;  %v33091_v43 = vsel %vm97_vm0, %v33062_v28, 0.0 }
 0x591   :  { %v31779_v58 = vmul.f32 2.0, %v38559_v61  ;;  %v29681_v27 = vpop.f32.mrf.mxu1  ;;  %v32227_v14 = vpop.xlane.xlu1 %32226 }
 0x592   :  { %v33086_v16 = vadd.f32 %v33085_v7, %v33084_v1  ;;  %v31905_v23 = vadd.f32 %v38545_v12, %v31777_v13  ;;  %v31776_v59 = vmul.f32 2.0, %v29681_v27  ;;  %v29756_v40 = vpop.f32.mrf.mxu0  ;;  %v32228_v32 = vrot.slane %v32227_v14, 4 }
 0x593   :  { %v31778_v30 = vmul.f32 2.0, %v29756_v40  ;;  %v31907_v53 = vadd.f32 %v38552_v44, %v31779_v58 }
 0x594   :  { %v33088_v38 = vadd.f32 %v33087_v52, %v33086_v16  ;;  %v32033_v24 = vadd.f32 %v38559_v61, %v31905_v23  ;;  %v31904_v50 = vadd.f32 %v31776_v59, %v29606_v36  ;;  %v32229_v56 = vadd.f32 %v32228_v32, %v32227_v14 }
 0x595   :  { %v38566_v49 = vpop.f32.mrf.mxu1  ;;  %v31906_v34 = vadd.f32 %v31778_v30, %v29681_v27 }
 0x596   :  { %v33223_v2 = vand.u32 2147483647, %v32033_v24  ;;  %v32032_v51 = vadd.f32 %v31904_v50, %v29756_v40  ;;  %v31781_v19 = vmul.f32 2.0, %v38566_v49  ;;  %v32035_v35 = vadd.f32 %v38566_v49, %v31907_v53  ;;  %v38573_v0 = vpop.f32.mrf.mxu0 }
 0x597   :  { %v31783_v57 = vmul.f32 2.0, %v38573_v0  ;;  %v29831_v12 = vpop.f32.mrf.mxu1  ;;  %v33090_v3 = vadd.f32 %v33089_v4, %v33088_v38  ;;  %v32230_v58 = vrot.slane %v32229_v56, 2 }
 0x598   :  { %v33239_v46 = vsel %vm97_vm0, %v33223_v2, 0.0  ;;  %v33222_v8 = vand.u32 2147483647, %v32032_v51  ;;  %v31909_v26 = vadd.f32 %v38559_v61, %v31781_v19  ;;  %v29906_v31 = vpop.f32.mrf.mxu0  ;;  %v33225_v36 = vand.u32 2147483647, %v32035_v35 }
 0x599   :  { %v31780_v17 = vmul.f32 2.0, %v29831_v12  ;;  %v32034_v25 = vadd.f32 %v31906_v34, %v29831_v12  ;;  %v31782_v39 = vmul.f32 2.0, %v29906_v31  ;;  %v31911_v10 = vadd.f32 %v38566_v49, %v31783_v57 }
 0x59a   :  { %v33238_v48 = vsel %vm97_vm0, %v33222_v8, 0.0  ;;  %v32037_v21 = vadd.f32 %v38573_v0, %v31909_v26  ;;  %v33092_v60 = vadd.f32 %v33091_v43, %v33090_v3  ;;  %v33243_v27 = vsel %vm97_vm0, %v33225_v36, 0.0 }
 0x59b   :  { %v33240_v47 = vadd.f32 %v33239_v46, %v33238_v48  ;;  %v33224_v62 = vand.u32 2147483647, %v32034_v25  ;;  %v31908_v44 = vadd.f32 %v31780_v17, %v29756_v40  ;;  %v38580_v1 = vpop.f32.mrf.mxu1  ;;  %v31910_v13 = vadd.f32 %v31782_v39, %v29831_v12 }
 0x59c   :  { %v31785_v7 = vmul.f32 2.0, %v38580_v1  ;;  %v38587_v61 = vpop.f32.mrf.mxu0  ;;  %v33094_v41 = vadd.f32 %v33093_v6, %v33092_v60  ;;  %v33227_v14 = vand.u32 2147483647, %v32037_v21  ;;  %v32039_v52 = vadd.f32 %v38580_v1, %v31911_v10 }
 0x59d   :  { %v33241_v16 = vsel %vm97_vm0, %v33224_v62, 0.0  ;;  %v32036_v20 = vadd.f32 %v31908_v44, %v29906_v31  ;;  %v29981_v23 = vpop.f32.mrf.mxu1  ;;  %v31787_v28 = vmul.f32 2.0, %v38587_v61  ;;  %v32231_v4 = vadd.f32 %v32230_v58, %v32229_v56 }
 0x59e   :  { %v33242_v59 = vadd.f32 %v33241_v16, %v33240_v47  ;;  %v31913_v30 = vadd.f32 %v38573_v0, %v31785_v7  ;;  %v30056_v40 = vpop.f32.mrf.mxu0  ;;  %33095 = vadd.xlane.f32.xlu1 %v33094_v41  ;;  %v31784_v38 = vmul.f32 2.0, %v29981_v23  ;;  %v32038_v24 = vadd.f32 %v31910_v13, %v29981_v23 }
 0x59f   :  { %v33226_v53 = vand.u32 2147483647, %v32036_v20  ;;  %v31786_v50 = vmul.f32 2.0, %v30056_v40  ;;  %v32290_v49 = vadd.f32 %v32289_v55, %v44458_v37  ;;  %v33247_v43 = vsel %vm97_vm0, %v33227_v14, 0.0 }
 0x5a0   :  { %v33244_v32 = vadd.f32 %v33243_v27, %v33242_v59  ;;  %v33228_v2 = vand.u32 2147483647, %v32038_v24  ;;  %v31912_v51 = vadd.f32 %v31784_v38, %v29906_v31  ;;  %v33229_v0 = vand.u32 2147483647, %v32039_v52 }
 0x5a1   :  { %v33245_v34 = vsel %vm97_vm0, %v33226_v53, 0.0  ;;  %v38594_v19 = vpop.f32.mrf.mxu1  ;;  %v31914_v35 = vadd.f32 %v31786_v50, %v29981_v23  ;;  %v32347_v3 = vadd.f32 %v32346_v54, %v44463_v42  ;;  %v32041_v6 = vadd.f32 %v38587_v61, %v31913_v30 }
 0x5a2   :  { %v33246_v57 = vadd.f32 %v33245_v34, %v33244_v32  ;;  %v38601_v12 = vpop.f32.mrf.mxu0  ;;  %v32040_v46 = vadd.f32 %v31912_v51, %v30056_v40  ;;  %v31789_v8 = vmul.f32 2.0, %v38594_v19  ;;  %v31915_v26 = vadd.f32 %v38580_v1, %v31787_v28 }
 0x5a3   :  { %v30131_v56 = vpop.f32.mrf.mxu1  ;;  %v33249_v37 = vsel %vm97_vm0, %v33228_v2, 0.0  ;;  %v32232_v17 = vrot.slane %v32231_v4, 1  ;;  %v32291_v31 = vrot.slane %v32290_v49, 1  ;;  %v33251_v10 = vsel %vm97_vm0, %v33229_v0, 0.0 }
 0x5a4   :  { %v33248_v36 = vadd.f32 %v33247_v43, %v33246_v57  ;;  %v30206_v55 = vpop.f32.mrf.mxu0  ;;  %v33230_v25 = vand.u32 2147483647, %v32040_v46  ;;  %v31788_v39 = vmul.f32 2.0, %v30131_v56  ;;  %v32042_v48 = vadd.f32 %v31914_v35, %v30131_v56 }
 0x5a5   :  { %v31790_v21 = vmul.f32 2.0, %v30206_v55  ;;  %v31791_v47 = vmul.f32 2.0, %v38601_v12  ;;  %v32348_v42 = vrot.slane %v32347_v3, 1  ;;  %v33231_v62 = vand.u32 2147483647, %v32041_v6 }
 0x5a6   :  { %v33250_v60 = vadd.f32 %v33249_v37, %v33248_v36  ;;  %v32043_v44 = vadd.f32 %v38594_v19, %v31915_v26  ;;  %v31917_v13 = vadd.f32 %v38587_v61, %v31789_v8  ;;  %v31916_v1 = vadd.f32 %v31788_v39, %v30056_v40 }
 0x5a7   :  { %v32461_v54 = vrot.slane %v44365_v15, 4  ;;  %v31918_v27 = vadd.f32 %v31790_v21, %v30131_v56  ;;  %v32233_v14 = vadd.f32 %v32232_v17, %v32231_v4  ;;  %v33253_v16 = vsel %vm97_vm0, %v33230_v25, 0.0 }
 0x5a8   :  { %v33252_v7 = vadd.f32 %v33251_v10, %v33250_v60  ;;  %v38608_v41 = vpop.f32.mrf.mxu1  ;;  %v38615_v58 = vpop.f32.mrf.mxu0  ;;  %v33232_v20 = vand.u32 2147483647, %v32042_v48  ;;  %v32044_v23 = vadd.f32 %v31916_v1, %v30206_v55  ;;  %v32292_v59 = vadd.f32 %v32291_v31, %v32290_v49 }
 0x5a9   :  { %v31919_v28 = vadd.f32 %v38594_v19, %v31791_v47  ;;  %38683 = vpush %v32233_v14  ;;  %v32349_v38 = vadd.f32 %v32348_v42, %v32347_v3  ;;  %v33255_v61 = vsel %vm97_vm0, %v33231_v62, 0.0  ;;  %v33233_v40 = vand.u32 2147483647, %v32043_v44 }
 0x5aa   :  { %v33254_v52 = vadd.f32 %v33253_v16, %v33252_v7  ;;  %v30281_v30 = vpop.f32.mrf.mxu1  ;;  %v30356_v53 = vpop.f32.mrf.mxu0  ;;  %v32045_v24 = vadd.f32 %v38601_v12, %v31917_v13  ;;  %38685 = vpush %v32292_v59  ;;  %v32462_v50 = vadd.f32 %v32461_v54, %v44365_v15  ;;  %v33234_v4 = vand.u32 2147483647, %v32044_v23 }
 0x5ab   :  { %v32046_v34 = vadd.f32 %v31918_v27, %v30281_v30  ;;  %38687 = vpush %v32349_v38  ;;  %v33257_v2 = vsel %vm97_vm0, %v33232_v20, 0.0  ;;  %v32047_v51 = vadd.f32 %v38608_v41, %v31919_v28  ;;  %v33259_v43 = vsel %vm97_vm0, %v33233_v40, 0.0 }
 0x5ac   :  { %v33256_v32 = vadd.f32 %v33255_v61, %v33254_v52  ;;  %v33235_v57 = vand.u32 2147483647, %v32045_v24  ;;  %v32463_v12 = vrot.slane %v32462_v50, 2  ;;  %v33261_v15 = vsel %vm97_vm0, %v33234_v4, 0.0 }
 0x5ad   :  { %v32400_v6 = vpop.xlane.xlu1 %32399  ;;  %v33236_v8 = vand.u32 2147483647, %v32046_v34  ;;  %v32518_v31 = vrot.slane %v44444_v5, 4  ;;  %v33237_v39 = vand.u32 2147483647, %v32047_v51 }
 0x5ae   :  { %v33258_v49 = vadd.f32 %v33257_v2, %v33256_v32  ;;  %v38622_v19 = vpop.f32.mrf.mxu1  ;;  %v38629_v35 = vpop.f32.mrf.mxu0  ;;  %v33263_v48 = vsel %vm97_vm0, %v33235_v57, 0.0  ;;  %v32401_v60 = vrot.slane %v32400_v6, 4  ;;  %v44489_v1 = vadd.f32 %v32463_v12, %v32462_v50 }
 0x5af   :  { %v31793_v0 = vmul.f32 2.0, %v38622_v19  ;;  %v31795_v3 = vmul.f32 2.0, %v38629_v35  ;;  %v33265_v47 = vsel %vm97_vm0, %v33236_v8, 0.0  ;;  %v32519_v27 = vadd.f32 %v32518_v31, %v44444_v5 }
 0x5b0   :  { %v33260_v46 = vadd.f32 %v33259_v43, %v33258_v49  ;;  %v30431_v26 = vpop.f32.mrf.mxu1  ;;  %v30506_v56 = vpop.f32.mrf.mxu0  ;;  %v33267_v59 = vsel %vm97_vm0, %v33237_v39, 0.0 }
 0x5b1   :  { %v31921_v36 = vadd.f32 %v38615_v58, %v31793_v0  ;;  %v31792_v37 = vmul.f32 2.0, %v30431_v26  ;;  %v31794_v55 = vmul.f32 2.0, %v30506_v56  ;;  %v31923_v17 = vadd.f32 %v38622_v19, %v31795_v3 }
 0x5b2   :  { %v33262_v25 = vadd.f32 %v33261_v15, %v33260_v46  ;;  %v32520_v57 = vrot.slane %v32519_v27, 2  ;;  %v32465_v3 = vrot.slane %v44489_v1, 1 }
 0x5b3   :  { %v32049_v21 = vadd.f32 %v38629_v35, %v31921_v36  ;;  %v31920_v10 = vadd.f32 %v31792_v37, %v30356_v53  ;;  %v31922_v44 = vadd.f32 %v31794_v55, %v30431_v26  ;;  %v32402_v53 = vadd.f32 %v32401_v60, %v32400_v6 }
 0x5b4   :  { %v38636_v42 = vpop.f32.mrf.mxu1  ;;  %v38643_v62 = vpop.f32.mrf.mxu0  ;;  %v33264_v13 = vadd.f32 %v33263_v48, %v33262_v25  ;;  %v32635_v48 = vrot.slane %v44432_v18, 4 }
 0x5b5   :  { %v33397_v54 = vand.u32 2147483647, %v32049_v21  ;;  %v32048_v7 = vadd.f32 %v31920_v10, %v30506_v56  ;;  %v31797_v41 = vmul.f32 2.0, %v38636_v42  ;;  %v32051_v58 = vadd.f32 %v38636_v42, %v31923_v17 }
 0x5b6   :  { %v31799_v14 = vmul.f32 2.0, %v38643_v62  ;;  %v30581_v16 = vpop.f32.mrf.mxu1  ;;  %v30656_v20 = vpop.f32.mrf.mxu0  ;;  %v33266_v23 = vadd.f32 %v33265_v47, %v33264_v13 }
 0x5b7   :  { %v33413_v52 = vsel %vm97_vm0, %v33397_v54, 0.0  ;;  %v33396_v28 = vand.u32 2147483647, %v32048_v7  ;;  %v31925_v30 = vadd.f32 %v38629_v35, %v31797_v41  ;;  %v33399_v38 = vand.u32 2147483647, %v32051_v58 }
 0x5b8   :  { %v31796_v61 = vmul.f32 2.0, %v30581_v16  ;;  %v32050_v40 = vadd.f32 %v31922_v44, %v30581_v16  ;;  %v31798_v24 = vmul.f32 2.0, %v30656_v20  ;;  %v31927_v4 = vadd.f32 %v38636_v42, %v31799_v14  ;;  %v32691_v42 = vpop.xlane.xlu0 %32690 }
 0x5b9   :  { %v33412_v50 = vsel %vm97_vm0, %v33396_v28, 0.0  ;;  %v32053_v32 = vadd.f32 %v38643_v62, %v31925_v30  ;;  %v33268_v5 = vadd.f32 %v33267_v59, %v33266_v23  ;;  %v32403_v35 = vrot.slane %v32402_v53, 2 }
 0x5ba   :  { %v33414_v34 = vadd.f32 %v33413_v52, %v33412_v50  ;;  %v33398_v2 = vand.u32 2147483647, %v32050_v40  ;;  %v31924_v49 = vadd.f32 %v31796_v61, %v30506_v56  ;;  %v38650_v51 = vpop.f32.mrf.mxu1  ;;  %v31926_v19 = vadd.f32 %v31798_v24, %v30581_v16  ;;  %v38657_v43 = vpop.f32.mrf.mxu0 }
 0x5bb   :  { %v31801_v0 = vmul.f32 2.0, %v38650_v51  ;;  %33269 = vadd.xlane.f32.xlu0 %v33268_v5  ;;  %v33417_v6 = vsel %vm97_vm0, %v33399_v38, 0.0  ;;  %v33401_v12 = vand.u32 2147483647, %v32053_v32  ;;  %v32055_v37 = vadd.f32 %v38650_v51, %v31927_v4 }
 0x5bc   :  { %v33415_v46 = vsel %vm97_vm0, %v33398_v2, 0.0  ;;  %v32052_v15 = vadd.f32 %v31924_v49, %v30656_v20  ;;  %v30731_v8 = vpop.f32.mrf.mxu1  ;;  %v30806_v26 = vpop.f32.mrf.mxu0  ;;  %v31803_v55 = vmul.f32 2.0, %v38657_v43  ;;  %v32404_v47 = vadd.f32 %v32403_v35, %v32402_v53 }
 0x5bd   :  { %v33416_v36 = vadd.f32 %v33415_v46, %v33414_v34  ;;  %v31800_v56 = vmul.f32 2.0, %v30731_v8  ;;  %v32054_v31 = vadd.f32 %v31926_v19, %v30731_v8  ;;  %v31929_v25 = vadd.f32 %v38643_v62, %v31801_v0  ;;  %v44505_v49 = vpop.xlane.xlu0 %33038 }
 0x5be   :  { %v33400_v17 = vand.u32 2147483647, %v32052_v15  ;;  %v31802_v39 = vmul.f32 2.0, %v30806_v26  ;;  %v33421_v44 = vsel %vm97_vm0, %v33401_v12, 0.0  ;;  %v32521_v7 = vadd.f32 %v32520_v57, %v32519_v27 }
 0x5bf   :  { %v33418_v21 = vadd.f32 %v33417_v6, %v33416_v36  ;;  %v31928_v10 = vadd.f32 %v31800_v56, %v30656_v20  ;;  %v38664_v60 = vpop.f32.mrf.mxu1  ;;  %33386 = vadd.xlane.f32.xlu0 %v44235_v45  ;;  %v33402_v54 = vand.u32 2147483647, %v32054_v31  ;;  %v33403_v58 = vand.u32 2147483647, %v32055_v37 }
 0x5c0   :  { %v33419_v13 = vsel %vm97_vm0, %v33400_v17, 0.0  ;;  %v31930_v16 = vadd.f32 %v31802_v39, %v30731_v8  ;;  %v32057_v59 = vadd.f32 %v38657_v43, %v31929_v25  ;;  %v31805_v52 = vmul.f32 2.0, %v38664_v60 }
 0x5c1   :  { %v33420_v41 = vadd.f32 %v33419_v13, %v33418_v21  ;;  %v32056_v14 = vadd.f32 %v31928_v10, %v30806_v26  ;;  %v30881_v62 = vpop.f32.mrf.mxu1  ;;  %v38671_v23 = vpop.f32.mrf.mxu0  ;;  %v31931_v20 = vadd.f32 %v38650_v51, %v31803_v55  ;;  %v32692_v30 = vrot.slane %v32691_v42, 4 }
 0x5c2   :  { %v31804_v28 = vmul.f32 2.0, %v30881_v62  ;;  %v33423_v53 = vsel %vm97_vm0, %v33402_v54, 0.0  ;;  %v32405_v61 = vrot.slane %v32404_v47, 1  ;;  %v32058_v24 = vadd.f32 %v31930_v16, %v30881_v62 }
 0x5c3   :  { %v33422_v45 = vadd.f32 %v33421_v44, %v33420_v41  ;;  %v30956_v38 = vpop.f32.mrf.mxu0  ;;  %v33404_v40 = vand.u32 2147483647, %v32056_v14  ;;  %v32636_v32 = vadd.f32 %v32635_v48, %v44432_v18  ;;  %v33425_v4 = vsel %vm97_vm0, %v33403_v58, 0.0  ;;  %v38678_v34 = vpop.f32.mrf.mxu1 }
 0x5c4   :  { %v31806_v50 = vmul.f32 2.0, %v30956_v38  ;;  %v31932_v27 = vadd.f32 %v31804_v28, %v30806_v26  ;;  %v32522_v2 = vrot.slane %v32521_v7, 1  ;;  %v33405_v51 = vand.u32 2147483647, %v32057_v59 }
 0x5c5   :  { %v33424_v5 = vadd.f32 %v33423_v53, %v33422_v45  ;;  %v32059_v19 = vadd.f32 %v38664_v60, %v31931_v20  ;;  %v31807_v57 = vmul.f32 2.0, %v38671_v23  ;;  %v31933_v0 = vadd.f32 %v38657_v43, %v31805_v52  ;;  %v31031_v56 = vpop.f32.mrf.mxu1 }
 0x5c6   :  { %v32693_v35 = vadd.f32 %v32692_v30, %v32691_v42  ;;  %v32406_v12 = vadd.f32 %v32405_v61, %v32404_v47  ;;  %v32466_v46 = vadd.f32 %v32465_v3, %v44489_v1  ;;  %v33427_v15 = vsel %vm97_vm0, %v33404_v40, 0.0 }
 0x5c7   :  { %v33426_v6 = vadd.f32 %v33425_v4, %v33424_v5  ;;  %v33406_v8 = vand.u32 2147483647, %v32058_v24  ;;  %v32060_v18 = vadd.f32 %v31932_v27, %v30956_v38  ;;  %v31934_v26 = vadd.f32 %v31806_v50, %v30881_v62 }
 0x5c8   :  { %v32637_v36 = vrot.slane %v32636_v32, 2  ;;  %38689 = vpush %v32406_v12  ;;  %v32523_v55 = vadd.f32 %v32522_v2, %v32521_v7  ;;  %v33429_v17 = vsel %vm97_vm0, %v33405_v51, 0.0  ;;  %v33407_v31 = vand.u32 2147483647, %v32059_v19 }
 0x5c9   :  { %v33428_v37 = vadd.f32 %v33427_v15, %v33426_v6  ;;  %v32061_v25 = vadd.f32 %v38671_v23, %v31933_v0  ;;  %v31935_v43 = vadd.f32 %v38664_v60, %v31807_v57  ;;  %38691 = vpush %v32466_v46  ;;  %v32694_v48 = vrot.slane %v32693_v35, 2 }
 0x5ca   :  { %v32574_v39 = vpop.xlane.xlu0 %32573  ;;  %38693 = vpush %v32523_v55  ;;  %v33431_v3 = vsel %vm97_vm0, %v33406_v8, 0.0  ;;  %v33408_v10 = vand.u32 2147483647, %v32060_v18  ;;  %v32062_v47 = vadd.f32 %v31934_v26, %v31031_v56  ;;  %v33433_v13 = vsel %vm97_vm0, %v33407_v31, 0.0 }
 0x5cb   :  { %v33430_v21 = vadd.f32 %v33429_v17, %v33428_v37  ;;  %v32575_v1 = vrot.slane %v32574_v39, 4  ;;  %v33409_v54 = vand.u32 2147483647, %v32061_v25  ;;  %v32063_v7 = vadd.f32 %v38678_v34, %v31935_v43 }
 0x5cc   :  { %v32638_v41 = vadd.f32 %v32637_v36, %v32636_v32  ;;  %v32695_v60 = vadd.f32 %v32694_v48, %v32693_v35  ;;  %v33435_v62 = vsel %vm97_vm0, %v33408_v10, 0.0  ;;  %v33410_v16 = vand.u32 2147483647, %v32062_v47 }
 0x5cd   :  { %v33432_v42 = vadd.f32 %v33431_v3, %v33430_v21  ;;  %v32576_v44 = vadd.f32 %v32575_v1, %v32574_v39  ;;  %v33437_v52 = vsel %vm97_vm0, %v33409_v54, 0.0  ;;  %v33411_v20 = vand.u32 2147483647, %v32063_v7 }
 0x5ce   :  { %v32639_v28 = vrot.slane %v32638_v41, 1  ;;  %v32696_v53 = vrot.slane %v32695_v60, 1  ;;  %v33439_v38 = vsel %vm97_vm0, %v33410_v16, 0.0  ;;  %v32809_v4 = vrot.slane %v44368_v22, 4 }
 0x5cf   :  { %v33434_v58 = vadd.f32 %v33433_v13, %v33432_v42  ;;  %v32577_v14 = vrot.slane %v32576_v44, 2  ;;  %v33441_v24 = vsel %vm97_vm0, %v33411_v20, 0.0  ;;  %v32866_v5 = vrot.slane %v44449_v33, 4 }
 0x5d0   :  { %v32640_v50 = vadd.f32 %v32639_v28, %v32638_v41  ;;  %v32697_v32 = vadd.f32 %v32696_v53, %v32695_v60  ;;  %v32810_v34 = vadd.f32 %v32809_v4, %v44368_v22  ;;  %v33040_v56 = vrot.slane %v44505_v49, 4 }
 0x5d1   :  { %v33436_v23 = vadd.f32 %v33435_v62, %v33434_v58  ;;  %v32578_v59 = vadd.f32 %v32577_v14, %v32576_v44  ;;  %v32867_v2 = vadd.f32 %v32866_v5, %v44449_v33  ;;  %v32983_v33 = vrot.slane %v44436_v63, 4 }
 0x5d2   :  { %v32811_v51 = vrot.slane %v32810_v34, 2  ;;  %v33041_v17 = vadd.f32 %v33040_v56, %v44505_v49  ;;  %v33157_v54 = vrot.slane %v44373_v9, 4  ;;  %v33214_v7 = vrot.slane %v44454_v11, 4 }
 0x5d3   :  { %v33438_v30 = vadd.f32 %v33437_v52, %v33436_v23  ;;  %v32579_v45 = vrot.slane %v32578_v59, 1  ;;  %v32868_v57 = vrot.slane %v32867_v2, 2  ;;  %v32984_v55 = vadd.f32 %v32983_v33, %v44436_v63 }
 0x5d4   :  { %v32812_v6 = vadd.f32 %v32811_v51, %v32810_v34  ;;  %v33042_v43 = vrot.slane %v33041_v17, 2  ;;  %v33158_v41 = vadd.f32 %v33157_v54, %v44373_v9  ;;  %v33215_v58 = vadd.f32 %v33214_v7, %v44454_v11 }
 0x5d5   :  { %v33440_v61 = vadd.f32 %v33439_v38, %v33438_v30  ;;  %v32580_v40 = vadd.f32 %v32579_v45, %v32578_v59  ;;  %v32869_v46 = vadd.f32 %v32868_v57, %v32867_v2  ;;  %v32985_v31 = vrot.slane %v32984_v55, 2 }
 0x5d6   :  { %v32813_v8 = vrot.slane %v32812_v6, 1  ;;  %v33043_v3 = vadd.f32 %v33042_v43, %v33041_v17  ;;  %v33159_v14 = vrot.slane %v33158_v41, 2  ;;  %v33216_v62 = vrot.slane %v33215_v58, 2 }
 0x5d7   :  { %v33442_v27 = vadd.f32 %v33441_v24, %v33440_v61  ;;  %38695 = vpush %v32580_v40  ;;  %v32870_v26 = vrot.slane %v32869_v46, 1  ;;  %v32986_v21 = vadd.f32 %v32985_v31, %v32984_v55  ;;  %v33331_v61 = vrot.slane %v44441_v29, 4 }
 0x5d8   :  { %38697 = vpush %v32640_v50  ;;  %v32814_v37 = vadd.f32 %v32813_v8, %v32812_v6  ;;  %v33044_v44 = vrot.slane %v33043_v3, 1  ;;  %v33160_v59 = vadd.f32 %v33159_v14, %v33158_v41  ;;  %v33217_v20 = vadd.f32 %v33216_v62, %v33215_v58 }
 0x5d9   :  { %33443 = vadd.xlane.f32.xlu1 %v33442_v27  ;;  %38699 = vpush %v32697_v32  ;;  %v32871_v22 = vadd.f32 %v32870_v26, %v32869_v46  ;;  %v32987_v47 = vrot.slane %v32986_v21, 1  ;;  %v33332_v40 = vadd.f32 %v33331_v61, %v44441_v29 }
 0x5da   :  { %s38684_s18 = spop %38683  ;;  %v33045_v49 = vadd.f32 %v33044_v44, %v33043_v3  ;;  %v33161_v30 = vrot.slane %v33160_v59, 1  ;;  %v33218_v53 = vrot.slane %v33217_v20, 1 }
 0x5db   :  { %s32235_s19 = sadd.f32 %s38684_s18, %s32178_s17  ;;  %s38686_s20 = spop %38685  ;;  %v32988_v13 = vadd.f32 %v32987_v47, %v32986_v21  ;;  %v33333_v24 = vrot.slane %v33332_v40, 2 }
 0x5dc   :  { %s38688_s21 = spop %38687  ;;  %v33162_v38 = vadd.f32 %v33161_v30, %v33160_v59  ;;  %v33219_v11 = vadd.f32 %v33218_v53, %v33217_v20 }
 0x5dd   :  { %32237 = sst [smem:[#allocation12]] %s32235_s19  ;;  %v33334_v5 = vadd.f32 %v33333_v24, %v33332_v40 }
 0x5de   :  { %s32351_s22 = sadd.f32 %s38688_s21, %s38686_s20 }
 0x5df   :  { %v33335_v57 = vrot.slane %v33334_v5, 1 }
 0x5ea   :  { %v32748_v19 = vpop.xlane.xlu1 %32747 }
 0x5eb   :  { %v32749_v0 = vrot.slane %v32748_v19, 4 }
 0x5ed   :  { %v32750_v35 = vadd.f32 %v32749_v0, %v32748_v19 }
 0x5ef   :  { %v32751_v12 = vrot.slane %v32750_v35, 2 }
 0x5f1   :  { %v32752_v15 = vadd.f32 %v32751_v12, %v32750_v35  ;;  %v33336_v12 = vadd.f32 %v33335_v57, %v33334_v5 }
 0x5f3   :  { %v32753_v18 = vrot.slane %v32752_v15, 1 }
 0x5f5   :  { %v32754_v36 = vadd.f32 %v32753_v18, %v32752_v15 }
 0x5f7   :  { %38701 = vpush %v32754_v36 }
 0x5f8   :  { %38703 = vpush %v32814_v37 }
 0x5f9   :  { %38705 = vpush %v32871_v22  ;;  %s38690_s23 = spop %38689 }
 0x5fa   :  { %s32408_s24 = sadd.f32 %s38690_s23, %s32351_s22  ;;  %s38692_s25 = spop %38691 }
 0x5fb   :  { %s38694_s26 = spop %38693 }
 0x5fc   :  { %32411 = sst [smem:[#allocation12 + $0x1]] %s32408_s24 }
 0x5fd   :  { %s32525_s27 = sadd.f32 %s38694_s26, %s38692_s25  ;;  %s39036_s25 = smov [#allocation12]  }
 0x607   :  { %v32922_v25 = vpop.xlane.xlu0 %32921 }
 0x608   :  { %v32923_v39 = vrot.slane %v32922_v25, 4  ;;  %s38696_s28 = spop %38695 }
 0x609   :  { %s32582_s29 = sadd.f32 %s38696_s28, %s32525_s27  ;;  %s38698_s30 = spop %38697 }
 0x60a   :  { %v32924_v48 = vadd.f32 %v32923_v39, %v32922_v25  ;;  %s38700_s6 = spop %38699 }
 0x60b   :  { %32585 = sst [smem:[#allocation12 + $0x2]] %s32582_s29 }
 0x60c   :  { %v32925_v1 = vrot.slane %v32924_v48, 2  ;;  %s32699_s7 = sadd.f32 %s38700_s6, %s38698_s30 }
 0x60e   :  { %v32926_v10 = vadd.f32 %v32925_v1, %v32924_v48 }
 0x610   :  { %v32927_v42 = vrot.slane %v32926_v10, 1 }
 0x612   :  { %v32928_v63 = vadd.f32 %v32927_v42, %v32926_v10 }
 0x614   :  { %38707 = vpush %v32928_v63 }
 0x615   :  { %38709 = vpush %v32988_v13 }
 0x616   :  { %38711 = vpush %v33045_v49 }
 0x627   :  { %v33096_v60 = vpop.xlane.xlu1 %33095 }
 0x628   :  { %v33097_v16 = vrot.slane %v33096_v60, 4  ;;  %s38702_s8 = spop %38701 }
 0x629   :  { %s32756_s1 = sadd.f32 %s38702_s8, %s32699_s7  ;;  %s38704_s9 = spop %38703 }
 0x62a   :  { %v33098_v23 = vadd.f32 %v33097_v16, %v33096_v60  ;;  %s38706_s10 = spop %38705 }
 0x62b   :  { %32759 = sst [smem:[#allocation12 + $0x3]] %s32756_s1 }
 0x62c   :  { %v33099_v52 = vrot.slane %v33098_v23, 2  ;;  %s32873_s3 = sadd.f32 %s38706_s10, %s38704_s9 }
 0x62e   :  { %v33100_v28 = vadd.f32 %v33099_v52, %v33098_v23 }
 0x630   :  { %v33101_v45 = vrot.slane %v33100_v28, 1 }
 0x632   :  { %v33102_v9 = vadd.f32 %v33101_v45, %v33100_v28 }
 0x634   :  { %38713 = vpush %v33102_v9 }
 0x635   :  { %38715 = vpush %v33162_v38 }
 0x636   :  { %38717 = vpush %v33219_v11 }
 0x644   :  { %v33270_v50 = vpop.xlane.xlu0 %33269 }
 0x645   :  { %v33271_v27 = vrot.slane %v33270_v50, 4  ;;  %s38708_s11 = spop %38707 }
 0x646   :  { %s32930_s12 = sadd.f32 %s38708_s11, %s32873_s3  ;;  %s38710_s13 = spop %38709 }
 0x647   :  { %v33272_v32 = vadd.f32 %v33271_v27, %v33270_v50  ;;  %s38712_s14 = spop %38711 }
 0x648   :  { %v33387_v4 = vpop.xlane.xlu0 %33386  ;;  %32933 = sst [smem:[#allocation12 + $0x4]] %s32930_s12 }
 0x649   :  { %v33273_v34 = vrot.slane %v33272_v32, 2  ;;  %v33388_v2 = vrot.slane %v33387_v4, 4  ;;  %s33047_s15 = sadd.f32 %s38712_s14, %s38710_s13 }
 0x64b   :  { %v33389_v51 = vadd.f32 %v33388_v2, %v33387_v4  ;;  %v33274_v19 = vadd.f32 %v33273_v34, %v33272_v32 }
 0x64d   :  { %v33390_v0 = vrot.slane %v33389_v51, 2  ;;  %v33275_v35 = vrot.slane %v33274_v19, 1 }
 0x64f   :  { %v33391_v6 = vadd.f32 %v33390_v0, %v33389_v51  ;;  %v33276_v29 = vadd.f32 %v33275_v35, %v33274_v19 }
 0x651   :  { %38719 = vpush %v33276_v29  ;;  %v33392_v46 = vrot.slane %v33391_v6, 1 }
 0x652   :  { %38721 = vpush %v33336_v12 }
 0x653   :  { %v33393_v15 = vadd.f32 %v33392_v46, %v33391_v6 }
 0x655   :  { %38723 = vpush %v33393_v15 }
 0x662   :  { %v33444_v8 = vpop.xlane.xlu1 %33443 }
 0x663   :  { %v33445_v18 = vrot.slane %v33444_v8, 4 }
 0x665   :  { %v33446_v26 = vadd.f32 %v33445_v18, %v33444_v8  ;;  %s38714_s0 = spop %38713 }
 0x666   :  { %s33104_s16 = sadd.f32 %s38714_s0, %s33047_s15  ;;  %s38716_s2 = spop %38715 }
 0x667   :  { %v33447_v36 = vrot.slane %v33446_v26, 2  ;;  %s38718_s4 = spop %38717 }
 0x668   :  { %33107 = sst [smem:[#allocation12 + $0x5]] %s33104_s16 }
 0x669   :  { %v33448_v37 = vadd.f32 %v33447_v36, %v33446_v26  ;;  %s33221_s17 = sadd.f32 %s38718_s4, %s38716_s2 }
 0x66b   :  { %v33449_v22 = vrot.slane %v33448_v37, 1 }
 0x66d   :  { %v33450_v33 = vadd.f32 %v33449_v22, %v33448_v37 }
 0x66f   :  { %38725 = vpush %v33450_v33 }
 0x682   :  { %s38720_s18 = spop %38719 }
 0x683   :  { %s33278_s19 = sadd.f32 %s38720_s18, %s33221_s17  ;;  %s38722_s20 = spop %38721 }
 0x685   :  { %33281 = sst [smem:[#allocation12 + $0x6]] %s33278_s19 }
 0x686   :  { %s38724_s21 = spop %38723 }
 0x687   :  { %s33395_s22 = sadd.f32 %s38724_s21, %s38722_s20 }
 0x6a0   :  { %s38726_s23 = spop %38725 }
 0x6a1   :  { %s33452_s24 = sadd.f32 %s38726_s23, %s33395_s22 }
 0x6a3   :  { %33455 = sst [smem:[#allocation12 + $0x7]] %s33452_s24 }
 0x6a4   :  { %33463 = dma.smem_to_hbm %s39036_s25, 16, %s44538_s5, [#allocation5]  }
 0x6a5   :  { %39026 = dma.done.wait [#allocation5], 16  }
 0x6a6   :  { %39027 = vsyncadd [#allocation5], 4294967280 }
 0x6a7   :  { %33467 = sfence }
 0x6a8   :  { %33468 = vsyncpa [#allocation4], 1 }
 0x6a9   :  { %33469 = vsyncpa [#allocation7], 1 }
 0x6aa   :  { %33470 = vsyncpa [#allocation10], 1 }
 0x6ab   :  { %33471 = vsyncpa [#allocation5], 1 }

</bundles_post_ra>
